<compile_context>
chip_gen: v7x
topology: tpu7x:2x2x1
jax: 0.10.0
libtpu: 0.0.40
codegen_flags: <defaults>
</compile_context>

<pallas_src>
import numpy as np
import jax
import jax.numpy as jnp
from jax import lax
from jax.experimental import pallas as pl
from jax.experimental.pallas import tpu as pltpu

# ----------------------------- model config ---------------------------------
CNN_HIDDEN = 8                 # cnn_hidden_size
C_OUT = 2 * CNN_HIDDEN         # conv1 out_channels (16)
H = W = 28                     # fixed by the module's forward (view to 28x28)
PH = PW = 14                   # spatial after 2x2 maxpool
P = PH * PW                    # 196 pooled pixels
FC_IN = C_OUT * P              # 2*hidden*14*14 = 3136
FC_OUT = 64
N_TAPS = 9                     # 3x3 conv taps, k = dy*3 + dx
N_POOL = 4                     # positions inside a 2x2 pool window, q = qy*2 + qx

LANE_P = 224                   # pooled pixel stored at ph*16 + pw (pw padded 14 -> 16), lane-dense
CH_STRIDE = 256                # channel slot stride in the fc-input scratch (128-lane aligned)
FC_IN_PAD = C_OUT * CH_STRIDE  # 4096
SUB = 8                        # batch rows per conv sub-block (bounds live vregs)
TB_MAX = 128                   # max batch rows per grid step (v7x 64MiB VMEM friendly)


# ------------------------------- fused kernel --------------------------------
def fused_cnn_kernel(v_ref, wc_ref, bc_ref, g_ref, bfc_ref, out_ref, fcin_ref):
    """Whole network for one batch tile.

    v_ref   : (16, TB, 224) f32 VMEM  shifted stride-2 subgrids, slab index v = (qy+dy)*4 + (qx+dx)
    wc_ref  : (144,)  f32 SMEM        conv weights, wc[c*9 + dy*3 + dx]
    bc_ref  : (16,)   f32 SMEM        conv bias
    g_ref   : (4096, 64) bf16 VMEM    fc weight with NCHW flatten + 224->256 channel pad folded in
    bfc_ref : (1, 64) f32 VMEM        fc bias
    out_ref : (TB, 64) f32 VMEM
    fcin_ref: (TB, 4096) f32 VMEM     fc-input scratch, channel slots of stride 256
    """
    tb = out_ref.shape[0]
    nsub = tb // SUB

    # Channel-slot tails (lanes 224..255 of each slot) are never written by the conv stores; zero
    # the scratch so stale VMEM garbage cannot leak NaN/Inf into the (zero-weighted) fc columns.
    fcin_ref[...] = jnp.zeros_like(fcin_ref)

    def conv_pool_subblock(r0):
        # The 16 tap slabs for this 8-row sub-block: dense (SUB, 224) loads (batch on sublanes),
        # loaded once and reused by every channel and pool position.
        taps = [v_ref[v, pl.ds(r0, SUB), :] for v in range(16)]
        for c in range(C_OUT):
            w = [wc_ref[c * N_TAPS + k] for k in range(N_TAPS)]     # 9 scalars, read once each
            m = None
            for q in range(N_POOL):
                qy, qx = divmod(q, 2)
                s = None
                for k in range(N_TAPS):                             # 3x3 conv as 9 VPU MACs
                    dy, dx = divmod(k, 3)
                    t = taps[(qy + dy) * 4 + (qx + dx)]
                    s = t * w[k] if s is None else s + t * w[k]
                m = s if m is None else jnp.maximum(m, s)           # 2x2 maxpool over q
            pooled = jnp.maximum(m + bc_ref[c], 0.0)                # bias once after the max, ReLU
            # Aligned (start = c*256) masked store into this channel's 256-wide fc slot.
            fcin_ref[pl.ds(r0, SUB), pl.ds(c * CH_STRIDE, LANE_P)] = pooled

    if nsub == 1:
        conv_pool_subblock(0)
    else:
        def body(i, carry):
            conv_pool_subblock(pl.multiple_of(i * SUB, SUB))
            return carry
        lax.fori_loop(0, nsub, body, 0)

    # fc: ONE long-K bf16 MXU matmul (K = 4096) with f32 accumulation, then bias + ReLU.
    acc = jnp.dot(fcin_ref[...].astype(jnp.bfloat16), g_ref[...],
                  preferred_element_type=jnp.float32)
    out_ref[...] = jnp.maximum(acc + bfc_ref[...], 0.0)


# ------------------------------- glue ----------------------------------------
def _shifted_subgrids(x_nhw, n_pad):
    """(N, 28, 28) -> (16, n_pad, 224).

    Slab (a+1)*4+(b+1), a,b in {-1,0,1,2}, holds v[n, ph*16+pw] = x[n, 2*ph+a, 2*pw+b] (OOB = 0):
    the only 16 distinct shifted stride-2 subsamples needed by the 36 (pool-pos, conv-tap) pairs.
    """
    n = x_nhw.shape[0]
    xpad = jnp.pad(x_nhw, ((0, 0), (1, 1), (1, 1)))                  # (N, 30, 30)
    # TODO(synk): the remaining ~4.6x inflation could drop to ~1.3x by shipping only the 4 raw
    # stride-2 subgrids (zero-padded 16x16 frames) and building these 16 shifts in-kernel with
    # pltpu.roll / unaligned lane slices; kept in XLA glue here for lowering robustness.
    slabs = []
    for a in range(-1, 3):
        for b in range(-1, 3):
            slabs.append(xpad[:, a + 1:a + 28:2, b + 1:b + 28:2])    # (N, 14, 14)
    v = jnp.stack(slabs, axis=0)                                     # (16, N, 14, 14)
    v = jnp.pad(v, ((0, 0), (0, n_pad - n), (0, 0), (0, 2)))         # (16, n_pad, 14, 16)
    return v.reshape(16, n_pad, LANE_P)                              # lane dim = ph*16 + pw


@jax.jit
def custom_cnn_forward(x, conv_w, conv_b, fc_w, fc_b):
    """x: (B, S, 28, 28) float32 -> (B, S, 64) float32 (matches the torch view semantics)."""
    b_sz, s_len = x.shape[0], x.shape[1]
    n = b_sz * s_len
    xr = x.reshape(n, H, W).astype(jnp.float32)

    # Batch tiling: TB is always a multiple of 8 (full sublane occupancy); the batch axis only
    # splits into a >1 'parallel' grid (megacore-shardable on v7x) once N exceeds TB_MAX.
    n8 = ((n + 7) // 8) * 8
    tb = min(n8, TB_MAX)
    n_tiles = (n8 + tb - 1) // tb
    n_pad = n_tiles * tb

    v = _shifted_subgrids(xr, n_pad)                                 # (16, n_pad, 224)

    wc = conv_w.reshape(C_OUT * N_TAPS).astype(jnp.float32)          # flat (144,) SMEM
    # Fold the NCHW flatten order (feature = c*196 + ph*14 + pw) and the 224->256 channel padding
    # into the fc weight at trace time; keep it bf16 for the MXU.
    g = fc_w.reshape(FC_OUT, C_OUT, PH, PW)
    g = jnp.pad(g, ((0, 0), (0, 0), (0, 2), (0, 2)))                 # (64, 16, 16, 16)
    g = g.transpose(1, 2, 3, 0).reshape(FC_IN_PAD, FC_OUT).astype(jnp.bfloat16)

    out = pl.pallas_call(
        fused_cnn_kernel,
        out_shape=jax.ShapeDtypeStruct((n_pad, FC_OUT), jnp.float32),
        grid=(n_tiles,),
        in_specs=[
            pl.BlockSpec((16, tb, LANE_P), lambda i: (0, i, 0)),      # tap slabs (batch tile)
            pl.BlockSpec(memory_space=pltpu.MemorySpace.SMEM),        # conv weights (144,)
            pl.BlockSpec(memory_space=pltpu.MemorySpace.SMEM),        # conv bias (16,)
            # Grid-invariant operands (constant index maps).  At n_tiles == 1 (the test size) there
            # is no pipelining; at scale pl.Buffered(1) on these would halve their VMEM residency.
            pl.BlockSpec((FC_IN_PAD, FC_OUT), lambda i: (0, 0)),      # fc weight (VMEM-resident)
            pl.BlockSpec((1, FC_OUT), lambda i: (0, 0)),              # fc bias
        ],
        out_specs=pl.BlockSpec((tb, FC_OUT), lambda i: (i, 0)),
        scratch_shapes=[pltpu.VMEM((tb, FC_IN_PAD), jnp.float32)],    # fc input scratch
        compiler_params=pltpu.CompilerParams(
            dimension_semantics=("parallel",),
            vmem_limit_bytes=32 * 1024 * 1024,
        ),
    )(v, wc, conv_b.astype(jnp.float32), g, fc_b.reshape(1, FC_OUT).astype(jnp.float32))

    # .cuda() in the torch code is a device move only; no-op here.
    return out[:n].reshape(b_sz, s_len, FC_OUT)


# --------------------------- pure-JAX reference -------------------------------
def reference_forward(x, conv_w, conv_b, fc_w, fc_b):
    b_sz, s_len = x.shape[0], x.shape[1]
    n = b_sz * s_len
    xr = x.reshape(n, H, W).astype(jnp.float32)
    xpad = jnp.pad(xr, ((0, 0), (1, 1), (1, 1)))
    conv = jnp.zeros((n, H, W, C_OUT), jnp.float32)
    for dy in range(3):
        for dx in range(3):
            conv = conv + xpad[:, dy:dy + H, dx:dx + W, None] * conv_w[:, dy, dx][None, None, None, :]
    conv = jnp.maximum(conv + conv_b[None, None, None, :], 0.0)
    pooled = conv.reshape(n, PH, 2, PW, 2, C_OUT).max(axis=(2, 4))      # (N, 14, 14, C)
    feat = pooled.transpose(0, 3, 1, 2).reshape(n, FC_IN)               # NCHW flatten order
    out = jnp.maximum(feat @ fc_w.T + fc_b[None, :], 0.0)
    return out.reshape(b_sz, s_len, FC_OUT)


# --------------------------------- main ---------------------------------------
if __name__ == "__main__":
    B, S = 2, 4  # inputs: [B, S, 28, 28]; the module views them as [B*S, 1, 28, 28]

    key = jax.random.PRNGKey(0)
    k1, k2, k3, k4, k5 = jax.random.split(key, 5)
    # Deterministic synthetic parameters (shapes from the module's __init__).
    conv_w = jax.random.normal(k1, (C_OUT, 3, 3), jnp.float32) * (1.0 / 3.0)   # conv1.weight[:, 0]
    conv_b = jax.random.normal(k2, (C_OUT,), jnp.float32) * 0.1                # conv1.bias
    fc_w = jax.random.normal(k3, (FC_OUT, FC_IN), jnp.float32) * (1.0 / np.sqrt(FC_IN))
    fc_b = jax.random.normal(k4, (FC_OUT,), jnp.float32) * 0.1
    x = jax.random.normal(k5, (B, S, H, W), jnp.float32)

    out = jax.block_until_ready(custom_cnn_forward(x, conv_w, conv_b, fc_w, fc_b))

    ref = reference_forward(x, conv_w, conv_b, fc_w, fc_b)
    np.testing.assert_allclose(np.asarray(out), np.asarray(ref), rtol=2e-2, atol=2e-2)
    assert out.shape == (B, S, FC_OUT)

    print("KERNEL_OK")
</pallas_src>

<mosaic_0001>
module attributes {stable_mosaic.version = 11 : i64} {
  func.func @fused_cnn_kernel(%arg0: i32, %arg1: memref<16x8x224xf32, #tpu.memory_space<vmem>>, %arg2: memref<144xf32, #tpu.memory_space<smem>>, %arg3: memref<16xf32, #tpu.memory_space<smem>>, %arg4: memref<4096x64xbf16, #tpu.memory_space<vmem>>, %arg5: memref<1x64xf32, #tpu.memory_space<vmem>>, %arg6: memref<8x64xf32, #tpu.memory_space<vmem>>, %arg7: memref<8x4096xf32, #tpu.memory_space<vmem>>) attributes {dimension_semantics = [#tpu.dimension_semantics<parallel>], iteration_bounds = array<i64: 1>, scalar_prefetch = 0 : i64, scratch_operands = 1 : i64, tpu.core_type = #tpu.core_type<tc>, window_params = [{transform_indices = @transform_0, window_bounds = array<i64: 16, 8, 224>}, {transform_indices = @transform_1, window_bounds = array<i64: 144>}, {transform_indices = @transform_2, window_bounds = array<i64: 16>}, {pipeline_mode = #tpu.pipeline_mode<synchronous>, transform_indices = @transform_3, window_bounds = array<i64: 4096, 64>}, {pipeline_mode = #tpu.pipeline_mode<synchronous>, transform_indices = @transform_4, window_bounds = array<i64: 1, 64>}, {transform_indices = @transform_5, window_bounds = array<i64: 8, 64>}]} {
    %cst = arith.constant 0.000000e+00 : f32
    %0 = vector.broadcast %cst : f32 to vector<8x4096xf32>
    %c0 = arith.constant 0 : index
    %c0_0 = arith.constant 0 : index
    %1 = vector.load %arg7[%c0, %c0_0] : memref<8x4096xf32, #tpu.memory_space<vmem>>, vector<8x4096xf32>
    tpu.vector_store %arg7[%c0, %c0_0], %0 {strides = array<i32>} : memref<8x4096xf32, #tpu.memory_space<vmem>>, vector<8x4096xf32>,
    %c0_1 = arith.constant 0 : index
    %c0_2 = arith.constant 0 : index
    %c0_3 = arith.constant 0 : index
    %2 = vector.load %arg1[%c0_1, %c0_2, %c0_3] : memref<16x8x224xf32, #tpu.memory_space<vmem>>, vector<1x8x224xf32>
    %3 = vector.shape_cast %2 : vector<1x8x224xf32> to vector<8x224xf32>
    %c1 = arith.constant 1 : index
    %c0_4 = arith.constant 0 : index
    %c0_5 = arith.constant 0 : index
    %4 = vector.load %arg1[%c1, %c0_4, %c0_5] : memref<16x8x224xf32, #tpu.memory_space<vmem>>, vector<1x8x224xf32>
    %5 = vector.shape_cast %4 : vector<1x8x224xf32> to vector<8x224xf32>
    %c2 = arith.constant 2 : index
    %c0_6 = arith.constant 0 : index
    %c0_7 = arith.constant 0 : index
    %6 = vector.load %arg1[%c2, %c0_6, %c0_7] : memref<16x8x224xf32, #tpu.memory_space<vmem>>, vector<1x8x224xf32>
    %7 = vector.shape_cast %6 : vector<1x8x224xf32> to vector<8x224xf32>
    %c3 = arith.constant 3 : index
    %c0_8 = arith.constant 0 : index
    %c0_9 = arith.constant 0 : index
    %8 = vector.load %arg1[%c3, %c0_8, %c0_9] : memref<16x8x224xf32, #tpu.memory_space<vmem>>, vector<1x8x224xf32>
    %9 = vector.shape_cast %8 : vector<1x8x224xf32> to vector<8x224xf32>
    %c4 = arith.constant 4 : index
    %c0_10 = arith.constant 0 : index
    %c0_11 = arith.constant 0 : index
    %10 = vector.load %arg1[%c4, %c0_10, %c0_11] : memref<16x8x224xf32, #tpu.memory_space<vmem>>, vector<1x8x224xf32>
    %11 = vector.shape_cast %10 : vector<1x8x224xf32> to vector<8x224xf32>
    %c5 = arith.constant 5 : index
    %c0_12 = arith.constant 0 : index
    %c0_13 = arith.constant 0 : index
    %12 = vector.load %arg1[%c5, %c0_12, %c0_13] : memref<16x8x224xf32, #tpu.memory_space<vmem>>, vector<1x8x224xf32>
    %13 = vector.shape_cast %12 : vector<1x8x224xf32> to vector<8x224xf32>
    %c6 = arith.constant 6 : index
    %c0_14 = arith.constant 0 : index
    %c0_15 = arith.constant 0 : index
    %14 = vector.load %arg1[%c6, %c0_14, %c0_15] : memref<16x8x224xf32, #tpu.memory_space<vmem>>, vector<1x8x224xf32>
    %15 = vector.shape_cast %14 : vector<1x8x224xf32> to vector<8x224xf32>
    %c7 = arith.constant 7 : index
    %c0_16 = arith.constant 0 : index
    %c0_17 = arith.constant 0 : index
    %16 = vector.load %arg1[%c7, %c0_16, %c0_17] : memref<16x8x224xf32, #tpu.memory_space<vmem>>, vector<1x8x224xf32>
    %17 = vector.shape_cast %16 : vector<1x8x224xf32> to vector<8x224xf32>
    %c8 = arith.constant 8 : index
    %c0_18 = arith.constant 0 : index
    %c0_19 = arith.constant 0 : index
    %18 = vector.load %arg1[%c8, %c0_18, %c0_19] : memref<16x8x224xf32, #tpu.memory_space<vmem>>, vector<1x8x224xf32>
    %19 = vector.shape_cast %18 : vector<1x8x224xf32> to vector<8x224xf32>
    %c9 = arith.constant 9 : index
    %c0_20 = arith.constant 0 : index
    %c0_21 = arith.constant 0 : index
    %20 = vector.load %arg1[%c9, %c0_20, %c0_21] : memref<16x8x224xf32, #tpu.memory_space<vmem>>, vector<1x8x224xf32>
    %21 = vector.shape_cast %20 : vector<1x8x224xf32> to vector<8x224xf32>
    %c10 = arith.constant 10 : index
    %c0_22 = arith.constant 0 : index
    %c0_23 = arith.constant 0 : index
    %22 = vector.load %arg1[%c10, %c0_22, %c0_23] : memref<16x8x224xf32, #tpu.memory_space<vmem>>, vector<1x8x224xf32>
    %23 = vector.shape_cast %22 : vector<1x8x224xf32> to vector<8x224xf32>
    %c11 = arith.constant 11 : index
    %c0_24 = arith.constant 0 : index
    %c0_25 = arith.constant 0 : index
    %24 = vector.load %arg1[%c11, %c0_24, %c0_25] : memref<16x8x224xf32, #tpu.memory_space<vmem>>, vector<1x8x224xf32>
    %25 = vector.shape_cast %24 : vector<1x8x224xf32> to vector<8x224xf32>
    %c12 = arith.constant 12 : index
    %c0_26 = arith.constant 0 : index
    %c0_27 = arith.constant 0 : index
    %26 = vector.load %arg1[%c12, %c0_26, %c0_27] : memref<16x8x224xf32, #tpu.memory_space<vmem>>, vector<1x8x224xf32>
    %27 = vector.shape_cast %26 : vector<1x8x224xf32> to vector<8x224xf32>
    %c13 = arith.constant 13 : index
    %c0_28 = arith.constant 0 : index
    %c0_29 = arith.constant 0 : index
    %28 = vector.load %arg1[%c13, %c0_28, %c0_29] : memref<16x8x224xf32, #tpu.memory_space<vmem>>, vector<1x8x224xf32>
    %29 = vector.shape_cast %28 : vector<1x8x224xf32> to vector<8x224xf32>
    %c14 = arith.constant 14 : index
    %c0_30 = arith.constant 0 : index
    %c0_31 = arith.constant 0 : index
    %30 = vector.load %arg1[%c14, %c0_30, %c0_31] : memref<16x8x224xf32, #tpu.memory_space<vmem>>, vector<1x8x224xf32>
    %31 = vector.shape_cast %30 : vector<1x8x224xf32> to vector<8x224xf32>
    %c15 = arith.constant 15 : index
    %c0_32 = arith.constant 0 : index
    %c0_33 = arith.constant 0 : index
    %32 = vector.load %arg1[%c15, %c0_32, %c0_33] : memref<16x8x224xf32, #tpu.memory_space<vmem>>, vector<1x8x224xf32>
    %33 = vector.shape_cast %32 : vector<1x8x224xf32> to vector<8x224xf32>
    %c0_34 = arith.constant 0 : index
    %34 = memref.load %arg2[%c0_34] : memref<144xf32, #tpu.memory_space<smem>>
    %c1_35 = arith.constant 1 : index
    %35 = memref.load %arg2[%c1_35] : memref<144xf32, #tpu.memory_space<smem>>
    %c2_36 = arith.constant 2 : index
    %36 = memref.load %arg2[%c2_36] : memref<144xf32, #tpu.memory_space<smem>>
    %c3_37 = arith.constant 3 : index
    %37 = memref.load %arg2[%c3_37] : memref<144xf32, #tpu.memory_space<smem>>
    %c4_38 = arith.constant 4 : index
    %38 = memref.load %arg2[%c4_38] : memref<144xf32, #tpu.memory_space<smem>>
    %c5_39 = arith.constant 5 : index
    %39 = memref.load %arg2[%c5_39] : memref<144xf32, #tpu.memory_space<smem>>
    %c6_40 = arith.constant 6 : index
    %40 = memref.load %arg2[%c6_40] : memref<144xf32, #tpu.memory_space<smem>>
    %c7_41 = arith.constant 7 : index
    %41 = memref.load %arg2[%c7_41] : memref<144xf32, #tpu.memory_space<smem>>
    %c8_42 = arith.constant 8 : index
    %42 = memref.load %arg2[%c8_42] : memref<144xf32, #tpu.memory_space<smem>>
    %43 = vector.broadcast %34 : f32 to vector<8x224xf32>
    %44 = arith.mulf %3, %43 : vector<8x224xf32>
    %45 = vector.broadcast %35 : f32 to vector<8x224xf32>
    %46 = arith.mulf %5, %45 : vector<8x224xf32>
    %47 = arith.addf %44, %46 : vector<8x224xf32>
    %48 = vector.broadcast %36 : f32 to vector<8x224xf32>
    %49 = arith.mulf %7, %48 : vector<8x224xf32>
    %50 = arith.addf %47, %49 : vector<8x224xf32>
    %51 = vector.broadcast %37 : f32 to vector<8x224xf32>
    %52 = arith.mulf %11, %51 : vector<8x224xf32>
    %53 = arith.addf %50, %52 : vector<8x224xf32>
    %54 = vector.broadcast %38 : f32 to vector<8x224xf32>
    %55 = arith.mulf %13, %54 : vector<8x224xf32>
    %56 = arith.addf %53, %55 : vector<8x224xf32>
    %57 = vector.broadcast %39 : f32 to vector<8x224xf32>
    %58 = arith.mulf %15, %57 : vector<8x224xf32>
    %59 = arith.addf %56, %58 : vector<8x224xf32>
    %60 = vector.broadcast %40 : f32 to vector<8x224xf32>
    %61 = arith.mulf %19, %60 : vector<8x224xf32>
    %62 = arith.addf %59, %61 : vector<8x224xf32>
    %63 = vector.broadcast %41 : f32 to vector<8x224xf32>
    %64 = arith.mulf %21, %63 : vector<8x224xf32>
    %65 = arith.addf %62, %64 : vector<8x224xf32>
    %66 = vector.broadcast %42 : f32 to vector<8x224xf32>
    %67 = arith.mulf %23, %66 : vector<8x224xf32>
    %68 = arith.addf %65, %67 : vector<8x224xf32>
    %69 = vector.broadcast %34 : f32 to vector<8x224xf32>
    %70 = arith.mulf %5, %69 : vector<8x224xf32>
    %71 = vector.broadcast %35 : f32 to vector<8x224xf32>
    %72 = arith.mulf %7, %71 : vector<8x224xf32>
    %73 = arith.addf %70, %72 : vector<8x224xf32>
    %74 = vector.broadcast %36 : f32 to vector<8x224xf32>
    %75 = arith.mulf %9, %74 : vector<8x224xf32>
    %76 = arith.addf %73, %75 : vector<8x224xf32>
    %77 = vector.broadcast %37 : f32 to vector<8x224xf32>
    %78 = arith.mulf %13, %77 : vector<8x224xf32>
    %79 = arith.addf %76, %78 : vector<8x224xf32>
    %80 = vector.broadcast %38 : f32 to vector<8x224xf32>
    %81 = arith.mulf %15, %80 : vector<8x224xf32>
    %82 = arith.addf %79, %81 : vector<8x224xf32>
    %83 = vector.broadcast %39 : f32 to vector<8x224xf32>
    %84 = arith.mulf %17, %83 : vector<8x224xf32>
    %85 = arith.addf %82, %84 : vector<8x224xf32>
    %86 = vector.broadcast %40 : f32 to vector<8x224xf32>
    %87 = arith.mulf %21, %86 : vector<8x224xf32>
    %88 = arith.addf %85, %87 : vector<8x224xf32>
    %89 = vector.broadcast %41 : f32 to vector<8x224xf32>
    %90 = arith.mulf %23, %89 : vector<8x224xf32>
    %91 = arith.addf %88, %90 : vector<8x224xf32>
    %92 = vector.broadcast %42 : f32 to vector<8x224xf32>
    %93 = arith.mulf %25, %92 : vector<8x224xf32>
    %94 = arith.addf %91, %93 : vector<8x224xf32>
    %95 = arith.maximumf %68, %94 : vector<8x224xf32>
    %96 = vector.broadcast %34 : f32 to vector<8x224xf32>
    %97 = arith.mulf %11, %96 : vector<8x224xf32>
    %98 = vector.broadcast %35 : f32 to vector<8x224xf32>
    %99 = arith.mulf %13, %98 : vector<8x224xf32>
    %100 = arith.addf %97, %99 : vector<8x224xf32>
    %101 = vector.broadcast %36 : f32 to vector<8x224xf32>
    %102 = arith.mulf %15, %101 : vector<8x224xf32>
    %103 = arith.addf %100, %102 : vector<8x224xf32>
    %104 = vector.broadcast %37 : f32 to vector<8x224xf32>
    %105 = arith.mulf %19, %104 : vector<8x224xf32>
    %106 = arith.addf %103, %105 : vector<8x224xf32>
    %107 = vector.broadcast %38 : f32 to vector<8x224xf32>
    %108 = arith.mulf %21, %107 : vector<8x224xf32>
    %109 = arith.addf %106, %108 : vector<8x224xf32>
    %110 = vector.broadcast %39 : f32 to vector<8x224xf32>
    %111 = arith.mulf %23, %110 : vector<8x224xf32>
    %112 = arith.addf %109, %111 : vector<8x224xf32>
    %113 = vector.broadcast %40 : f32 to vector<8x224xf32>
    %114 = arith.mulf %27, %113 : vector<8x224xf32>
    %115 = arith.addf %112, %114 : vector<8x224xf32>
    %116 = vector.broadcast %41 : f32 to vector<8x224xf32>
    %117 = arith.mulf %29, %116 : vector<8x224xf32>
    %118 = arith.addf %115, %117 : vector<8x224xf32>
    %119 = vector.broadcast %42 : f32 to vector<8x224xf32>
    %120 = arith.mulf %31, %119 : vector<8x224xf32>
    %121 = arith.addf %118, %120 : vector<8x224xf32>
    %122 = arith.maximumf %95, %121 : vector<8x224xf32>
    %123 = vector.broadcast %34 : f32 to vector<8x224xf32>
    %124 = arith.mulf %13, %123 : vector<8x224xf32>
    %125 = vector.broadcast %35 : f32 to vector<8x224xf32>
    %126 = arith.mulf %15, %125 : vector<8x224xf32>
    %127 = arith.addf %124, %126 : vector<8x224xf32>
    %128 = vector.broadcast %36 : f32 to vector<8x224xf32>
    %129 = arith.mulf %17, %128 : vector<8x224xf32>
    %130 = arith.addf %127, %129 : vector<8x224xf32>
    %131 = vector.broadcast %37 : f32 to vector<8x224xf32>
    %132 = arith.mulf %21, %131 : vector<8x224xf32>
    %133 = arith.addf %130, %132 : vector<8x224xf32>
    %134 = vector.broadcast %38 : f32 to vector<8x224xf32>
    %135 = arith.mulf %23, %134 : vector<8x224xf32>
    %136 = arith.addf %133, %135 : vector<8x224xf32>
    %137 = vector.broadcast %39 : f32 to vector<8x224xf32>
    %138 = arith.mulf %25, %137 : vector<8x224xf32>
    %139 = arith.addf %136, %138 : vector<8x224xf32>
    %140 = vector.broadcast %40 : f32 to vector<8x224xf32>
    %141 = arith.mulf %29, %140 : vector<8x224xf32>
    %142 = arith.addf %139, %141 : vector<8x224xf32>
    %143 = vector.broadcast %41 : f32 to vector<8x224xf32>
    %144 = arith.mulf %31, %143 : vector<8x224xf32>
    %145 = arith.addf %142, %144 : vector<8x224xf32>
    %146 = vector.broadcast %42 : f32 to vector<8x224xf32>
    %147 = arith.mulf %33, %146 : vector<8x224xf32>
    %148 = arith.addf %145, %147 : vector<8x224xf32>
    %149 = arith.maximumf %122, %148 : vector<8x224xf32>
    %c0_43 = arith.constant 0 : index
    %150 = memref.load %arg3[%c0_43] : memref<16xf32, #tpu.memory_space<smem>>
    %151 = vector.broadcast %150 : f32 to vector<8x224xf32>
    %152 = arith.addf %149, %151 : vector<8x224xf32>
    %cst_44 = arith.constant 0.000000e+00 : f32
    %153 = vector.broadcast %cst_44 : f32 to vector<8x224xf32>
    %154 = arith.maximumf %152, %153 : vector<8x224xf32>
    %c0_45 = arith.constant 0 : index
    %c0_46 = arith.constant 0 : index
    %155 = vector.load %arg7[%c0_45, %c0_46] : memref<8x4096xf32, #tpu.memory_space<vmem>>, vector<8x224xf32>
    tpu.vector_store %arg7[%c0_45, %c0_46], %154 {strides = array<i32>} : memref<8x4096xf32, #tpu.memory_space<vmem>>, vector<8x224xf32>,
    %c9_47 = arith.constant 9 : index
    %156 = memref.load %arg2[%c9_47] : memref<144xf32, #tpu.memory_space<smem>>
    %c10_48 = arith.constant 10 : index
    %157 = memref.load %arg2[%c10_48] : memref<144xf32, #tpu.memory_space<smem>>
    %c11_49 = arith.constant 11 : index
    %158 = memref.load %arg2[%c11_49] : memref<144xf32, #tpu.memory_space<smem>>
    %c12_50 = arith.constant 12 : index
    %159 = memref.load %arg2[%c12_50] : memref<144xf32, #tpu.memory_space<smem>>
    %c13_51 = arith.constant 13 : index
    %160 = memref.load %arg2[%c13_51] : memref<144xf32, #tpu.memory_space<smem>>
    %c14_52 = arith.constant 14 : index
    %161 = memref.load %arg2[%c14_52] : memref<144xf32, #tpu.memory_space<smem>>
    %c15_53 = arith.constant 15 : index
    %162 = memref.load %arg2[%c15_53] : memref<144xf32, #tpu.memory_space<smem>>
    %c16 = arith.constant 16 : index
    %163 = memref.load %arg2[%c16] : memref<144xf32, #tpu.memory_space<smem>>
    %c17 = arith.constant 17 : index
    %164 = memref.load %arg2[%c17] : memref<144xf32, #tpu.memory_space<smem>>
    %165 = vector.broadcast %156 : f32 to vector<8x224xf32>
    %166 = arith.mulf %3, %165 : vector<8x224xf32>
    %167 = vector.broadcast %157 : f32 to vector<8x224xf32>
    %168 = arith.mulf %5, %167 : vector<8x224xf32>
    %169 = arith.addf %166, %168 : vector<8x224xf32>
    %170 = vector.broadcast %158 : f32 to vector<8x224xf32>
    %171 = arith.mulf %7, %170 : vector<8x224xf32>
    %172 = arith.addf %169, %171 : vector<8x224xf32>
    %173 = vector.broadcast %159 : f32 to vector<8x224xf32>
    %174 = arith.mulf %11, %173 : vector<8x224xf32>
    %175 = arith.addf %172, %174 : vector<8x224xf32>
    %176 = vector.broadcast %160 : f32 to vector<8x224xf32>
    %177 = arith.mulf %13, %176 : vector<8x224xf32>
    %178 = arith.addf %175, %177 : vector<8x224xf32>
    %179 = vector.broadcast %161 : f32 to vector<8x224xf32>
    %180 = arith.mulf %15, %179 : vector<8x224xf32>
    %181 = arith.addf %178, %180 : vector<8x224xf32>
    %182 = vector.broadcast %162 : f32 to vector<8x224xf32>
    %183 = arith.mulf %19, %182 : vector<8x224xf32>
    %184 = arith.addf %181, %183 : vector<8x224xf32>
    %185 = vector.broadcast %163 : f32 to vector<8x224xf32>
    %186 = arith.mulf %21, %185 : vector<8x224xf32>
    %187 = arith.addf %184, %186 : vector<8x224xf32>
    %188 = vector.broadcast %164 : f32 to vector<8x224xf32>
    %189 = arith.mulf %23, %188 : vector<8x224xf32>
    %190 = arith.addf %187, %189 : vector<8x224xf32>
    %191 = vector.broadcast %156 : f32 to vector<8x224xf32>
    %192 = arith.mulf %5, %191 : vector<8x224xf32>
    %193 = vector.broadcast %157 : f32 to vector<8x224xf32>
    %194 = arith.mulf %7, %193 : vector<8x224xf32>
    %195 = arith.addf %192, %194 : vector<8x224xf32>
    %196 = vector.broadcast %158 : f32 to vector<8x224xf32>
    %197 = arith.mulf %9, %196 : vector<8x224xf32>
    %198 = arith.addf %195, %197 : vector<8x224xf32>
    %199 = vector.broadcast %159 : f32 to vector<8x224xf32>
    %200 = arith.mulf %13, %199 : vector<8x224xf32>
    %201 = arith.addf %198, %200 : vector<8x224xf32>
    %202 = vector.broadcast %160 : f32 to vector<8x224xf32>
    %203 = arith.mulf %15, %202 : vector<8x224xf32>
    %204 = arith.addf %201, %203 : vector<8x224xf32>
    %205 = vector.broadcast %161 : f32 to vector<8x224xf32>
    %206 = arith.mulf %17, %205 : vector<8x224xf32>
    %207 = arith.addf %204, %206 : vector<8x224xf32>
    %208 = vector.broadcast %162 : f32 to vector<8x224xf32>
    %209 = arith.mulf %21, %208 : vector<8x224xf32>
    %210 = arith.addf %207, %209 : vector<8x224xf32>
    %211 = vector.broadcast %163 : f32 to vector<8x224xf32>
    %212 = arith.mulf %23, %211 : vector<8x224xf32>
    %213 = arith.addf %210, %212 : vector<8x224xf32>
    %214 = vector.broadcast %164 : f32 to vector<8x224xf32>
    %215 = arith.mulf %25, %214 : vector<8x224xf32>
    %216 = arith.addf %213, %215 : vector<8x224xf32>
    %217 = arith.maximumf %190, %216 : vector<8x224xf32>
    %218 = vector.broadcast %156 : f32 to vector<8x224xf32>
    %219 = arith.mulf %11, %218 : vector<8x224xf32>
    %220 = vector.broadcast %157 : f32 to vector<8x224xf32>
    %221 = arith.mulf %13, %220 : vector<8x224xf32>
    %222 = arith.addf %219, %221 : vector<8x224xf32>
    %223 = vector.broadcast %158 : f32 to vector<8x224xf32>
    %224 = arith.mulf %15, %223 : vector<8x224xf32>
    %225 = arith.addf %222, %224 : vector<8x224xf32>
    %226 = vector.broadcast %159 : f32 to vector<8x224xf32>
    %227 = arith.mulf %19, %226 : vector<8x224xf32>
    %228 = arith.addf %225, %227 : vector<8x224xf32>
    %229 = vector.broadcast %160 : f32 to vector<8x224xf32>
    %230 = arith.mulf %21, %229 : vector<8x224xf32>
    %231 = arith.addf %228, %230 : vector<8x224xf32>
    %232 = vector.broadcast %161 : f32 to vector<8x224xf32>
    %233 = arith.mulf %23, %232 : vector<8x224xf32>
    %234 = arith.addf %231, %233 : vector<8x224xf32>
    %235 = vector.broadcast %162 : f32 to vector<8x224xf32>
    %236 = arith.mulf %27, %235 : vector<8x224xf32>
    %237 = arith.addf %234, %236 : vector<8x224xf32>
    %238 = vector.broadcast %163 : f32 to vector<8x224xf32>
    %239 = arith.mulf %29, %238 : vector<8x224xf32>
    %240 = arith.addf %237, %239 : vector<8x224xf32>
    %241 = vector.broadcast %164 : f32 to vector<8x224xf32>
    %242 = arith.mulf %31, %241 : vector<8x224xf32>
    %243 = arith.addf %240, %242 : vector<8x224xf32>
    %244 = arith.maximumf %217, %243 : vector<8x224xf32>
    %245 = vector.broadcast %156 : f32 to vector<8x224xf32>
    %246 = arith.mulf %13, %245 : vector<8x224xf32>
    %247 = vector.broadcast %157 : f32 to vector<8x224xf32>
    %248 = arith.mulf %15, %247 : vector<8x224xf32>
    %249 = arith.addf %246, %248 : vector<8x224xf32>
    %250 = vector.broadcast %158 : f32 to vector<8x224xf32>
    %251 = arith.mulf %17, %250 : vector<8x224xf32>
    %252 = arith.addf %249, %251 : vector<8x224xf32>
    %253 = vector.broadcast %159 : f32 to vector<8x224xf32>
    %254 = arith.mulf %21, %253 : vector<8x224xf32>
    %255 = arith.addf %252, %254 : vector<8x224xf32>
    %256 = vector.broadcast %160 : f32 to vector<8x224xf32>
    %257 = arith.mulf %23, %256 : vector<8x224xf32>
    %258 = arith.addf %255, %257 : vector<8x224xf32>
    %259 = vector.broadcast %161 : f32 to vector<8x224xf32>
    %260 = arith.mulf %25, %259 : vector<8x224xf32>
    %261 = arith.addf %258, %260 : vector<8x224xf32>
    %262 = vector.broadcast %162 : f32 to vector<8x224xf32>
    %263 = arith.mulf %29, %262 : vector<8x224xf32>
    %264 = arith.addf %261, %263 : vector<8x224xf32>
    %265 = vector.broadcast %163 : f32 to vector<8x224xf32>
    %266 = arith.mulf %31, %265 : vector<8x224xf32>
    %267 = arith.addf %264, %266 : vector<8x224xf32>
    %268 = vector.broadcast %164 : f32 to vector<8x224xf32>
    %269 = arith.mulf %33, %268 : vector<8x224xf32>
    %270 = arith.addf %267, %269 : vector<8x224xf32>
    %271 = arith.maximumf %244, %270 : vector<8x224xf32>
    %c1_54 = arith.constant 1 : index
    %272 = memref.load %arg3[%c1_54] : memref<16xf32, #tpu.memory_space<smem>>
    %273 = vector.broadcast %272 : f32 to vector<8x224xf32>
    %274 = arith.addf %271, %273 : vector<8x224xf32>
    %cst_55 = arith.constant 0.000000e+00 : f32
    %275 = vector.broadcast %cst_55 : f32 to vector<8x224xf32>
    %276 = arith.maximumf %274, %275 : vector<8x224xf32>
    %c0_56 = arith.constant 0 : index
    %c256 = arith.constant 256 : index
    %277 = vector.load %arg7[%c0_56, %c256] : memref<8x4096xf32, #tpu.memory_space<vmem>>, vector<8x224xf32>
    tpu.vector_store %arg7[%c0_56, %c256], %276 {strides = array<i32>} : memref<8x4096xf32, #tpu.memory_space<vmem>>, vector<8x224xf32>,
    %c18 = arith.constant 18 : index
    %278 = memref.load %arg2[%c18] : memref<144xf32, #tpu.memory_space<smem>>
    %c19 = arith.constant 19 : index
    %279 = memref.load %arg2[%c19] : memref<144xf32, #tpu.memory_space<smem>>
    %c20 = arith.constant 20 : index
    %280 = memref.load %arg2[%c20] : memref<144xf32, #tpu.memory_space<smem>>
    %c21 = arith.constant 21 : index
    %281 = memref.load %arg2[%c21] : memref<144xf32, #tpu.memory_space<smem>>
    %c22 = arith.constant 22 : index
    %282 = memref.load %arg2[%c22] : memref<144xf32, #tpu.memory_space<smem>>
    %c23 = arith.constant 23 : index
    %283 = memref.load %arg2[%c23] : memref<144xf32, #tpu.memory_space<smem>>
    %c24 = arith.constant 24 : index
    %284 = memref.load %arg2[%c24] : memref<144xf32, #tpu.memory_space<smem>>
    %c25 = arith.constant 25 : index
    %285 = memref.load %arg2[%c25] : memref<144xf32, #tpu.memory_space<smem>>
    %c26 = arith.constant 26 : index
    %286 = memref.load %arg2[%c26] : memref<144xf32, #tpu.memory_space<smem>>
    %287 = vector.broadcast %278 : f32 to vector<8x224xf32>
    %288 = arith.mulf %3, %287 : vector<8x224xf32>
    %289 = vector.broadcast %279 : f32 to vector<8x224xf32>
    %290 = arith.mulf %5, %289 : vector<8x224xf32>
    %291 = arith.addf %288, %290 : vector<8x224xf32>
    %292 = vector.broadcast %280 : f32 to vector<8x224xf32>
    %293 = arith.mulf %7, %292 : vector<8x224xf32>
    %294 = arith.addf %291, %293 : vector<8x224xf32>
    %295 = vector.broadcast %281 : f32 to vector<8x224xf32>
    %296 = arith.mulf %11, %295 : vector<8x224xf32>
    %297 = arith.addf %294, %296 : vector<8x224xf32>
    %298 = vector.broadcast %282 : f32 to vector<8x224xf32>
    %299 = arith.mulf %13, %298 : vector<8x224xf32>
    %300 = arith.addf %297, %299 : vector<8x224xf32>
    %301 = vector.broadcast %283 : f32 to vector<8x224xf32>
    %302 = arith.mulf %15, %301 : vector<8x224xf32>
    %303 = arith.addf %300, %302 : vector<8x224xf32>
    %304 = vector.broadcast %284 : f32 to vector<8x224xf32>
    %305 = arith.mulf %19, %304 : vector<8x224xf32>
    %306 = arith.addf %303, %305 : vector<8x224xf32>
    %307 = vector.broadcast %285 : f32 to vector<8x224xf32>
    %308 = arith.mulf %21, %307 : vector<8x224xf32>
    %309 = arith.addf %306, %308 : vector<8x224xf32>
    %310 = vector.broadcast %286 : f32 to vector<8x224xf32>
    %311 = arith.mulf %23, %310 : vector<8x224xf32>
    %312 = arith.addf %309, %311 : vector<8x224xf32>
    %313 = vector.broadcast %278 : f32 to vector<8x224xf32>
    %314 = arith.mulf %5, %313 : vector<8x224xf32>
    %315 = vector.broadcast %279 : f32 to vector<8x224xf32>
    %316 = arith.mulf %7, %315 : vector<8x224xf32>
    %317 = arith.addf %314, %316 : vector<8x224xf32>
    %318 = vector.broadcast %280 : f32 to vector<8x224xf32>
    %319 = arith.mulf %9, %318 : vector<8x224xf32>
    %320 = arith.addf %317, %319 : vector<8x224xf32>
    %321 = vector.broadcast %281 : f32 to vector<8x224xf32>
    %322 = arith.mulf %13, %321 : vector<8x224xf32>
    %323 = arith.addf %320, %322 : vector<8x224xf32>
    %324 = vector.broadcast %282 : f32 to vector<8x224xf32>
    %325 = arith.mulf %15, %324 : vector<8x224xf32>
    %326 = arith.addf %323, %325 : vector<8x224xf32>
    %327 = vector.broadcast %283 : f32 to vector<8x224xf32>
    %328 = arith.mulf %17, %327 : vector<8x224xf32>
    %329 = arith.addf %326, %328 : vector<8x224xf32>
    %330 = vector.broadcast %284 : f32 to vector<8x224xf32>
    %331 = arith.mulf %21, %330 : vector<8x224xf32>
    %332 = arith.addf %329, %331 : vector<8x224xf32>
    %333 = vector.broadcast %285 : f32 to vector<8x224xf32>
    %334 = arith.mulf %23, %333 : vector<8x224xf32>
    %335 = arith.addf %332, %334 : vector<8x224xf32>
    %336 = vector.broadcast %286 : f32 to vector<8x224xf32>
    %337 = arith.mulf %25, %336 : vector<8x224xf32>
    %338 = arith.addf %335, %337 : vector<8x224xf32>
    %339 = arith.maximumf %312, %338 : vector<8x224xf32>
    %340 = vector.broadcast %278 : f32 to vector<8x224xf32>
    %341 = arith.mulf %11, %340 : vector<8x224xf32>
    %342 = vector.broadcast %279 : f32 to vector<8x224xf32>
    %343 = arith.mulf %13, %342 : vector<8x224xf32>
    %344 = arith.addf %341, %343 : vector<8x224xf32>
    %345 = vector.broadcast %280 : f32 to vector<8x224xf32>
    %346 = arith.mulf %15, %345 : vector<8x224xf32>
    %347 = arith.addf %344, %346 : vector<8x224xf32>
    %348 = vector.broadcast %281 : f32 to vector<8x224xf32>
    %349 = arith.mulf %19, %348 : vector<8x224xf32>
    %350 = arith.addf %347, %349 : vector<8x224xf32>
    %351 = vector.broadcast %282 : f32 to vector<8x224xf32>
    %352 = arith.mulf %21, %351 : vector<8x224xf32>
    %353 = arith.addf %350, %352 : vector<8x224xf32>
    %354 = vector.broadcast %283 : f32 to vector<8x224xf32>
    %355 = arith.mulf %23, %354 : vector<8x224xf32>
    %356 = arith.addf %353, %355 : vector<8x224xf32>
    %357 = vector.broadcast %284 : f32 to vector<8x224xf32>
    %358 = arith.mulf %27, %357 : vector<8x224xf32>
    %359 = arith.addf %356, %358 : vector<8x224xf32>
    %360 = vector.broadcast %285 : f32 to vector<8x224xf32>
    %361 = arith.mulf %29, %360 : vector<8x224xf32>
    %362 = arith.addf %359, %361 : vector<8x224xf32>
    %363 = vector.broadcast %286 : f32 to vector<8x224xf32>
    %364 = arith.mulf %31, %363 : vector<8x224xf32>
    %365 = arith.addf %362, %364 : vector<8x224xf32>
    %366 = arith.maximumf %339, %365 : vector<8x224xf32>
    %367 = vector.broadcast %278 : f32 to vector<8x224xf32>
    %368 = arith.mulf %13, %367 : vector<8x224xf32>
    %369 = vector.broadcast %279 : f32 to vector<8x224xf32>
    %370 = arith.mulf %15, %369 : vector<8x224xf32>
    %371 = arith.addf %368, %370 : vector<8x224xf32>
    %372 = vector.broadcast %280 : f32 to vector<8x224xf32>
    %373 = arith.mulf %17, %372 : vector<8x224xf32>
    %374 = arith.addf %371, %373 : vector<8x224xf32>
    %375 = vector.broadcast %281 : f32 to vector<8x224xf32>
    %376 = arith.mulf %21, %375 : vector<8x224xf32>
    %377 = arith.addf %374, %376 : vector<8x224xf32>
    %378 = vector.broadcast %282 : f32 to vector<8x224xf32>
    %379 = arith.mulf %23, %378 : vector<8x224xf32>
    %380 = arith.addf %377, %379 : vector<8x224xf32>
    %381 = vector.broadcast %283 : f32 to vector<8x224xf32>
    %382 = arith.mulf %25, %381 : vector<8x224xf32>
    %383 = arith.addf %380, %382 : vector<8x224xf32>
    %384 = vector.broadcast %284 : f32 to vector<8x224xf32>
    %385 = arith.mulf %29, %384 : vector<8x224xf32>
    %386 = arith.addf %383, %385 : vector<8x224xf32>
    %387 = vector.broadcast %285 : f32 to vector<8x224xf32>
    %388 = arith.mulf %31, %387 : vector<8x224xf32>
    %389 = arith.addf %386, %388 : vector<8x224xf32>
    %390 = vector.broadcast %286 : f32 to vector<8x224xf32>
    %391 = arith.mulf %33, %390 : vector<8x224xf32>
    %392 = arith.addf %389, %391 : vector<8x224xf32>
    %393 = arith.maximumf %366, %392 : vector<8x224xf32>
    %c2_57 = arith.constant 2 : index
    %394 = memref.load %arg3[%c2_57] : memref<16xf32, #tpu.memory_space<smem>>
    %395 = vector.broadcast %394 : f32 to vector<8x224xf32>
    %396 = arith.addf %393, %395 : vector<8x224xf32>
    %cst_58 = arith.constant 0.000000e+00 : f32
    %397 = vector.broadcast %cst_58 : f32 to vector<8x224xf32>
    %398 = arith.maximumf %396, %397 : vector<8x224xf32>
    %c0_59 = arith.constant 0 : index
    %c512 = arith.constant 512 : index
    %399 = vector.load %arg7[%c0_59, %c512] : memref<8x4096xf32, #tpu.memory_space<vmem>>, vector<8x224xf32>
    tpu.vector_store %arg7[%c0_59, %c512], %398 {strides = array<i32>} : memref<8x4096xf32, #tpu.memory_space<vmem>>, vector<8x224xf32>,
    %c27 = arith.constant 27 : index
    %400 = memref.load %arg2[%c27] : memref<144xf32, #tpu.memory_space<smem>>
    %c28 = arith.constant 28 : index
    %401 = memref.load %arg2[%c28] : memref<144xf32, #tpu.memory_space<smem>>
    %c29 = arith.constant 29 : index
    %402 = memref.load %arg2[%c29] : memref<144xf32, #tpu.memory_space<smem>>
    %c30 = arith.constant 30 : index
    %403 = memref.load %arg2[%c30] : memref<144xf32, #tpu.memory_space<smem>>
    %c31 = arith.constant 31 : index
    %404 = memref.load %arg2[%c31] : memref<144xf32, #tpu.memory_space<smem>>
    %c32 = arith.constant 32 : index
    %405 = memref.load %arg2[%c32] : memref<144xf32, #tpu.memory_space<smem>>
    %c33 = arith.constant 33 : index
    %406 = memref.load %arg2[%c33] : memref<144xf32, #tpu.memory_space<smem>>
    %c34 = arith.constant 34 : index
    %407 = memref.load %arg2[%c34] : memref<144xf32, #tpu.memory_space<smem>>
    %c35 = arith.constant 35 : index
    %408 = memref.load %arg2[%c35] : memref<144xf32, #tpu.memory_space<smem>>
    %409 = vector.broadcast %400 : f32 to vector<8x224xf32>
    %410 = arith.mulf %3, %409 : vector<8x224xf32>
    %411 = vector.broadcast %401 : f32 to vector<8x224xf32>
    %412 = arith.mulf %5, %411 : vector<8x224xf32>
    %413 = arith.addf %410, %412 : vector<8x224xf32>
    %414 = vector.broadcast %402 : f32 to vector<8x224xf32>
    %415 = arith.mulf %7, %414 : vector<8x224xf32>
    %416 = arith.addf %413, %415 : vector<8x224xf32>
    %417 = vector.broadcast %403 : f32 to vector<8x224xf32>
    %418 = arith.mulf %11, %417 : vector<8x224xf32>
    %419 = arith.addf %416, %418 : vector<8x224xf32>
    %420 = vector.broadcast %404 : f32 to vector<8x224xf32>
    %421 = arith.mulf %13, %420 : vector<8x224xf32>
    %422 = arith.addf %419, %421 : vector<8x224xf32>
    %423 = vector.broadcast %405 : f32 to vector<8x224xf32>
    %424 = arith.mulf %15, %423 : vector<8x224xf32>
    %425 = arith.addf %422, %424 : vector<8x224xf32>
    %426 = vector.broadcast %406 : f32 to vector<8x224xf32>
    %427 = arith.mulf %19, %426 : vector<8x224xf32>
    %428 = arith.addf %425, %427 : vector<8x224xf32>
    %429 = vector.broadcast %407 : f32 to vector<8x224xf32>
    %430 = arith.mulf %21, %429 : vector<8x224xf32>
    %431 = arith.addf %428, %430 : vector<8x224xf32>
    %432 = vector.broadcast %408 : f32 to vector<8x224xf32>
    %433 = arith.mulf %23, %432 : vector<8x224xf32>
    %434 = arith.addf %431, %433 : vector<8x224xf32>
    %435 = vector.broadcast %400 : f32 to vector<8x224xf32>
    %436 = arith.mulf %5, %435 : vector<8x224xf32>
    %437 = vector.broadcast %401 : f32 to vector<8x224xf32>
    %438 = arith.mulf %7, %437 : vector<8x224xf32>
    %439 = arith.addf %436, %438 : vector<8x224xf32>
    %440 = vector.broadcast %402 : f32 to vector<8x224xf32>
    %441 = arith.mulf %9, %440 : vector<8x224xf32>
    %442 = arith.addf %439, %441 : vector<8x224xf32>
    %443 = vector.broadcast %403 : f32 to vector<8x224xf32>
    %444 = arith.mulf %13, %443 : vector<8x224xf32>
    %445 = arith.addf %442, %444 : vector<8x224xf32>
    %446 = vector.broadcast %404 : f32 to vector<8x224xf32>
    %447 = arith.mulf %15, %446 : vector<8x224xf32>
    %448 = arith.addf %445, %447 : vector<8x224xf32>
    %449 = vector.broadcast %405 : f32 to vector<8x224xf32>
    %450 = arith.mulf %17, %449 : vector<8x224xf32>
    %451 = arith.addf %448, %450 : vector<8x224xf32>
    %452 = vector.broadcast %406 : f32 to vector<8x224xf32>
    %453 = arith.mulf %21, %452 : vector<8x224xf32>
    %454 = arith.addf %451, %453 : vector<8x224xf32>
    %455 = vector.broadcast %407 : f32 to vector<8x224xf32>
    %456 = arith.mulf %23, %455 : vector<8x224xf32>
    %457 = arith.addf %454, %456 : vector<8x224xf32>
    %458 = vector.broadcast %408 : f32 to vector<8x224xf32>
    %459 = arith.mulf %25, %458 : vector<8x224xf32>
    %460 = arith.addf %457, %459 : vector<8x224xf32>
    %461 = arith.maximumf %434, %460 : vector<8x224xf32>
    %462 = vector.broadcast %400 : f32 to vector<8x224xf32>
    %463 = arith.mulf %11, %462 : vector<8x224xf32>
    %464 = vector.broadcast %401 : f32 to vector<8x224xf32>
    %465 = arith.mulf %13, %464 : vector<8x224xf32>
    %466 = arith.addf %463, %465 : vector<8x224xf32>
    %467 = vector.broadcast %402 : f32 to vector<8x224xf32>
    %468 = arith.mulf %15, %467 : vector<8x224xf32>
    %469 = arith.addf %466, %468 : vector<8x224xf32>
    %470 = vector.broadcast %403 : f32 to vector<8x224xf32>
    %471 = arith.mulf %19, %470 : vector<8x224xf32>
    %472 = arith.addf %469, %471 : vector<8x224xf32>
    %473 = vector.broadcast %404 : f32 to vector<8x224xf32>
    %474 = arith.mulf %21, %473 : vector<8x224xf32>
    %475 = arith.addf %472, %474 : vector<8x224xf32>
    %476 = vector.broadcast %405 : f32 to vector<8x224xf32>
    %477 = arith.mulf %23, %476 : vector<8x224xf32>
    %478 = arith.addf %475, %477 : vector<8x224xf32>
    %479 = vector.broadcast %406 : f32 to vector<8x224xf32>
    %480 = arith.mulf %27, %479 : vector<8x224xf32>
    %481 = arith.addf %478, %480 : vector<8x224xf32>
    %482 = vector.broadcast %407 : f32 to vector<8x224xf32>
    %483 = arith.mulf %29, %482 : vector<8x224xf32>
    %484 = arith.addf %481, %483 : vector<8x224xf32>
    %485 = vector.broadcast %408 : f32 to vector<8x224xf32>
    %486 = arith.mulf %31, %485 : vector<8x224xf32>
    %487 = arith.addf %484, %486 : vector<8x224xf32>
    %488 = arith.maximumf %461, %487 : vector<8x224xf32>
    %489 = vector.broadcast %400 : f32 to vector<8x224xf32>
    %490 = arith.mulf %13, %489 : vector<8x224xf32>
    %491 = vector.broadcast %401 : f32 to vector<8x224xf32>
    %492 = arith.mulf %15, %491 : vector<8x224xf32>
    %493 = arith.addf %490, %492 : vector<8x224xf32>
    %494 = vector.broadcast %402 : f32 to vector<8x224xf32>
    %495 = arith.mulf %17, %494 : vector<8x224xf32>
    %496 = arith.addf %493, %495 : vector<8x224xf32>
    %497 = vector.broadcast %403 : f32 to vector<8x224xf32>
    %498 = arith.mulf %21, %497 : vector<8x224xf32>
    %499 = arith.addf %496, %498 : vector<8x224xf32>
    %500 = vector.broadcast %404 : f32 to vector<8x224xf32>
    %501 = arith.mulf %23, %500 : vector<8x224xf32>
    %502 = arith.addf %499, %501 : vector<8x224xf32>
    %503 = vector.broadcast %405 : f32 to vector<8x224xf32>
    %504 = arith.mulf %25, %503 : vector<8x224xf32>
    %505 = arith.addf %502, %504 : vector<8x224xf32>
    %506 = vector.broadcast %406 : f32 to vector<8x224xf32>
    %507 = arith.mulf %29, %506 : vector<8x224xf32>
    %508 = arith.addf %505, %507 : vector<8x224xf32>
    %509 = vector.broadcast %407 : f32 to vector<8x224xf32>
    %510 = arith.mulf %31, %509 : vector<8x224xf32>
    %511 = arith.addf %508, %510 : vector<8x224xf32>
    %512 = vector.broadcast %408 : f32 to vector<8x224xf32>
    %513 = arith.mulf %33, %512 : vector<8x224xf32>
    %514 = arith.addf %511, %513 : vector<8x224xf32>
    %515 = arith.maximumf %488, %514 : vector<8x224xf32>
    %c3_60 = arith.constant 3 : index
    %516 = memref.load %arg3[%c3_60] : memref<16xf32, #tpu.memory_space<smem>>
    %517 = vector.broadcast %516 : f32 to vector<8x224xf32>
    %518 = arith.addf %515, %517 : vector<8x224xf32>
    %cst_61 = arith.constant 0.000000e+00 : f32
    %519 = vector.broadcast %cst_61 : f32 to vector<8x224xf32>
    %520 = arith.maximumf %518, %519 : vector<8x224xf32>
    %c0_62 = arith.constant 0 : index
    %c768 = arith.constant 768 : index
    %521 = vector.load %arg7[%c0_62, %c768] : memref<8x4096xf32, #tpu.memory_space<vmem>>, vector<8x224xf32>
    tpu.vector_store %arg7[%c0_62, %c768], %520 {strides = array<i32>} : memref<8x4096xf32, #tpu.memory_space<vmem>>, vector<8x224xf32>,
    %c36 = arith.constant 36 : index
    %522 = memref.load %arg2[%c36] : memref<144xf32, #tpu.memory_space<smem>>
    %c37 = arith.constant 37 : index
    %523 = memref.load %arg2[%c37] : memref<144xf32, #tpu.memory_space<smem>>
    %c38 = arith.constant 38 : index
    %524 = memref.load %arg2[%c38] : memref<144xf32, #tpu.memory_space<smem>>
    %c39 = arith.constant 39 : index
    %525 = memref.load %arg2[%c39] : memref<144xf32, #tpu.memory_space<smem>>
    %c40 = arith.constant 40 : index
    %526 = memref.load %arg2[%c40] : memref<144xf32, #tpu.memory_space<smem>>
    %c41 = arith.constant 41 : index
    %527 = memref.load %arg2[%c41] : memref<144xf32, #tpu.memory_space<smem>>
    %c42 = arith.constant 42 : index
    %528 = memref.load %arg2[%c42] : memref<144xf32, #tpu.memory_space<smem>>
    %c43 = arith.constant 43 : index
    %529 = memref.load %arg2[%c43] : memref<144xf32, #tpu.memory_space<smem>>
    %c44 = arith.constant 44 : index
    %530 = memref.load %arg2[%c44] : memref<144xf32, #tpu.memory_space<smem>>
    %531 = vector.broadcast %522 : f32 to vector<8x224xf32>
    %532 = arith.mulf %3, %531 : vector<8x224xf32>
    %533 = vector.broadcast %523 : f32 to vector<8x224xf32>
    %534 = arith.mulf %5, %533 : vector<8x224xf32>
    %535 = arith.addf %532, %534 : vector<8x224xf32>
    %536 = vector.broadcast %524 : f32 to vector<8x224xf32>
    %537 = arith.mulf %7, %536 : vector<8x224xf32>
    %538 = arith.addf %535, %537 : vector<8x224xf32>
    %539 = vector.broadcast %525 : f32 to vector<8x224xf32>
    %540 = arith.mulf %11, %539 : vector<8x224xf32>
    %541 = arith.addf %538, %540 : vector<8x224xf32>
    %542 = vector.broadcast %526 : f32 to vector<8x224xf32>
    %543 = arith.mulf %13, %542 : vector<8x224xf32>
    %544 = arith.addf %541, %543 : vector<8x224xf32>
    %545 = vector.broadcast %527 : f32 to vector<8x224xf32>
    %546 = arith.mulf %15, %545 : vector<8x224xf32>
    %547 = arith.addf %544, %546 : vector<8x224xf32>
    %548 = vector.broadcast %528 : f32 to vector<8x224xf32>
    %549 = arith.mulf %19, %548 : vector<8x224xf32>
    %550 = arith.addf %547, %549 : vector<8x224xf32>
    %551 = vector.broadcast %529 : f32 to vector<8x224xf32>
    %552 = arith.mulf %21, %551 : vector<8x224xf32>
    %553 = arith.addf %550, %552 : vector<8x224xf32>
    %554 = vector.broadcast %530 : f32 to vector<8x224xf32>
    %555 = arith.mulf %23, %554 : vector<8x224xf32>
    %556 = arith.addf %553, %555 : vector<8x224xf32>
    %557 = vector.broadcast %522 : f32 to vector<8x224xf32>
    %558 = arith.mulf %5, %557 : vector<8x224xf32>
    %559 = vector.broadcast %523 : f32 to vector<8x224xf32>
    %560 = arith.mulf %7, %559 : vector<8x224xf32>
    %561 = arith.addf %558, %560 : vector<8x224xf32>
    %562 = vector.broadcast %524 : f32 to vector<8x224xf32>
    %563 = arith.mulf %9, %562 : vector<8x224xf32>
    %564 = arith.addf %561, %563 : vector<8x224xf32>
    %565 = vector.broadcast %525 : f32 to vector<8x224xf32>
    %566 = arith.mulf %13, %565 : vector<8x224xf32>
    %567 = arith.addf %564, %566 : vector<8x224xf32>
    %568 = vector.broadcast %526 : f32 to vector<8x224xf32>
    %569 = arith.mulf %15, %568 : vector<8x224xf32>
    %570 = arith.addf %567, %569 : vector<8x224xf32>
    %571 = vector.broadcast %527 : f32 to vector<8x224xf32>
    %572 = arith.mulf %17, %571 : vector<8x224xf32>
    %573 = arith.addf %570, %572 : vector<8x224xf32>
    %574 = vector.broadcast %528 : f32 to vector<8x224xf32>
    %575 = arith.mulf %21, %574 : vector<8x224xf32>
    %576 = arith.addf %573, %575 : vector<8x224xf32>
    %577 = vector.broadcast %529 : f32 to vector<8x224xf32>
    %578 = arith.mulf %23, %577 : vector<8x224xf32>
    %579 = arith.addf %576, %578 : vector<8x224xf32>
    %580 = vector.broadcast %530 : f32 to vector<8x224xf32>
    %581 = arith.mulf %25, %580 : vector<8x224xf32>
    %582 = arith.addf %579, %581 : vector<8x224xf32>
    %583 = arith.maximumf %556, %582 : vector<8x224xf32>
    %584 = vector.broadcast %522 : f32 to vector<8x224xf32>
    %585 = arith.mulf %11, %584 : vector<8x224xf32>
    %586 = vector.broadcast %523 : f32 to vector<8x224xf32>
    %587 = arith.mulf %13, %586 : vector<8x224xf32>
    %588 = arith.addf %585, %587 : vector<8x224xf32>
    %589 = vector.broadcast %524 : f32 to vector<8x224xf32>
    %590 = arith.mulf %15, %589 : vector<8x224xf32>
    %591 = arith.addf %588, %590 : vector<8x224xf32>
    %592 = vector.broadcast %525 : f32 to vector<8x224xf32>
    %593 = arith.mulf %19, %592 : vector<8x224xf32>
    %594 = arith.addf %591, %593 : vector<8x224xf32>
    %595 = vector.broadcast %526 : f32 to vector<8x224xf32>
    %596 = arith.mulf %21, %595 : vector<8x224xf32>
    %597 = arith.addf %594, %596 : vector<8x224xf32>
    %598 = vector.broadcast %527 : f32 to vector<8x224xf32>
    %599 = arith.mulf %23, %598 : vector<8x224xf32>
    %600 = arith.addf %597, %599 : vector<8x224xf32>
    %601 = vector.broadcast %528 : f32 to vector<8x224xf32>
    %602 = arith.mulf %27, %601 : vector<8x224xf32>
    %603 = arith.addf %600, %602 : vector<8x224xf32>
    %604 = vector.broadcast %529 : f32 to vector<8x224xf32>
    %605 = arith.mulf %29, %604 : vector<8x224xf32>
    %606 = arith.addf %603, %605 : vector<8x224xf32>
    %607 = vector.broadcast %530 : f32 to vector<8x224xf32>
    %608 = arith.mulf %31, %607 : vector<8x224xf32>
    %609 = arith.addf %606, %608 : vector<8x224xf32>
    %610 = arith.maximumf %583, %609 : vector<8x224xf32>
    %611 = vector.broadcast %522 : f32 to vector<8x224xf32>
    %612 = arith.mulf %13, %611 : vector<8x224xf32>
    %613 = vector.broadcast %523 : f32 to vector<8x224xf32>
    %614 = arith.mulf %15, %613 : vector<8x224xf32>
    %615 = arith.addf %612, %614 : vector<8x224xf32>
    %616 = vector.broadcast %524 : f32 to vector<8x224xf32>
    %617 = arith.mulf %17, %616 : vector<8x224xf32>
    %618 = arith.addf %615, %617 : vector<8x224xf32>
    %619 = vector.broadcast %525 : f32 to vector<8x224xf32>
    %620 = arith.mulf %21, %619 : vector<8x224xf32>
    %621 = arith.addf %618, %620 : vector<8x224xf32>
    %622 = vector.broadcast %526 : f32 to vector<8x224xf32>
    %623 = arith.mulf %23, %622 : vector<8x224xf32>
    %624 = arith.addf %621, %623 : vector<8x224xf32>
    %625 = vector.broadcast %527 : f32 to vector<8x224xf32>
    %626 = arith.mulf %25, %625 : vector<8x224xf32>
    %627 = arith.addf %624, %626 : vector<8x224xf32>
    %628 = vector.broadcast %528 : f32 to vector<8x224xf32>
    %629 = arith.mulf %29, %628 : vector<8x224xf32>
    %630 = arith.addf %627, %629 : vector<8x224xf32>
    %631 = vector.broadcast %529 : f32 to vector<8x224xf32>
    %632 = arith.mulf %31, %631 : vector<8x224xf32>
    %633 = arith.addf %630, %632 : vector<8x224xf32>
    %634 = vector.broadcast %530 : f32 to vector<8x224xf32>
    %635 = arith.mulf %33, %634 : vector<8x224xf32>
    %636 = arith.addf %633, %635 : vector<8x224xf32>
    %637 = arith.maximumf %610, %636 : vector<8x224xf32>
    %c4_63 = arith.constant 4 : index
    %638 = memref.load %arg3[%c4_63] : memref<16xf32, #tpu.memory_space<smem>>
    %639 = vector.broadcast %638 : f32 to vector<8x224xf32>
    %640 = arith.addf %637, %639 : vector<8x224xf32>
    %cst_64 = arith.constant 0.000000e+00 : f32
    %641 = vector.broadcast %cst_64 : f32 to vector<8x224xf32>
    %642 = arith.maximumf %640, %641 : vector<8x224xf32>
    %c0_65 = arith.constant 0 : index
    %c1024 = arith.constant 1024 : index
    %643 = vector.load %arg7[%c0_65, %c1024] : memref<8x4096xf32, #tpu.memory_space<vmem>>, vector<8x224xf32>
    tpu.vector_store %arg7[%c0_65, %c1024], %642 {strides = array<i32>} : memref<8x4096xf32, #tpu.memory_space<vmem>>, vector<8x224xf32>,
    %c45 = arith.constant 45 : index
    %644 = memref.load %arg2[%c45] : memref<144xf32, #tpu.memory_space<smem>>
    %c46 = arith.constant 46 : index
    %645 = memref.load %arg2[%c46] : memref<144xf32, #tpu.memory_space<smem>>
    %c47 = arith.constant 47 : index
    %646 = memref.load %arg2[%c47] : memref<144xf32, #tpu.memory_space<smem>>
    %c48 = arith.constant 48 : index
    %647 = memref.load %arg2[%c48] : memref<144xf32, #tpu.memory_space<smem>>
    %c49 = arith.constant 49 : index
    %648 = memref.load %arg2[%c49] : memref<144xf32, #tpu.memory_space<smem>>
    %c50 = arith.constant 50 : index
    %649 = memref.load %arg2[%c50] : memref<144xf32, #tpu.memory_space<smem>>
    %c51 = arith.constant 51 : index
    %650 = memref.load %arg2[%c51] : memref<144xf32, #tpu.memory_space<smem>>
    %c52 = arith.constant 52 : index
    %651 = memref.load %arg2[%c52] : memref<144xf32, #tpu.memory_space<smem>>
    %c53 = arith.constant 53 : index
    %652 = memref.load %arg2[%c53] : memref<144xf32, #tpu.memory_space<smem>>
    %653 = vector.broadcast %644 : f32 to vector<8x224xf32>
    %654 = arith.mulf %3, %653 : vector<8x224xf32>
    %655 = vector.broadcast %645 : f32 to vector<8x224xf32>
    %656 = arith.mulf %5, %655 : vector<8x224xf32>
    %657 = arith.addf %654, %656 : vector<8x224xf32>
    %658 = vector.broadcast %646 : f32 to vector<8x224xf32>
    %659 = arith.mulf %7, %658 : vector<8x224xf32>
    %660 = arith.addf %657, %659 : vector<8x224xf32>
    %661 = vector.broadcast %647 : f32 to vector<8x224xf32>
    %662 = arith.mulf %11, %661 : vector<8x224xf32>
    %663 = arith.addf %660, %662 : vector<8x224xf32>
    %664 = vector.broadcast %648 : f32 to vector<8x224xf32>
    %665 = arith.mulf %13, %664 : vector<8x224xf32>
    %666 = arith.addf %663, %665 : vector<8x224xf32>
    %667 = vector.broadcast %649 : f32 to vector<8x224xf32>
    %668 = arith.mulf %15, %667 : vector<8x224xf32>
    %669 = arith.addf %666, %668 : vector<8x224xf32>
    %670 = vector.broadcast %650 : f32 to vector<8x224xf32>
    %671 = arith.mulf %19, %670 : vector<8x224xf32>
    %672 = arith.addf %669, %671 : vector<8x224xf32>
    %673 = vector.broadcast %651 : f32 to vector<8x224xf32>
    %674 = arith.mulf %21, %673 : vector<8x224xf32>
    %675 = arith.addf %672, %674 : vector<8x224xf32>
    %676 = vector.broadcast %652 : f32 to vector<8x224xf32>
    %677 = arith.mulf %23, %676 : vector<8x224xf32>
    %678 = arith.addf %675, %677 : vector<8x224xf32>
    %679 = vector.broadcast %644 : f32 to vector<8x224xf32>
    %680 = arith.mulf %5, %679 : vector<8x224xf32>
    %681 = vector.broadcast %645 : f32 to vector<8x224xf32>
    %682 = arith.mulf %7, %681 : vector<8x224xf32>
    %683 = arith.addf %680, %682 : vector<8x224xf32>
    %684 = vector.broadcast %646 : f32 to vector<8x224xf32>
    %685 = arith.mulf %9, %684 : vector<8x224xf32>
    %686 = arith.addf %683, %685 : vector<8x224xf32>
    %687 = vector.broadcast %647 : f32 to vector<8x224xf32>
    %688 = arith.mulf %13, %687 : vector<8x224xf32>
    %689 = arith.addf %686, %688 : vector<8x224xf32>
    %690 = vector.broadcast %648 : f32 to vector<8x224xf32>
    %691 = arith.mulf %15, %690 : vector<8x224xf32>
    %692 = arith.addf %689, %691 : vector<8x224xf32>
    %693 = vector.broadcast %649 : f32 to vector<8x224xf32>
    %694 = arith.mulf %17, %693 : vector<8x224xf32>
    %695 = arith.addf %692, %694 : vector<8x224xf32>
    %696 = vector.broadcast %650 : f32 to vector<8x224xf32>
    %697 = arith.mulf %21, %696 : vector<8x224xf32>
    %698 = arith.addf %695, %697 : vector<8x224xf32>
    %699 = vector.broadcast %651 : f32 to vector<8x224xf32>
    %700 = arith.mulf %23, %699 : vector<8x224xf32>
    %701 = arith.addf %698, %700 : vector<8x224xf32>
    %702 = vector.broadcast %652 : f32 to vector<8x224xf32>
    %703 = arith.mulf %25, %702 : vector<8x224xf32>
    %704 = arith.addf %701, %703 : vector<8x224xf32>
    %705 = arith.maximumf %678, %704 : vector<8x224xf32>
    %706 = vector.broadcast %644 : f32 to vector<8x224xf32>
    %707 = arith.mulf %11, %706 : vector<8x224xf32>
    %708 = vector.broadcast %645 : f32 to vector<8x224xf32>
    %709 = arith.mulf %13, %708 : vector<8x224xf32>
    %710 = arith.addf %707, %709 : vector<8x224xf32>
    %711 = vector.broadcast %646 : f32 to vector<8x224xf32>
    %712 = arith.mulf %15, %711 : vector<8x224xf32>
    %713 = arith.addf %710, %712 : vector<8x224xf32>
    %714 = vector.broadcast %647 : f32 to vector<8x224xf32>
    %715 = arith.mulf %19, %714 : vector<8x224xf32>
    %716 = arith.addf %713, %715 : vector<8x224xf32>
    %717 = vector.broadcast %648 : f32 to vector<8x224xf32>
    %718 = arith.mulf %21, %717 : vector<8x224xf32>
    %719 = arith.addf %716, %718 : vector<8x224xf32>
    %720 = vector.broadcast %649 : f32 to vector<8x224xf32>
    %721 = arith.mulf %23, %720 : vector<8x224xf32>
    %722 = arith.addf %719, %721 : vector<8x224xf32>
    %723 = vector.broadcast %650 : f32 to vector<8x224xf32>
    %724 = arith.mulf %27, %723 : vector<8x224xf32>
    %725 = arith.addf %722, %724 : vector<8x224xf32>
    %726 = vector.broadcast %651 : f32 to vector<8x224xf32>
    %727 = arith.mulf %29, %726 : vector<8x224xf32>
    %728 = arith.addf %725, %727 : vector<8x224xf32>
    %729 = vector.broadcast %652 : f32 to vector<8x224xf32>
    %730 = arith.mulf %31, %729 : vector<8x224xf32>
    %731 = arith.addf %728, %730 : vector<8x224xf32>
    %732 = arith.maximumf %705, %731 : vector<8x224xf32>
    %733 = vector.broadcast %644 : f32 to vector<8x224xf32>
    %734 = arith.mulf %13, %733 : vector<8x224xf32>
    %735 = vector.broadcast %645 : f32 to vector<8x224xf32>
    %736 = arith.mulf %15, %735 : vector<8x224xf32>
    %737 = arith.addf %734, %736 : vector<8x224xf32>
    %738 = vector.broadcast %646 : f32 to vector<8x224xf32>
    %739 = arith.mulf %17, %738 : vector<8x224xf32>
    %740 = arith.addf %737, %739 : vector<8x224xf32>
    %741 = vector.broadcast %647 : f32 to vector<8x224xf32>
    %742 = arith.mulf %21, %741 : vector<8x224xf32>
    %743 = arith.addf %740, %742 : vector<8x224xf32>
    %744 = vector.broadcast %648 : f32 to vector<8x224xf32>
    %745 = arith.mulf %23, %744 : vector<8x224xf32>
    %746 = arith.addf %743, %745 : vector<8x224xf32>
    %747 = vector.broadcast %649 : f32 to vector<8x224xf32>
    %748 = arith.mulf %25, %747 : vector<8x224xf32>
    %749 = arith.addf %746, %748 : vector<8x224xf32>
    %750 = vector.broadcast %650 : f32 to vector<8x224xf32>
    %751 = arith.mulf %29, %750 : vector<8x224xf32>
    %752 = arith.addf %749, %751 : vector<8x224xf32>
    %753 = vector.broadcast %651 : f32 to vector<8x224xf32>
    %754 = arith.mulf %31, %753 : vector<8x224xf32>
    %755 = arith.addf %752, %754 : vector<8x224xf32>
    %756 = vector.broadcast %652 : f32 to vector<8x224xf32>
    %757 = arith.mulf %33, %756 : vector<8x224xf32>
    %758 = arith.addf %755, %757 : vector<8x224xf32>
    %759 = arith.maximumf %732, %758 : vector<8x224xf32>
    %c5_66 = arith.constant 5 : index
    %760 = memref.load %arg3[%c5_66] : memref<16xf32, #tpu.memory_space<smem>>
    %761 = vector.broadcast %760 : f32 to vector<8x224xf32>
    %762 = arith.addf %759, %761 : vector<8x224xf32>
    %cst_67 = arith.constant 0.000000e+00 : f32
    %763 = vector.broadcast %cst_67 : f32 to vector<8x224xf32>
    %764 = arith.maximumf %762, %763 : vector<8x224xf32>
    %c0_68 = arith.constant 0 : index
    %c1280 = arith.constant 1280 : index
    %765 = vector.load %arg7[%c0_68, %c1280] : memref<8x4096xf32, #tpu.memory_space<vmem>>, vector<8x224xf32>
    tpu.vector_store %arg7[%c0_68, %c1280], %764 {strides = array<i32>} : memref<8x4096xf32, #tpu.memory_space<vmem>>, vector<8x224xf32>,
    %c54 = arith.constant 54 : index
    %766 = memref.load %arg2[%c54] : memref<144xf32, #tpu.memory_space<smem>>
    %c55 = arith.constant 55 : index
    %767 = memref.load %arg2[%c55] : memref<144xf32, #tpu.memory_space<smem>>
    %c56 = arith.constant 56 : index
    %768 = memref.load %arg2[%c56] : memref<144xf32, #tpu.memory_space<smem>>
    %c57 = arith.constant 57 : index
    %769 = memref.load %arg2[%c57] : memref<144xf32, #tpu.memory_space<smem>>
    %c58 = arith.constant 58 : index
    %770 = memref.load %arg2[%c58] : memref<144xf32, #tpu.memory_space<smem>>
    %c59 = arith.constant 59 : index
    %771 = memref.load %arg2[%c59] : memref<144xf32, #tpu.memory_space<smem>>
    %c60 = arith.constant 60 : index
    %772 = memref.load %arg2[%c60] : memref<144xf32, #tpu.memory_space<smem>>
    %c61 = arith.constant 61 : index
    %773 = memref.load %arg2[%c61] : memref<144xf32, #tpu.memory_space<smem>>
    %c62 = arith.constant 62 : index
    %774 = memref.load %arg2[%c62] : memref<144xf32, #tpu.memory_space<smem>>
    %775 = vector.broadcast %766 : f32 to vector<8x224xf32>
    %776 = arith.mulf %3, %775 : vector<8x224xf32>
    %777 = vector.broadcast %767 : f32 to vector<8x224xf32>
    %778 = arith.mulf %5, %777 : vector<8x224xf32>
    %779 = arith.addf %776, %778 : vector<8x224xf32>
    %780 = vector.broadcast %768 : f32 to vector<8x224xf32>
    %781 = arith.mulf %7, %780 : vector<8x224xf32>
    %782 = arith.addf %779, %781 : vector<8x224xf32>
    %783 = vector.broadcast %769 : f32 to vector<8x224xf32>
    %784 = arith.mulf %11, %783 : vector<8x224xf32>
    %785 = arith.addf %782, %784 : vector<8x224xf32>
    %786 = vector.broadcast %770 : f32 to vector<8x224xf32>
    %787 = arith.mulf %13, %786 : vector<8x224xf32>
    %788 = arith.addf %785, %787 : vector<8x224xf32>
    %789 = vector.broadcast %771 : f32 to vector<8x224xf32>
    %790 = arith.mulf %15, %789 : vector<8x224xf32>
    %791 = arith.addf %788, %790 : vector<8x224xf32>
    %792 = vector.broadcast %772 : f32 to vector<8x224xf32>
    %793 = arith.mulf %19, %792 : vector<8x224xf32>
    %794 = arith.addf %791, %793 : vector<8x224xf32>
    %795 = vector.broadcast %773 : f32 to vector<8x224xf32>
    %796 = arith.mulf %21, %795 : vector<8x224xf32>
    %797 = arith.addf %794, %796 : vector<8x224xf32>
    %798 = vector.broadcast %774 : f32 to vector<8x224xf32>
    %799 = arith.mulf %23, %798 : vector<8x224xf32>
    %800 = arith.addf %797, %799 : vector<8x224xf32>
    %801 = vector.broadcast %766 : f32 to vector<8x224xf32>
    %802 = arith.mulf %5, %801 : vector<8x224xf32>
    %803 = vector.broadcast %767 : f32 to vector<8x224xf32>
    %804 = arith.mulf %7, %803 : vector<8x224xf32>
    %805 = arith.addf %802, %804 : vector<8x224xf32>
    %806 = vector.broadcast %768 : f32 to vector<8x224xf32>
    %807 = arith.mulf %9, %806 : vector<8x224xf32>
    %808 = arith.addf %805, %807 : vector<8x224xf32>
    %809 = vector.broadcast %769 : f32 to vector<8x224xf32>
    %810 = arith.mulf %13, %809 : vector<8x224xf32>
    %811 = arith.addf %808, %810 : vector<8x224xf32>
    %812 = vector.broadcast %770 : f32 to vector<8x224xf32>
    %813 = arith.mulf %15, %812 : vector<8x224xf32>
    %814 = arith.addf %811, %813 : vector<8x224xf32>
    %815 = vector.broadcast %771 : f32 to vector<8x224xf32>
    %816 = arith.mulf %17, %815 : vector<8x224xf32>
    %817 = arith.addf %814, %816 : vector<8x224xf32>
    %818 = vector.broadcast %772 : f32 to vector<8x224xf32>
    %819 = arith.mulf %21, %818 : vector<8x224xf32>
    %820 = arith.addf %817, %819 : vector<8x224xf32>
    %821 = vector.broadcast %773 : f32 to vector<8x224xf32>
    %822 = arith.mulf %23, %821 : vector<8x224xf32>
    %823 = arith.addf %820, %822 : vector<8x224xf32>
    %824 = vector.broadcast %774 : f32 to vector<8x224xf32>
    %825 = arith.mulf %25, %824 : vector<8x224xf32>
    %826 = arith.addf %823, %825 : vector<8x224xf32>
    %827 = arith.maximumf %800, %826 : vector<8x224xf32>
    %828 = vector.broadcast %766 : f32 to vector<8x224xf32>
    %829 = arith.mulf %11, %828 : vector<8x224xf32>
    %830 = vector.broadcast %767 : f32 to vector<8x224xf32>
    %831 = arith.mulf %13, %830 : vector<8x224xf32>
    %832 = arith.addf %829, %831 : vector<8x224xf32>
    %833 = vector.broadcast %768 : f32 to vector<8x224xf32>
    %834 = arith.mulf %15, %833 : vector<8x224xf32>
    %835 = arith.addf %832, %834 : vector<8x224xf32>
    %836 = vector.broadcast %769 : f32 to vector<8x224xf32>
    %837 = arith.mulf %19, %836 : vector<8x224xf32>
    %838 = arith.addf %835, %837 : vector<8x224xf32>
    %839 = vector.broadcast %770 : f32 to vector<8x224xf32>
    %840 = arith.mulf %21, %839 : vector<8x224xf32>
    %841 = arith.addf %838, %840 : vector<8x224xf32>
    %842 = vector.broadcast %771 : f32 to vector<8x224xf32>
    %843 = arith.mulf %23, %842 : vector<8x224xf32>
    %844 = arith.addf %841, %843 : vector<8x224xf32>
    %845 = vector.broadcast %772 : f32 to vector<8x224xf32>
    %846 = arith.mulf %27, %845 : vector<8x224xf32>
    %847 = arith.addf %844, %846 : vector<8x224xf32>
    %848 = vector.broadcast %773 : f32 to vector<8x224xf32>
    %849 = arith.mulf %29, %848 : vector<8x224xf32>
    %850 = arith.addf %847, %849 : vector<8x224xf32>
    %851 = vector.broadcast %774 : f32 to vector<8x224xf32>
    %852 = arith.mulf %31, %851 : vector<8x224xf32>
    %853 = arith.addf %850, %852 : vector<8x224xf32>
    %854 = arith.maximumf %827, %853 : vector<8x224xf32>
    %855 = vector.broadcast %766 : f32 to vector<8x224xf32>
    %856 = arith.mulf %13, %855 : vector<8x224xf32>
    %857 = vector.broadcast %767 : f32 to vector<8x224xf32>
    %858 = arith.mulf %15, %857 : vector<8x224xf32>
    %859 = arith.addf %856, %858 : vector<8x224xf32>
    %860 = vector.broadcast %768 : f32 to vector<8x224xf32>
    %861 = arith.mulf %17, %860 : vector<8x224xf32>
    %862 = arith.addf %859, %861 : vector<8x224xf32>
    %863 = vector.broadcast %769 : f32 to vector<8x224xf32>
    %864 = arith.mulf %21, %863 : vector<8x224xf32>
    %865 = arith.addf %862, %864 : vector<8x224xf32>
    %866 = vector.broadcast %770 : f32 to vector<8x224xf32>
    %867 = arith.mulf %23, %866 : vector<8x224xf32>
    %868 = arith.addf %865, %867 : vector<8x224xf32>
    %869 = vector.broadcast %771 : f32 to vector<8x224xf32>
    %870 = arith.mulf %25, %869 : vector<8x224xf32>
    %871 = arith.addf %868, %870 : vector<8x224xf32>
    %872 = vector.broadcast %772 : f32 to vector<8x224xf32>
    %873 = arith.mulf %29, %872 : vector<8x224xf32>
    %874 = arith.addf %871, %873 : vector<8x224xf32>
    %875 = vector.broadcast %773 : f32 to vector<8x224xf32>
    %876 = arith.mulf %31, %875 : vector<8x224xf32>
    %877 = arith.addf %874, %876 : vector<8x224xf32>
    %878 = vector.broadcast %774 : f32 to vector<8x224xf32>
    %879 = arith.mulf %33, %878 : vector<8x224xf32>
    %880 = arith.addf %877, %879 : vector<8x224xf32>
    %881 = arith.maximumf %854, %880 : vector<8x224xf32>
    %c6_69 = arith.constant 6 : index
    %882 = memref.load %arg3[%c6_69] : memref<16xf32, #tpu.memory_space<smem>>
    %883 = vector.broadcast %882 : f32 to vector<8x224xf32>
    %884 = arith.addf %881, %883 : vector<8x224xf32>
    %cst_70 = arith.constant 0.000000e+00 : f32
    %885 = vector.broadcast %cst_70 : f32 to vector<8x224xf32>
    %886 = arith.maximumf %884, %885 : vector<8x224xf32>
    %c0_71 = arith.constant 0 : index
    %c1536 = arith.constant 1536 : index
    %887 = vector.load %arg7[%c0_71, %c1536] : memref<8x4096xf32, #tpu.memory_space<vmem>>, vector<8x224xf32>
    tpu.vector_store %arg7[%c0_71, %c1536], %886 {strides = array<i32>} : memref<8x4096xf32, #tpu.memory_space<vmem>>, vector<8x224xf32>,
    %c63 = arith.constant 63 : index
    %888 = memref.load %arg2[%c63] : memref<144xf32, #tpu.memory_space<smem>>
    %c64 = arith.constant 64 : index
    %889 = memref.load %arg2[%c64] : memref<144xf32, #tpu.memory_space<smem>>
    %c65 = arith.constant 65 : index
    %890 = memref.load %arg2[%c65] : memref<144xf32, #tpu.memory_space<smem>>
    %c66 = arith.constant 66 : index
    %891 = memref.load %arg2[%c66] : memref<144xf32, #tpu.memory_space<smem>>
    %c67 = arith.constant 67 : index
    %892 = memref.load %arg2[%c67] : memref<144xf32, #tpu.memory_space<smem>>
    %c68 = arith.constant 68 : index
    %893 = memref.load %arg2[%c68] : memref<144xf32, #tpu.memory_space<smem>>
    %c69 = arith.constant 69 : index
    %894 = memref.load %arg2[%c69] : memref<144xf32, #tpu.memory_space<smem>>
    %c70 = arith.constant 70 : index
    %895 = memref.load %arg2[%c70] : memref<144xf32, #tpu.memory_space<smem>>
    %c71 = arith.constant 71 : index
    %896 = memref.load %arg2[%c71] : memref<144xf32, #tpu.memory_space<smem>>
    %897 = vector.broadcast %888 : f32 to vector<8x224xf32>
    %898 = arith.mulf %3, %897 : vector<8x224xf32>
    %899 = vector.broadcast %889 : f32 to vector<8x224xf32>
    %900 = arith.mulf %5, %899 : vector<8x224xf32>
    %901 = arith.addf %898, %900 : vector<8x224xf32>
    %902 = vector.broadcast %890 : f32 to vector<8x224xf32>
    %903 = arith.mulf %7, %902 : vector<8x224xf32>
    %904 = arith.addf %901, %903 : vector<8x224xf32>
    %905 = vector.broadcast %891 : f32 to vector<8x224xf32>
    %906 = arith.mulf %11, %905 : vector<8x224xf32>
    %907 = arith.addf %904, %906 : vector<8x224xf32>
    %908 = vector.broadcast %892 : f32 to vector<8x224xf32>
    %909 = arith.mulf %13, %908 : vector<8x224xf32>
    %910 = arith.addf %907, %909 : vector<8x224xf32>
    %911 = vector.broadcast %893 : f32 to vector<8x224xf32>
    %912 = arith.mulf %15, %911 : vector<8x224xf32>
    %913 = arith.addf %910, %912 : vector<8x224xf32>
    %914 = vector.broadcast %894 : f32 to vector<8x224xf32>
    %915 = arith.mulf %19, %914 : vector<8x224xf32>
    %916 = arith.addf %913, %915 : vector<8x224xf32>
    %917 = vector.broadcast %895 : f32 to vector<8x224xf32>
    %918 = arith.mulf %21, %917 : vector<8x224xf32>
    %919 = arith.addf %916, %918 : vector<8x224xf32>
    %920 = vector.broadcast %896 : f32 to vector<8x224xf32>
    %921 = arith.mulf %23, %920 : vector<8x224xf32>
    %922 = arith.addf %919, %921 : vector<8x224xf32>
    %923 = vector.broadcast %888 : f32 to vector<8x224xf32>
    %924 = arith.mulf %5, %923 : vector<8x224xf32>
    %925 = vector.broadcast %889 : f32 to vector<8x224xf32>
    %926 = arith.mulf %7, %925 : vector<8x224xf32>
    %927 = arith.addf %924, %926 : vector<8x224xf32>
    %928 = vector.broadcast %890 : f32 to vector<8x224xf32>
    %929 = arith.mulf %9, %928 : vector<8x224xf32>
    %930 = arith.addf %927, %929 : vector<8x224xf32>
    %931 = vector.broadcast %891 : f32 to vector<8x224xf32>
    %932 = arith.mulf %13, %931 : vector<8x224xf32>
    %933 = arith.addf %930, %932 : vector<8x224xf32>
    %934 = vector.broadcast %892 : f32 to vector<8x224xf32>
    %935 = arith.mulf %15, %934 : vector<8x224xf32>
    %936 = arith.addf %933, %935 : vector<8x224xf32>
    %937 = vector.broadcast %893 : f32 to vector<8x224xf32>
    %938 = arith.mulf %17, %937 : vector<8x224xf32>
    %939 = arith.addf %936, %938 : vector<8x224xf32>
    %940 = vector.broadcast %894 : f32 to vector<8x224xf32>
    %941 = arith.mulf %21, %940 : vector<8x224xf32>
    %942 = arith.addf %939, %941 : vector<8x224xf32>
    %943 = vector.broadcast %895 : f32 to vector<8x224xf32>
    %944 = arith.mulf %23, %943 : vector<8x224xf32>
    %945 = arith.addf %942, %944 : vector<8x224xf32>
    %946 = vector.broadcast %896 : f32 to vector<8x224xf32>
    %947 = arith.mulf %25, %946 : vector<8x224xf32>
    %948 = arith.addf %945, %947 : vector<8x224xf32>
    %949 = arith.maximumf %922, %948 : vector<8x224xf32>
    %950 = vector.broadcast %888 : f32 to vector<8x224xf32>
    %951 = arith.mulf %11, %950 : vector<8x224xf32>
    %952 = vector.broadcast %889 : f32 to vector<8x224xf32>
    %953 = arith.mulf %13, %952 : vector<8x224xf32>
    %954 = arith.addf %951, %953 : vector<8x224xf32>
    %955 = vector.broadcast %890 : f32 to vector<8x224xf32>
    %956 = arith.mulf %15, %955 : vector<8x224xf32>
    %957 = arith.addf %954, %956 : vector<8x224xf32>
    %958 = vector.broadcast %891 : f32 to vector<8x224xf32>
    %959 = arith.mulf %19, %958 : vector<8x224xf32>
    %960 = arith.addf %957, %959 : vector<8x224xf32>
    %961 = vector.broadcast %892 : f32 to vector<8x224xf32>
    %962 = arith.mulf %21, %961 : vector<8x224xf32>
    %963 = arith.addf %960, %962 : vector<8x224xf32>
    %964 = vector.broadcast %893 : f32 to vector<8x224xf32>
    %965 = arith.mulf %23, %964 : vector<8x224xf32>
    %966 = arith.addf %963, %965 : vector<8x224xf32>
    %967 = vector.broadcast %894 : f32 to vector<8x224xf32>
    %968 = arith.mulf %27, %967 : vector<8x224xf32>
    %969 = arith.addf %966, %968 : vector<8x224xf32>
    %970 = vector.broadcast %895 : f32 to vector<8x224xf32>
    %971 = arith.mulf %29, %970 : vector<8x224xf32>
    %972 = arith.addf %969, %971 : vector<8x224xf32>
    %973 = vector.broadcast %896 : f32 to vector<8x224xf32>
    %974 = arith.mulf %31, %973 : vector<8x224xf32>
    %975 = arith.addf %972, %974 : vector<8x224xf32>
    %976 = arith.maximumf %949, %975 : vector<8x224xf32>
    %977 = vector.broadcast %888 : f32 to vector<8x224xf32>
    %978 = arith.mulf %13, %977 : vector<8x224xf32>
    %979 = vector.broadcast %889 : f32 to vector<8x224xf32>
    %980 = arith.mulf %15, %979 : vector<8x224xf32>
    %981 = arith.addf %978, %980 : vector<8x224xf32>
    %982 = vector.broadcast %890 : f32 to vector<8x224xf32>
    %983 = arith.mulf %17, %982 : vector<8x224xf32>
    %984 = arith.addf %981, %983 : vector<8x224xf32>
    %985 = vector.broadcast %891 : f32 to vector<8x224xf32>
    %986 = arith.mulf %21, %985 : vector<8x224xf32>
    %987 = arith.addf %984, %986 : vector<8x224xf32>
    %988 = vector.broadcast %892 : f32 to vector<8x224xf32>
    %989 = arith.mulf %23, %988 : vector<8x224xf32>
    %990 = arith.addf %987, %989 : vector<8x224xf32>
    %991 = vector.broadcast %893 : f32 to vector<8x224xf32>
    %992 = arith.mulf %25, %991 : vector<8x224xf32>
    %993 = arith.addf %990, %992 : vector<8x224xf32>
    %994 = vector.broadcast %894 : f32 to vector<8x224xf32>
    %995 = arith.mulf %29, %994 : vector<8x224xf32>
    %996 = arith.addf %993, %995 : vector<8x224xf32>
    %997 = vector.broadcast %895 : f32 to vector<8x224xf32>
    %998 = arith.mulf %31, %997 : vector<8x224xf32>
    %999 = arith.addf %996, %998 : vector<8x224xf32>
    %1000 = vector.broadcast %896 : f32 to vector<8x224xf32>
    %1001 = arith.mulf %33, %1000 : vector<8x224xf32>
    %1002 = arith.addf %999, %1001 : vector<8x224xf32>
    %1003 = arith.maximumf %976, %1002 : vector<8x224xf32>
    %c7_72 = arith.constant 7 : index
    %1004 = memref.load %arg3[%c7_72] : memref<16xf32, #tpu.memory_space<smem>>
    %1005 = vector.broadcast %1004 : f32 to vector<8x224xf32>
    %1006 = arith.addf %1003, %1005 : vector<8x224xf32>
    %cst_73 = arith.constant 0.000000e+00 : f32
    %1007 = vector.broadcast %cst_73 : f32 to vector<8x224xf32>
    %1008 = arith.maximumf %1006, %1007 : vector<8x224xf32>
    %c0_74 = arith.constant 0 : index
    %c1792 = arith.constant 1792 : index
    %1009 = vector.load %arg7[%c0_74, %c1792] : memref<8x4096xf32, #tpu.memory_space<vmem>>, vector<8x224xf32>
    tpu.vector_store %arg7[%c0_74, %c1792], %1008 {strides = array<i32>} : memref<8x4096xf32, #tpu.memory_space<vmem>>, vector<8x224xf32>,
    %c72 = arith.constant 72 : index
    %1010 = memref.load %arg2[%c72] : memref<144xf32, #tpu.memory_space<smem>>
    %c73 = arith.constant 73 : index
    %1011 = memref.load %arg2[%c73] : memref<144xf32, #tpu.memory_space<smem>>
    %c74 = arith.constant 74 : index
    %1012 = memref.load %arg2[%c74] : memref<144xf32, #tpu.memory_space<smem>>
    %c75 = arith.constant 75 : index
    %1013 = memref.load %arg2[%c75] : memref<144xf32, #tpu.memory_space<smem>>
    %c76 = arith.constant 76 : index
    %1014 = memref.load %arg2[%c76] : memref<144xf32, #tpu.memory_space<smem>>
    %c77 = arith.constant 77 : index
    %1015 = memref.load %arg2[%c77] : memref<144xf32, #tpu.memory_space<smem>>
    %c78 = arith.constant 78 : index
    %1016 = memref.load %arg2[%c78] : memref<144xf32, #tpu.memory_space<smem>>
    %c79 = arith.constant 79 : index
    %1017 = memref.load %arg2[%c79] : memref<144xf32, #tpu.memory_space<smem>>
    %c80 = arith.constant 80 : index
    %1018 = memref.load %arg2[%c80] : memref<144xf32, #tpu.memory_space<smem>>
    %1019 = vector.broadcast %1010 : f32 to vector<8x224xf32>
    %1020 = arith.mulf %3, %1019 : vector<8x224xf32>
    %1021 = vector.broadcast %1011 : f32 to vector<8x224xf32>
    %1022 = arith.mulf %5, %1021 : vector<8x224xf32>
    %1023 = arith.addf %1020, %1022 : vector<8x224xf32>
    %1024 = vector.broadcast %1012 : f32 to vector<8x224xf32>
    %1025 = arith.mulf %7, %1024 : vector<8x224xf32>
    %1026 = arith.addf %1023, %1025 : vector<8x224xf32>
    %1027 = vector.broadcast %1013 : f32 to vector<8x224xf32>
    %1028 = arith.mulf %11, %1027 : vector<8x224xf32>
    %1029 = arith.addf %1026, %1028 : vector<8x224xf32>
    %1030 = vector.broadcast %1014 : f32 to vector<8x224xf32>
    %1031 = arith.mulf %13, %1030 : vector<8x224xf32>
    %1032 = arith.addf %1029, %1031 : vector<8x224xf32>
    %1033 = vector.broadcast %1015 : f32 to vector<8x224xf32>
    %1034 = arith.mulf %15, %1033 : vector<8x224xf32>
    %1035 = arith.addf %1032, %1034 : vector<8x224xf32>
    %1036 = vector.broadcast %1016 : f32 to vector<8x224xf32>
    %1037 = arith.mulf %19, %1036 : vector<8x224xf32>
    %1038 = arith.addf %1035, %1037 : vector<8x224xf32>
    %1039 = vector.broadcast %1017 : f32 to vector<8x224xf32>
    %1040 = arith.mulf %21, %1039 : vector<8x224xf32>
    %1041 = arith.addf %1038, %1040 : vector<8x224xf32>
    %1042 = vector.broadcast %1018 : f32 to vector<8x224xf32>
    %1043 = arith.mulf %23, %1042 : vector<8x224xf32>
    %1044 = arith.addf %1041, %1043 : vector<8x224xf32>
    %1045 = vector.broadcast %1010 : f32 to vector<8x224xf32>
    %1046 = arith.mulf %5, %1045 : vector<8x224xf32>
    %1047 = vector.broadcast %1011 : f32 to vector<8x224xf32>
    %1048 = arith.mulf %7, %1047 : vector<8x224xf32>
    %1049 = arith.addf %1046, %1048 : vector<8x224xf32>
    %1050 = vector.broadcast %1012 : f32 to vector<8x224xf32>
    %1051 = arith.mulf %9, %1050 : vector<8x224xf32>
    %1052 = arith.addf %1049, %1051 : vector<8x224xf32>
    %1053 = vector.broadcast %1013 : f32 to vector<8x224xf32>
    %1054 = arith.mulf %13, %1053 : vector<8x224xf32>
    %1055 = arith.addf %1052, %1054 : vector<8x224xf32>
    %1056 = vector.broadcast %1014 : f32 to vector<8x224xf32>
    %1057 = arith.mulf %15, %1056 : vector<8x224xf32>
    %1058 = arith.addf %1055, %1057 : vector<8x224xf32>
    %1059 = vector.broadcast %1015 : f32 to vector<8x224xf32>
    %1060 = arith.mulf %17, %1059 : vector<8x224xf32>
    %1061 = arith.addf %1058, %1060 : vector<8x224xf32>
    %1062 = vector.broadcast %1016 : f32 to vector<8x224xf32>
    %1063 = arith.mulf %21, %1062 : vector<8x224xf32>
    %1064 = arith.addf %1061, %1063 : vector<8x224xf32>
    %1065 = vector.broadcast %1017 : f32 to vector<8x224xf32>
    %1066 = arith.mulf %23, %1065 : vector<8x224xf32>
    %1067 = arith.addf %1064, %1066 : vector<8x224xf32>
    %1068 = vector.broadcast %1018 : f32 to vector<8x224xf32>
    %1069 = arith.mulf %25, %1068 : vector<8x224xf32>
    %1070 = arith.addf %1067, %1069 : vector<8x224xf32>
    %1071 = arith.maximumf %1044, %1070 : vector<8x224xf32>
    %1072 = vector.broadcast %1010 : f32 to vector<8x224xf32>
    %1073 = arith.mulf %11, %1072 : vector<8x224xf32>
    %1074 = vector.broadcast %1011 : f32 to vector<8x224xf32>
    %1075 = arith.mulf %13, %1074 : vector<8x224xf32>
    %1076 = arith.addf %1073, %1075 : vector<8x224xf32>
    %1077 = vector.broadcast %1012 : f32 to vector<8x224xf32>
    %1078 = arith.mulf %15, %1077 : vector<8x224xf32>
    %1079 = arith.addf %1076, %1078 : vector<8x224xf32>
    %1080 = vector.broadcast %1013 : f32 to vector<8x224xf32>
    %1081 = arith.mulf %19, %1080 : vector<8x224xf32>
    %1082 = arith.addf %1079, %1081 : vector<8x224xf32>
    %1083 = vector.broadcast %1014 : f32 to vector<8x224xf32>
    %1084 = arith.mulf %21, %1083 : vector<8x224xf32>
    %1085 = arith.addf %1082, %1084 : vector<8x224xf32>
    %1086 = vector.broadcast %1015 : f32 to vector<8x224xf32>
    %1087 = arith.mulf %23, %1086 : vector<8x224xf32>
    %1088 = arith.addf %1085, %1087 : vector<8x224xf32>
    %1089 = vector.broadcast %1016 : f32 to vector<8x224xf32>
    %1090 = arith.mulf %27, %1089 : vector<8x224xf32>
    %1091 = arith.addf %1088, %1090 : vector<8x224xf32>
    %1092 = vector.broadcast %1017 : f32 to vector<8x224xf32>
    %1093 = arith.mulf %29, %1092 : vector<8x224xf32>
    %1094 = arith.addf %1091, %1093 : vector<8x224xf32>
    %1095 = vector.broadcast %1018 : f32 to vector<8x224xf32>
    %1096 = arith.mulf %31, %1095 : vector<8x224xf32>
    %1097 = arith.addf %1094, %1096 : vector<8x224xf32>
    %1098 = arith.maximumf %1071, %1097 : vector<8x224xf32>
    %1099 = vector.broadcast %1010 : f32 to vector<8x224xf32>
    %1100 = arith.mulf %13, %1099 : vector<8x224xf32>
    %1101 = vector.broadcast %1011 : f32 to vector<8x224xf32>
    %1102 = arith.mulf %15, %1101 : vector<8x224xf32>
    %1103 = arith.addf %1100, %1102 : vector<8x224xf32>
    %1104 = vector.broadcast %1012 : f32 to vector<8x224xf32>
    %1105 = arith.mulf %17, %1104 : vector<8x224xf32>
    %1106 = arith.addf %1103, %1105 : vector<8x224xf32>
    %1107 = vector.broadcast %1013 : f32 to vector<8x224xf32>
    %1108 = arith.mulf %21, %1107 : vector<8x224xf32>
    %1109 = arith.addf %1106, %1108 : vector<8x224xf32>
    %1110 = vector.broadcast %1014 : f32 to vector<8x224xf32>
    %1111 = arith.mulf %23, %1110 : vector<8x224xf32>
    %1112 = arith.addf %1109, %1111 : vector<8x224xf32>
    %1113 = vector.broadcast %1015 : f32 to vector<8x224xf32>
    %1114 = arith.mulf %25, %1113 : vector<8x224xf32>
    %1115 = arith.addf %1112, %1114 : vector<8x224xf32>
    %1116 = vector.broadcast %1016 : f32 to vector<8x224xf32>
    %1117 = arith.mulf %29, %1116 : vector<8x224xf32>
    %1118 = arith.addf %1115, %1117 : vector<8x224xf32>
    %1119 = vector.broadcast %1017 : f32 to vector<8x224xf32>
    %1120 = arith.mulf %31, %1119 : vector<8x224xf32>
    %1121 = arith.addf %1118, %1120 : vector<8x224xf32>
    %1122 = vector.broadcast %1018 : f32 to vector<8x224xf32>
    %1123 = arith.mulf %33, %1122 : vector<8x224xf32>
    %1124 = arith.addf %1121, %1123 : vector<8x224xf32>
    %1125 = arith.maximumf %1098, %1124 : vector<8x224xf32>
    %c8_75 = arith.constant 8 : index
    %1126 = memref.load %arg3[%c8_75] : memref<16xf32, #tpu.memory_space<smem>>
    %1127 = vector.broadcast %1126 : f32 to vector<8x224xf32>
    %1128 = arith.addf %1125, %1127 : vector<8x224xf32>
    %cst_76 = arith.constant 0.000000e+00 : f32
    %1129 = vector.broadcast %cst_76 : f32 to vector<8x224xf32>
    %1130 = arith.maximumf %1128, %1129 : vector<8x224xf32>
    %c0_77 = arith.constant 0 : index
    %c2048 = arith.constant 2048 : index
    %1131 = vector.load %arg7[%c0_77, %c2048] : memref<8x4096xf32, #tpu.memory_space<vmem>>, vector<8x224xf32>
    tpu.vector_store %arg7[%c0_77, %c2048], %1130 {strides = array<i32>} : memref<8x4096xf32, #tpu.memory_space<vmem>>, vector<8x224xf32>,
    %c81 = arith.constant 81 : index
    %1132 = memref.load %arg2[%c81] : memref<144xf32, #tpu.memory_space<smem>>
    %c82 = arith.constant 82 : index
    %1133 = memref.load %arg2[%c82] : memref<144xf32, #tpu.memory_space<smem>>
    %c83 = arith.constant 83 : index
    %1134 = memref.load %arg2[%c83] : memref<144xf32, #tpu.memory_space<smem>>
    %c84 = arith.constant 84 : index
    %1135 = memref.load %arg2[%c84] : memref<144xf32, #tpu.memory_space<smem>>
    %c85 = arith.constant 85 : index
    %1136 = memref.load %arg2[%c85] : memref<144xf32, #tpu.memory_space<smem>>
    %c86 = arith.constant 86 : index
    %1137 = memref.load %arg2[%c86] : memref<144xf32, #tpu.memory_space<smem>>
    %c87 = arith.constant 87 : index
    %1138 = memref.load %arg2[%c87] : memref<144xf32, #tpu.memory_space<smem>>
    %c88 = arith.constant 88 : index
    %1139 = memref.load %arg2[%c88] : memref<144xf32, #tpu.memory_space<smem>>
    %c89 = arith.constant 89 : index
    %1140 = memref.load %arg2[%c89] : memref<144xf32, #tpu.memory_space<smem>>
    %1141 = vector.broadcast %1132 : f32 to vector<8x224xf32>
    %1142 = arith.mulf %3, %1141 : vector<8x224xf32>
    %1143 = vector.broadcast %1133 : f32 to vector<8x224xf32>
    %1144 = arith.mulf %5, %1143 : vector<8x224xf32>
    %1145 = arith.addf %1142, %1144 : vector<8x224xf32>
    %1146 = vector.broadcast %1134 : f32 to vector<8x224xf32>
    %1147 = arith.mulf %7, %1146 : vector<8x224xf32>
    %1148 = arith.addf %1145, %1147 : vector<8x224xf32>
    %1149 = vector.broadcast %1135 : f32 to vector<8x224xf32>
    %1150 = arith.mulf %11, %1149 : vector<8x224xf32>
    %1151 = arith.addf %1148, %1150 : vector<8x224xf32>
    %1152 = vector.broadcast %1136 : f32 to vector<8x224xf32>
    %1153 = arith.mulf %13, %1152 : vector<8x224xf32>
    %1154 = arith.addf %1151, %1153 : vector<8x224xf32>
    %1155 = vector.broadcast %1137 : f32 to vector<8x224xf32>
    %1156 = arith.mulf %15, %1155 : vector<8x224xf32>
    %1157 = arith.addf %1154, %1156 : vector<8x224xf32>
    %1158 = vector.broadcast %1138 : f32 to vector<8x224xf32>
    %1159 = arith.mulf %19, %1158 : vector<8x224xf32>
    %1160 = arith.addf %1157, %1159 : vector<8x224xf32>
    %1161 = vector.broadcast %1139 : f32 to vector<8x224xf32>
    %1162 = arith.mulf %21, %1161 : vector<8x224xf32>
    %1163 = arith.addf %1160, %1162 : vector<8x224xf32>
    %1164 = vector.broadcast %1140 : f32 to vector<8x224xf32>
    %1165 = arith.mulf %23, %1164 : vector<8x224xf32>
    %1166 = arith.addf %1163, %1165 : vector<8x224xf32>
    %1167 = vector.broadcast %1132 : f32 to vector<8x224xf32>
    %1168 = arith.mulf %5, %1167 : vector<8x224xf32>
    %1169 = vector.broadcast %1133 : f32 to vector<8x224xf32>
    %1170 = arith.mulf %7, %1169 : vector<8x224xf32>
    %1171 = arith.addf %1168, %1170 : vector<8x224xf32>
    %1172 = vector.broadcast %1134 : f32 to vector<8x224xf32>
    %1173 = arith.mulf %9, %1172 : vector<8x224xf32>
    %1174 = arith.addf %1171, %1173 : vector<8x224xf32>
    %1175 = vector.broadcast %1135 : f32 to vector<8x224xf32>
    %1176 = arith.mulf %13, %1175 : vector<8x224xf32>
    %1177 = arith.addf %1174, %1176 : vector<8x224xf32>
    %1178 = vector.broadcast %1136 : f32 to vector<8x224xf32>
    %1179 = arith.mulf %15, %1178 : vector<8x224xf32>
    %1180 = arith.addf %1177, %1179 : vector<8x224xf32>
    %1181 = vector.broadcast %1137 : f32 to vector<8x224xf32>
    %1182 = arith.mulf %17, %1181 : vector<8x224xf32>
    %1183 = arith.addf %1180, %1182 : vector<8x224xf32>
    %1184 = vector.broadcast %1138 : f32 to vector<8x224xf32>
    %1185 = arith.mulf %21, %1184 : vector<8x224xf32>
    %1186 = arith.addf %1183, %1185 : vector<8x224xf32>
    %1187 = vector.broadcast %1139 : f32 to vector<8x224xf32>
    %1188 = arith.mulf %23, %1187 : vector<8x224xf32>
    %1189 = arith.addf %1186, %1188 : vector<8x224xf32>
    %1190 = vector.broadcast %1140 : f32 to vector<8x224xf32>
    %1191 = arith.mulf %25, %1190 : vector<8x224xf32>
    %1192 = arith.addf %1189, %1191 : vector<8x224xf32>
    %1193 = arith.maximumf %1166, %1192 : vector<8x224xf32>
    %1194 = vector.broadcast %1132 : f32 to vector<8x224xf32>
    %1195 = arith.mulf %11, %1194 : vector<8x224xf32>
    %1196 = vector.broadcast %1133 : f32 to vector<8x224xf32>
    %1197 = arith.mulf %13, %1196 : vector<8x224xf32>
    %1198 = arith.addf %1195, %1197 : vector<8x224xf32>
    %1199 = vector.broadcast %1134 : f32 to vector<8x224xf32>
    %1200 = arith.mulf %15, %1199 : vector<8x224xf32>
    %1201 = arith.addf %1198, %1200 : vector<8x224xf32>
    %1202 = vector.broadcast %1135 : f32 to vector<8x224xf32>
    %1203 = arith.mulf %19, %1202 : vector<8x224xf32>
    %1204 = arith.addf %1201, %1203 : vector<8x224xf32>
    %1205 = vector.broadcast %1136 : f32 to vector<8x224xf32>
    %1206 = arith.mulf %21, %1205 : vector<8x224xf32>
    %1207 = arith.addf %1204, %1206 : vector<8x224xf32>
    %1208 = vector.broadcast %1137 : f32 to vector<8x224xf32>
    %1209 = arith.mulf %23, %1208 : vector<8x224xf32>
    %1210 = arith.addf %1207, %1209 : vector<8x224xf32>
    %1211 = vector.broadcast %1138 : f32 to vector<8x224xf32>
    %1212 = arith.mulf %27, %1211 : vector<8x224xf32>
    %1213 = arith.addf %1210, %1212 : vector<8x224xf32>
    %1214 = vector.broadcast %1139 : f32 to vector<8x224xf32>
    %1215 = arith.mulf %29, %1214 : vector<8x224xf32>
    %1216 = arith.addf %1213, %1215 : vector<8x224xf32>
    %1217 = vector.broadcast %1140 : f32 to vector<8x224xf32>
    %1218 = arith.mulf %31, %1217 : vector<8x224xf32>
    %1219 = arith.addf %1216, %1218 : vector<8x224xf32>
    %1220 = arith.maximumf %1193, %1219 : vector<8x224xf32>
    %1221 = vector.broadcast %1132 : f32 to vector<8x224xf32>
    %1222 = arith.mulf %13, %1221 : vector<8x224xf32>
    %1223 = vector.broadcast %1133 : f32 to vector<8x224xf32>
    %1224 = arith.mulf %15, %1223 : vector<8x224xf32>
    %1225 = arith.addf %1222, %1224 : vector<8x224xf32>
    %1226 = vector.broadcast %1134 : f32 to vector<8x224xf32>
    %1227 = arith.mulf %17, %1226 : vector<8x224xf32>
    %1228 = arith.addf %1225, %1227 : vector<8x224xf32>
    %1229 = vector.broadcast %1135 : f32 to vector<8x224xf32>
    %1230 = arith.mulf %21, %1229 : vector<8x224xf32>
    %1231 = arith.addf %1228, %1230 : vector<8x224xf32>
    %1232 = vector.broadcast %1136 : f32 to vector<8x224xf32>
    %1233 = arith.mulf %23, %1232 : vector<8x224xf32>
    %1234 = arith.addf %1231, %1233 : vector<8x224xf32>
    %1235 = vector.broadcast %1137 : f32 to vector<8x224xf32>
    %1236 = arith.mulf %25, %1235 : vector<8x224xf32>
    %1237 = arith.addf %1234, %1236 : vector<8x224xf32>
    %1238 = vector.broadcast %1138 : f32 to vector<8x224xf32>
    %1239 = arith.mulf %29, %1238 : vector<8x224xf32>
    %1240 = arith.addf %1237, %1239 : vector<8x224xf32>
    %1241 = vector.broadcast %1139 : f32 to vector<8x224xf32>
    %1242 = arith.mulf %31, %1241 : vector<8x224xf32>
    %1243 = arith.addf %1240, %1242 : vector<8x224xf32>
    %1244 = vector.broadcast %1140 : f32 to vector<8x224xf32>
    %1245 = arith.mulf %33, %1244 : vector<8x224xf32>
    %1246 = arith.addf %1243, %1245 : vector<8x224xf32>
    %1247 = arith.maximumf %1220, %1246 : vector<8x224xf32>
    %c9_78 = arith.constant 9 : index
    %1248 = memref.load %arg3[%c9_78] : memref<16xf32, #tpu.memory_space<smem>>
    %1249 = vector.broadcast %1248 : f32 to vector<8x224xf32>
    %1250 = arith.addf %1247, %1249 : vector<8x224xf32>
    %cst_79 = arith.constant 0.000000e+00 : f32
    %1251 = vector.broadcast %cst_79 : f32 to vector<8x224xf32>
    %1252 = arith.maximumf %1250, %1251 : vector<8x224xf32>
    %c0_80 = arith.constant 0 : index
    %c2304 = arith.constant 2304 : index
    %1253 = vector.load %arg7[%c0_80, %c2304] : memref<8x4096xf32, #tpu.memory_space<vmem>>, vector<8x224xf32>
    tpu.vector_store %arg7[%c0_80, %c2304], %1252 {strides = array<i32>} : memref<8x4096xf32, #tpu.memory_space<vmem>>, vector<8x224xf32>,
    %c90 = arith.constant 90 : index
    %1254 = memref.load %arg2[%c90] : memref<144xf32, #tpu.memory_space<smem>>
    %c91 = arith.constant 91 : index
    %1255 = memref.load %arg2[%c91] : memref<144xf32, #tpu.memory_space<smem>>
    %c92 = arith.constant 92 : index
    %1256 = memref.load %arg2[%c92] : memref<144xf32, #tpu.memory_space<smem>>
    %c93 = arith.constant 93 : index
    %1257 = memref.load %arg2[%c93] : memref<144xf32, #tpu.memory_space<smem>>
    %c94 = arith.constant 94 : index
    %1258 = memref.load %arg2[%c94] : memref<144xf32, #tpu.memory_space<smem>>
    %c95 = arith.constant 95 : index
    %1259 = memref.load %arg2[%c95] : memref<144xf32, #tpu.memory_space<smem>>
    %c96 = arith.constant 96 : index
    %1260 = memref.load %arg2[%c96] : memref<144xf32, #tpu.memory_space<smem>>
    %c97 = arith.constant 97 : index
    %1261 = memref.load %arg2[%c97] : memref<144xf32, #tpu.memory_space<smem>>
    %c98 = arith.constant 98 : index
    %1262 = memref.load %arg2[%c98] : memref<144xf32, #tpu.memory_space<smem>>
    %1263 = vector.broadcast %1254 : f32 to vector<8x224xf32>
    %1264 = arith.mulf %3, %1263 : vector<8x224xf32>
    %1265 = vector.broadcast %1255 : f32 to vector<8x224xf32>
    %1266 = arith.mulf %5, %1265 : vector<8x224xf32>
    %1267 = arith.addf %1264, %1266 : vector<8x224xf32>
    %1268 = vector.broadcast %1256 : f32 to vector<8x224xf32>
    %1269 = arith.mulf %7, %1268 : vector<8x224xf32>
    %1270 = arith.addf %1267, %1269 : vector<8x224xf32>
    %1271 = vector.broadcast %1257 : f32 to vector<8x224xf32>
    %1272 = arith.mulf %11, %1271 : vector<8x224xf32>
    %1273 = arith.addf %1270, %1272 : vector<8x224xf32>
    %1274 = vector.broadcast %1258 : f32 to vector<8x224xf32>
    %1275 = arith.mulf %13, %1274 : vector<8x224xf32>
    %1276 = arith.addf %1273, %1275 : vector<8x224xf32>
    %1277 = vector.broadcast %1259 : f32 to vector<8x224xf32>
    %1278 = arith.mulf %15, %1277 : vector<8x224xf32>
    %1279 = arith.addf %1276, %1278 : vector<8x224xf32>
    %1280 = vector.broadcast %1260 : f32 to vector<8x224xf32>
    %1281 = arith.mulf %19, %1280 : vector<8x224xf32>
    %1282 = arith.addf %1279, %1281 : vector<8x224xf32>
    %1283 = vector.broadcast %1261 : f32 to vector<8x224xf32>
    %1284 = arith.mulf %21, %1283 : vector<8x224xf32>
    %1285 = arith.addf %1282, %1284 : vector<8x224xf32>
    %1286 = vector.broadcast %1262 : f32 to vector<8x224xf32>
    %1287 = arith.mulf %23, %1286 : vector<8x224xf32>
    %1288 = arith.addf %1285, %1287 : vector<8x224xf32>
    %1289 = vector.broadcast %1254 : f32 to vector<8x224xf32>
    %1290 = arith.mulf %5, %1289 : vector<8x224xf32>
    %1291 = vector.broadcast %1255 : f32 to vector<8x224xf32>
    %1292 = arith.mulf %7, %1291 : vector<8x224xf32>
    %1293 = arith.addf %1290, %1292 : vector<8x224xf32>
    %1294 = vector.broadcast %1256 : f32 to vector<8x224xf32>
    %1295 = arith.mulf %9, %1294 : vector<8x224xf32>
    %1296 = arith.addf %1293, %1295 : vector<8x224xf32>
    %1297 = vector.broadcast %1257 : f32 to vector<8x224xf32>
    %1298 = arith.mulf %13, %1297 : vector<8x224xf32>
    %1299 = arith.addf %1296, %1298 : vector<8x224xf32>
    %1300 = vector.broadcast %1258 : f32 to vector<8x224xf32>
    %1301 = arith.mulf %15, %1300 : vector<8x224xf32>
    %1302 = arith.addf %1299, %1301 : vector<8x224xf32>
    %1303 = vector.broadcast %1259 : f32 to vector<8x224xf32>
    %1304 = arith.mulf %17, %1303 : vector<8x224xf32>
    %1305 = arith.addf %1302, %1304 : vector<8x224xf32>
    %1306 = vector.broadcast %1260 : f32 to vector<8x224xf32>
    %1307 = arith.mulf %21, %1306 : vector<8x224xf32>
    %1308 = arith.addf %1305, %1307 : vector<8x224xf32>
    %1309 = vector.broadcast %1261 : f32 to vector<8x224xf32>
    %1310 = arith.mulf %23, %1309 : vector<8x224xf32>
    %1311 = arith.addf %1308, %1310 : vector<8x224xf32>
    %1312 = vector.broadcast %1262 : f32 to vector<8x224xf32>
    %1313 = arith.mulf %25, %1312 : vector<8x224xf32>
    %1314 = arith.addf %1311, %1313 : vector<8x224xf32>
    %1315 = arith.maximumf %1288, %1314 : vector<8x224xf32>
    %1316 = vector.broadcast %1254 : f32 to vector<8x224xf32>
    %1317 = arith.mulf %11, %1316 : vector<8x224xf32>
    %1318 = vector.broadcast %1255 : f32 to vector<8x224xf32>
    %1319 = arith.mulf %13, %1318 : vector<8x224xf32>
    %1320 = arith.addf %1317, %1319 : vector<8x224xf32>
    %1321 = vector.broadcast %1256 : f32 to vector<8x224xf32>
    %1322 = arith.mulf %15, %1321 : vector<8x224xf32>
    %1323 = arith.addf %1320, %1322 : vector<8x224xf32>
    %1324 = vector.broadcast %1257 : f32 to vector<8x224xf32>
    %1325 = arith.mulf %19, %1324 : vector<8x224xf32>
    %1326 = arith.addf %1323, %1325 : vector<8x224xf32>
    %1327 = vector.broadcast %1258 : f32 to vector<8x224xf32>
    %1328 = arith.mulf %21, %1327 : vector<8x224xf32>
    %1329 = arith.addf %1326, %1328 : vector<8x224xf32>
    %1330 = vector.broadcast %1259 : f32 to vector<8x224xf32>
    %1331 = arith.mulf %23, %1330 : vector<8x224xf32>
    %1332 = arith.addf %1329, %1331 : vector<8x224xf32>
    %1333 = vector.broadcast %1260 : f32 to vector<8x224xf32>
    %1334 = arith.mulf %27, %1333 : vector<8x224xf32>
    %1335 = arith.addf %1332, %1334 : vector<8x224xf32>
    %1336 = vector.broadcast %1261 : f32 to vector<8x224xf32>
    %1337 = arith.mulf %29, %1336 : vector<8x224xf32>
    %1338 = arith.addf %1335, %1337 : vector<8x224xf32>
    %1339 = vector.broadcast %1262 : f32 to vector<8x224xf32>
    %1340 = arith.mulf %31, %1339 : vector<8x224xf32>
    %1341 = arith.addf %1338, %1340 : vector<8x224xf32>
    %1342 = arith.maximumf %1315, %1341 : vector<8x224xf32>
    %1343 = vector.broadcast %1254 : f32 to vector<8x224xf32>
    %1344 = arith.mulf %13, %1343 : vector<8x224xf32>
    %1345 = vector.broadcast %1255 : f32 to vector<8x224xf32>
    %1346 = arith.mulf %15, %1345 : vector<8x224xf32>
    %1347 = arith.addf %1344, %1346 : vector<8x224xf32>
    %1348 = vector.broadcast %1256 : f32 to vector<8x224xf32>
    %1349 = arith.mulf %17, %1348 : vector<8x224xf32>
    %1350 = arith.addf %1347, %1349 : vector<8x224xf32>
    %1351 = vector.broadcast %1257 : f32 to vector<8x224xf32>
    %1352 = arith.mulf %21, %1351 : vector<8x224xf32>
    %1353 = arith.addf %1350, %1352 : vector<8x224xf32>
    %1354 = vector.broadcast %1258 : f32 to vector<8x224xf32>
    %1355 = arith.mulf %23, %1354 : vector<8x224xf32>
    %1356 = arith.addf %1353, %1355 : vector<8x224xf32>
    %1357 = vector.broadcast %1259 : f32 to vector<8x224xf32>
    %1358 = arith.mulf %25, %1357 : vector<8x224xf32>
    %1359 = arith.addf %1356, %1358 : vector<8x224xf32>
    %1360 = vector.broadcast %1260 : f32 to vector<8x224xf32>
    %1361 = arith.mulf %29, %1360 : vector<8x224xf32>
    %1362 = arith.addf %1359, %1361 : vector<8x224xf32>
    %1363 = vector.broadcast %1261 : f32 to vector<8x224xf32>
    %1364 = arith.mulf %31, %1363 : vector<8x224xf32>
    %1365 = arith.addf %1362, %1364 : vector<8x224xf32>
    %1366 = vector.broadcast %1262 : f32 to vector<8x224xf32>
    %1367 = arith.mulf %33, %1366 : vector<8x224xf32>
    %1368 = arith.addf %1365, %1367 : vector<8x224xf32>
    %1369 = arith.maximumf %1342, %1368 : vector<8x224xf32>
    %c10_81 = arith.constant 10 : index
    %1370 = memref.load %arg3[%c10_81] : memref<16xf32, #tpu.memory_space<smem>>
    %1371 = vector.broadcast %1370 : f32 to vector<8x224xf32>
    %1372 = arith.addf %1369, %1371 : vector<8x224xf32>
    %cst_82 = arith.constant 0.000000e+00 : f32
    %1373 = vector.broadcast %cst_82 : f32 to vector<8x224xf32>
    %1374 = arith.maximumf %1372, %1373 : vector<8x224xf32>
    %c0_83 = arith.constant 0 : index
    %c2560 = arith.constant 2560 : index
    %1375 = vector.load %arg7[%c0_83, %c2560] : memref<8x4096xf32, #tpu.memory_space<vmem>>, vector<8x224xf32>
    tpu.vector_store %arg7[%c0_83, %c2560], %1374 {strides = array<i32>} : memref<8x4096xf32, #tpu.memory_space<vmem>>, vector<8x224xf32>,
    %c99 = arith.constant 99 : index
    %1376 = memref.load %arg2[%c99] : memref<144xf32, #tpu.memory_space<smem>>
    %c100 = arith.constant 100 : index
    %1377 = memref.load %arg2[%c100] : memref<144xf32, #tpu.memory_space<smem>>
    %c101 = arith.constant 101 : index
    %1378 = memref.load %arg2[%c101] : memref<144xf32, #tpu.memory_space<smem>>
    %c102 = arith.constant 102 : index
    %1379 = memref.load %arg2[%c102] : memref<144xf32, #tpu.memory_space<smem>>
    %c103 = arith.constant 103 : index
    %1380 = memref.load %arg2[%c103] : memref<144xf32, #tpu.memory_space<smem>>
    %c104 = arith.constant 104 : index
    %1381 = memref.load %arg2[%c104] : memref<144xf32, #tpu.memory_space<smem>>
    %c105 = arith.constant 105 : index
    %1382 = memref.load %arg2[%c105] : memref<144xf32, #tpu.memory_space<smem>>
    %c106 = arith.constant 106 : index
    %1383 = memref.load %arg2[%c106] : memref<144xf32, #tpu.memory_space<smem>>
    %c107 = arith.constant 107 : index
    %1384 = memref.load %arg2[%c107] : memref<144xf32, #tpu.memory_space<smem>>
    %1385 = vector.broadcast %1376 : f32 to vector<8x224xf32>
    %1386 = arith.mulf %3, %1385 : vector<8x224xf32>
    %1387 = vector.broadcast %1377 : f32 to vector<8x224xf32>
    %1388 = arith.mulf %5, %1387 : vector<8x224xf32>
    %1389 = arith.addf %1386, %1388 : vector<8x224xf32>
    %1390 = vector.broadcast %1378 : f32 to vector<8x224xf32>
    %1391 = arith.mulf %7, %1390 : vector<8x224xf32>
    %1392 = arith.addf %1389, %1391 : vector<8x224xf32>
    %1393 = vector.broadcast %1379 : f32 to vector<8x224xf32>
    %1394 = arith.mulf %11, %1393 : vector<8x224xf32>
    %1395 = arith.addf %1392, %1394 : vector<8x224xf32>
    %1396 = vector.broadcast %1380 : f32 to vector<8x224xf32>
    %1397 = arith.mulf %13, %1396 : vector<8x224xf32>
    %1398 = arith.addf %1395, %1397 : vector<8x224xf32>
    %1399 = vector.broadcast %1381 : f32 to vector<8x224xf32>
    %1400 = arith.mulf %15, %1399 : vector<8x224xf32>
    %1401 = arith.addf %1398, %1400 : vector<8x224xf32>
    %1402 = vector.broadcast %1382 : f32 to vector<8x224xf32>
    %1403 = arith.mulf %19, %1402 : vector<8x224xf32>
    %1404 = arith.addf %1401, %1403 : vector<8x224xf32>
    %1405 = vector.broadcast %1383 : f32 to vector<8x224xf32>
    %1406 = arith.mulf %21, %1405 : vector<8x224xf32>
    %1407 = arith.addf %1404, %1406 : vector<8x224xf32>
    %1408 = vector.broadcast %1384 : f32 to vector<8x224xf32>
    %1409 = arith.mulf %23, %1408 : vector<8x224xf32>
    %1410 = arith.addf %1407, %1409 : vector<8x224xf32>
    %1411 = vector.broadcast %1376 : f32 to vector<8x224xf32>
    %1412 = arith.mulf %5, %1411 : vector<8x224xf32>
    %1413 = vector.broadcast %1377 : f32 to vector<8x224xf32>
    %1414 = arith.mulf %7, %1413 : vector<8x224xf32>
    %1415 = arith.addf %1412, %1414 : vector<8x224xf32>
    %1416 = vector.broadcast %1378 : f32 to vector<8x224xf32>
    %1417 = arith.mulf %9, %1416 : vector<8x224xf32>
    %1418 = arith.addf %1415, %1417 : vector<8x224xf32>
    %1419 = vector.broadcast %1379 : f32 to vector<8x224xf32>
    %1420 = arith.mulf %13, %1419 : vector<8x224xf32>
    %1421 = arith.addf %1418, %1420 : vector<8x224xf32>
    %1422 = vector.broadcast %1380 : f32 to vector<8x224xf32>
    %1423 = arith.mulf %15, %1422 : vector<8x224xf32>
    %1424 = arith.addf %1421, %1423 : vector<8x224xf32>
    %1425 = vector.broadcast %1381 : f32 to vector<8x224xf32>
    %1426 = arith.mulf %17, %1425 : vector<8x224xf32>
    %1427 = arith.addf %1424, %1426 : vector<8x224xf32>
    %1428 = vector.broadcast %1382 : f32 to vector<8x224xf32>
    %1429 = arith.mulf %21, %1428 : vector<8x224xf32>
    %1430 = arith.addf %1427, %1429 : vector<8x224xf32>
    %1431 = vector.broadcast %1383 : f32 to vector<8x224xf32>
    %1432 = arith.mulf %23, %1431 : vector<8x224xf32>
    %1433 = arith.addf %1430, %1432 : vector<8x224xf32>
    %1434 = vector.broadcast %1384 : f32 to vector<8x224xf32>
    %1435 = arith.mulf %25, %1434 : vector<8x224xf32>
    %1436 = arith.addf %1433, %1435 : vector<8x224xf32>
    %1437 = arith.maximumf %1410, %1436 : vector<8x224xf32>
    %1438 = vector.broadcast %1376 : f32 to vector<8x224xf32>
    %1439 = arith.mulf %11, %1438 : vector<8x224xf32>
    %1440 = vector.broadcast %1377 : f32 to vector<8x224xf32>
    %1441 = arith.mulf %13, %1440 : vector<8x224xf32>
    %1442 = arith.addf %1439, %1441 : vector<8x224xf32>
    %1443 = vector.broadcast %1378 : f32 to vector<8x224xf32>
    %1444 = arith.mulf %15, %1443 : vector<8x224xf32>
    %1445 = arith.addf %1442, %1444 : vector<8x224xf32>
    %1446 = vector.broadcast %1379 : f32 to vector<8x224xf32>
    %1447 = arith.mulf %19, %1446 : vector<8x224xf32>
    %1448 = arith.addf %1445, %1447 : vector<8x224xf32>
    %1449 = vector.broadcast %1380 : f32 to vector<8x224xf32>
    %1450 = arith.mulf %21, %1449 : vector<8x224xf32>
    %1451 = arith.addf %1448, %1450 : vector<8x224xf32>
    %1452 = vector.broadcast %1381 : f32 to vector<8x224xf32>
    %1453 = arith.mulf %23, %1452 : vector<8x224xf32>
    %1454 = arith.addf %1451, %1453 : vector<8x224xf32>
    %1455 = vector.broadcast %1382 : f32 to vector<8x224xf32>
    %1456 = arith.mulf %27, %1455 : vector<8x224xf32>
    %1457 = arith.addf %1454, %1456 : vector<8x224xf32>
    %1458 = vector.broadcast %1383 : f32 to vector<8x224xf32>
    %1459 = arith.mulf %29, %1458 : vector<8x224xf32>
    %1460 = arith.addf %1457, %1459 : vector<8x224xf32>
    %1461 = vector.broadcast %1384 : f32 to vector<8x224xf32>
    %1462 = arith.mulf %31, %1461 : vector<8x224xf32>
    %1463 = arith.addf %1460, %1462 : vector<8x224xf32>
    %1464 = arith.maximumf %1437, %1463 : vector<8x224xf32>
    %1465 = vector.broadcast %1376 : f32 to vector<8x224xf32>
    %1466 = arith.mulf %13, %1465 : vector<8x224xf32>
    %1467 = vector.broadcast %1377 : f32 to vector<8x224xf32>
    %1468 = arith.mulf %15, %1467 : vector<8x224xf32>
    %1469 = arith.addf %1466, %1468 : vector<8x224xf32>
    %1470 = vector.broadcast %1378 : f32 to vector<8x224xf32>
    %1471 = arith.mulf %17, %1470 : vector<8x224xf32>
    %1472 = arith.addf %1469, %1471 : vector<8x224xf32>
    %1473 = vector.broadcast %1379 : f32 to vector<8x224xf32>
    %1474 = arith.mulf %21, %1473 : vector<8x224xf32>
    %1475 = arith.addf %1472, %1474 : vector<8x224xf32>
    %1476 = vector.broadcast %1380 : f32 to vector<8x224xf32>
    %1477 = arith.mulf %23, %1476 : vector<8x224xf32>
    %1478 = arith.addf %1475, %1477 : vector<8x224xf32>
    %1479 = vector.broadcast %1381 : f32 to vector<8x224xf32>
    %1480 = arith.mulf %25, %1479 : vector<8x224xf32>
    %1481 = arith.addf %1478, %1480 : vector<8x224xf32>
    %1482 = vector.broadcast %1382 : f32 to vector<8x224xf32>
    %1483 = arith.mulf %29, %1482 : vector<8x224xf32>
    %1484 = arith.addf %1481, %1483 : vector<8x224xf32>
    %1485 = vector.broadcast %1383 : f32 to vector<8x224xf32>
    %1486 = arith.mulf %31, %1485 : vector<8x224xf32>
    %1487 = arith.addf %1484, %1486 : vector<8x224xf32>
    %1488 = vector.broadcast %1384 : f32 to vector<8x224xf32>
    %1489 = arith.mulf %33, %1488 : vector<8x224xf32>
    %1490 = arith.addf %1487, %1489 : vector<8x224xf32>
    %1491 = arith.maximumf %1464, %1490 : vector<8x224xf32>
    %c11_84 = arith.constant 11 : index
    %1492 = memref.load %arg3[%c11_84] : memref<16xf32, #tpu.memory_space<smem>>
    %1493 = vector.broadcast %1492 : f32 to vector<8x224xf32>
    %1494 = arith.addf %1491, %1493 : vector<8x224xf32>
    %cst_85 = arith.constant 0.000000e+00 : f32
    %1495 = vector.broadcast %cst_85 : f32 to vector<8x224xf32>
    %1496 = arith.maximumf %1494, %1495 : vector<8x224xf32>
    %c0_86 = arith.constant 0 : index
    %c2816 = arith.constant 2816 : index
    %1497 = vector.load %arg7[%c0_86, %c2816] : memref<8x4096xf32, #tpu.memory_space<vmem>>, vector<8x224xf32>
    tpu.vector_store %arg7[%c0_86, %c2816], %1496 {strides = array<i32>} : memref<8x4096xf32, #tpu.memory_space<vmem>>, vector<8x224xf32>,
    %c108 = arith.constant 108 : index
    %1498 = memref.load %arg2[%c108] : memref<144xf32, #tpu.memory_space<smem>>
    %c109 = arith.constant 109 : index
    %1499 = memref.load %arg2[%c109] : memref<144xf32, #tpu.memory_space<smem>>
    %c110 = arith.constant 110 : index
    %1500 = memref.load %arg2[%c110] : memref<144xf32, #tpu.memory_space<smem>>
    %c111 = arith.constant 111 : index
    %1501 = memref.load %arg2[%c111] : memref<144xf32, #tpu.memory_space<smem>>
    %c112 = arith.constant 112 : index
    %1502 = memref.load %arg2[%c112] : memref<144xf32, #tpu.memory_space<smem>>
    %c113 = arith.constant 113 : index
    %1503 = memref.load %arg2[%c113] : memref<144xf32, #tpu.memory_space<smem>>
    %c114 = arith.constant 114 : index
    %1504 = memref.load %arg2[%c114] : memref<144xf32, #tpu.memory_space<smem>>
    %c115 = arith.constant 115 : index
    %1505 = memref.load %arg2[%c115] : memref<144xf32, #tpu.memory_space<smem>>
    %c116 = arith.constant 116 : index
    %1506 = memref.load %arg2[%c116] : memref<144xf32, #tpu.memory_space<smem>>
    %1507 = vector.broadcast %1498 : f32 to vector<8x224xf32>
    %1508 = arith.mulf %3, %1507 : vector<8x224xf32>
    %1509 = vector.broadcast %1499 : f32 to vector<8x224xf32>
    %1510 = arith.mulf %5, %1509 : vector<8x224xf32>
    %1511 = arith.addf %1508, %1510 : vector<8x224xf32>
    %1512 = vector.broadcast %1500 : f32 to vector<8x224xf32>
    %1513 = arith.mulf %7, %1512 : vector<8x224xf32>
    %1514 = arith.addf %1511, %1513 : vector<8x224xf32>
    %1515 = vector.broadcast %1501 : f32 to vector<8x224xf32>
    %1516 = arith.mulf %11, %1515 : vector<8x224xf32>
    %1517 = arith.addf %1514, %1516 : vector<8x224xf32>
    %1518 = vector.broadcast %1502 : f32 to vector<8x224xf32>
    %1519 = arith.mulf %13, %1518 : vector<8x224xf32>
    %1520 = arith.addf %1517, %1519 : vector<8x224xf32>
    %1521 = vector.broadcast %1503 : f32 to vector<8x224xf32>
    %1522 = arith.mulf %15, %1521 : vector<8x224xf32>
    %1523 = arith.addf %1520, %1522 : vector<8x224xf32>
    %1524 = vector.broadcast %1504 : f32 to vector<8x224xf32>
    %1525 = arith.mulf %19, %1524 : vector<8x224xf32>
    %1526 = arith.addf %1523, %1525 : vector<8x224xf32>
    %1527 = vector.broadcast %1505 : f32 to vector<8x224xf32>
    %1528 = arith.mulf %21, %1527 : vector<8x224xf32>
    %1529 = arith.addf %1526, %1528 : vector<8x224xf32>
    %1530 = vector.broadcast %1506 : f32 to vector<8x224xf32>
    %1531 = arith.mulf %23, %1530 : vector<8x224xf32>
    %1532 = arith.addf %1529, %1531 : vector<8x224xf32>
    %1533 = vector.broadcast %1498 : f32 to vector<8x224xf32>
    %1534 = arith.mulf %5, %1533 : vector<8x224xf32>
    %1535 = vector.broadcast %1499 : f32 to vector<8x224xf32>
    %1536 = arith.mulf %7, %1535 : vector<8x224xf32>
    %1537 = arith.addf %1534, %1536 : vector<8x224xf32>
    %1538 = vector.broadcast %1500 : f32 to vector<8x224xf32>
    %1539 = arith.mulf %9, %1538 : vector<8x224xf32>
    %1540 = arith.addf %1537, %1539 : vector<8x224xf32>
    %1541 = vector.broadcast %1501 : f32 to vector<8x224xf32>
    %1542 = arith.mulf %13, %1541 : vector<8x224xf32>
    %1543 = arith.addf %1540, %1542 : vector<8x224xf32>
    %1544 = vector.broadcast %1502 : f32 to vector<8x224xf32>
    %1545 = arith.mulf %15, %1544 : vector<8x224xf32>
    %1546 = arith.addf %1543, %1545 : vector<8x224xf32>
    %1547 = vector.broadcast %1503 : f32 to vector<8x224xf32>
    %1548 = arith.mulf %17, %1547 : vector<8x224xf32>
    %1549 = arith.addf %1546, %1548 : vector<8x224xf32>
    %1550 = vector.broadcast %1504 : f32 to vector<8x224xf32>
    %1551 = arith.mulf %21, %1550 : vector<8x224xf32>
    %1552 = arith.addf %1549, %1551 : vector<8x224xf32>
    %1553 = vector.broadcast %1505 : f32 to vector<8x224xf32>
    %1554 = arith.mulf %23, %1553 : vector<8x224xf32>
    %1555 = arith.addf %1552, %1554 : vector<8x224xf32>
    %1556 = vector.broadcast %1506 : f32 to vector<8x224xf32>
    %1557 = arith.mulf %25, %1556 : vector<8x224xf32>
    %1558 = arith.addf %1555, %1557 : vector<8x224xf32>
    %1559 = arith.maximumf %1532, %1558 : vector<8x224xf32>
    %1560 = vector.broadcast %1498 : f32 to vector<8x224xf32>
    %1561 = arith.mulf %11, %1560 : vector<8x224xf32>
    %1562 = vector.broadcast %1499 : f32 to vector<8x224xf32>
    %1563 = arith.mulf %13, %1562 : vector<8x224xf32>
    %1564 = arith.addf %1561, %1563 : vector<8x224xf32>
    %1565 = vector.broadcast %1500 : f32 to vector<8x224xf32>
    %1566 = arith.mulf %15, %1565 : vector<8x224xf32>
    %1567 = arith.addf %1564, %1566 : vector<8x224xf32>
    %1568 = vector.broadcast %1501 : f32 to vector<8x224xf32>
    %1569 = arith.mulf %19, %1568 : vector<8x224xf32>
    %1570 = arith.addf %1567, %1569 : vector<8x224xf32>
    %1571 = vector.broadcast %1502 : f32 to vector<8x224xf32>
    %1572 = arith.mulf %21, %1571 : vector<8x224xf32>
    %1573 = arith.addf %1570, %1572 : vector<8x224xf32>
    %1574 = vector.broadcast %1503 : f32 to vector<8x224xf32>
    %1575 = arith.mulf %23, %1574 : vector<8x224xf32>
    %1576 = arith.addf %1573, %1575 : vector<8x224xf32>
    %1577 = vector.broadcast %1504 : f32 to vector<8x224xf32>
    %1578 = arith.mulf %27, %1577 : vector<8x224xf32>
    %1579 = arith.addf %1576, %1578 : vector<8x224xf32>
    %1580 = vector.broadcast %1505 : f32 to vector<8x224xf32>
    %1581 = arith.mulf %29, %1580 : vector<8x224xf32>
    %1582 = arith.addf %1579, %1581 : vector<8x224xf32>
    %1583 = vector.broadcast %1506 : f32 to vector<8x224xf32>
    %1584 = arith.mulf %31, %1583 : vector<8x224xf32>
    %1585 = arith.addf %1582, %1584 : vector<8x224xf32>
    %1586 = arith.maximumf %1559, %1585 : vector<8x224xf32>
    %1587 = vector.broadcast %1498 : f32 to vector<8x224xf32>
    %1588 = arith.mulf %13, %1587 : vector<8x224xf32>
    %1589 = vector.broadcast %1499 : f32 to vector<8x224xf32>
    %1590 = arith.mulf %15, %1589 : vector<8x224xf32>
    %1591 = arith.addf %1588, %1590 : vector<8x224xf32>
    %1592 = vector.broadcast %1500 : f32 to vector<8x224xf32>
    %1593 = arith.mulf %17, %1592 : vector<8x224xf32>
    %1594 = arith.addf %1591, %1593 : vector<8x224xf32>
    %1595 = vector.broadcast %1501 : f32 to vector<8x224xf32>
    %1596 = arith.mulf %21, %1595 : vector<8x224xf32>
    %1597 = arith.addf %1594, %1596 : vector<8x224xf32>
    %1598 = vector.broadcast %1502 : f32 to vector<8x224xf32>
    %1599 = arith.mulf %23, %1598 : vector<8x224xf32>
    %1600 = arith.addf %1597, %1599 : vector<8x224xf32>
    %1601 = vector.broadcast %1503 : f32 to vector<8x224xf32>
    %1602 = arith.mulf %25, %1601 : vector<8x224xf32>
    %1603 = arith.addf %1600, %1602 : vector<8x224xf32>
    %1604 = vector.broadcast %1504 : f32 to vector<8x224xf32>
    %1605 = arith.mulf %29, %1604 : vector<8x224xf32>
    %1606 = arith.addf %1603, %1605 : vector<8x224xf32>
    %1607 = vector.broadcast %1505 : f32 to vector<8x224xf32>
    %1608 = arith.mulf %31, %1607 : vector<8x224xf32>
    %1609 = arith.addf %1606, %1608 : vector<8x224xf32>
    %1610 = vector.broadcast %1506 : f32 to vector<8x224xf32>
    %1611 = arith.mulf %33, %1610 : vector<8x224xf32>
    %1612 = arith.addf %1609, %1611 : vector<8x224xf32>
    %1613 = arith.maximumf %1586, %1612 : vector<8x224xf32>
    %c12_87 = arith.constant 12 : index
    %1614 = memref.load %arg3[%c12_87] : memref<16xf32, #tpu.memory_space<smem>>
    %1615 = vector.broadcast %1614 : f32 to vector<8x224xf32>
    %1616 = arith.addf %1613, %1615 : vector<8x224xf32>
    %cst_88 = arith.constant 0.000000e+00 : f32
    %1617 = vector.broadcast %cst_88 : f32 to vector<8x224xf32>
    %1618 = arith.maximumf %1616, %1617 : vector<8x224xf32>
    %c0_89 = arith.constant 0 : index
    %c3072 = arith.constant 3072 : index
    %1619 = vector.load %arg7[%c0_89, %c3072] : memref<8x4096xf32, #tpu.memory_space<vmem>>, vector<8x224xf32>
    tpu.vector_store %arg7[%c0_89, %c3072], %1618 {strides = array<i32>} : memref<8x4096xf32, #tpu.memory_space<vmem>>, vector<8x224xf32>,
    %c117 = arith.constant 117 : index
    %1620 = memref.load %arg2[%c117] : memref<144xf32, #tpu.memory_space<smem>>
    %c118 = arith.constant 118 : index
    %1621 = memref.load %arg2[%c118] : memref<144xf32, #tpu.memory_space<smem>>
    %c119 = arith.constant 119 : index
    %1622 = memref.load %arg2[%c119] : memref<144xf32, #tpu.memory_space<smem>>
    %c120 = arith.constant 120 : index
    %1623 = memref.load %arg2[%c120] : memref<144xf32, #tpu.memory_space<smem>>
    %c121 = arith.constant 121 : index
    %1624 = memref.load %arg2[%c121] : memref<144xf32, #tpu.memory_space<smem>>
    %c122 = arith.constant 122 : index
    %1625 = memref.load %arg2[%c122] : memref<144xf32, #tpu.memory_space<smem>>
    %c123 = arith.constant 123 : index
    %1626 = memref.load %arg2[%c123] : memref<144xf32, #tpu.memory_space<smem>>
    %c124 = arith.constant 124 : index
    %1627 = memref.load %arg2[%c124] : memref<144xf32, #tpu.memory_space<smem>>
    %c125 = arith.constant 125 : index
    %1628 = memref.load %arg2[%c125] : memref<144xf32, #tpu.memory_space<smem>>
    %1629 = vector.broadcast %1620 : f32 to vector<8x224xf32>
    %1630 = arith.mulf %3, %1629 : vector<8x224xf32>
    %1631 = vector.broadcast %1621 : f32 to vector<8x224xf32>
    %1632 = arith.mulf %5, %1631 : vector<8x224xf32>
    %1633 = arith.addf %1630, %1632 : vector<8x224xf32>
    %1634 = vector.broadcast %1622 : f32 to vector<8x224xf32>
    %1635 = arith.mulf %7, %1634 : vector<8x224xf32>
    %1636 = arith.addf %1633, %1635 : vector<8x224xf32>
    %1637 = vector.broadcast %1623 : f32 to vector<8x224xf32>
    %1638 = arith.mulf %11, %1637 : vector<8x224xf32>
    %1639 = arith.addf %1636, %1638 : vector<8x224xf32>
    %1640 = vector.broadcast %1624 : f32 to vector<8x224xf32>
    %1641 = arith.mulf %13, %1640 : vector<8x224xf32>
    %1642 = arith.addf %1639, %1641 : vector<8x224xf32>
    %1643 = vector.broadcast %1625 : f32 to vector<8x224xf32>
    %1644 = arith.mulf %15, %1643 : vector<8x224xf32>
    %1645 = arith.addf %1642, %1644 : vector<8x224xf32>
    %1646 = vector.broadcast %1626 : f32 to vector<8x224xf32>
    %1647 = arith.mulf %19, %1646 : vector<8x224xf32>
    %1648 = arith.addf %1645, %1647 : vector<8x224xf32>
    %1649 = vector.broadcast %1627 : f32 to vector<8x224xf32>
    %1650 = arith.mulf %21, %1649 : vector<8x224xf32>
    %1651 = arith.addf %1648, %1650 : vector<8x224xf32>
    %1652 = vector.broadcast %1628 : f32 to vector<8x224xf32>
    %1653 = arith.mulf %23, %1652 : vector<8x224xf32>
    %1654 = arith.addf %1651, %1653 : vector<8x224xf32>
    %1655 = vector.broadcast %1620 : f32 to vector<8x224xf32>
    %1656 = arith.mulf %5, %1655 : vector<8x224xf32>
    %1657 = vector.broadcast %1621 : f32 to vector<8x224xf32>
    %1658 = arith.mulf %7, %1657 : vector<8x224xf32>
    %1659 = arith.addf %1656, %1658 : vector<8x224xf32>
    %1660 = vector.broadcast %1622 : f32 to vector<8x224xf32>
    %1661 = arith.mulf %9, %1660 : vector<8x224xf32>
    %1662 = arith.addf %1659, %1661 : vector<8x224xf32>
    %1663 = vector.broadcast %1623 : f32 to vector<8x224xf32>
    %1664 = arith.mulf %13, %1663 : vector<8x224xf32>
    %1665 = arith.addf %1662, %1664 : vector<8x224xf32>
    %1666 = vector.broadcast %1624 : f32 to vector<8x224xf32>
    %1667 = arith.mulf %15, %1666 : vector<8x224xf32>
    %1668 = arith.addf %1665, %1667 : vector<8x224xf32>
    %1669 = vector.broadcast %1625 : f32 to vector<8x224xf32>
    %1670 = arith.mulf %17, %1669 : vector<8x224xf32>
    %1671 = arith.addf %1668, %1670 : vector<8x224xf32>
    %1672 = vector.broadcast %1626 : f32 to vector<8x224xf32>
    %1673 = arith.mulf %21, %1672 : vector<8x224xf32>
    %1674 = arith.addf %1671, %1673 : vector<8x224xf32>
    %1675 = vector.broadcast %1627 : f32 to vector<8x224xf32>
    %1676 = arith.mulf %23, %1675 : vector<8x224xf32>
    %1677 = arith.addf %1674, %1676 : vector<8x224xf32>
    %1678 = vector.broadcast %1628 : f32 to vector<8x224xf32>
    %1679 = arith.mulf %25, %1678 : vector<8x224xf32>
    %1680 = arith.addf %1677, %1679 : vector<8x224xf32>
    %1681 = arith.maximumf %1654, %1680 : vector<8x224xf32>
    %1682 = vector.broadcast %1620 : f32 to vector<8x224xf32>
    %1683 = arith.mulf %11, %1682 : vector<8x224xf32>
    %1684 = vector.broadcast %1621 : f32 to vector<8x224xf32>
    %1685 = arith.mulf %13, %1684 : vector<8x224xf32>
    %1686 = arith.addf %1683, %1685 : vector<8x224xf32>
    %1687 = vector.broadcast %1622 : f32 to vector<8x224xf32>
    %1688 = arith.mulf %15, %1687 : vector<8x224xf32>
    %1689 = arith.addf %1686, %1688 : vector<8x224xf32>
    %1690 = vector.broadcast %1623 : f32 to vector<8x224xf32>
    %1691 = arith.mulf %19, %1690 : vector<8x224xf32>
    %1692 = arith.addf %1689, %1691 : vector<8x224xf32>
    %1693 = vector.broadcast %1624 : f32 to vector<8x224xf32>
    %1694 = arith.mulf %21, %1693 : vector<8x224xf32>
    %1695 = arith.addf %1692, %1694 : vector<8x224xf32>
    %1696 = vector.broadcast %1625 : f32 to vector<8x224xf32>
    %1697 = arith.mulf %23, %1696 : vector<8x224xf32>
    %1698 = arith.addf %1695, %1697 : vector<8x224xf32>
    %1699 = vector.broadcast %1626 : f32 to vector<8x224xf32>
    %1700 = arith.mulf %27, %1699 : vector<8x224xf32>
    %1701 = arith.addf %1698, %1700 : vector<8x224xf32>
    %1702 = vector.broadcast %1627 : f32 to vector<8x224xf32>
    %1703 = arith.mulf %29, %1702 : vector<8x224xf32>
    %1704 = arith.addf %1701, %1703 : vector<8x224xf32>
    %1705 = vector.broadcast %1628 : f32 to vector<8x224xf32>
    %1706 = arith.mulf %31, %1705 : vector<8x224xf32>
    %1707 = arith.addf %1704, %1706 : vector<8x224xf32>
    %1708 = arith.maximumf %1681, %1707 : vector<8x224xf32>
    %1709 = vector.broadcast %1620 : f32 to vector<8x224xf32>
    %1710 = arith.mulf %13, %1709 : vector<8x224xf32>
    %1711 = vector.broadcast %1621 : f32 to vector<8x224xf32>
    %1712 = arith.mulf %15, %1711 : vector<8x224xf32>
    %1713 = arith.addf %1710, %1712 : vector<8x224xf32>
    %1714 = vector.broadcast %1622 : f32 to vector<8x224xf32>
    %1715 = arith.mulf %17, %1714 : vector<8x224xf32>
    %1716 = arith.addf %1713, %1715 : vector<8x224xf32>
    %1717 = vector.broadcast %1623 : f32 to vector<8x224xf32>
    %1718 = arith.mulf %21, %1717 : vector<8x224xf32>
    %1719 = arith.addf %1716, %1718 : vector<8x224xf32>
    %1720 = vector.broadcast %1624 : f32 to vector<8x224xf32>
    %1721 = arith.mulf %23, %1720 : vector<8x224xf32>
    %1722 = arith.addf %1719, %1721 : vector<8x224xf32>
    %1723 = vector.broadcast %1625 : f32 to vector<8x224xf32>
    %1724 = arith.mulf %25, %1723 : vector<8x224xf32>
    %1725 = arith.addf %1722, %1724 : vector<8x224xf32>
    %1726 = vector.broadcast %1626 : f32 to vector<8x224xf32>
    %1727 = arith.mulf %29, %1726 : vector<8x224xf32>
    %1728 = arith.addf %1725, %1727 : vector<8x224xf32>
    %1729 = vector.broadcast %1627 : f32 to vector<8x224xf32>
    %1730 = arith.mulf %31, %1729 : vector<8x224xf32>
    %1731 = arith.addf %1728, %1730 : vector<8x224xf32>
    %1732 = vector.broadcast %1628 : f32 to vector<8x224xf32>
    %1733 = arith.mulf %33, %1732 : vector<8x224xf32>
    %1734 = arith.addf %1731, %1733 : vector<8x224xf32>
    %1735 = arith.maximumf %1708, %1734 : vector<8x224xf32>
    %c13_90 = arith.constant 13 : index
    %1736 = memref.load %arg3[%c13_90] : memref<16xf32, #tpu.memory_space<smem>>
    %1737 = vector.broadcast %1736 : f32 to vector<8x224xf32>
    %1738 = arith.addf %1735, %1737 : vector<8x224xf32>
    %cst_91 = arith.constant 0.000000e+00 : f32
    %1739 = vector.broadcast %cst_91 : f32 to vector<8x224xf32>
    %1740 = arith.maximumf %1738, %1739 : vector<8x224xf32>
    %c0_92 = arith.constant 0 : index
    %c3328 = arith.constant 3328 : index
    %1741 = vector.load %arg7[%c0_92, %c3328] : memref<8x4096xf32, #tpu.memory_space<vmem>>, vector<8x224xf32>
    tpu.vector_store %arg7[%c0_92, %c3328], %1740 {strides = array<i32>} : memref<8x4096xf32, #tpu.memory_space<vmem>>, vector<8x224xf32>,
    %c126 = arith.constant 126 : index
    %1742 = memref.load %arg2[%c126] : memref<144xf32, #tpu.memory_space<smem>>
    %c127 = arith.constant 127 : index
    %1743 = memref.load %arg2[%c127] : memref<144xf32, #tpu.memory_space<smem>>
    %c128 = arith.constant 128 : index
    %1744 = memref.load %arg2[%c128] : memref<144xf32, #tpu.memory_space<smem>>
    %c129 = arith.constant 129 : index
    %1745 = memref.load %arg2[%c129] : memref<144xf32, #tpu.memory_space<smem>>
    %c130 = arith.constant 130 : index
    %1746 = memref.load %arg2[%c130] : memref<144xf32, #tpu.memory_space<smem>>
    %c131 = arith.constant 131 : index
    %1747 = memref.load %arg2[%c131] : memref<144xf32, #tpu.memory_space<smem>>
    %c132 = arith.constant 132 : index
    %1748 = memref.load %arg2[%c132] : memref<144xf32, #tpu.memory_space<smem>>
    %c133 = arith.constant 133 : index
    %1749 = memref.load %arg2[%c133] : memref<144xf32, #tpu.memory_space<smem>>
    %c134 = arith.constant 134 : index
    %1750 = memref.load %arg2[%c134] : memref<144xf32, #tpu.memory_space<smem>>
    %1751 = vector.broadcast %1742 : f32 to vector<8x224xf32>
    %1752 = arith.mulf %3, %1751 : vector<8x224xf32>
    %1753 = vector.broadcast %1743 : f32 to vector<8x224xf32>
    %1754 = arith.mulf %5, %1753 : vector<8x224xf32>
    %1755 = arith.addf %1752, %1754 : vector<8x224xf32>
    %1756 = vector.broadcast %1744 : f32 to vector<8x224xf32>
    %1757 = arith.mulf %7, %1756 : vector<8x224xf32>
    %1758 = arith.addf %1755, %1757 : vector<8x224xf32>
    %1759 = vector.broadcast %1745 : f32 to vector<8x224xf32>
    %1760 = arith.mulf %11, %1759 : vector<8x224xf32>
    %1761 = arith.addf %1758, %1760 : vector<8x224xf32>
    %1762 = vector.broadcast %1746 : f32 to vector<8x224xf32>
    %1763 = arith.mulf %13, %1762 : vector<8x224xf32>
    %1764 = arith.addf %1761, %1763 : vector<8x224xf32>
    %1765 = vector.broadcast %1747 : f32 to vector<8x224xf32>
    %1766 = arith.mulf %15, %1765 : vector<8x224xf32>
    %1767 = arith.addf %1764, %1766 : vector<8x224xf32>
    %1768 = vector.broadcast %1748 : f32 to vector<8x224xf32>
    %1769 = arith.mulf %19, %1768 : vector<8x224xf32>
    %1770 = arith.addf %1767, %1769 : vector<8x224xf32>
    %1771 = vector.broadcast %1749 : f32 to vector<8x224xf32>
    %1772 = arith.mulf %21, %1771 : vector<8x224xf32>
    %1773 = arith.addf %1770, %1772 : vector<8x224xf32>
    %1774 = vector.broadcast %1750 : f32 to vector<8x224xf32>
    %1775 = arith.mulf %23, %1774 : vector<8x224xf32>
    %1776 = arith.addf %1773, %1775 : vector<8x224xf32>
    %1777 = vector.broadcast %1742 : f32 to vector<8x224xf32>
    %1778 = arith.mulf %5, %1777 : vector<8x224xf32>
    %1779 = vector.broadcast %1743 : f32 to vector<8x224xf32>
    %1780 = arith.mulf %7, %1779 : vector<8x224xf32>
    %1781 = arith.addf %1778, %1780 : vector<8x224xf32>
    %1782 = vector.broadcast %1744 : f32 to vector<8x224xf32>
    %1783 = arith.mulf %9, %1782 : vector<8x224xf32>
    %1784 = arith.addf %1781, %1783 : vector<8x224xf32>
    %1785 = vector.broadcast %1745 : f32 to vector<8x224xf32>
    %1786 = arith.mulf %13, %1785 : vector<8x224xf32>
    %1787 = arith.addf %1784, %1786 : vector<8x224xf32>
    %1788 = vector.broadcast %1746 : f32 to vector<8x224xf32>
    %1789 = arith.mulf %15, %1788 : vector<8x224xf32>
    %1790 = arith.addf %1787, %1789 : vector<8x224xf32>
    %1791 = vector.broadcast %1747 : f32 to vector<8x224xf32>
    %1792 = arith.mulf %17, %1791 : vector<8x224xf32>
    %1793 = arith.addf %1790, %1792 : vector<8x224xf32>
    %1794 = vector.broadcast %1748 : f32 to vector<8x224xf32>
    %1795 = arith.mulf %21, %1794 : vector<8x224xf32>
    %1796 = arith.addf %1793, %1795 : vector<8x224xf32>
    %1797 = vector.broadcast %1749 : f32 to vector<8x224xf32>
    %1798 = arith.mulf %23, %1797 : vector<8x224xf32>
    %1799 = arith.addf %1796, %1798 : vector<8x224xf32>
    %1800 = vector.broadcast %1750 : f32 to vector<8x224xf32>
    %1801 = arith.mulf %25, %1800 : vector<8x224xf32>
    %1802 = arith.addf %1799, %1801 : vector<8x224xf32>
    %1803 = arith.maximumf %1776, %1802 : vector<8x224xf32>
    %1804 = vector.broadcast %1742 : f32 to vector<8x224xf32>
    %1805 = arith.mulf %11, %1804 : vector<8x224xf32>
    %1806 = vector.broadcast %1743 : f32 to vector<8x224xf32>
    %1807 = arith.mulf %13, %1806 : vector<8x224xf32>
    %1808 = arith.addf %1805, %1807 : vector<8x224xf32>
    %1809 = vector.broadcast %1744 : f32 to vector<8x224xf32>
    %1810 = arith.mulf %15, %1809 : vector<8x224xf32>
    %1811 = arith.addf %1808, %1810 : vector<8x224xf32>
    %1812 = vector.broadcast %1745 : f32 to vector<8x224xf32>
    %1813 = arith.mulf %19, %1812 : vector<8x224xf32>
    %1814 = arith.addf %1811, %1813 : vector<8x224xf32>
    %1815 = vector.broadcast %1746 : f32 to vector<8x224xf32>
    %1816 = arith.mulf %21, %1815 : vector<8x224xf32>
    %1817 = arith.addf %1814, %1816 : vector<8x224xf32>
    %1818 = vector.broadcast %1747 : f32 to vector<8x224xf32>
    %1819 = arith.mulf %23, %1818 : vector<8x224xf32>
    %1820 = arith.addf %1817, %1819 : vector<8x224xf32>
    %1821 = vector.broadcast %1748 : f32 to vector<8x224xf32>
    %1822 = arith.mulf %27, %1821 : vector<8x224xf32>
    %1823 = arith.addf %1820, %1822 : vector<8x224xf32>
    %1824 = vector.broadcast %1749 : f32 to vector<8x224xf32>
    %1825 = arith.mulf %29, %1824 : vector<8x224xf32>
    %1826 = arith.addf %1823, %1825 : vector<8x224xf32>
    %1827 = vector.broadcast %1750 : f32 to vector<8x224xf32>
    %1828 = arith.mulf %31, %1827 : vector<8x224xf32>
    %1829 = arith.addf %1826, %1828 : vector<8x224xf32>
    %1830 = arith.maximumf %1803, %1829 : vector<8x224xf32>
    %1831 = vector.broadcast %1742 : f32 to vector<8x224xf32>
    %1832 = arith.mulf %13, %1831 : vector<8x224xf32>
    %1833 = vector.broadcast %1743 : f32 to vector<8x224xf32>
    %1834 = arith.mulf %15, %1833 : vector<8x224xf32>
    %1835 = arith.addf %1832, %1834 : vector<8x224xf32>
    %1836 = vector.broadcast %1744 : f32 to vector<8x224xf32>
    %1837 = arith.mulf %17, %1836 : vector<8x224xf32>
    %1838 = arith.addf %1835, %1837 : vector<8x224xf32>
    %1839 = vector.broadcast %1745 : f32 to vector<8x224xf32>
    %1840 = arith.mulf %21, %1839 : vector<8x224xf32>
    %1841 = arith.addf %1838, %1840 : vector<8x224xf32>
    %1842 = vector.broadcast %1746 : f32 to vector<8x224xf32>
    %1843 = arith.mulf %23, %1842 : vector<8x224xf32>
    %1844 = arith.addf %1841, %1843 : vector<8x224xf32>
    %1845 = vector.broadcast %1747 : f32 to vector<8x224xf32>
    %1846 = arith.mulf %25, %1845 : vector<8x224xf32>
    %1847 = arith.addf %1844, %1846 : vector<8x224xf32>
    %1848 = vector.broadcast %1748 : f32 to vector<8x224xf32>
    %1849 = arith.mulf %29, %1848 : vector<8x224xf32>
    %1850 = arith.addf %1847, %1849 : vector<8x224xf32>
    %1851 = vector.broadcast %1749 : f32 to vector<8x224xf32>
    %1852 = arith.mulf %31, %1851 : vector<8x224xf32>
    %1853 = arith.addf %1850, %1852 : vector<8x224xf32>
    %1854 = vector.broadcast %1750 : f32 to vector<8x224xf32>
    %1855 = arith.mulf %33, %1854 : vector<8x224xf32>
    %1856 = arith.addf %1853, %1855 : vector<8x224xf32>
    %1857 = arith.maximumf %1830, %1856 : vector<8x224xf32>
    %c14_93 = arith.constant 14 : index
    %1858 = memref.load %arg3[%c14_93] : memref<16xf32, #tpu.memory_space<smem>>
    %1859 = vector.broadcast %1858 : f32 to vector<8x224xf32>
    %1860 = arith.addf %1857, %1859 : vector<8x224xf32>
    %cst_94 = arith.constant 0.000000e+00 : f32
    %1861 = vector.broadcast %cst_94 : f32 to vector<8x224xf32>
    %1862 = arith.maximumf %1860, %1861 : vector<8x224xf32>
    %c0_95 = arith.constant 0 : index
    %c3584 = arith.constant 3584 : index
    %1863 = vector.load %arg7[%c0_95, %c3584] : memref<8x4096xf32, #tpu.memory_space<vmem>>, vector<8x224xf32>
    tpu.vector_store %arg7[%c0_95, %c3584], %1862 {strides = array<i32>} : memref<8x4096xf32, #tpu.memory_space<vmem>>, vector<8x224xf32>,
    %c135 = arith.constant 135 : index
    %1864 = memref.load %arg2[%c135] : memref<144xf32, #tpu.memory_space<smem>>
    %c136 = arith.constant 136 : index
    %1865 = memref.load %arg2[%c136] : memref<144xf32, #tpu.memory_space<smem>>
    %c137 = arith.constant 137 : index
    %1866 = memref.load %arg2[%c137] : memref<144xf32, #tpu.memory_space<smem>>
    %c138 = arith.constant 138 : index
    %1867 = memref.load %arg2[%c138] : memref<144xf32, #tpu.memory_space<smem>>
    %c139 = arith.constant 139 : index
    %1868 = memref.load %arg2[%c139] : memref<144xf32, #tpu.memory_space<smem>>
    %c140 = arith.constant 140 : index
    %1869 = memref.load %arg2[%c140] : memref<144xf32, #tpu.memory_space<smem>>
    %c141 = arith.constant 141 : index
    %1870 = memref.load %arg2[%c141] : memref<144xf32, #tpu.memory_space<smem>>
    %c142 = arith.constant 142 : index
    %1871 = memref.load %arg2[%c142] : memref<144xf32, #tpu.memory_space<smem>>
    %c143 = arith.constant 143 : index
    %1872 = memref.load %arg2[%c143] : memref<144xf32, #tpu.memory_space<smem>>
    %1873 = vector.broadcast %1864 : f32 to vector<8x224xf32>
    %1874 = arith.mulf %3, %1873 : vector<8x224xf32>
    %1875 = vector.broadcast %1865 : f32 to vector<8x224xf32>
    %1876 = arith.mulf %5, %1875 : vector<8x224xf32>
    %1877 = arith.addf %1874, %1876 : vector<8x224xf32>
    %1878 = vector.broadcast %1866 : f32 to vector<8x224xf32>
    %1879 = arith.mulf %7, %1878 : vector<8x224xf32>
    %1880 = arith.addf %1877, %1879 : vector<8x224xf32>
    %1881 = vector.broadcast %1867 : f32 to vector<8x224xf32>
    %1882 = arith.mulf %11, %1881 : vector<8x224xf32>
    %1883 = arith.addf %1880, %1882 : vector<8x224xf32>
    %1884 = vector.broadcast %1868 : f32 to vector<8x224xf32>
    %1885 = arith.mulf %13, %1884 : vector<8x224xf32>
    %1886 = arith.addf %1883, %1885 : vector<8x224xf32>
    %1887 = vector.broadcast %1869 : f32 to vector<8x224xf32>
    %1888 = arith.mulf %15, %1887 : vector<8x224xf32>
    %1889 = arith.addf %1886, %1888 : vector<8x224xf32>
    %1890 = vector.broadcast %1870 : f32 to vector<8x224xf32>
    %1891 = arith.mulf %19, %1890 : vector<8x224xf32>
    %1892 = arith.addf %1889, %1891 : vector<8x224xf32>
    %1893 = vector.broadcast %1871 : f32 to vector<8x224xf32>
    %1894 = arith.mulf %21, %1893 : vector<8x224xf32>
    %1895 = arith.addf %1892, %1894 : vector<8x224xf32>
    %1896 = vector.broadcast %1872 : f32 to vector<8x224xf32>
    %1897 = arith.mulf %23, %1896 : vector<8x224xf32>
    %1898 = arith.addf %1895, %1897 : vector<8x224xf32>
    %1899 = vector.broadcast %1864 : f32 to vector<8x224xf32>
    %1900 = arith.mulf %5, %1899 : vector<8x224xf32>
    %1901 = vector.broadcast %1865 : f32 to vector<8x224xf32>
    %1902 = arith.mulf %7, %1901 : vector<8x224xf32>
    %1903 = arith.addf %1900, %1902 : vector<8x224xf32>
    %1904 = vector.broadcast %1866 : f32 to vector<8x224xf32>
    %1905 = arith.mulf %9, %1904 : vector<8x224xf32>
    %1906 = arith.addf %1903, %1905 : vector<8x224xf32>
    %1907 = vector.broadcast %1867 : f32 to vector<8x224xf32>
    %1908 = arith.mulf %13, %1907 : vector<8x224xf32>
    %1909 = arith.addf %1906, %1908 : vector<8x224xf32>
    %1910 = vector.broadcast %1868 : f32 to vector<8x224xf32>
    %1911 = arith.mulf %15, %1910 : vector<8x224xf32>
    %1912 = arith.addf %1909, %1911 : vector<8x224xf32>
    %1913 = vector.broadcast %1869 : f32 to vector<8x224xf32>
    %1914 = arith.mulf %17, %1913 : vector<8x224xf32>
    %1915 = arith.addf %1912, %1914 : vector<8x224xf32>
    %1916 = vector.broadcast %1870 : f32 to vector<8x224xf32>
    %1917 = arith.mulf %21, %1916 : vector<8x224xf32>
    %1918 = arith.addf %1915, %1917 : vector<8x224xf32>
    %1919 = vector.broadcast %1871 : f32 to vector<8x224xf32>
    %1920 = arith.mulf %23, %1919 : vector<8x224xf32>
    %1921 = arith.addf %1918, %1920 : vector<8x224xf32>
    %1922 = vector.broadcast %1872 : f32 to vector<8x224xf32>
    %1923 = arith.mulf %25, %1922 : vector<8x224xf32>
    %1924 = arith.addf %1921, %1923 : vector<8x224xf32>
    %1925 = arith.maximumf %1898, %1924 : vector<8x224xf32>
    %1926 = vector.broadcast %1864 : f32 to vector<8x224xf32>
    %1927 = arith.mulf %11, %1926 : vector<8x224xf32>
    %1928 = vector.broadcast %1865 : f32 to vector<8x224xf32>
    %1929 = arith.mulf %13, %1928 : vector<8x224xf32>
    %1930 = arith.addf %1927, %1929 : vector<8x224xf32>
    %1931 = vector.broadcast %1866 : f32 to vector<8x224xf32>
    %1932 = arith.mulf %15, %1931 : vector<8x224xf32>
    %1933 = arith.addf %1930, %1932 : vector<8x224xf32>
    %1934 = vector.broadcast %1867 : f32 to vector<8x224xf32>
    %1935 = arith.mulf %19, %1934 : vector<8x224xf32>
    %1936 = arith.addf %1933, %1935 : vector<8x224xf32>
    %1937 = vector.broadcast %1868 : f32 to vector<8x224xf32>
    %1938 = arith.mulf %21, %1937 : vector<8x224xf32>
    %1939 = arith.addf %1936, %1938 : vector<8x224xf32>
    %1940 = vector.broadcast %1869 : f32 to vector<8x224xf32>
    %1941 = arith.mulf %23, %1940 : vector<8x224xf32>
    %1942 = arith.addf %1939, %1941 : vector<8x224xf32>
    %1943 = vector.broadcast %1870 : f32 to vector<8x224xf32>
    %1944 = arith.mulf %27, %1943 : vector<8x224xf32>
    %1945 = arith.addf %1942, %1944 : vector<8x224xf32>
    %1946 = vector.broadcast %1871 : f32 to vector<8x224xf32>
    %1947 = arith.mulf %29, %1946 : vector<8x224xf32>
    %1948 = arith.addf %1945, %1947 : vector<8x224xf32>
    %1949 = vector.broadcast %1872 : f32 to vector<8x224xf32>
    %1950 = arith.mulf %31, %1949 : vector<8x224xf32>
    %1951 = arith.addf %1948, %1950 : vector<8x224xf32>
    %1952 = arith.maximumf %1925, %1951 : vector<8x224xf32>
    %1953 = vector.broadcast %1864 : f32 to vector<8x224xf32>
    %1954 = arith.mulf %13, %1953 : vector<8x224xf32>
    %1955 = vector.broadcast %1865 : f32 to vector<8x224xf32>
    %1956 = arith.mulf %15, %1955 : vector<8x224xf32>
    %1957 = arith.addf %1954, %1956 : vector<8x224xf32>
    %1958 = vector.broadcast %1866 : f32 to vector<8x224xf32>
    %1959 = arith.mulf %17, %1958 : vector<8x224xf32>
    %1960 = arith.addf %1957, %1959 : vector<8x224xf32>
    %1961 = vector.broadcast %1867 : f32 to vector<8x224xf32>
    %1962 = arith.mulf %21, %1961 : vector<8x224xf32>
    %1963 = arith.addf %1960, %1962 : vector<8x224xf32>
    %1964 = vector.broadcast %1868 : f32 to vector<8x224xf32>
    %1965 = arith.mulf %23, %1964 : vector<8x224xf32>
    %1966 = arith.addf %1963, %1965 : vector<8x224xf32>
    %1967 = vector.broadcast %1869 : f32 to vector<8x224xf32>
    %1968 = arith.mulf %25, %1967 : vector<8x224xf32>
    %1969 = arith.addf %1966, %1968 : vector<8x224xf32>
    %1970 = vector.broadcast %1870 : f32 to vector<8x224xf32>
    %1971 = arith.mulf %29, %1970 : vector<8x224xf32>
    %1972 = arith.addf %1969, %1971 : vector<8x224xf32>
    %1973 = vector.broadcast %1871 : f32 to vector<8x224xf32>
    %1974 = arith.mulf %31, %1973 : vector<8x224xf32>
    %1975 = arith.addf %1972, %1974 : vector<8x224xf32>
    %1976 = vector.broadcast %1872 : f32 to vector<8x224xf32>
    %1977 = arith.mulf %33, %1976 : vector<8x224xf32>
    %1978 = arith.addf %1975, %1977 : vector<8x224xf32>
    %1979 = arith.maximumf %1952, %1978 : vector<8x224xf32>
    %c15_96 = arith.constant 15 : index
    %1980 = memref.load %arg3[%c15_96] : memref<16xf32, #tpu.memory_space<smem>>
    %1981 = vector.broadcast %1980 : f32 to vector<8x224xf32>
    %1982 = arith.addf %1979, %1981 : vector<8x224xf32>
    %cst_97 = arith.constant 0.000000e+00 : f32
    %1983 = vector.broadcast %cst_97 : f32 to vector<8x224xf32>
    %1984 = arith.maximumf %1982, %1983 : vector<8x224xf32>
    %c0_98 = arith.constant 0 : index
    %c3840 = arith.constant 3840 : index
    %1985 = vector.load %arg7[%c0_98, %c3840] : memref<8x4096xf32, #tpu.memory_space<vmem>>, vector<8x224xf32>
    tpu.vector_store %arg7[%c0_98, %c3840], %1984 {strides = array<i32>} : memref<8x4096xf32, #tpu.memory_space<vmem>>, vector<8x224xf32>,
    %c0_99 = arith.constant 0 : index
    %c0_100 = arith.constant 0 : index
    %1986 = vector.load %arg7[%c0_99, %c0_100] : memref<8x4096xf32, #tpu.memory_space<vmem>>, vector<8x4096xf32>
    %1987 = arith.truncf %1986 : vector<8x4096xf32> to vector<8x4096xbf16>
    %c0_101 = arith.constant 0 : index
    %c0_102 = arith.constant 0 : index
    %1988 = vector.load %arg4[%c0_101, %c0_102] : memref<4096x64xbf16, #tpu.memory_space<vmem>>, vector<4096x64xbf16>
    %cst_103 = arith.constant dense<0.000000e+00> : vector<8x64xf32>
    %1989 = tpu.matmul %1987, %1988, %cst_103 {dimension_numbers = #tpu.dot_dimension_numbers<[1], [0], [0], [1], [0, 0, 1, 1], [], []>} : vector<8x4096xbf16>, vector<4096x64xbf16>, vector<8x64xf32> -> vector<8x64xf32>
    %c0_104 = arith.constant 0 : index
    %c0_105 = arith.constant 0 : index
    %1990 = vector.load %arg5[%c0_104, %c0_105] : memref<1x64xf32, #tpu.memory_space<vmem>>, vector<1x64xf32>
    %1991 = vector.broadcast %1990 : vector<1x64xf32> to vector<8x64xf32>
    %1992 = arith.addf %1989, %1991 : vector<8x64xf32>
    %cst_106 = arith.constant 0.000000e+00 : f32
    %1993 = vector.broadcast %cst_106 : f32 to vector<8x64xf32>
    %1994 = arith.maximumf %1992, %1993 : vector<8x64xf32>
    %c0_107 = arith.constant 0 : index
    %c0_108 = arith.constant 0 : index
    %1995 = vector.load %arg6[%c0_107, %c0_108] : memref<8x64xf32, #tpu.memory_space<vmem>>, vector<8x64xf32>
    tpu.vector_store %arg6[%c0_107, %c0_108], %1994 {strides = array<i32>} : memref<8x64xf32, #tpu.memory_space<vmem>>, vector<8x64xf32>,
    return
  }
  func.func @transform_0(%arg0: i32) -> (i32, i32, i32) {
    %c0_i32 = arith.constant 0 : i32
    %c0_i32_0 = arith.constant 0 : i32
    %c0_i32_1 = arith.constant 0 : i32
    return %c0_i32, %arg0, %c0_i32_0 : i32, i32, i32
  }
  func.func @transform_1(%arg0: i32) -> i32 {
    %c0_i32 = arith.constant 0 : i32
    %c0_i32_0 = arith.constant 0 : i32
    return %c0_i32 : i32
  }
  func.func @transform_2(%arg0: i32) -> i32 {
    %c0_i32 = arith.constant 0 : i32
    %c0_i32_0 = arith.constant 0 : i32
    return %c0_i32 : i32
  }
  func.func @transform_3(%arg0: i32) -> (i32, i32) {
    %c0_i32 = arith.constant 0 : i32
    %c0_i32_0 = arith.constant 0 : i32
    %c0_i32_1 = arith.constant 0 : i32
    return %c0_i32, %c0_i32_0 : i32, i32
  }
  func.func @transform_4(%arg0: i32) -> (i32, i32) {
    %c0_i32 = arith.constant 0 : i32
    %c0_i32_0 = arith.constant 0 : i32
    %c0_i32_1 = arith.constant 0 : i32
    return %c0_i32, %c0_i32_0 : i32, i32
  }
  func.func @transform_5(%arg0: i32) -> (i32, i32) {
    %c0_i32 = arith.constant 0 : i32
    %c0_i32_0 = arith.constant 0 : i32
    return %arg0, %c0_i32 : i32, i32
  }
}

</mosaic_0001>

<bundles_post_ra>
// kernel: custom_cnn_forward.1
= control target key start
LH: loop header
LB: loop body
LE: loop exit
PB: predicated region body
PF: predicated region fallthrough
CT: control target
= control target key end

     0   :  { %10 = vsyncpa [#allocation5], 0  ;;  %s12101_s0 = inlined_call_operand.vmem [shape: f32[16,8,224], index: 0, kind: input, shape index: {}]   ;;  %s12102_s1 = inlined_call_operand.vmem [shape: f32[144], index: 1, kind: input, shape index: {}]   ;;  %s12103_s2 = inlined_call_operand.vmem [shape: f32[16], index: 2, kind: input, shape index: {}]   ;;  %s12104_s3 = inlined_call_operand.vmem [shape: bf16[4096,64], index: 3, kind: input, shape index: {}]   ;;  %s12105_s4 = inlined_call_operand.vmem [shape: f32[1,64], index: 4, kind: input, shape index: {}]   ;;  %s12106_s5 = inlined_call_operand.hbm [shape: f32[8,64], index: 5, kind: output, shape index: {}]  }
   0x1   :  { %11 = vsyncpa [#allocation7], 0 }
   0x2   :  { %12 = vsyncpa [#allocation4], 0  ;;  %s21_s20 = sshll.u32 %s12102_s1, 4  ;;  %s31_s23 = sshll.u32 %s12103_s2, 4  ;;  %s22_s20 = int_to_ptr.vmem [resolvable:$true] %s21_s20  ;;  %s32_s23 = int_to_ptr.vmem [resolvable:$true] %s31_s23 }
   0x3   :  { %s6825_s24 = scalar_lea.vmem %s22_s20, 32  ;;  %p6830_p1 = scmp.lt.s32.totalorder %s22_s20, %s22_s20 }
   0x4   :  { %p6826_p0 = scmp.ne.s32.totalorder %s22_s20, %s6825_s24  ;;  %p6831_p2 = scmp.lt.s32.totalorder %s6825_s24, %s6825_s24 }
   0x6   :  { %p6832_p3 = por %p6831_p2, %p6830_p1 }
   0x8   :  { %p6833_p4 = pnand %p6832_p3, %p6826_p0 }
   0xa   :  { %6836 = shalt.err (!%p6833_p4)
}
   0xb   :  { %s6877_s25 = smov [#allocation3]   ;;  %s6837_s26 = scalar_lea.vmem %s32_s23, 16 }
   0xc   :  { %24 = dma.vmem_to_smem %s22_s20, 32, %s6877_s25, [#allocation5]  }
   0xd   :  { %p6838_p5 = scmp.ne.s32.totalorder %s32_s23, %s6837_s26  ;;  %p6842_p6 = scmp.lt.s32.totalorder %s32_s23, %s32_s23 }
   0xe   :  { %p6843_p7 = scmp.lt.s32.totalorder %s6837_s26, %s6837_s26 }
  0x10   :  { %p6844_p8 = por %p6843_p7, %p6842_p6 }
  0x12   :  { %p6845_p9 = pnand %p6844_p8, %p6838_p5 }
  0x14   :  { %6848 = shalt.err (!%p6845_p9)
}
  0x15   :  { %s6878_s1 = smov [#allocation6]  }
  0x16   :  { %34 = dma.vmem_to_smem %s32_s23, 16, %s6878_s1, [#allocation7]  }
  0x17   :  { %6871 = dma.done.wait [#allocation5], 32  }
  0x18   :  { %6872 = vsyncadd [#allocation5], 4294967264 }
  0x19   :  { %6873 = dma.done.wait [#allocation7], 16  }
  0x1a   :  { %6874 = vsyncadd [#allocation7], 4294967280 }
  0x1b   :  { %45 = sfence }
  0x1c   :  { %v6394_v0 = vld [vmem:[%s12104_s3 + $0x40] sm:$0xff]   ;;  %v6879_v2 = vmov 0.0   ;;  %v6398_v5 = vld [vmem:[%s12104_s3 + $0x48] sm:$0xff]   ;;  %v6402_v9 = vld [vmem:[%s12104_s3 + $0x50] sm:$0xff]   ;;  %s126_s11 = sld [smem:[#allocation3]]  ;;  %s5623_s12 = sld [smem:[#allocation3 + $0x1]] }
  0x1d   :  { %v6395_v1 = vld [vmem:[%s12104_s3 + $0xc0] sm:$0xff]   ;;  %48 = vst [vmem:[#allocation2 + $0x8] sm:$0xff] %v6879_v2  ;;  %50 = vst [vmem:[#allocation2 + $0x18] sm:$0xff] %v6879_v2  ;;  %6038 = vmatprep.subr.bf16.mxu0 %v6394_v0  ;;  %v6399_v6 = vld [vmem:[%s12104_s3 + $0xc8] sm:$0xff]   ;;  %s5624_s13 = sld [smem:[#allocation3 + $0x2]]  ;;  %s5625_s18 = sld [smem:[#allocation3 + $0x3]] }
  0x1e   :  { %52 = vst [vmem:[#allocation2 + $0x28] sm:$0xff] %v6879_v2  ;;  %54 = vst [vmem:[#allocation2 + $0x38] sm:$0xff] %v6879_v2  ;;  %v6396_v3 = vld [vmem:[%s12104_s3] sm:$0xff]   ;;  %6060 = vmatprep.subr.bf16.mxu1 %v6395_v1  ;;  %v6400_v7 = vld [vmem:[%s12104_s3 + $0x8] sm:$0xff]   ;;  %s5626_s25 = sld [smem:[#allocation3 + $0x4]]  ;;  %s5627_s2 = sld [smem:[#allocation3 + $0x5]] }
  0x1f   :  { %56 = vst [vmem:[#allocation2 + $0x48] sm:$0xff] %v6879_v2  ;;  %58 = vst [vmem:[#allocation2 + $0x58] sm:$0xff] %v6879_v2  ;;  %v6397_v4 = vld [vmem:[%s12104_s3 + $0x80] sm:$0xff]   ;;  %6039 = vmatpush3.bf16.msra.mxu0 %v6396_v3  ;;  %v6401_v8 = vld [vmem:[%s12104_s3 + $0x88] sm:$0xff]   ;;  %s5628_s27 = sld [smem:[#allocation3 + $0x6]]  ;;  %s5629_s30 = sld [smem:[#allocation3 + $0x7]] }
  0x20   :  { %60 = vst [vmem:[#allocation2 + $0x68] sm:$0xff] %v6879_v2  ;;  %62 = vst [vmem:[#allocation2 + $0x78] sm:$0xff] %v6879_v2  ;;  %6061 = vmatpush3.bf16.msra.mxu1 %v6397_v4  ;;  %6040 = vmatprep.subr.bf16.mxu0 %v6398_v5  ;;  %v6403_v10 = vld [vmem:[%s12104_s3 + $0xd0] sm:$0xff]   ;;  %v6406_v13 = vld [vmem:[%s12104_s3 + $0x58] sm:$0xff]   ;;  %s7046_s6 = sld [smem:[#allocation3 + $0x8]]  ;;  %s7143_s24 = sld [smem:[#allocation3 + $0x9]] }
  0x21   :  { %64 = vst [vmem:[#allocation2 + $0x88] sm:$0xff] %v6879_v2  ;;  %66 = vst [vmem:[#allocation2 + $0x98] sm:$0xff] %v6879_v2  ;;  %6062 = vmatprep.subr.bf16.mxu1 %v6399_v6  ;;  %v6404_v11 = vld [vmem:[%s12104_s3 + $0x10] sm:$0xff]   ;;  %v6407_v14 = vld [vmem:[%s12104_s3 + $0xd8] sm:$0xff]   ;;  %s7141_s23 = sld [smem:[#allocation6]]  ;;  %s7161_s28 = sld [smem:[#allocation3 + $0xb]] }
  0x22   :  { %68 = vst [vmem:[#allocation2 + $0xa8] sm:$0xff] %v6879_v2  ;;  %70 = vst [vmem:[#allocation2 + $0xb8] sm:$0xff] %v6879_v2  ;;  %v6405_v12 = vld [vmem:[%s12104_s3 + $0x90] sm:$0xff]   ;;  %v6408_v15 = vld [vmem:[%s12104_s3 + $0x18] sm:$0xff]   ;;  %v7048_v40 = vstv %s126_s11  ;;  %v7052_v42 = vstv %s5623_s12  ;;  %s7169_s29 = sld [smem:[#allocation3 + $0xc]]  ;;  %s7180_s7 = sld [smem:[#allocation3 + $0xd]] }
  0x23   :  { %72 = vst [vmem:[#allocation2 + $0xc8] sm:$0xff] %v6879_v2  ;;  %74 = vst [vmem:[#allocation2 + $0xd8] sm:$0xff] %v6879_v2  ;;  %6041 = vmatpush3.bf16.msra.mxu0 %v6400_v7  ;;  %v6409_v16 = vld [vmem:[%s12104_s3 + $0x98] sm:$0xff]   ;;  %v6410_v17 = vld [vmem:[%s12104_s3 + $0x60] sm:$0xff]   ;;  %v7063_v46 = vstv %s5624_s13  ;;  %v7071_v50 = vstv %s5625_s18  ;;  %s7188_s8 = sld [smem:[#allocation3 + $0xe]]  ;;  %s7194_s9 = sld [smem:[#allocation3 + $0xf]] }
  0x24   :  { %76 = vst [vmem:[#allocation2 + $0xe8] sm:$0xff] %v6879_v2  ;;  %78 = vst [vmem:[#allocation2 + $0xf8] sm:$0xff] %v6879_v2  ;;  %6063 = vmatpush3.bf16.msra.mxu1 %v6401_v8  ;;  %6042 = vmatprep.subr.bf16.mxu0 %v6402_v9  ;;  %v6411_v18 = vld [vmem:[%s12104_s3 + $0xe0] sm:$0xff]   ;;  %v6414_v21 = vld [vmem:[%s12104_s3 + $0x68] sm:$0xff]   ;;  %v7079_v55 = vstv %s5626_s25  ;;  %v7084_v58 = vstv %s5627_s2  ;;  %s7200_s10 = sld [smem:[#allocation3 + $0x10]]  ;;  %s7206_s11 = sld [smem:[#allocation3 + $0x11]] }
  0x25   :  { %6064 = vmatprep.subr.bf16.mxu1 %v6403_v10  ;;  %v6412_v19 = vld [vmem:[%s12104_s3 + $0x20] sm:$0xff]   ;;  %v6415_v22 = vld [vmem:[%s12104_s3 + $0xe8] sm:$0xff]   ;;  %v6418_v25 = vld [vmem:[%s12104_s3 + $0x70] sm:$0xff]   ;;  %v7086_v59 = vstv %s5628_s27  ;;  %s7159_s27 = sld [smem:[#allocation3 + $0xa]]  ;;  %vm293_vm0 = vcmask 785408   ;;  %s7284_s12 = sld [smem:[#allocation6 + $0x1]] }
  0x26   :  { %v6413_v20 = vld [vmem:[%s12104_s3 + $0xa0] sm:$0xff]   ;;  %v6416_v23 = vld [vmem:[%s12104_s3 + $0x28] sm:$0xff]   ;;  %v6419_v26 = vld [vmem:[%s12104_s3 + $0xf0] sm:$0xff]   ;;  %v7101_v2 = vstv %s5629_s30  ;;  %s7514_s20 = sld [smem:[#allocation3 + $0x12]]  ;;  %s7520_s21 = sld [smem:[#allocation3 + $0x13]]  ;;  %vm5575_vm1 = vcmask 523264  }
  0x27   :  { %6043 = vmatpush3.bf16.msra.mxu0 %v6404_v11  ;;  %v6417_v24 = vld [vmem:[%s12104_s3 + $0xa8] sm:$0xff]   ;;  %v6420_v27 = vld [vmem:[%s12104_s3 + $0x30] sm:$0xff]   ;;  %v6422_v29 = vld [vmem:[%s12104_s3 + $0x78] sm:$0xff]   ;;  %v7121_v7 = vstv %s7046_s6  ;;  %s7526_s22 = sld [smem:[#allocation3 + $0x14]]  ;;  %s7538_s25 = sld [smem:[#allocation3 + $0x16]] }
  0x28   :  { %6065 = vmatpush3.bf16.msra.mxu1 %v6405_v12  ;;  %6044 = vmatprep.subr.bf16.mxu0 %v6406_v13  ;;  %v6421_v28 = vld [vmem:[%s12104_s3 + $0xb0] sm:$0xff]   ;;  %v6423_v30 = vld [vmem:[%s12104_s3 + $0xf8] sm:$0xff]   ;;  %v7016_v33 = vld [vmem:[%s12101_s0 + $0x8] sm:$0xff]  ;;  %s7544_s26 = sld [smem:[#allocation3 + $0x17]]  ;;  %s7550_s1 = sld [smem:[#allocation3 + $0x18]] }
  0x29   :  { %6066 = vmatprep.subr.bf16.mxu1 %v6407_v14  ;;  %v6424_v31 = vld [vmem:[%s12104_s3 + $0x38] sm:$0xff]   ;;  %v7026_v35 = vld [vmem:[%s12101_s0 + $0x28] sm:$0xff]  ;;  %v6426_v39 = vld [vmem:[%s12104_s3 + $0x140] sm:$0xff]   ;;  %v137_v41 = vmul.f32 %v7048_v40, %v7016_v33  ;;  %s7556_s2 = sld [smem:[#allocation3 + $0x19]]  ;;  %s7721_s17 = sld [smem:[#allocation3 + $0x20]] }
  0x2a   :  { %v6425_v32 = vld [vmem:[%s12104_s3 + $0xb8] sm:$0xff]   ;;  %v7036_v37 = vld [vmem:[%s12101_s0 + $0x48] sm:$0xff]  ;;  %v181_v47 = vmul.f32 %v7026_v35, %v7052_v42  ;;  %v145_v49 = vmul.f32 %v7026_v35, %v7063_v46  ;;  %v6427_v57 = vld [vmem:[%s12104_s3 + $0x1c0] sm:$0xff]   ;;  %s7723_s18 = sld [smem:[#allocation3 + $0x21]]  ;;  %s7729_s19 = sld [smem:[#allocation3 + $0x22]] }
  0x2b   :  { %6045 = vmatpush3.bf16.msra.mxu0 %v6408_v15  ;;  %v7021_v34 = vld [vmem:[%s12101_s0 + $0x18] sm:$0xff]  ;;  %v7059_v44 = vld [vmem:[%s12101_s0 + $0x68] sm:$0xff]  ;;  %v215_v48 = vmul.f32 %v7036_v37, %v7048_v40  ;;  %v150_v54 = vmul.f32 %v7036_v37, %v7071_v50  ;;  %s7998_s13 = sld [smem:[#allocation6 + $0x3]]  ;;  %s8237_s30 = sld [smem:[#allocation3 + $0x2a]] }
  0x2c   :  { %6067 = vmatpush3.bf16.msra.mxu1 %v6409_v16  ;;  %6046 = vmatprep.subr.bf16.mxu0 %v6410_v17  ;;  %v7031_v36 = vld [vmem:[%s12101_s0 + $0x38] sm:$0xff]  ;;  %v179_v43 = vmul.f32 %v7021_v34, %v7048_v40  ;;  %v140_v45 = vmul.f32 %v7021_v34, %v7052_v42  ;;  %v221_v61 = vmul.f32 %v7059_v44, %v7063_v46  ;;  %v7095_v62 = vld [vmem:[%s12101_s0 + $0x88] sm:$0xff]  ;;  %s8239_s6 = sld [smem:[#allocation3 + $0x2b]]  ;;  %s8363_s16 = sld [smem:[#allocation3 + $0x35]] }
  0x2d   :  { %6068 = vmatprep.subr.bf16.mxu1 %v6411_v18  ;;  %v7041_v38 = vld [vmem:[%s12101_s0 + $0x58] sm:$0xff]  ;;  %v185_v51 = vmul.f32 %v7031_v36, %v7063_v46  ;;  %12225 = vst [vmem:[#allocation12_spill] sm:$0xff] %v7095_v62  ;;  %v160_v1 = vmul.f32 %v7059_v44, %v7084_v58  ;;  %v7116_v5 = vld [vmem:[%s12101_s0 + $0xa8] sm:$0xff]  ;;  %v165_v6 = vmul.f32 %v7095_v62, %v7086_v59  ;;  %s9197_s15 = sld [smem:[#allocation3 + $0x47]]  ;;  %s9575_s14 = sld [smem:[#allocation3 + $0x49]] }
  0x2e   :  { %v217_v52 = vmul.f32 %v7041_v38, %v7052_v42  ;;  %v142_v53 = vadd.f32 %v140_v45, %v137_v41  ;;  %v183_v56 = vadd.f32 %v181_v47, %v179_v43  ;;  %v189_v60 = vmul.f32 %v7041_v38, %v7071_v50  ;;  %v7106_v3 = vld [vmem:[%s12101_s0 + $0x78] sm:$0xff]  ;;  %12227 = vst [vmem:[#allocation14_spill] sm:$0xff] %v7116_v5  ;;  %v7133_v11 = vld [vmem:[%s12101_s0 + $0xc8] sm:$0xff] }
  0x2f   :  { %6047 = vmatpush3.bf16.msra.mxu0 %v6412_v19  ;;  %v155_v0 = vmul.f32 %v7041_v38, %v7079_v55  ;;  %v7111_v4 = vld [vmem:[%s12101_s0 + $0x98] sm:$0xff]  ;;  %v193_v9 = vmul.f32 %v7059_v44, %v7079_v55  ;;  %v175_v14 = vmul.f32 %v7116_v5, %v7121_v7  ;;  %v197_v15 = vmul.f32 %v7106_v3, %v7084_v58  ;;  %v7153_v17 = vld [vmem:[%s12101_s0 + $0xe8] sm:$0xff] }
  0x30   :  { %6069 = vmatpush3.bf16.msra.mxu1 %v6413_v20  ;;  %6048 = vmatprep.subr.bf16.mxu0 %v6414_v21  ;;  %v147_v63 = vadd.f32 %v145_v49, %v142_v53  ;;  %12226 = vst [vmem:[#allocation13_spill] sm:$0xff] %v7111_v4  ;;  %v187_v8 = vadd.f32 %v185_v51, %v183_v56  ;;  %v7128_v10 = vld [vmem:[%s12101_s0 + $0xb8] sm:$0xff] }
  0x31   :  { %6070 = vmatprep.subr.bf16.mxu1 %v6415_v22  ;;  %v170_v13 = vmul.f32 %v7111_v4, %v7101_v2  ;;  %v7148_v16 = vld [vmem:[%s12101_s0 + $0xd8] sm:$0xff]  ;;  %v201_v19 = vmul.f32 %v7111_v4, %v7086_v59  ;;  %v205_v20 = vmul.f32 %v7116_v5, %v7101_v2  ;;  %v219_v21 = vadd.f32 %v217_v52, %v215_v48 }
  0x32   :  { %v152_v12 = vadd.f32 %v150_v54, %v147_v63  ;;  %v191_v18 = vadd.f32 %v189_v60, %v187_v8  ;;  %v253_v41 = vmul.f32 %v7059_v44, %v7052_v42  ;;  %v245_v47 = vmul.f32 %v7153_v17, %v7121_v7 }
  0x33   :  { %6049 = vmatpush3.bf16.msra.mxu0 %v6416_v23  ;;  %v209_v23 = vmul.f32 %v7128_v10, %v7121_v7  ;;  %v257_v48 = vmul.f32 %v7106_v3, %v7063_v46  ;;  %v261_v52 = vmul.f32 %v7111_v4, %v7071_v50  ;;  %v265_v53 = vmul.f32 %v7116_v5, %v7079_v55 }
  0x34   :  { %6071 = vmatpush3.bf16.msra.mxu1 %v6417_v24  ;;  %6050 = vmatprep.subr.bf16.mxu0 %v6418_v25  ;;  %v157_v22 = vadd.f32 %v155_v0, %v152_v12  ;;  %v225_v24 = vmul.f32 %v7095_v62, %v7071_v50  ;;  %v229_v25 = vmul.f32 %v7111_v4, %v7079_v55  ;;  %v7216_v12 = vstv %s7159_s27  ;;  %s8217_s27 = sld [smem:[#allocation3 + $0x27]] }
  0x35   :  { %6072 = vmatprep.subr.bf16.mxu1 %v6419_v26  ;;  %v7174_v26 = vld [vmem:[%s12101_s0 + $0xf8] sm:$0xff]  ;;  %v273_v60 = vmul.f32 %v7148_v16, %v7086_v59  ;;  %v277_v0 = vmul.f32 %v7153_v17, %v7101_v2 }
  0x37   :  { %6051 = vmatpush3.bf16.msra.mxu0 %v6420_v27  ;;  %v195_v27 = vadd.f32 %v193_v9, %v191_v18  ;;  %v7213_v9 = vstv %s7143_s24  ;;  %s7532_s24 = sld [smem:[#allocation3 + $0x15]] }
  0x38   :  { %6073 = vmatpush3.bf16.msra.mxu1 %v6421_v28  ;;  %6052 = vmatprep.subr.bf16.mxu0 %v6422_v29  ;;  %v223_v28 = vadd.f32 %v221_v61, %v219_v21  ;;  %v233_v29 = vmul.f32 %v7116_v5, %v7084_v58 }
  0x39   :  { %6074 = vmatprep.subr.bf16.mxu1 %v6423_v30  ;;  %v237_v30 = vmul.f32 %v7133_v11, %v7086_v59  ;;  %v199_v43 = vadd.f32 %v197_v15, %v195_v27 }
  0x3a   :  { %v227_v45 = vadd.f32 %v225_v24, %v223_v28  ;;  %v7226_v24 = vstv %s7169_s29  ;;  %s8223_s29 = sld [smem:[#allocation3 + $0x29]] }
  0x3b   :  { %6053 = vmatpush3.bf16.msra.mxu0 %v6424_v31  ;;  %v162_v31 = vadd.f32 %v160_v1, %v157_v22  ;;  %v203_v54 = vadd.f32 %v201_v19, %v199_v43  ;;  %v281_v1 = vmul.f32 %v7174_v26, %v7121_v7  ;;  %v309_v19 = vmul.f32 %v7021_v34, %v7216_v12 }
  0x3c   :  { %6075 = vmatpush3.bf16.msra.mxu1 %v6425_v32  ;;  %6082 = vmatprep.subr.bf16.mxu0 %v6426_v39  ;;  %v241_v32 = vmul.f32 %v7148_v16, %v7101_v2  ;;  %v251_v39 = vmul.f32 %v7041_v38, %v7048_v40  ;;  %v231_v56 = vadd.f32 %v229_v25, %v227_v45 }
  0x3d   :  { %6104 = vmatprep.subr.bf16.mxu1 %v6427_v57  ;;  %v167_v49 = vadd.f32 %v165_v6, %v162_v31  ;;  %v269_v57 = vmul.f32 %v7128_v10, %v7084_v58  ;;  %v207_v6 = vadd.f32 %v205_v20, %v203_v54  ;;  %v7223_v20 = vstv %s7161_s28  ;;  %s8221_s28 = sld [smem:[#allocation3 + $0x28]] }
  0x3e   :  { %v255_v51 = vadd.f32 %v253_v41, %v251_v39  ;;  %v235_v8 = vadd.f32 %v233_v29, %v231_v56  ;;  %v319_v28 = vmul.f32 %v7036_v37, %v7226_v24  ;;  %v7233_v39 = vstv %s7180_s7  ;;  %s8245_s7 = sld [smem:[#allocation3 + $0x2c]] }
  0x3f   :  { %v172_v61 = vadd.f32 %v170_v13, %v167_v49  ;;  %v306_v13 = vmul.f32 %v7213_v9, %v7016_v33  ;;  %v211_v21 = vadd.f32 %v209_v23, %v207_v6  ;;  %v7236_v23 = vstv %s7188_s8  ;;  %s7696_s8 = sld [smem:[#allocation3 + $0x1e]] }
  0x40   :  { %v259_v63 = vadd.f32 %v257_v48, %v255_v51  ;;  %v239_v22 = vadd.f32 %v237_v30, %v235_v8  ;;  %v12107_v41 = vstv %s7141_s23  ;;  %v324_v45 = vmul.f32 %v7041_v38, %v7233_v39 }
  0x41   :  { %v177_v15 = vadd.f32 %v175_v14, %v172_v61  ;;  %v311_v27 = vadd.f32 %v309_v19, %v306_v13  ;;  %v314_v14 = vmul.f32 %v7026_v35, %v7223_v20  ;;  %v7242_v49 = vstv %s7194_s9  ;;  %s7698_s9 = sld [smem:[#allocation3 + $0x1f]] }
  0x42   :  { %v263_v18 = vadd.f32 %v261_v52, %v259_v63  ;;  %v243_v31 = vadd.f32 %v241_v32, %v239_v22  ;;  %v7245_v51 = vstv %s7200_s10  ;;  %v7248_v52 = vstv %s7206_s11  ;;  %s8263_s10 = sld [smem:[#allocation3 + $0x2d]]  ;;  %s8265_s11 = sld [smem:[#allocation3 + $0x2e]] }
  0x43   :  { %v213_v29 = vmax.f32 %v177_v15, %v211_v21  ;;  %v316_v43 = vadd.f32 %v314_v14, %v311_v27  ;;  %v329_v32 = vmul.f32 %v7059_v44, %v7236_v23  ;;  %v334_v56 = vmul.f32 %v7095_v62, %v7242_v49 }
  0x44   :  { %v267_v25 = vadd.f32 %v265_v53, %v263_v18  ;;  %v247_v48 = vadd.f32 %v245_v47, %v243_v31  ;;  %v339_v61 = vmul.f32 %v7111_v4, %v7245_v51  ;;  %v348_v47 = vmul.f32 %v7021_v34, %v7213_v9 }
  0x45   :  { %v321_v54 = vadd.f32 %v319_v28, %v316_v43  ;;  %v350_v63 = vmul.f32 %v7026_v35, %v7216_v12  ;;  %v344_v8 = vmul.f32 %v7116_v5, %v7248_v52  ;;  %v354_v15 = vmul.f32 %v7031_v36, %v7223_v20 }
  0x46   :  { %v271_v30 = vadd.f32 %v269_v57, %v267_v25  ;;  %v249_v57 = vmax.f32 %v213_v29, %v247_v48  ;;  %v358_v13 = vmul.f32 %v7041_v38, %v7226_v24  ;;  %v362_v19 = vmul.f32 %v7059_v44, %v7233_v39 }
  0x47   :  { %v352_v18 = vadd.f32 %v350_v63, %v348_v47  ;;  %v366_v21 = vmul.f32 %v7106_v3, %v7236_v23  ;;  %v374_v27 = vmul.f32 %v7116_v5, %v7245_v51  ;;  %v384_v14 = vmul.f32 %v7036_v37, %v7213_v9 }
  0x48   :  { %v275_v53 = vadd.f32 %v273_v60, %v271_v30  ;;  %v326_v60 = vadd.f32 %v324_v45, %v321_v54  ;;  %v386_v28 = vmul.f32 %v7041_v38, %v7216_v12  ;;  %v390_v29 = vmul.f32 %v7059_v44, %v7223_v20 }
  0x49   :  { %v356_v36 = vadd.f32 %v354_v15, %v352_v18  ;;  %v378_v30 = vmul.f32 %v7128_v10, %v7248_v52  ;;  %v394_v43 = vmul.f32 %v7095_v62, %v7226_v24  ;;  %v398_v37 = vmul.f32 %v7111_v4, %v7233_v39  ;;  %v7303_v15 = vld [vmem:[%s12101_s0] sm:$0xff] }
  0x4a   :  { %v279_v6 = vadd.f32 %v277_v0, %v275_v53  ;;  %v331_v25 = vadd.f32 %v329_v32, %v326_v60  ;;  %v370_v0 = vmul.f32 %v7111_v4, %v7242_v49  ;;  %v388_v48 = vadd.f32 %v386_v28, %v384_v14 }
  0x4b   :  { %v360_v45 = vadd.f32 %v358_v13, %v356_v36  ;;  %v402_v53 = vmul.f32 %v7116_v5, %v7236_v23  ;;  %v422_v60 = vmul.f32 %v7059_v44, %v7216_v12  ;;  %v426_v13 = vmul.f32 %v7106_v3, %v7223_v20 }
  0x4c   :  { %v283_v22 = vadd.f32 %v281_v1, %v279_v6  ;;  %v336_v1 = vadd.f32 %v334_v56, %v331_v25  ;;  %v406_v56 = vmul.f32 %v7133_v11, %v7242_v49  ;;  %v392_v63 = vadd.f32 %v390_v29, %v388_v48  ;;  %v7335_v29 = vld [vmem:[%s12101_s0 + $0x40] sm:$0xff] }
  0x4d   :  { %v364_v47 = vadd.f32 %v362_v19, %v360_v45  ;;  %v420_v6 = vmul.f32 %v7041_v38, %v7213_v9  ;;  %v414_v11 = vmul.f32 %v7153_v17, %v7248_v52  ;;  %v7314_v38 = vld [vmem:[%s12101_s0 + $0x10] sm:$0xff]  ;;  %v430_v36 = vmul.f32 %v7111_v4, %v7226_v24 }
  0x4e   :  { %v285_v31 = vmax.f32 %v249_v57, %v283_v22  ;;  %v341_v32 = vadd.f32 %v339_v61, %v336_v1  ;;  %v410_v57 = vmul.f32 %v7148_v16, %v7245_v51  ;;  %v396_v22 = vadd.f32 %v394_v43, %v392_v63  ;;  %v7364_v63 = vld [vmem:[%s12101_s0 + $0x80] sm:$0xff] }
  0x4f   :  { %v368_v19 = vadd.f32 %v366_v21, %v364_v47  ;;  %v424_v25 = vadd.f32 %v422_v60, %v420_v6  ;;  %v434_v3 = vmul.f32 %v7116_v5, %v7233_v39  ;;  %v438_v14 = vmul.f32 %v7128_v10, %v7236_v23  ;;  %v7342_v10 = vld [vmem:[%s12101_s0 + $0x30] sm:$0xff] }
  0x50   :  { %v289_v54 = vadd.f32 %v12107_v41, %v285_v31  ;;  %v7305_v18 = vadd.f32 %v344_v8, %v341_v32  ;;  %v7321_v8 = vld [vmem:[%s12101_s0 + $0x20] sm:$0xff]  ;;  %v442_v21 = vmul.f32 %v7148_v16, %v7242_v49  ;;  %v446_v28 = vmul.f32 %v7153_v17, %v7245_v51  ;;  %v7347_v16 = vld [vmem:[%s12101_s0 + $0x50] sm:$0xff] }
  0x51   :  { %v372_v31 = vadd.f32 %v370_v0, %v368_v19  ;;  %v400_v1 = vadd.f32 %v398_v37, %v396_v22  ;;  %v428_v43 = vadd.f32 %v426_v13, %v424_v25  ;;  %v450_v45 = vmul.f32 %v7174_v26, %v7248_v52  ;;  %v7353_v0 = vld [vmem:[%s12101_s0 + $0x60] sm:$0xff]  ;;  %v7371_v60 = vld [vmem:[%s12101_s0 + $0x90] sm:$0xff] }
  0x52   :  { %v291_v61 = vmax.f32 %v289_v54, 0.0  ;;  %v136_v48 = vmul.f32 %v7048_v40, %v7303_v15  ;;  %v139_v26 = vmul.f32 %v7314_v38, %v7052_v42  ;;  %v144_v37 = vmul.f32 %v7321_v8, %v7063_v46 }
  0x53   :  { %v376_v54 = vadd.f32 %v374_v27, %v372_v31  ;;  %v404_v32 = vadd.f32 %v402_v53, %v400_v1  ;;  %v432_v47 = vadd.f32 %v430_v36, %v428_v43  ;;  %v149_v6 = vmul.f32 %v7335_v29, %v7071_v50  ;;  %v7384_v31 = vld [vmem:[%s12101_s0 + $0xa0] sm:$0xff] }
  0x54   :  { %294 = vst.msk [vmem:[#allocation2 + $0x8] sm:$0xff] %vm293_vm0, %v291_v61  ;;  %v141_v61 = vadd.f32 %v139_v26, %v136_v48  ;;  %v154_v13 = vmul.f32 %v7347_v16, %v7079_v55  ;;  %v159_v27 = vmul.f32 %v7353_v0, %v7084_v58  ;;  %v164_v53 = vmul.f32 %v7364_v63, %v7086_v59 }
  0x55   :  { %v380_v19 = vadd.f32 %v378_v30, %v376_v54  ;;  %v408_v22 = vadd.f32 %v406_v56, %v404_v32  ;;  %v436_v25 = vadd.f32 %v434_v3, %v432_v47  ;;  %v169_v36 = vmul.f32 %v7371_v60, %v7101_v2 }
  0x56   :  { %v146_v1 = vadd.f32 %v144_v37, %v141_v61  ;;  %v178_v43 = vmul.f32 %v7314_v38, %v7048_v40  ;;  %v180_v48 = vmul.f32 %v7321_v8, %v7052_v42  ;;  %v184_v30 = vmul.f32 %v7342_v10, %v7063_v46  ;;  %v7398_v37 = vld [vmem:[%s12101_s0 + $0x70] sm:$0xff] }
  0x57   :  { %v382_v3 = vmax.f32 %v7305_v18, %v380_v19  ;;  %v412_v26 = vadd.f32 %v410_v57, %v408_v22  ;;  %v440_v54 = vadd.f32 %v438_v14, %v436_v25  ;;  %v174_v32 = vmul.f32 %v7384_v31, %v7121_v7 }
  0x58   :  { %v151_v61 = vadd.f32 %v149_v6, %v146_v1  ;;  %v182_v41 = vadd.f32 %v180_v48, %v178_v43  ;;  %v188_v17 = vmul.f32 %v7347_v16, %v7071_v50  ;;  %v192_v57 = vmul.f32 %v7353_v0, %v7079_v55 }
  0x59   :  { %v416_v5 = vadd.f32 %v414_v11, %v412_v26  ;;  %v444_v4 = vadd.f32 %v442_v21, %v440_v54  ;;  %v196_v18 = vmul.f32 %v7398_v37, %v7084_v58  ;;  %v200_v22 = vmul.f32 %v7371_v60, %v7086_v59  ;;  %v7413_v11 = vld [vmem:[%s12101_s0 + $0xb0] sm:$0xff]  ;;  %v7418_v21 = vld [vmem:[%s12101_s0 + $0xc0] sm:$0xff] }
  0x5a   :  { %v156_v14 = vadd.f32 %v154_v13, %v151_v61  ;;  %v186_v19 = vadd.f32 %v184_v30, %v182_v41  ;;  %v204_v6 = vmul.f32 %v7384_v31, %v7101_v2  ;;  %v214_v41 = vmul.f32 %v7335_v29, %v7048_v40 }
  0x5b   :  { %v2816_v56 = vld [vmem:[#allocation2 + $0x8] sm:$0xff]  ;;  %v418_v25 = vmax.f32 %v382_v3, %v416_v5  ;;  %v448_v1 = vadd.f32 %v446_v28, %v444_v4  ;;  %v216_v13 = vmul.f32 %v7347_v16, %v7052_v42  ;;  %v7427_v4 = vld [vmem:[%s12101_s0 + $0xd0] sm:$0xff]  ;;  %v208_v43 = vmul.f32 %v7413_v11, %v7121_v7 }
  0x5c   :  { %v2848_v47 = vpack.c.bf16 %v2816_v56, %v2816_v56  ;;  %v161_v5 = vadd.f32 %v159_v27, %v156_v14  ;;  %v190_v28 = vadd.f32 %v188_v17, %v186_v19  ;;  %v220_v48 = vmul.f32 %v7353_v0, %v7063_v46  ;;  %v7440_v27 = vld [vmem:[%s12101_s0 + $0xe0] sm:$0xff] }
  0x5d   :  { %v452_v30 = vadd.f32 %v450_v45, %v448_v1  ;;  %v218_v56 = vadd.f32 %v216_v13, %v214_v41  ;;  %v224_v3 = vmul.f32 %v7364_v63, %v7071_v50  ;;  %v228_v26 = vmul.f32 %v7371_v60, %v7079_v55 }
  0x5e   :  { %4966 = vmatprep.mubr.bf16.mxu0 %v2848_v47  ;;  %v166_v17 = vadd.f32 %v164_v53, %v161_v5  ;;  %v194_v54 = vadd.f32 %v192_v57, %v190_v28  ;;  %v232_v47 = vmul.f32 %v7384_v31, %v7084_v58  ;;  %v236_v45 = vmul.f32 %v7418_v21, %v7086_v59 }
  0x5f   :  { %v454_v61 = vmax.f32 %v418_v25, %v452_v30  ;;  %v222_v14 = vadd.f32 %v220_v48, %v218_v56  ;;  %v240_v19 = vmul.f32 %v7427_v4, %v7101_v2  ;;  %v250_v1 = vmul.f32 %v7347_v16, %v7048_v40  ;;  %v7463_v40 = vld [vmem:[%s12101_s0 + $0xf0] sm:$0xff] }
  0x60   :  { %v171_v41 = vadd.f32 %v169_v36, %v166_v17  ;;  %v198_v13 = vadd.f32 %v196_v18, %v194_v54  ;;  %v252_v53 = vmul.f32 %v7353_v0, %v7052_v42  ;;  %v256_v57 = vmul.f32 %v7398_v37, %v7063_v46 }
  0x61   :  { %v12228_v5 = vstv %s7284_s12  ;;  %v226_v62 = vadd.f32 %v224_v3, %v222_v14  ;;  %v244_v25 = vmul.f32 %v7440_v27, %v7121_v7  ;;  %v260_v48 = vmul.f32 %v7371_v60, %v7071_v50 }
  0x62   :  { %v458_v28 = vadd.f32 %v12228_v5, %v454_v61  ;;  %v176_v36 = vadd.f32 %v174_v32, %v171_v41  ;;  %v202_v18 = vadd.f32 %v200_v22, %v198_v13  ;;  %v254_v42 = vadd.f32 %v252_v53, %v250_v1 }
  0x63   :  { %v264_v46 = vmul.f32 %v7384_v31, %v7079_v55  ;;  %v230_v56 = vadd.f32 %v228_v26, %v226_v62  ;;  %v268_v3 = vmul.f32 %v7413_v11, %v7084_v58  ;;  %v272_v17 = vmul.f32 %v7427_v4, %v7086_v59 }
  0x64   :  { %v460_v30 = vmax.f32 %v458_v28, 0.0  ;;  %v206_v50 = vadd.f32 %v204_v6, %v202_v18  ;;  %v258_v54 = vadd.f32 %v256_v57, %v254_v42  ;;  %v276_v61 = vmul.f32 %v7440_v27, %v7101_v2 }
  0x65   :  { %v305_v32 = vmul.f32 %v7213_v9, %v7303_v15  ;;  %v234_v22 = vadd.f32 %v232_v47, %v230_v56  ;;  %v280_v55 = vmul.f32 %v7463_v40, %v7121_v7  ;;  %v308_v58 = vmul.f32 %v7314_v38, %v7216_v12 }
  0x66   :  { %462 = vst.msk [vmem:[#allocation2 + $0x18] sm:$0xff] %vm293_vm0, %v460_v30  ;;  %v313_v59 = vmul.f32 %v7321_v8, %v7223_v20  ;;  %v210_v62 = vadd.f32 %v208_v43, %v206_v50  ;;  %v262_v6 = vadd.f32 %v260_v48, %v258_v54  ;;  %v318_v2 = vmul.f32 %v7335_v29, %v7226_v24 }
  0x67   :  { %v323_v15 = vmul.f32 %v7347_v16, %v7233_v39  ;;  %v238_v26 = vadd.f32 %v236_v45, %v234_v22  ;;  %v310_v14 = vadd.f32 %v308_v58, %v305_v32  ;;  %v328_v47 = vmul.f32 %v7353_v0, %v7236_v23 }
  0x68   :  { %v333_v7 = vmul.f32 %v7364_v63, %v7242_v49  ;;  %v212_v1 = vmax.f32 %v176_v36, %v210_v62  ;;  %v266_v41 = vadd.f32 %v264_v46, %v262_v6  ;;  %v338_v43 = vmul.f32 %v7371_v60, %v7245_v51 }
  0x69   :  { %v347_v13 = vmul.f32 %v7314_v38, %v7213_v9  ;;  %v242_v53 = vadd.f32 %v240_v19, %v238_v26  ;;  %v315_v57 = vadd.f32 %v313_v59, %v310_v14  ;;  %v349_v45 = vmul.f32 %v7321_v8, %v7216_v12 }
  0x6a   :  { %v353_v5 = vmul.f32 %v7342_v10, %v7223_v20  ;;  %v270_v28 = vadd.f32 %v268_v3, %v266_v41  ;;  %v343_v48 = vmul.f32 %v7384_v31, %v7248_v52  ;;  %v357_v36 = vmul.f32 %v7347_v16, %v7226_v24 }
  0x6b   :  { %v361_v18 = vmul.f32 %v7353_v0, %v7233_v39  ;;  %v246_v42 = vadd.f32 %v244_v25, %v242_v53  ;;  %v320_v38 = vadd.f32 %v318_v2, %v315_v57  ;;  %v351_v19 = vadd.f32 %v349_v45, %v347_v13 }
  0x6c   :  { %v365_v46 = vmul.f32 %v7398_v37, %v7236_v23  ;;  %v274_v30 = vadd.f32 %v272_v17, %v270_v28  ;;  %v369_v10 = vmul.f32 %v7371_v60, %v7242_v49  ;;  %v373_v56 = vmul.f32 %v7384_v31, %v7245_v51 }
  0x6d   :  { %v2818_v8 = vld [vmem:[#allocation2 + $0x18] sm:$0xff]  ;;  %v383_v3 = vmul.f32 %v7335_v29, %v7213_v9  ;;  %v325_v54 = vadd.f32 %v323_v15, %v320_v38  ;;  %v355_v32 = vadd.f32 %v353_v5, %v351_v19  ;;  %v377_v25 = vmul.f32 %v7413_v11, %v7248_v52  ;;  %v6430_v19 = vld [vmem:[%s12104_s3 + $0x148] sm:$0xff]  }
  0x6e   :  { %v2850_v50 = vpack.c.bf16 %v2818_v8, %v2818_v8  ;;  %v248_v22 = vmax.f32 %v212_v1, %v246_v42  ;;  %v278_v58 = vadd.f32 %v276_v61, %v274_v30  ;;  %v385_v17 = vmul.f32 %v7347_v16, %v7216_v12 }
  0x6f   :  { %v389_v59 = vmul.f32 %v7353_v0, %v7223_v20  ;;  %v330_v29 = vadd.f32 %v328_v47, %v325_v54  ;;  %v359_v62 = vadd.f32 %v357_v36, %v355_v32  ;;  %v393_v6 = vmul.f32 %v7364_v63, %v7226_v24  ;;  %v7604_v54 = vld [vmem:[%s12101_s0 + $0x48] sm:$0xff] }
  0x70   :  { %5006 = vmatprep.mubr.bf16.mxu1 %v2850_v50  ;;  %v397_v2 = vmul.f32 %v7371_v60, %v7233_v39  ;;  %v282_v61 = vadd.f32 %v280_v55, %v278_v58  ;;  %v387_v15 = vadd.f32 %v385_v17, %v383_v3  ;;  %v401_v26 = vmul.f32 %v7384_v31, %v7236_v23  ;;  %v7617_v58 = vld [vmem:[%s12101_s0 + $0x58] sm:$0xff] }
  0x71   :  { %v405_v14 = vmul.f32 %v7418_v21, %v7242_v49  ;;  %v335_v47 = vadd.f32 %v333_v7, %v330_v29  ;;  %v363_v1 = vadd.f32 %v361_v18, %v359_v62  ;;  %v409_v63 = vmul.f32 %v7427_v4, %v7245_v51 }
  0x72   :  { %v419_v41 = vmul.f32 %v7347_v16, %v7213_v9  ;;  %v284_v55 = vmax.f32 %v248_v22, %v282_v61  ;;  %v391_v13 = vadd.f32 %v389_v59, %v387_v15  ;;  %v421_v53 = vmul.f32 %v7353_v0, %v7216_v12  ;;  %v6434_v22 = vld [vmem:[%s12104_s3 + $0x150] sm:$0xff]  }
  0x73   :  { %v425_v21 = vmul.f32 %v7398_v37, %v7223_v20  ;;  %v340_v7 = vadd.f32 %v338_v43, %v335_v47  ;;  %v367_v57 = vadd.f32 %v365_v46, %v363_v1  ;;  %v413_v45 = vmul.f32 %v7440_v27, %v7248_v52  ;;  %v12230_v47 = vld [vmem:[#allocation12_spill] sm:$0xff] }
  0x74   :  { %v429_v9 = vmul.f32 %v7371_v60, %v7226_v24  ;;  %v12229_v16 = vstv %s7141_s23  ;;  %v395_v28 = vadd.f32 %v393_v6, %v391_v13  ;;  %v423_v12 = vadd.f32 %v421_v53, %v419_v41  ;;  %s7564_s23 = sld [smem:[#allocation3 + $0x1a]]  ;;  %v7654_v53 = vld [vmem:[%s12101_s0 + $0x28] sm:$0xff] }
  0x75   :  { %v288_v5 = vadd.f32 %v12229_v16, %v284_v55  ;;  %v433_v20 = vmul.f32 %v7384_v31, %v7233_v39  ;;  %v7558_v0 = vadd.f32 %v343_v48, %v340_v7  ;;  %v371_v37 = vadd.f32 %v369_v10, %v367_v57  ;;  %v6428_v48 = vld [vmem:[%s12104_s3 + $0x100] sm:$0xff]   ;;  %v7647_v55 = vld [vmem:[%s12101_s0 + $0x18] sm:$0xff] }
  0x76   :  { %v437_v24 = vmul.f32 %v7413_v11, %v7236_v23  ;;  %v441_v60 = vmul.f32 %v7427_v4, %v7242_v49  ;;  %v399_v36 = vadd.f32 %v397_v2, %v395_v28  ;;  %v427_v18 = vadd.f32 %v425_v21, %v423_v12  ;;  %v7661_v7 = vld [vmem:[%s12101_s0 + $0x38] sm:$0xff] }
  0x77   :  { %v290_v43 = vmax.f32 %v288_v5, 0.0  ;;  %v445_v39 = vmul.f32 %v7440_v27, %v7245_v51  ;;  %v375_v31 = vadd.f32 %v373_v56, %v371_v37  ;;  %v7572_v42 = vstv %s7514_s20  ;;  %v12232_v16 = vld [vmem:[#allocation14_spill] sm:$0xff]  ;;  %v7685_v37 = vld [vmem:[%s12101_s0 + $0x68] sm:$0xff]  ;;  %s7731_s20 = sld [smem:[#allocation3 + $0x23]] }
  0x78   :  { %v7575_v23 = vstv %s7520_s21  ;;  %v7578_v49 = vstv %s7526_s22  ;;  %v403_v4 = vadd.f32 %v401_v26, %v399_v36  ;;  %v431_v38 = vadd.f32 %v429_v9, %v427_v18  ;;  %v6436_v26 = vld [vmem:[%s12104_s3 + $0x110] sm:$0xff]   ;;  %v6440_v12 = vld [vmem:[%s12104_s3 + $0x118] sm:$0xff]   ;;  %s8315_s22 = sld [smem:[#allocation3 + $0x33]]  ;;  %s9599_s21 = sld [smem:[#allocation3 + $0x4c]] }
  0x79   :  { %v2847_v11 = vpack.c.bf16 %v290_v43, %v290_v43  ;;  %v474_v51 = vmul.f32 %v7572_v42, %v7016_v33  ;;  %v379_v27 = vadd.f32 %v377_v25, %v375_v31  ;;  %v477_v46 = vmul.f32 %v7021_v34, %v7575_v23  ;;  %v6432_v34 = vld [vmem:[%s12104_s3 + $0x108] sm:$0xff]   ;;  %v6442_v18 = vld [vmem:[%s12104_s3 + $0x160] sm:$0xff]  }
  0x7a   :  { %v482_v8 = vmul.f32 %v7026_v35, %v7578_v49  ;;  %v7590_v30 = vstv %s7532_s24  ;;  %v407_v10 = vadd.f32 %v405_v14, %v403_v4  ;;  %v435_v56 = vadd.f32 %v433_v20, %v431_v38  ;;  %v6438_v14 = vld [vmem:[%s12104_s3 + $0x158] sm:$0xff]   ;;  %s8038_s24 = sld [smem:[#allocation3 + $0x24]] }
  0x7b   :  { %4967 = vmatmul.mubr.bf16.vlgmr.msra.gmra.mrb[0].mxu0 %v2847_v11  ;;  %v449_v3 = vmul.f32 %v7463_v40, %v7248_v52  ;;  %v7595_v50 = vstv %s7538_s25  ;;  %v381_v33 = vmax.f32 %v7558_v0, %v379_v27  ;;  %v479_v35 = vadd.f32 %v477_v46, %v474_v51  ;;  %s8215_s25 = sld [smem:[#allocation3 + $0x26]] }
  0x7c   :  { %6083 = vmatpush3.bf16.msra.mxu0 %v6428_v48  ;;  %v487_v52 = vmul.f32 %v7604_v54, %v7590_v30  ;;  %v7609_v40 = vstv %s7544_s26  ;;  %v411_v32 = vadd.f32 %v409_v63, %v407_v10  ;;  %v439_v25 = vadd.f32 %v437_v24, %v435_v56  ;;  %v12231_v63 = vld [vmem:[#allocation13_spill] sm:$0xff]  ;;  %s7665_s26 = sld [smem:[#allocation6 + $0x2]]  ;;  %v7713_v48 = vld [vmem:[%s12101_s0 + $0xa8] sm:$0xff] }
  0x7d   :  { %6084 = vmatprep.subr.bf16.mxu0 %v6430_v19  ;;  %v492_v17 = vmul.f32 %v7617_v58, %v7595_v50  ;;  %v7622_v59 = vstv %s7550_s1  ;;  %v484_v29 = vadd.f32 %v482_v8, %v479_v35  ;;  %v497_v62 = vmul.f32 %v7059_v44, %v7609_v40  ;;  %s7667_s1 = sld [smem:[#allocation3 + $0x1b]]  ;;  %v7736_v8 = vld [vmem:[%s12101_s0 + $0xb8] sm:$0xff]  ;;  %v7745_v56 = vld [vmem:[%s12101_s0 + $0x88] sm:$0xff] }
  0x7e   :  { %v7627_v6 = vstv %s7556_s2  ;;  %v7630_v2 = vstv %s7564_s23  ;;  %v415_v61 = vadd.f32 %v413_v45, %v411_v32  ;;  %v443_v15 = vadd.f32 %v441_v60, %v439_v25  ;;  %s7675_s2 = sld [smem:[#allocation3 + $0x1c]]  ;;  %s7677_s23 = sld [smem:[#allocation3 + $0x1d]]  ;;  %v7692_v60 = vld [vmem:[%s12101_s0 + $0x78] sm:$0xff] }
  0x7f   :  { %v502_v1 = vmul.f32 %v12230_v47, %v7622_v59  ;;  %v7642_v44 = vmul.f32 %v12231_v63, %v7627_v6  ;;  %v489_v41 = vadd.f32 %v487_v52, %v484_v29  ;;  %v516_v13 = vmul.f32 %v7647_v55, %v7572_v42  ;;  %v7761_v29 = vld [vmem:[%s12101_s0 + $0xc8] sm:$0xff] }
  0x80   :  { %6085 = vmatpush3.bf16.msra.mxu0 %v6432_v34  ;;  %v518_v21 = vmul.f32 %v7654_v53, %v7575_v23  ;;  %v522_v57 = vmul.f32 %v7661_v7, %v7578_v49  ;;  %v417_v45 = vmax.f32 %v381_v33, %v415_v61  ;;  %v447_v9 = vadd.f32 %v445_v39, %v443_v15  ;;  %v7706_v39 = vld [vmem:[%s12101_s0 + $0x98] sm:$0xff]  ;;  %v6444_v34 = vld [vmem:[%s12104_s3 + $0x120] sm:$0xff]  }
  0x81   :  { %6086 = vmatprep.subr.bf16.mxu0 %v6434_v22  ;;  %v7671_v5 = vmul.f32 %v12232_v16, %v7630_v2  ;;  %v526_v28 = vmul.f32 %v7617_v58, %v7590_v30  ;;  %v494_v20 = vadd.f32 %v492_v17, %v489_v41  ;;  %v530_v24 = vmul.f32 %v7685_v37, %v7595_v50  ;;  %v7768_v61 = vld [vmem:[%s12101_s0 + $0xd8] sm:$0xff] }
  0x82   :  { %v520_v0 = vadd.f32 %v518_v21, %v516_v13  ;;  %v534_v43 = vmul.f32 %v7692_v60, %v7609_v40  ;;  %v451_v36 = vadd.f32 %v449_v3, %v447_v9  ;;  %v538_v31 = vmul.f32 %v7706_v39, %v7622_v59  ;;  %v6431_v21 = vld [vmem:[%s12104_s3 + $0x1c8] sm:$0xff]  }
  0x83   :  { %v7717_v11 = vmul.f32 %v7713_v48, %v7627_v6  ;;  %v552_v4 = vmul.f32 %v7604_v54, %v7572_v42  ;;  %v499_v38 = vadd.f32 %v497_v62, %v494_v20  ;;  %v554_v51 = vmul.f32 %v7617_v58, %v7575_v23 }
  0x84   :  { %6087 = vmatpush3.bf16.msra.mxu0 %v6436_v26  ;;  %v524_v19 = vadd.f32 %v522_v57, %v520_v0  ;;  %v558_v27 = vmul.f32 %v7685_v37, %v7578_v49  ;;  %v453_v46 = vmax.f32 %v417_v45, %v451_v36  ;;  %v7740_v10 = vmul.f32 %v7736_v8, %v7630_v2  ;;  %v6446_v57 = vld [vmem:[%s12104_s3 + $0x168] sm:$0xff]  }
  0x85   :  { %6088 = vmatprep.subr.bf16.mxu0 %v6438_v14  ;;  %v562_v3 = vmul.f32 %v7745_v56, %v7590_v30  ;;  %v566_v33 = vmul.f32 %v7706_v39, %v7595_v50  ;;  %v504_v35 = vadd.f32 %v502_v1, %v499_v38  ;;  %v556_v32 = vadd.f32 %v554_v51, %v552_v4  ;;  %v6429_v14 = vld [vmem:[%s12104_s3 + $0x180] sm:$0xff]   ;;  %v7791_v45 = vld [vmem:[%s12101_s0 + $0xe8] sm:$0xff] }
  0x86   :  { %v528_v52 = vadd.f32 %v526_v28, %v524_v19  ;;  %v570_v25 = vmul.f32 %v7713_v48, %v7609_v40  ;;  %v12233_v22 = vstv %s7284_s12  ;;  %v574_v62 = vmul.f32 %v7761_v29, %v7622_v59  ;;  %v6448_v28 = vld [vmem:[%s12104_s3 + $0x128] sm:$0xff]   ;;  %s8247_s12 = sld [smem:[#allocation6 + $0x4]] }
  0x87   :  { %v457_v17 = vadd.f32 %v12233_v22, %v453_v46  ;;  %v7772_v15 = vmul.f32 %v7768_v61, %v7627_v6  ;;  %v588_v26 = vmul.f32 %v7617_v58, %v7572_v42  ;;  %v509_v47 = vadd.f32 %v7642_v44, %v504_v35  ;;  %v6435_v46 = vld [vmem:[%s12104_s3 + $0x1d0] sm:$0xff]  }
  0x88   :  { %6089 = vmatpush3.bf16.msra.mxu0 %v6440_v12  ;;  %v532_v1 = vadd.f32 %v530_v24, %v528_v52  ;;  %v560_v63 = vadd.f32 %v558_v27, %v556_v32  ;;  %v590_v41 = vmul.f32 %v7685_v37, %v7575_v23  ;;  %v7795_v44 = vmul.f32 %v7791_v45, %v7630_v2  ;;  %v6452_v32 = vld [vmem:[%s12104_s3 + $0x130] sm:$0xff]  }
  0x89   :  { %v459_v13 = vmax.f32 %v457_v17, 0.0  ;;  %6090 = vmatprep.subr.bf16.mxu0 %v6442_v18  ;;  %v594_v9 = vmul.f32 %v7692_v60, %v7578_v49  ;;  %v598_v16 = vmul.f32 %v7706_v39, %v7590_v30  ;;  %v602_v24 = vmul.f32 %v7713_v48, %v7595_v50 }
  0x8a   :  { %v536_v12 = vadd.f32 %v534_v43, %v532_v1  ;;  %v564_v20 = vadd.f32 %v562_v3, %v560_v63  ;;  %v592_v0 = vadd.f32 %v590_v41, %v588_v26  ;;  %v7807_v18 = vadd.f32 %v7671_v5, %v509_v47  ;;  %v6433_v43 = vld [vmem:[%s12104_s3 + $0x188] sm:$0xff]   ;;  %v6450_v3 = vld [vmem:[%s12104_s3 + $0x170] sm:$0xff]  }
  0x8b   :  { %v2849_v36 = vpack.c.bf16 %v459_v13, %v459_v13  ;;  %v606_v4 = vmul.f32 %v7736_v8, %v7609_v40  ;;  %v610_v38 = vmul.f32 %v7768_v61, %v7622_v59  ;;  %v614_v5 = vmul.f32 %v7791_v45, %v7627_v6  ;;  %v7849_v47 = vld [vmem:[%s12101_s0 + $0x8] sm:$0xff]  ;;  %v6437_v13 = vld [vmem:[%s12104_s3 + $0x190] sm:$0xff]  }
  0x8c   :  { %6091 = vmatpush3.bf16.msra.mxu0 %v6444_v34  ;;  %v540_v19 = vadd.f32 %v538_v31, %v536_v12  ;;  %v568_v51 = vadd.f32 %v566_v33, %v564_v20  ;;  %v596_v27 = vadd.f32 %v594_v9, %v592_v0  ;;  %v7827_v34 = vld [vmem:[%s12101_s0 + $0xf8] sm:$0xff]  ;;  %v7834_v33 = vstv %s7667_s1  ;;  %s8276_s1 = sld [smem:[#allocation3 + $0x2f]] }
  0x8d   :  { %5007 = vmatmul.mubr.bf16.vlgmr.msra.gmra.mrb[0].mxu1 %v2849_v36  ;;  %6092 = vmatprep.subr.bf16.mxu0 %v6446_v57  ;;  %v7831_v31 = vmul.f32 %v7827_v34, %v7630_v2  ;;  %v7837_v35 = vstv %s7675_s2  ;;  %v7840_v52 = vstv %s7677_s23  ;;  %v642_v1 = vmul.f32 %v7849_v47, %v7834_v33  ;;  %v6439_v12 = vld [vmem:[%s12104_s3 + $0x1d8] sm:$0xff]   ;;  %s8278_s2 = sld [smem:[#allocation3 + $0x30]]  ;;  %s9104_s23 = sld [smem:[#allocation3 + $0x3f]] }
  0x8e   :  { %6105 = vmatpush3.bf16.msra.mxu1 %v6429_v14  ;;  %v544_v22 = vadd.f32 %v7717_v11, %v540_v19  ;;  %v572_v17 = vadd.f32 %v570_v25, %v568_v51  ;;  %v600_v26 = vadd.f32 %v598_v16, %v596_v27  ;;  %v6454_v14 = vld [vmem:[%s12104_s3 + $0x178] sm:$0xff]   ;;  %v645_v11 = vmul.f32 %v7647_v55, %v7837_v35 }
  0x8f   :  { %6106 = vmatprep.subr.bf16.mxu1 %v6431_v21  ;;  %v650_v25 = vmul.f32 %v7654_v53, %v7840_v52  ;;  %v7861_v63 = vstv %s7696_s8  ;;  %v7864_v41 = vstv %s7698_s9  ;;  %v624_v16 = vstv %s7665_s26  ;;  %s8299_s8 = sld [smem:[#allocation3 + $0x31]]  ;;  %s8693_s26 = sld [smem:[#allocation6 + $0x5]] }
  0x90   :  { %6093 = vmatpush3.bf16.msra.mxu0 %v6448_v28  ;;  %v548_v21 = vadd.f32 %v7740_v10, %v544_v22  ;;  %v576_v57 = vadd.f32 %v574_v62, %v572_v17  ;;  %v604_v9 = vadd.f32 %v602_v24, %v600_v26  ;;  %v647_v20 = vadd.f32 %v645_v11, %v642_v1  ;;  %v6456_v10 = vld [vmem:[%s12104_s3 + $0x138] sm:$0xff]   ;;  %v6458_v17 = vld [vmem:[%s12104_s3 + $0x240] sm:$0xff]   ;;  %s9614_s9 = sld [smem:[#allocation3 + $0x4d]] }
  0x91   :  { %6094 = vmatprep.subr.bf16.mxu0 %v6450_v3  ;;  %v655_v0 = vmul.f32 %v7604_v54, %v7861_v63  ;;  %v7877_v36 = vstv %s7721_s17  ;;  %v7880_v19 = vstv %s7723_s18  ;;  %v660_v51 = vmul.f32 %v7617_v58, %v7864_v41  ;;  %v6443_v1 = vld [vmem:[%s12104_s3 + $0x1e0] sm:$0xff]   ;;  %s8313_s18 = sld [smem:[#allocation3 + $0x32]] }
  0x92   :  { %6107 = vmatpush3.bf16.msra.mxu1 %v6433_v43  ;;  %v550_v62 = vmax.f32 %v7807_v18, %v548_v21  ;;  %v580_v28 = vadd.f32 %v7772_v15, %v576_v57  ;;  %v608_v24 = vadd.f32 %v606_v4, %v604_v9  ;;  %v652_v27 = vadd.f32 %v650_v25, %v647_v20  ;;  %v6441_v15 = vld [vmem:[%s12104_s3 + $0x198] sm:$0xff]   ;;  %s8932_s17 = sld [smem:[#allocation3 + $0x3a]] }
  0x93   :  { %6108 = vmatprep.subr.bf16.mxu1 %v6435_v46  ;;  %v665_v3 = vmul.f32 %v7685_v37, %v7877_v36  ;;  %v7892_v22 = vstv %s7729_s19  ;;  %v7895_v43 = vstv %s7731_s20  ;;  %v670_v46 = vmul.f32 %v7745_v56, %v7880_v19  ;;  %s8201_s20 = sld [smem:[#allocation3 + $0x25]]  ;;  %s8948_s19 = sld [smem:[#allocation3 + $0x3c]] }
  0x94   :  { %6095 = vmatpush3.bf16.msra.mxu0 %v6452_v32  ;;  %v584_v18 = vadd.f32 %v7795_v44, %v580_v28  ;;  %v612_v4 = vadd.f32 %v610_v38, %v608_v24  ;;  %v675_v26 = vmul.f32 %v7706_v39, %v7892_v22  ;;  %v657_v11 = vadd.f32 %v655_v0, %v652_v27 }
  0x95   :  { %6096 = vmatprep.subr.bf16.mxu0 %v6454_v14  ;;  %v684_v25 = vmul.f32 %v7647_v55, %v7834_v33  ;;  %v686_v32 = vmul.f32 %v7654_v53, %v7837_v35  ;;  %v690_v44 = vmul.f32 %v7661_v7, %v7840_v52  ;;  %v680_v57 = vmul.f32 %v7713_v48, %v7895_v43  ;;  %v6445_v7 = vld [vmem:[%s12104_s3 + $0x1a0] sm:$0xff]  }
  0x96   :  { %6109 = vmatpush3.bf16.msra.mxu1 %v6437_v13  ;;  %v586_v38 = vmax.f32 %v550_v62, %v584_v18  ;;  %v616_v21 = vadd.f32 %v614_v5, %v612_v4  ;;  %v694_v9 = vmul.f32 %v7617_v58, %v7861_v63  ;;  %v662_v14 = vadd.f32 %v660_v51, %v657_v11  ;;  %v6447_v62 = vld [vmem:[%s12104_s3 + $0x1e8] sm:$0xff]  }
  0x97   :  { %6110 = vmatprep.subr.bf16.mxu1 %v6439_v12  ;;  %v688_v20 = vadd.f32 %v686_v32, %v684_v25  ;;  %v698_v55 = vmul.f32 %v7685_v37, %v7864_v41  ;;  %v702_v53 = vmul.f32 %v7692_v60, %v7877_v36  ;;  %v706_v13 = vmul.f32 %v7706_v39, %v7880_v19 }
  0x98   :  { %6097 = vmatpush3.bf16.msra.mxu0 %v6456_v10  ;;  %v620_v5 = vadd.f32 %v7831_v31, %v616_v21  ;;  %v710_v12 = vmul.f32 %v7713_v48, %v7892_v22  ;;  %v720_v0 = vmul.f32 %v7604_v54, %v7834_v33  ;;  %v667_v28 = vadd.f32 %v665_v3, %v662_v14  ;;  %v6449_v21 = vld [vmem:[%s12104_s3 + $0x1a8] sm:$0xff]  }
  0x99   :  { %v692_v24 = vadd.f32 %v690_v44, %v688_v20  ;;  %v722_v10 = vmul.f32 %v7617_v58, %v7837_v35  ;;  %v726_v31 = vmul.f32 %v7685_v37, %v7840_v52  ;;  %6126 = vmatprep.subr.bf16.mxu0 %v6458_v17  ;;  %v7944_v27 = vmul.f32 %v7736_v8, %v7895_v43 }
  0x9a   :  { %6111 = vmatpush3.bf16.msra.mxu1 %v6441_v15  ;;  %v622_v51 = vmax.f32 %v586_v38, %v620_v5  ;;  %v730_v54 = vmul.f32 %v7745_v56, %v7861_v63  ;;  %v734_v3 = vmul.f32 %v7706_v39, %v7864_v41  ;;  %v672_v18 = vadd.f32 %v670_v46, %v667_v28 }
  0x9b   :  { %6112 = vmatprep.subr.bf16.mxu1 %v6443_v1  ;;  %v696_v4 = vadd.f32 %v694_v9, %v692_v24  ;;  %v724_v11 = vadd.f32 %v722_v10, %v720_v0  ;;  %v738_v25 = vmul.f32 %v7713_v48, %v7877_v36  ;;  %v742_v15 = vmul.f32 %v7761_v29, %v7880_v19  ;;  %v8024_v10 = vld [vmem:[%s12101_s0 + $0x40] sm:$0xff] }
  0x9c   :  { %v626_v17 = vadd.f32 %v624_v16, %v622_v51  ;;  %v7958_v32 = vmul.f32 %v7768_v61, %v7892_v22  ;;  %v756_v56 = vmul.f32 %v7617_v58, %v7834_v33  ;;  %v677_v44 = vadd.f32 %v675_v26, %v672_v18  ;;  %v6455_v51 = vld [vmem:[%s12104_s3 + $0x1f8] sm:$0xff]  }
  0x9d   :  { %v700_v1 = vadd.f32 %v698_v55, %v696_v4  ;;  %v728_v46 = vadd.f32 %v726_v31, %v724_v11  ;;  %v758_v38 = vmul.f32 %v7685_v37, %v7837_v35  ;;  %v7969_v29 = vmul.f32 %v7791_v45, %v7895_v43  ;;  %v6451_v37 = vld [vmem:[%s12104_s3 + $0x1f0] sm:$0xff]  }
  0x9e   :  { %6113 = vmatpush3.bf16.msra.mxu1 %v6445_v7  ;;  %v628_v9 = vmax.f32 %v626_v17, 0.0  ;;  %v762_v14 = vmul.f32 %v7692_v60, %v7840_v52  ;;  %v766_v58 = vmul.f32 %v7706_v39, %v7861_v63  ;;  %v770_v7 = vmul.f32 %v7713_v48, %v7864_v41  ;;  %v8034_v4 = vld [vmem:[%s12101_s0 + $0x50] sm:$0xff] }
  0x9f   :  { %6114 = vmatprep.subr.bf16.mxu1 %v6447_v62  ;;  %v704_v26 = vadd.f32 %v702_v53, %v700_v1  ;;  %v732_v20 = vadd.f32 %v730_v54, %v728_v46  ;;  %v760_v55 = vadd.f32 %v758_v38, %v756_v56  ;;  %v7981_v5 = vadd.f32 %v680_v57, %v677_v44  ;;  %v6453_v53 = vld [vmem:[%s12104_s3 + $0x1b0] sm:$0xff]   ;;  %v8043_v56 = vld [vmem:[%s12101_s0 + $0x60] sm:$0xff]  ;;  %v6457_v38 = vld [vmem:[%s12104_s3 + $0x1b8] sm:$0xff]  }
  0xa0   :  { %630 = vst.msk [vmem:[#allocation2 + $0x28] sm:$0xff] %vm293_vm0, %v628_v9  ;;  %v774_v60 = vmul.f32 %v7736_v8, %v7877_v36  ;;  %v778_v39 = vmul.f32 %v7768_v61, %v7880_v19  ;;  %v7989_v0 = vmul.f32 %v7791_v45, %v7892_v22  ;;  %v7996_v57 = vmul.f32 %v7827_v34, %v7895_v43  ;;  %v8003_v8 = vld [vmem:[%s12101_s0] sm:$0xff]  ;;  %v8010_v45 = vld [vmem:[%s12101_s0 + $0x10] sm:$0xff] }
  0xa1   :  { %v708_v62 = vadd.f32 %v706_v13, %v704_v26  ;;  %v736_v48 = vadd.f32 %v734_v3, %v732_v20  ;;  %v764_v28 = vadd.f32 %v762_v14, %v760_v55  ;;  %v473_v61 = vmul.f32 %v8003_v8, %v7572_v42  ;;  %v8017_v13 = vld [vmem:[%s12101_s0 + $0x20] sm:$0xff]  ;;  %v8057_v1 = vld [vmem:[%s12101_s0 + $0x90] sm:$0xff] }
  0xa2   :  { %6115 = vmatpush3.bf16.msra.mxu1 %v6449_v21  ;;  %v476_v34 = vmul.f32 %v8010_v45, %v7575_v23  ;;  %v481_v24 = vmul.f32 %v8017_v13, %v7578_v49  ;;  %v486_v31 = vmul.f32 %v8024_v10, %v7590_v30  ;;  %v491_v11 = vmul.f32 %v8034_v4, %v7595_v50 }
  0xa3   :  { %6116 = vmatprep.subr.bf16.mxu1 %v6451_v37  ;;  %v712_v54 = vadd.f32 %v710_v12, %v708_v62  ;;  %v740_v3 = vadd.f32 %v738_v25, %v736_v48  ;;  %v768_v18 = vadd.f32 %v766_v58, %v764_v28  ;;  %v496_v12 = vmul.f32 %v8043_v56, %v7609_v40  ;;  %v8050_v25 = vld [vmem:[%s12101_s0 + $0x80] sm:$0xff] }
  0xa4   :  { %v478_v17 = vadd.f32 %v476_v34, %v473_v61  ;;  %v501_v44 = vmul.f32 %v8050_v25, %v7622_v59  ;;  %v506_v46 = vmul.f32 %v8057_v1, %v7627_v6  ;;  %v8068_v58 = vld [vmem:[%s12101_s0 + $0xa0] sm:$0xff]  ;;  %v515_v20 = vmul.f32 %v8010_v45, %v7572_v42 }
  0xa5   :  { %v716_v21 = vadd.f32 %v7944_v27, %v712_v54  ;;  %v744_v9 = vadd.f32 %v742_v15, %v740_v3  ;;  %v772_v14 = vadd.f32 %v770_v7, %v768_v18  ;;  %v8072_v37 = vmul.f32 %v8068_v58, %v7630_v2  ;;  %v8081_v27 = vld [vmem:[%s12101_s0 + $0x30] sm:$0xff]  ;;  %v6459_v61 = vld [vmem:[%s12104_s3 + $0x2c0] sm:$0xff]  }
  0xa6   :  { %6117 = vmatpush3.bf16.msra.mxu1 %v6453_v53  ;;  %v483_v26 = vadd.f32 %v481_v24, %v478_v17  ;;  %v517_v55 = vmul.f32 %v8017_v13, %v7575_v23  ;;  %v521_v15 = vmul.f32 %v8081_v27, %v7578_v49  ;;  %v525_v28 = vmul.f32 %v8034_v4, %v7590_v30 }
  0xa7   :  { %6118 = vmatprep.subr.bf16.mxu1 %v6455_v51  ;;  %v2820_v7 = vld [vmem:[#allocation2 + $0x28] sm:$0xff]  ;;  %v718_v62 = vmax.f32 %v7981_v5, %v716_v21  ;;  %v748_v53 = vadd.f32 %v7958_v32, %v744_v9  ;;  %v776_v48 = vadd.f32 %v774_v60, %v772_v14  ;;  %v529_v51 = vmul.f32 %v8043_v56, %v7595_v50  ;;  %v8098_v32 = vld [vmem:[%s12101_s0 + $0x70] sm:$0xff] }
  0xa8   :  { %v2852_v34 = vpack.c.bf16 %v2820_v7, %v2820_v7  ;;  %v488_v24 = vadd.f32 %v486_v31, %v483_v26  ;;  %v519_v54 = vadd.f32 %v517_v55, %v515_v20  ;;  %v533_v60 = vmul.f32 %v8098_v32, %v7609_v40 }
  0xa9   :  { %v752_v5 = vadd.f32 %v7969_v29, %v748_v53  ;;  %v780_v3 = vadd.f32 %v778_v39, %v776_v48  ;;  %v537_v18 = vmul.f32 %v8057_v1, %v7622_v59  ;;  %v792_v31 = vstv %s7998_s13  ;;  %s9177_s13 = sld [smem:[#allocation3 + $0x44]] }
  0xaa   :  { %6119 = vmatpush3.bf16.msra.mxu1 %v6457_v38  ;;  %5046 = vmatprep.mubr.bf16.mxu0 %v2852_v34  ;;  %v493_v17 = vadd.f32 %v491_v11, %v488_v24  ;;  %v523_v21 = vadd.f32 %v521_v15, %v519_v54  ;;  %v541_v29 = vmul.f32 %v8068_v58, %v7627_v6  ;;  %v8111_v26 = vstv %s8038_s24  ;;  %v8134_v34 = vld [vmem:[%s12101_s0 + $0xc0] sm:$0xff]  ;;  %v8141_v54 = vld [vmem:[%s12101_s0 + $0xd0] sm:$0xff]  ;;  %s8934_s24 = sld [smem:[#allocation3 + $0x3b]] }
  0xab   :  { %v754_v39 = vmax.f32 %v718_v62, %v752_v5  ;;  %v784_v9 = vadd.f32 %v7989_v0, %v780_v3  ;;  %v551_v14 = vmul.f32 %v8024_v10, %v7572_v42  ;;  %6148 = vmatprep.subr.bf16.mxu1 %v6459_v61  ;;  %v553_v38 = vmul.f32 %v8034_v4, %v7575_v23  ;;  %v8121_v0 = vld [vmem:[%s12101_s0 + $0xb0] sm:$0xff] }
  0xac   :  { %v498_v20 = vadd.f32 %v496_v12, %v493_v17  ;;  %v527_v55 = vadd.f32 %v525_v28, %v523_v21  ;;  %v557_v11 = vmul.f32 %v8043_v56, %v7578_v49  ;;  %v545_v7 = vmul.f32 %v8121_v0, %v7630_v2 }
  0xad   :  { %v788_v15 = vadd.f32 %v7996_v57, %v784_v9  ;;  %v561_v12 = vmul.f32 %v8050_v25, %v7590_v30  ;;  %v565_v62 = vmul.f32 %v8057_v1, %v7595_v50  ;;  %v555_v28 = vadd.f32 %v553_v38, %v551_v14  ;;  %v8154_v9 = vld [vmem:[%s12101_s0 + $0xe0] sm:$0xff] }
  0xae   :  { %v503_v53 = vadd.f32 %v501_v44, %v498_v20  ;;  %v531_v48 = vadd.f32 %v529_v51, %v527_v55  ;;  %v569_v57 = vmul.f32 %v8068_v58, %v7609_v40  ;;  %v573_v24 = vmul.f32 %v8134_v34, %v7622_v59 }
  0xaf   :  { %v790_v61 = vmax.f32 %v754_v39, %v788_v15  ;;  %v577_v44 = vmul.f32 %v8141_v54, %v7627_v6  ;;  %v587_v51 = vmul.f32 %v8034_v4, %v7572_v42  ;;  %v559_v17 = vadd.f32 %v557_v11, %v555_v28 }
  0xb0   :  { %v508_v5 = vadd.f32 %v506_v46, %v503_v53  ;;  %v535_v3 = vadd.f32 %v533_v60, %v531_v48  ;;  %v589_v21 = vmul.f32 %v8043_v56, %v7575_v23  ;;  %v581_v14 = vmul.f32 %v8154_v9, %v7630_v2 }
  0xb1   :  { %v794_v39 = vadd.f32 %v792_v31, %v790_v61  ;;  %v593_v20 = vmul.f32 %v8098_v32, %v7578_v49  ;;  %v597_v42 = vmul.f32 %v8057_v1, %v7590_v30  ;;  %v563_v60 = vadd.f32 %v561_v12, %v559_v17 }
  0xb2   :  { %v539_v46 = vadd.f32 %v537_v18, %v535_v3  ;;  %v591_v55 = vadd.f32 %v589_v21, %v587_v51  ;;  %v601_v23 = vmul.f32 %v8068_v58, %v7595_v50  ;;  %v513_v11 = vadd.f32 %v8072_v37, %v508_v5  ;;  %v8175_v50 = vld [vmem:[%s12101_s0 + $0xf0] sm:$0xff] }
  0xb3   :  { %v796_v38 = vmax.f32 %v794_v39, 0.0  ;;  %v605_v15 = vmul.f32 %v8121_v0, %v7609_v40  ;;  %v609_v53 = vmul.f32 %v8141_v54, %v7622_v59  ;;  %v567_v49 = vadd.f32 %v565_v62, %v563_v60 }
  0xb4   :  { %v543_v48 = vadd.f32 %v541_v29, %v539_v46  ;;  %v595_v28 = vadd.f32 %v593_v20, %v591_v55  ;;  %v613_v30 = vmul.f32 %v8154_v9, %v7627_v6  ;;  %v617_v37 = vmul.f32 %v8175_v50, %v7630_v2 }
  0xb5   :  { %798 = vst.msk [vmem:[#allocation2 + $0x38] sm:$0xff] %vm293_vm0, %v796_v38  ;;  %v641_v40 = vmul.f32 %v8003_v8, %v7834_v33  ;;  %v644_v59 = vmul.f32 %v8010_v45, %v7837_v35  ;;  %v649_v18 = vmul.f32 %v8017_v13, %v7840_v52  ;;  %v571_v29 = vadd.f32 %v569_v57, %v567_v49 }
  0xb6   :  { %v547_v6 = vadd.f32 %v545_v7, %v543_v48  ;;  %v599_v12 = vadd.f32 %v597_v42, %v595_v28  ;;  %v654_v62 = vmul.f32 %v8024_v10, %v7861_v63  ;;  %v659_v51 = vmul.f32 %v8034_v4, %v7864_v41 }
  0xb7   :  { %v646_v61 = vadd.f32 %v644_v59, %v641_v40  ;;  %v664_v2 = vmul.f32 %v8043_v56, %v7877_v36  ;;  %v669_v8 = vmul.f32 %v8050_v25, %v7880_v19  ;;  %v575_v3 = vadd.f32 %v573_v24, %v571_v29 }
  0xb8   :  { %v549_v5 = vmax.f32 %v513_v11, %v547_v6  ;;  %v603_v17 = vadd.f32 %v601_v23, %v599_v12  ;;  %v674_v7 = vmul.f32 %v8057_v1, %v7892_v22  ;;  %v683_v21 = vmul.f32 %v8010_v45, %v7834_v33 }
  0xb9   :  { %v651_v57 = vadd.f32 %v649_v18, %v646_v61  ;;  %v685_v39 = vmul.f32 %v8017_v13, %v7837_v35  ;;  %v689_v20 = vmul.f32 %v8081_v27, %v7840_v52  ;;  %v579_v42 = vadd.f32 %v577_v44, %v575_v3 }
  0xba   :  { %v607_v46 = vadd.f32 %v605_v15, %v603_v17  ;;  %v679_v24 = vmul.f32 %v8068_v58, %v7895_v43  ;;  %v693_v60 = vmul.f32 %v8034_v4, %v7861_v63  ;;  %v697_v45 = vmul.f32 %v8043_v56, %v7864_v41 }
  0xbb   :  { %v656_v55 = vadd.f32 %v654_v62, %v651_v57  ;;  %v687_v23 = vadd.f32 %v685_v39, %v683_v21  ;;  %v701_v13 = vmul.f32 %v8098_v32, %v7877_v36  ;;  %v583_v27 = vadd.f32 %v581_v14, %v579_v42 }
  0xbc   :  { %v2822_v38 = vld [vmem:[#allocation2 + $0x38] sm:$0xff]  ;;  %v611_v11 = vadd.f32 %v609_v53, %v607_v46  ;;  %v705_v44 = vmul.f32 %v8057_v1, %v7880_v19  ;;  %v709_v15 = vmul.f32 %v8068_v58, %v7892_v22  ;;  %v719_v40 = vmul.f32 %v8024_v10, %v7834_v33 }
  0xbd   :  { %v2854_v48 = vpack.c.bf16 %v2822_v38, %v2822_v38  ;;  %v661_v49 = vadd.f32 %v659_v51, %v656_v55  ;;  %v691_v28 = vadd.f32 %v689_v20, %v687_v23  ;;  %v585_v14 = vmax.f32 %v549_v5, %v583_v27 }
  0xbe   :  { %v615_v53 = vadd.f32 %v613_v30, %v611_v11  ;;  %v721_v59 = vmul.f32 %v8034_v4, %v7837_v35  ;;  %v725_v18 = vmul.f32 %v8043_v56, %v7840_v52  ;;  %v713_v12 = vmul.f32 %v8121_v0, %v7895_v43 }
  0xbf   :  { %5086 = vmatprep.mubr.bf16.mxu1 %v2854_v48  ;;  %v666_v6 = vadd.f32 %v664_v2, %v661_v49  ;;  %v695_v29 = vadd.f32 %v693_v60, %v691_v28  ;;  %v729_v10 = vmul.f32 %v8050_v25, %v7861_v63  ;;  %v733_v30 = vmul.f32 %v8057_v1, %v7864_v41  ;;  %v8323_v48 = vld [vmem:[%s12101_s0 + $0x28] sm:$0xff] }
  0xc0   :  { %v619_v62 = vadd.f32 %v617_v37, %v615_v53  ;;  %v723_v61 = vadd.f32 %v721_v59, %v719_v40  ;;  %v737_v51 = vmul.f32 %v8068_v58, %v7877_v36  ;;  %v741_v3 = vmul.f32 %v8134_v34, %v7880_v19 }
  0xc1   :  { %v671_v2 = vadd.f32 %v669_v8, %v666_v6  ;;  %v699_v5 = vadd.f32 %v697_v45, %v695_v29  ;;  %v745_v25 = vmul.f32 %v8141_v54, %v7892_v22  ;;  %v755_v57 = vmul.f32 %v8034_v4, %v7834_v33 }
  0xc2   :  { %v621_v37 = vmax.f32 %v585_v14, %v619_v62  ;;  %v727_v17 = vadd.f32 %v725_v18, %v723_v61  ;;  %v757_v21 = vmul.f32 %v8043_v56, %v7837_v35  ;;  %v8255_v34 = vmul.f32 %v8154_v9, %v7895_v43  ;;  %v8333_v14 = vld [vmem:[%s12101_s0 + $0x48] sm:$0xff] }
  0xc3   :  { %v676_v8 = vadd.f32 %v674_v7, %v671_v2  ;;  %v703_v39 = vadd.f32 %v701_v13, %v699_v5  ;;  %v761_v20 = vmul.f32 %v8098_v32, %v7840_v52  ;;  %v765_v55 = vmul.f32 %v8057_v1, %v7861_v63  ;;  %v6470_v5 = vld [vmem:[%s12104_s3 + $0x258] sm:$0xff]  }
  0xc4   :  { %v625_v42 = vadd.f32 %v624_v16, %v621_v37  ;;  %v731_v46 = vadd.f32 %v729_v10, %v727_v17  ;;  %v759_v60 = vadd.f32 %v757_v21, %v755_v57  ;;  %v769_v4 = vmul.f32 %v8068_v58, %v7864_v41  ;;  %v6460_v16 = vld [vmem:[%s12104_s3 + $0x200] sm:$0xff]   ;;  %v6462_v41 = vld [vmem:[%s12104_s3 + $0x248] sm:$0xff]   ;;  %v8386_v21 = vld [vmem:[%s12101_s0 + $0x98] sm:$0xff] }
  0xc5   :  { %v8267_v33 = vadd.f32 %v679_v24, %v676_v8  ;;  %v707_v35 = vadd.f32 %v705_v44, %v703_v39  ;;  %v773_v52 = vmul.f32 %v8121_v0, %v7877_v36  ;;  %v777_v32 = vmul.f32 %v8141_v54, %v7880_v19  ;;  %v8295_v19 = vld [vmem:[%s12101_s0 + $0x18] sm:$0xff]  ;;  %v6466_v44 = vld [vmem:[%s12104_s3 + $0x250] sm:$0xff]   ;;  %v8379_v17 = vld [vmem:[%s12101_s0 + $0x88] sm:$0xff] }
  0xc6   :  { %v627_v63 = vmax.f32 %v625_v42, 0.0  ;;  %v735_v56 = vadd.f32 %v733_v30, %v731_v46  ;;  %v763_v1 = vadd.f32 %v761_v20, %v759_v60  ;;  %v781_v58 = vmul.f32 %v8154_v9, %v7892_v22 }
  0xc7   :  { %v711_v36 = vadd.f32 %v709_v15, %v707_v35  ;;  %v810_v0 = vmul.f32 %v7849_v47, %v8111_v26  ;;  %v8290_v7 = vstv %s8201_s20  ;;  %v6464_v47 = vld [vmem:[%s12104_s3 + $0x208] sm:$0xff]   ;;  %v8305_v22 = vstv %s8215_s25  ;;  %v6472_v35 = vld [vmem:[%s12104_s3 + $0x218] sm:$0xff]   ;;  %s8956_s20 = sld [smem:[#allocation3 + $0x3d]]  ;;  %s9391_s25 = sld [smem:[#allocation3 + $0x48]] }
  0xc8   :  { %v2851_v24 = vpack.c.bf16 %v627_v63, %v627_v63  ;;  %v739_v23 = vadd.f32 %v737_v51, %v735_v56  ;;  %v767_v45 = vadd.f32 %v765_v55, %v763_v1  ;;  %v813_v54 = vmul.f32 %v8295_v19, %v8290_v7  ;;  %v8402_v55 = vld [vmem:[%s12101_s0 + $0xa8] sm:$0xff]  ;;  %v8416_v63 = vld [vmem:[%s12101_s0 + $0x78] sm:$0xff] }
  0xc9   :  { %v715_v13 = vadd.f32 %v713_v12, %v711_v36  ;;  %v8308_v9 = vstv %s8217_s27  ;;  %v8311_v38 = vstv %s8221_s28  ;;  %v818_v49 = vmul.f32 %v8323_v48, %v8305_v22  ;;  %v8343_v12 = vld [vmem:[%s12101_s0 + $0x58] sm:$0xff]  ;;  %s9179_s27 = sld [smem:[#allocation3 + $0x45]]  ;;  %s10217_s28 = sld [smem:[#allocation3 + $0x61]] }
  0xca   :  { %5047 = vmatmul.mubr.bf16.vlgmr.msra.gmra.mrb[4].mxu0 %v2851_v24  ;;  %v743_v27 = vadd.f32 %v741_v3, %v739_v23  ;;  %v771_v11 = vadd.f32 %v769_v4, %v767_v45  ;;  %v815_v15 = vadd.f32 %v813_v54, %v810_v0  ;;  %v785_v40 = vmul.f32 %v8175_v50, %v7895_v43  ;;  %v6468_v50 = vld [vmem:[%s12104_s3 + $0x210] sm:$0xff]  }
  0xcb   :  { %v717_v28 = vmax.f32 %v8267_v33, %v715_v13  ;;  %6127 = vmatpush3.bf16.msra.mxu0 %v6460_v16  ;;  %v823_v53 = vmul.f32 %v8333_v14, %v8308_v9  ;;  %v8338_v59 = vstv %s8223_s29  ;;  %v828_v43 = vmul.f32 %v8343_v12, %v8311_v38  ;;  %s8361_s29 = sld [smem:[#allocation3 + $0x34]] }
  0xcc   :  { %v747_v18 = vadd.f32 %v745_v25, %v743_v27  ;;  %v775_v6 = vadd.f32 %v773_v52, %v771_v11  ;;  %6128 = vmatprep.subr.bf16.mxu0 %v6462_v41  ;;  %v820_v29 = vadd.f32 %v818_v49, %v815_v15  ;;  %v8351_v10 = vstv %s8237_s30  ;;  %v8372_v25 = vld [vmem:[%s12101_s0 + $0x68] sm:$0xff]  ;;  %s8733_s30 = sld [smem:[#allocation3 + $0x36]] }
  0xcd   :  { %v8354_v62 = vstv %s8239_s6  ;;  %v8357_v61 = vstv %s8245_s7  ;;  %v852_v30 = vmul.f32 %v8295_v19, %v8111_v26  ;;  %v833_v37 = vmul.f32 %v8372_v25, %v8338_v59  ;;  %s8924_s6 = sld [smem:[#allocation3 + $0x38]]  ;;  %s8926_s7 = sld [smem:[#allocation3 + $0x39]] }
  0xce   :  { %v751_v51 = vadd.f32 %v8255_v34, %v747_v18  ;;  %v779_v2 = vadd.f32 %v777_v32, %v775_v6  ;;  %v825_v3 = vadd.f32 %v823_v53, %v820_v29  ;;  %v838_v57 = vmul.f32 %v8379_v17, %v8351_v10  ;;  %v8395_v34 = vld [vmem:[%s12101_s0 + $0x38] sm:$0xff]  ;;  %v6474_v32 = vld [vmem:[%s12104_s3 + $0x260] sm:$0xff]   ;;  %v8458_v6 = vld [vmem:[%s12101_s0 + $0xc8] sm:$0xff] }
  0xcf   :  { %6129 = vmatpush3.bf16.msra.mxu0 %v6464_v47  ;;  %v843_v8 = vmul.f32 %v8386_v21, %v8354_v62  ;;  %v854_v39 = vmul.f32 %v8323_v48, %v8290_v7  ;;  %v858_v20 = vmul.f32 %v8395_v34, %v8305_v22  ;;  %v848_v33 = vmul.f32 %v8402_v55, %v8357_v61  ;;  %v8438_v47 = vld [vmem:[%s12101_s0 + $0xb8] sm:$0xff] }
  0xd0   :  { %v753_v42 = vmax.f32 %v717_v28, %v751_v51  ;;  %v783_v46 = vadd.f32 %v781_v58, %v779_v2  ;;  %6130 = vmatprep.subr.bf16.mxu0 %v6466_v44  ;;  %v830_v60 = vadd.f32 %v828_v43, %v825_v3  ;;  %v862_v52 = vmul.f32 %v8343_v12, %v8308_v9  ;;  %v6476_v44 = vld [vmem:[%s12104_s3 + $0x220] sm:$0xff]   ;;  %v8465_v43 = vld [vmem:[%s12101_s0 + $0xd8] sm:$0xff] }
  0xd1   :  { %v856_v4 = vadd.f32 %v854_v39, %v852_v30  ;;  %v866_v16 = vmul.f32 %v8372_v25, %v8311_v38  ;;  %v870_v56 = vmul.f32 %v8416_v63, %v8338_v59  ;;  %v874_v36 = vmul.f32 %v8386_v21, %v8351_v10  ;;  %v8489_v39 = vld [vmem:[%s12101_s0 + $0xe8] sm:$0xff] }
  0xd2   :  { %v787_v1 = vadd.f32 %v785_v40, %v783_v46  ;;  %v835_v41 = vadd.f32 %v833_v37, %v830_v60  ;;  %v8427_v58 = vmul.f32 %v8402_v55, %v8354_v62  ;;  %v888_v24 = vmul.f32 %v8333_v14, %v8111_v26  ;;  %v6463_v37 = vld [vmem:[%s12104_s3 + $0x2c8] sm:$0xff]  }
  0xd3   :  { %6131 = vmatpush3.bf16.msra.mxu0 %v6468_v50  ;;  %v860_v0 = vadd.f32 %v858_v20, %v856_v4  ;;  %v890_v23 = vmul.f32 %v8343_v12, %v8290_v7  ;;  %v894_v45 = vmul.f32 %v8372_v25, %v8305_v22  ;;  %v8442_v27 = vmul.f32 %v8438_v47, %v8357_v61  ;;  %v6480_v46 = vld [vmem:[%s12104_s3 + $0x228] sm:$0xff]  }
  0xd4   :  { %v789_v54 = vmax.f32 %v753_v42, %v787_v1  ;;  %6132 = vmatprep.subr.bf16.mxu0 %v6470_v5  ;;  %v840_v13 = vadd.f32 %v838_v57, %v835_v41  ;;  %v898_v11 = vmul.f32 %v8379_v17, %v8308_v9  ;;  %v902_v28 = vmul.f32 %v8386_v21, %v8311_v38  ;;  %v6478_v57 = vld [vmem:[%s12104_s3 + $0x268] sm:$0xff]  }
  0xd5   :  { %v864_v15 = vadd.f32 %v862_v52, %v860_v0  ;;  %v892_v49 = vadd.f32 %v890_v23, %v888_v24  ;;  %v906_v40 = vmul.f32 %v8402_v55, %v8338_v59  ;;  %v910_v29 = vmul.f32 %v8458_v6, %v8351_v10 }
  0xd6   :  { %v793_v53 = vadd.f32 %v792_v31, %v789_v54  ;;  %v845_v18 = vadd.f32 %v843_v8, %v840_v13  ;;  %v8469_v50 = vmul.f32 %v8465_v43, %v8354_v62  ;;  %v6461_v31 = vld [vmem:[%s12104_s3 + $0x280] sm:$0xff]   ;;  %v924_v2 = vmul.f32 %v8343_v12, %v8111_v26  ;;  %v6482_v54 = vld [vmem:[%s12104_s3 + $0x270] sm:$0xff]   ;;  %v8522_v13 = vld [vmem:[%s12101_s0 + $0xf8] sm:$0xff] }
  0xd7   :  { %6133 = vmatpush3.bf16.msra.mxu0 %v6472_v35  ;;  %v868_v30 = vadd.f32 %v866_v16, %v864_v15  ;;  %v896_v51 = vadd.f32 %v894_v45, %v892_v49  ;;  %v926_v5 = vmul.f32 %v8372_v25, %v8290_v7  ;;  %v8493_v20 = vmul.f32 %v8489_v39, %v8357_v61  ;;  %v6467_v45 = vld [vmem:[%s12104_s3 + $0x2d0] sm:$0xff]  }
  0xd8   :  { %v795_v3 = vmax.f32 %v793_v53, 0.0  ;;  %6134 = vmatprep.subr.bf16.mxu0 %v6474_v32  ;;  %v8484_v8 = vadd.f32 %v848_v33, %v845_v18  ;;  %v930_v42 = vmul.f32 %v8416_v63, %v8305_v22  ;;  %v934_v4 = vmul.f32 %v8386_v21, %v8308_v9  ;;  %v6484_v49 = vld [vmem:[%s12104_s3 + $0x230] sm:$0xff]  }
  0xd9   :  { %v872_v60 = vadd.f32 %v870_v56, %v868_v30  ;;  %v900_v35 = vadd.f32 %v898_v11, %v896_v51  ;;  %v928_v33 = vadd.f32 %v926_v5, %v924_v2  ;;  %v938_v16 = vmul.f32 %v8402_v55, %v8311_v38  ;;  %v6465_v56 = vld [vmem:[%s12104_s3 + $0x288] sm:$0xff]  }
  0xda   :  { %v2853_v52 = vpack.c.bf16 %v795_v3, %v795_v3  ;;  %v942_v1 = vmul.f32 %v8438_v47, %v8338_v59  ;;  %v946_v32 = vmul.f32 %v8465_v43, %v8351_v10  ;;  %v950_v23 = vmul.f32 %v8489_v39, %v8354_v62  ;;  %v8544_v30 = vld [vmem:[%s12101_s0 + $0x8] sm:$0xff]  ;;  %v6469_v3 = vld [vmem:[%s12104_s3 + $0x290] sm:$0xff]  }
  0xdb   :  { %6135 = vmatpush3.bf16.msra.mxu0 %v6476_v44  ;;  %v876_v41 = vadd.f32 %v874_v36, %v872_v60  ;;  %v904_v0 = vadd.f32 %v902_v28, %v900_v35  ;;  %v932_v24 = vadd.f32 %v930_v42, %v928_v33  ;;  %v8526_v36 = vmul.f32 %v8522_v13, %v8357_v61  ;;  %v6471_v35 = vld [vmem:[%s12104_s3 + $0x2d8] sm:$0xff]  }
  0xdc   :  { %5087 = vmatmul.mubr.bf16.vlgmr.msra.gmra.mrb[4].mxu1 %v2853_v52  ;;  %6136 = vmatprep.subr.bf16.mxu0 %v6478_v57  ;;  %v8529_v11 = vstv %s8263_s10  ;;  %v8532_v44 = vstv %s8265_s11  ;;  %v8535_v15 = vstv %s8276_s1  ;;  %v8556_v2 = vstv %s8278_s2  ;;  %s9195_s1 = sld [smem:[#allocation3 + $0x46]]  ;;  %s9728_s11 = sld [smem:[#allocation3 + $0x51]] }
  0xdd   :  { %6149 = vmatpush3.bf16.msra.mxu1 %v6461_v31  ;;  %v880_v28 = vadd.f32 %v8427_v58, %v876_v41  ;;  %v908_v53 = vadd.f32 %v906_v40, %v904_v0  ;;  %v936_v18 = vadd.f32 %v934_v4, %v932_v24  ;;  %v978_v51 = vmul.f32 %v8544_v30, %v8529_v11  ;;  %v6486_v31 = vld [vmem:[%s12104_s3 + $0x278] sm:$0xff]   ;;  %s9741_s2 = sld [smem:[#allocation3 + $0x53]]  ;;  %s10610_s10 = sld [smem:[#allocation3 + $0x6c]] }
  0xde   :  { %6150 = vmatprep.subr.bf16.mxu1 %v6463_v37  ;;  %v981_v58 = vmul.f32 %v8295_v19, %v8532_v44  ;;  %v986_v40 = vmul.f32 %v8323_v48, %v8535_v15  ;;  %v8559_v5 = vstv %s8299_s8  ;;  %v960_v60 = vstv %s8247_s12  ;;  %s8958_s12 = sld [smem:[#allocation3 + $0x3e]]  ;;  %s9755_s8 = sld [smem:[#allocation3 + $0x54]] }
  0xdf   :  { %6137 = vmatpush3.bf16.msra.mxu0 %v6480_v46  ;;  %v884_v37 = vadd.f32 %v8442_v27, %v880_v28  ;;  %v912_v57 = vadd.f32 %v910_v29, %v908_v53  ;;  %v940_v42 = vadd.f32 %v938_v16, %v936_v18  ;;  %v991_v4 = vmul.f32 %v8333_v14, %v8556_v2  ;;  %v6488_v27 = vld [vmem:[%s12104_s3 + $0x238] sm:$0xff]   ;;  %v6490_v53 = vld [vmem:[%s12104_s3 + $0x340] sm:$0xff]  }
  0xe0   :  { %6138 = vmatprep.subr.bf16.mxu0 %v6482_v54  ;;  %v983_v33 = vadd.f32 %v981_v58, %v978_v51  ;;  %v8572_v52 = vstv %s8313_s18  ;;  %v8575_v41 = vstv %s8315_s22  ;;  %v996_v0 = vmul.f32 %v8343_v12, %v8559_v5  ;;  %v6475_v51 = vld [vmem:[%s12104_s3 + $0x2e0] sm:$0xff]   ;;  %s9120_s18 = sld [smem:[#allocation3 + $0x40]]  ;;  %s9122_s22 = sld [smem:[#allocation3 + $0x41]] }
  0xe1   :  { %6151 = vmatpush3.bf16.msra.mxu1 %v6465_v56  ;;  %v886_v29 = vmax.f32 %v8484_v8, %v884_v37  ;;  %v916_v46 = vadd.f32 %v8469_v50, %v912_v57  ;;  %v944_v16 = vadd.f32 %v942_v1, %v940_v42  ;;  %v1001_v54 = vmul.f32 %v8372_v25, %v8572_v52  ;;  %v6473_v50 = vld [vmem:[%s12104_s3 + $0x298] sm:$0xff]  }
  0xe2   :  { %6152 = vmatprep.subr.bf16.mxu1 %v6467_v45  ;;  %v988_v24 = vadd.f32 %v986_v40, %v983_v33  ;;  %v8587_v28 = vstv %s8361_s29  ;;  %v8590_v56 = vstv %s8363_s16  ;;  %v1006_v45 = vmul.f32 %v8379_v17, %v8575_v41  ;;  %s8910_s16 = sld [smem:[#allocation3 + $0x37]] }
  0xe3   :  { %6139 = vmatpush3.bf16.msra.mxu0 %v6484_v49  ;;  %v920_v8 = vadd.f32 %v8493_v20, %v916_v46  ;;  %v948_v1 = vadd.f32 %v946_v32, %v944_v16  ;;  %v1011_v18 = vmul.f32 %v8386_v21, %v8587_v28  ;;  %v1020_v40 = vmul.f32 %v8295_v19, %v8529_v11  ;;  %s9626_s29 = sld [smem:[#allocation3 + $0x4f]] }
  0xe4   :  { %6140 = vmatprep.subr.bf16.mxu0 %v6486_v31  ;;  %v993_v58 = vadd.f32 %v991_v4, %v988_v24  ;;  %v1022_v49 = vmul.f32 %v8323_v48, %v8532_v44  ;;  %v1026_v20 = vmul.f32 %v8395_v34, %v8535_v15  ;;  %v1016_v57 = vmul.f32 %v8402_v55, %v8590_v56  ;;  %v6477_v34 = vld [vmem:[%s12104_s3 + $0x2a0] sm:$0xff]  }
  0xe5   :  { %6153 = vmatpush3.bf16.msra.mxu1 %v6469_v3  ;;  %v922_v32 = vmax.f32 %v886_v29, %v920_v8  ;;  %v952_v37 = vadd.f32 %v950_v23, %v948_v1  ;;  %v1030_v42 = vmul.f32 %v8343_v12, %v8556_v2  ;;  %v1034_v19 = vmul.f32 %v8372_v25, %v8559_v5  ;;  %v6479_v29 = vld [vmem:[%s12104_s3 + $0x2e8] sm:$0xff]  }
  0xe6   :  { %6154 = vmatprep.subr.bf16.mxu1 %v6471_v35  ;;  %v998_v31 = vadd.f32 %v996_v0, %v993_v58  ;;  %v1024_v33 = vadd.f32 %v1022_v49, %v1020_v40  ;;  %v1038_v48 = vmul.f32 %v8416_v63, %v8572_v52  ;;  %v1042_v3 = vmul.f32 %v8386_v21, %v8575_v41 }
  0xe7   :  { %6141 = vmatpush3.bf16.msra.mxu0 %v6488_v27  ;;  %v956_v23 = vadd.f32 %v8526_v36, %v952_v37  ;;  %v1046_v35 = vmul.f32 %v8402_v55, %v8587_v28  ;;  %v1056_v4 = vmul.f32 %v8333_v14, %v8529_v11  ;;  %v1058_v27 = vmul.f32 %v8343_v12, %v8532_v44  ;;  %v6481_v37 = vld [vmem:[%s12104_s3 + $0x2a8] sm:$0xff]  }
  0xe8   :  { %v1003_v46 = vadd.f32 %v1001_v54, %v998_v31  ;;  %v1028_v16 = vadd.f32 %v1026_v20, %v1024_v33  ;;  %v1062_v36 = vmul.f32 %v8372_v25, %v8535_v15  ;;  %6170 = vmatprep.subr.bf16.mxu0 %v6490_v53  ;;  %v8639_v24 = vmul.f32 %v8438_v47, %v8590_v56 }
  0xe9   :  { %6155 = vmatpush3.bf16.msra.mxu1 %v6473_v50  ;;  %v958_v0 = vmax.f32 %v922_v32, %v956_v23  ;;  %v1066_v14 = vmul.f32 %v8379_v17, %v8556_v2  ;;  %v1070_v54 = vmul.f32 %v8386_v21, %v8559_v5  ;;  %v1060_v58 = vadd.f32 %v1058_v27, %v1056_v4  ;;  %v8719_v27 = vld [vmem:[%s12101_s0 + $0x40] sm:$0xff] }
  0xea   :  { %6156 = vmatprep.subr.bf16.mxu1 %v6475_v51  ;;  %v1008_v8 = vadd.f32 %v1006_v45, %v1003_v46  ;;  %v1032_v1 = vadd.f32 %v1030_v42, %v1028_v16  ;;  %v1074_v40 = vmul.f32 %v8402_v55, %v8572_v52  ;;  %v1078_v50 = vmul.f32 %v8458_v6, %v8575_v41 }
  0xeb   :  { %v962_v53 = vadd.f32 %v960_v60, %v958_v0  ;;  %v8653_v49 = vmul.f32 %v8465_v43, %v8587_v28  ;;  %v1092_v17 = vmul.f32 %v8343_v12, %v8529_v11  ;;  %v1064_v45 = vadd.f32 %v1062_v36, %v1060_v58  ;;  %v6487_v0 = vld [vmem:[%s12104_s3 + $0x2f8] sm:$0xff]  }
  0xec   :  { %v1013_v20 = vadd.f32 %v1011_v18, %v1008_v8  ;;  %v1036_v51 = vadd.f32 %v1034_v19, %v1032_v1  ;;  %v1094_v32 = vmul.f32 %v8372_v25, %v8532_v44  ;;  %v8664_v6 = vmul.f32 %v8489_v39, %v8590_v56  ;;  %v6483_v25 = vld [vmem:[%s12104_s3 + $0x2f0] sm:$0xff]  }
  0xed   :  { %6157 = vmatpush3.bf16.msra.mxu1 %v6477_v34  ;;  %v964_v42 = vmax.f32 %v962_v53, 0.0  ;;  %v1098_v31 = vmul.f32 %v8416_v63, %v8535_v15  ;;  %v1102_v12 = vmul.f32 %v8386_v21, %v8556_v2  ;;  %v1068_v33 = vadd.f32 %v1066_v14, %v1064_v45  ;;  %v8729_v1 = vld [vmem:[%s12101_s0 + $0x50] sm:$0xff] }
  0xee   :  { %6158 = vmatprep.subr.bf16.mxu1 %v6479_v29  ;;  %v1040_v18 = vadd.f32 %v1038_v48, %v1036_v51  ;;  %v1096_v19 = vadd.f32 %v1094_v32, %v1092_v17  ;;  %v1106_v34 = vmul.f32 %v8402_v55, %v8559_v5  ;;  %v8676_v23 = vadd.f32 %v1016_v57, %v1013_v20  ;;  %v6485_v48 = vld [vmem:[%s12104_s3 + $0x2b0] sm:$0xff]   ;;  %v8738_v17 = vld [vmem:[%s12101_s0 + $0x60] sm:$0xff]  ;;  %v6489_v32 = vld [vmem:[%s12104_s3 + $0x2b8] sm:$0xff]  }
  0xef   :  { %966 = vst.msk [vmem:[#allocation2 + $0x48] sm:$0xff] %vm293_vm0, %v964_v42  ;;  %v1110_v63 = vmul.f32 %v8438_v47, %v8572_v52  ;;  %v1114_v21 = vmul.f32 %v8465_v43, %v8575_v41  ;;  %v8684_v4 = vmul.f32 %v8489_v39, %v8587_v28  ;;  %v1072_v55 = vadd.f32 %v1070_v54, %v1068_v33  ;;  %v8698_v47 = vld [vmem:[%s12101_s0] sm:$0xff]  ;;  %v8705_v39 = vld [vmem:[%s12101_s0 + $0x10] sm:$0xff] }
  0xf0   :  { %v1044_v29 = vadd.f32 %v1042_v3, %v1040_v18  ;;  %v1100_v46 = vadd.f32 %v1098_v31, %v1096_v19  ;;  %v8691_v57 = vmul.f32 %v8522_v13, %v8590_v56  ;;  %v809_v43 = vmul.f32 %v8698_v47, %v8111_v26  ;;  %v8712_v3 = vld [vmem:[%s12101_s0 + $0x20] sm:$0xff]  ;;  %v8752_v51 = vld [vmem:[%s12101_s0 + $0x90] sm:$0xff] }
  0xf1   :  { %6159 = vmatpush3.bf16.msra.mxu1 %v6481_v37  ;;  %v812_v13 = vmul.f32 %v8705_v39, %v8290_v7  ;;  %v817_v16 = vmul.f32 %v8712_v3, %v8305_v22  ;;  %v822_v36 = vmul.f32 %v8719_v27, %v8308_v9  ;;  %v1076_v54 = vadd.f32 %v1074_v40, %v1072_v55  ;;  %v8745_v40 = vld [vmem:[%s12101_s0 + $0x80] sm:$0xff] }
  0xf2   :  { %6160 = vmatprep.subr.bf16.mxu1 %v6483_v25  ;;  %v1048_v14 = vadd.f32 %v1046_v35, %v1044_v29  ;;  %v1104_v8 = vadd.f32 %v1102_v12, %v1100_v46  ;;  %v827_v58 = vmul.f32 %v8729_v1, %v8311_v38  ;;  %v832_v35 = vmul.f32 %v8738_v17, %v8338_v59  ;;  %v8763_v12 = vld [vmem:[%s12101_s0 + $0xa0] sm:$0xff] }
  0xf3   :  { %v814_v53 = vadd.f32 %v812_v13, %v809_v43  ;;  %v837_v20 = vmul.f32 %v8745_v40, %v8351_v10  ;;  %12234 = vst [vmem:[#allocation12_spill] sm:$0xff] %v8752_v51  ;;  %v842_v45 = vmul.f32 %v8752_v51, %v8354_v62  ;;  %v1080_v42 = vadd.f32 %v1078_v50, %v1076_v54  ;;  %v6491_v43 = vld [vmem:[%s12104_s3 + $0x3c0] sm:$0xff]  }
  0xf4   :  { %v1052_v37 = vadd.f32 %v8639_v24, %v1048_v14  ;;  %v1108_v31 = vadd.f32 %v1106_v34, %v1104_v8  ;;  %12235 = vst [vmem:[#allocation13_spill] sm:$0xff] %v8763_v12  ;;  %v8767_v25 = vmul.f32 %v8763_v12, %v8357_v61  ;;  %v851_v33 = vmul.f32 %v8705_v39, %v8111_v26  ;;  %v8776_v24 = vld [vmem:[%s12101_s0 + $0x30] sm:$0xff] }
  0xf5   :  { %6161 = vmatpush3.bf16.msra.mxu1 %v6485_v48  ;;  %v819_v18 = vadd.f32 %v817_v16, %v814_v53  ;;  %v853_v19 = vmul.f32 %v8712_v3, %v8290_v7  ;;  %12236 = vst [vmem:[#allocation14_spill] sm:$0xff] %v8776_v24  ;;  %v857_v50 = vmul.f32 %v8776_v24, %v8305_v22 }
  0xf6   :  { %6162 = vmatprep.subr.bf16.mxu1 %v6487_v0  ;;  %v2824_v34 = vld [vmem:[#allocation2 + $0x48] sm:$0xff]  ;;  %v1054_v29 = vmax.f32 %v8676_v23, %v1052_v37  ;;  %v1084_v48 = vadd.f32 %v8653_v49, %v1080_v42  ;;  %v1112_v55 = vadd.f32 %v1110_v63, %v1108_v31  ;;  %v861_v46 = vmul.f32 %v8729_v1, %v8308_v9  ;;  %v8793_v49 = vld [vmem:[%s12101_s0 + $0x70] sm:$0xff] }
  0xf7   :  { %v2856_v13 = vpack.c.bf16 %v2824_v34, %v2824_v34  ;;  %v824_v16 = vadd.f32 %v822_v36, %v819_v18  ;;  %v855_v14 = vadd.f32 %v853_v19, %v851_v33  ;;  %v865_v0 = vmul.f32 %v8738_v17, %v8311_v38  ;;  %12237 = vst [vmem:[#allocation15_spill] sm:$0xff] %v8793_v49 }
  0xf8   :  { %v1088_v23 = vadd.f32 %v8664_v6, %v1084_v48  ;;  %v1116_v54 = vadd.f32 %v1114_v21, %v1112_v55  ;;  %v869_v63 = vmul.f32 %v8793_v49, %v8338_v59  ;;  %v873_v8 = vmul.f32 %v8752_v51, %v8351_v10 }
  0xf9   :  { %6163 = vmatpush3.bf16.msra.mxu1 %v6489_v32  ;;  %5126 = vmatprep.mubr.bf16.mxu0 %v2856_v13  ;;  %v1128_v36 = vstv %s8693_s26  ;;  %v829_v53 = vadd.f32 %v827_v58, %v824_v16  ;;  %v859_v37 = vadd.f32 %v857_v50, %v855_v14  ;;  %v877_v6 = vmul.f32 %v8763_v12, %v8354_v62  ;;  %v8829_v13 = vld [vmem:[%s12101_s0 + $0xc0] sm:$0xff]  ;;  %v8836_v14 = vld [vmem:[%s12101_s0 + $0xd0] sm:$0xff]  ;;  %s9148_s26 = sld [smem:[#allocation3 + $0x42]] }
  0xfa   :  { %v1090_v21 = vmax.f32 %v1054_v29, %v1088_v23  ;;  %v1120_v42 = vadd.f32 %v8684_v4, %v1116_v54  ;;  %v887_v31 = vmul.f32 %v8719_v27, %v8111_v26  ;;  %6192 = vmatprep.subr.bf16.mxu1 %v6491_v43  ;;  %v8806_v18 = vstv %s8733_s30  ;;  %v8816_v4 = vld [vmem:[%s12101_s0 + $0xb0] sm:$0xff]  ;;  %12239 = vst [vmem:[#allocation17_spill] sm:$0xff] %v8829_v13  ;;  %s9620_s30 = sld [smem:[#allocation3 + $0x4e]] }
  0xfb   :  { %v834_v33 = vadd.f32 %v832_v35, %v829_v53  ;;  %v863_v19 = vadd.f32 %v861_v46, %v859_v37  ;;  %v889_v32 = vmul.f32 %v8729_v1, %v8290_v7  ;;  %v893_v58 = vmul.f32 %v8738_v17, %v8305_v22  ;;  %12238 = vst [vmem:[#allocation16_spill] sm:$0xff] %v8816_v4 }
  0xfc   :  { %v1124_v50 = vadd.f32 %v8691_v57, %v1120_v42  ;;  %v881_v34 = vmul.f32 %v8816_v4, %v8357_v61  ;;  %v897_v35 = vmul.f32 %v8745_v40, %v8308_v9  ;;  %v901_v29 = vmul.f32 %v8752_v51, %v8311_v38  ;;  %12240 = vst [vmem:[#allocation18_spill] sm:$0xff] %v8836_v14  ;;  %v8849_v42 = vld [vmem:[%s12101_s0 + $0xe0] sm:$0xff] }
  0xfd   :  { %v839_v48 = vadd.f32 %v837_v20, %v834_v33  ;;  %v867_v55 = vadd.f32 %v865_v0, %v863_v19  ;;  %v891_v46 = vadd.f32 %v889_v32, %v887_v31  ;;  %v905_v57 = vmul.f32 %v8763_v12, %v8338_v59  ;;  %12241 = vst [vmem:[#allocation19_spill] sm:$0xff] %v8849_v42 }
  0xfe   :  { %v1126_v43 = vmax.f32 %v1090_v21, %v1124_v50  ;;  %v909_v16 = vmul.f32 %v8829_v13, %v8351_v10  ;;  %v913_v20 = vmul.f32 %v8836_v14, %v8354_v62  ;;  %v923_v0 = vmul.f32 %v8729_v1, %v8111_v26 }
  0xff   :  { %v844_v23 = vadd.f32 %v842_v45, %v839_v48  ;;  %v871_v54 = vadd.f32 %v869_v63, %v867_v55  ;;  %v895_v53 = vadd.f32 %v893_v58, %v891_v46  ;;  %v925_v37 = vmul.f32 %v8738_v17, %v8290_v7 }
 0x100   :  { %v1130_v21 = vadd.f32 %v1128_v36, %v1126_v43  ;;  %v917_v31 = vmul.f32 %v8849_v42, %v8357_v61  ;;  %v929_v33 = vmul.f32 %v8793_v49, %v8305_v22  ;;  %v933_v26 = vmul.f32 %v8752_v51, %v8308_v9 }
 0x101   :  { %v875_v45 = vadd.f32 %v873_v8, %v871_v54  ;;  %v899_v63 = vadd.f32 %v897_v35, %v895_v53  ;;  %v927_v19 = vadd.f32 %v925_v37, %v923_v0  ;;  %v937_v7 = vmul.f32 %v8763_v12, %v8311_v38  ;;  %v8870_v38 = vld [vmem:[%s12101_s0 + $0xf0] sm:$0xff] }
 0x102   :  { %v1132_v32 = vmax.f32 %v1130_v21, 0.0  ;;  %v849_v58 = vadd.f32 %v8767_v25, %v844_v23  ;;  %v941_v50 = vmul.f32 %v8816_v4, %v8338_v59  ;;  %v945_v48 = vmul.f32 %v8836_v14, %v8351_v10  ;;  %12242 = vst [vmem:[#allocation20_spill] sm:$0xff] %v8870_v38 }
 0x103   :  { %v879_v55 = vadd.f32 %v877_v6, %v875_v45  ;;  %v903_v22 = vadd.f32 %v901_v29, %v899_v63  ;;  %v931_v46 = vadd.f32 %v929_v33, %v927_v19  ;;  %v949_v9 = vmul.f32 %v8849_v42, %v8354_v62 }
 0x104   :  { %1134 = vst.msk [vmem:[#allocation2 + $0x58] sm:$0xff] %vm293_vm0, %v1132_v32  ;;  %v953_v25 = vmul.f32 %v8870_v38, %v8357_v61  ;;  %v977_v59 = vmul.f32 %v8698_v47, %v8529_v11  ;;  %v980_v10 = vmul.f32 %v8705_v39, %v8532_v44  ;;  %v985_v8 = vmul.f32 %v8712_v3, %v8535_v15 }
 0x105   :  { %v883_v62 = vadd.f32 %v881_v34, %v879_v55  ;;  %v907_v6 = vadd.f32 %v905_v57, %v903_v22  ;;  %v935_v35 = vadd.f32 %v933_v26, %v931_v46  ;;  %v990_v29 = vmul.f32 %v8719_v27, %v8556_v2 }
 0x106   :  { %v982_v43 = vadd.f32 %v980_v10, %v977_v59  ;;  %v995_v0 = vmul.f32 %v8729_v1, %v8559_v5  ;;  %v1000_v61 = vmul.f32 %v8738_v17, %v8572_v52  ;;  %v1005_v23 = vmul.f32 %v8745_v40, %v8575_v41 }
 0x107   :  { %v885_v54 = vmax.f32 %v849_v58, %v883_v62  ;;  %v911_v53 = vadd.f32 %v909_v16, %v907_v6  ;;  %v939_v37 = vadd.f32 %v937_v7, %v935_v35  ;;  %v1010_v34 = vmul.f32 %v8752_v51, %v8587_v28 }
 0x108   :  { %v987_v57 = vadd.f32 %v985_v8, %v982_v43  ;;  %v1019_v21 = vmul.f32 %v8705_v39, %v8529_v11  ;;  %v1021_v33 = vmul.f32 %v8712_v3, %v8532_v44  ;;  %v1025_v26 = vmul.f32 %v8776_v24, %v8535_v15  ;;  %v6518_v24 = vld [vmem:[%s12104_s3 + $0x378] sm:$0xff]  }
 0x109   :  { %v915_v45 = vadd.f32 %v913_v20, %v911_v53  ;;  %v943_v63 = vadd.f32 %v941_v50, %v939_v37  ;;  %v1015_v19 = vmul.f32 %v8763_v12, %v8590_v56  ;;  %v1029_v16 = vmul.f32 %v8729_v1, %v8556_v2 }
 0x10a   :  { %v992_v7 = vadd.f32 %v990_v29, %v987_v57  ;;  %v1023_v32 = vadd.f32 %v1021_v33, %v1019_v21  ;;  %v1033_v58 = vmul.f32 %v8738_v17, %v8559_v5  ;;  %v1037_v55 = vmul.f32 %v8793_v49, %v8572_v52 }
 0x10b   :  { %v2826_v22 = vld [vmem:[#allocation2 + $0x58] sm:$0xff]  ;;  %v919_v46 = vadd.f32 %v917_v31, %v915_v45  ;;  %v947_v59 = vadd.f32 %v945_v48, %v943_v63  ;;  %v1041_v20 = vmul.f32 %v8752_v51, %v8575_v41  ;;  %v1045_v50 = vmul.f32 %v8763_v12, %v8587_v28 }
 0x10c   :  { %v2858_v10 = vpack.c.bf16 %v2826_v22, %v2826_v22  ;;  %v997_v8 = vadd.f32 %v995_v0, %v992_v7  ;;  %v1027_v62 = vadd.f32 %v1025_v26, %v1023_v32  ;;  %v1055_v6 = vmul.f32 %v8719_v27, %v8529_v11 }
 0x10d   :  { %v921_v35 = vmax.f32 %v885_v54, %v919_v46  ;;  %v951_v29 = vadd.f32 %v949_v9, %v947_v59  ;;  %v1057_v31 = vmul.f32 %v8729_v1, %v8532_v44  ;;  %v1061_v48 = vmul.f32 %v8738_v17, %v8535_v15 }
 0x10e   :  { %5166 = vmatprep.mubr.bf16.mxu1 %v2858_v10  ;;  %v1002_v43 = vadd.f32 %v1000_v61, %v997_v8  ;;  %v1031_v53 = vadd.f32 %v1029_v16, %v1027_v62  ;;  %v1049_v0 = vmul.f32 %v8816_v4, %v8590_v56  ;;  %v1065_v37 = vmul.f32 %v8745_v40, %v8556_v2 }
 0x10f   :  { %v955_v57 = vadd.f32 %v953_v25, %v951_v29  ;;  %v1059_v21 = vadd.f32 %v1057_v31, %v1055_v6  ;;  %v1069_v9 = vmul.f32 %v8752_v51, %v8559_v5  ;;  %v1073_v54 = vmul.f32 %v8763_v12, %v8572_v52 }
 0x110   :  { %v1007_v61 = vadd.f32 %v1005_v23, %v1002_v43  ;;  %v1035_v33 = vadd.f32 %v1033_v58, %v1031_v53  ;;  %v1077_v26 = vmul.f32 %v8829_v13, %v8575_v41  ;;  %v1081_v25 = vmul.f32 %v8836_v14, %v8587_v28  ;;  %v9232_v13 = vld [vmem:[%s12101_s0 + $0x8] sm:$0xff] }
 0x111   :  { %v957_v45 = vmax.f32 %v921_v35, %v955_v57  ;;  %v1063_v63 = vadd.f32 %v1061_v48, %v1059_v21  ;;  %v1091_v16 = vmul.f32 %v8729_v1, %v8529_v11  ;;  %v1093_v7 = vmul.f32 %v8738_v17, %v8532_v44  ;;  %v8978_v48 = vld [vmem:[%s12101_s0 + $0x18] sm:$0xff]  ;;  %12253 = vst [vmem:[#allocation31_spill] sm:$0xff] %v9232_v13 }
 0x112   :  { %v1012_v23 = vadd.f32 %v1010_v34, %v1007_v61  ;;  %v1039_v32 = vadd.f32 %v1037_v55, %v1035_v33  ;;  %v1085_v58 = vmul.f32 %v8849_v42, %v8590_v56  ;;  %v1097_v22 = vmul.f32 %v8793_v49, %v8535_v15  ;;  %12243 = vst [vmem:[#allocation21_spill] sm:$0xff] %v8978_v48  ;;  %v6496_v33 = vld [vmem:[%s12104_s3 + $0x308] sm:$0xff]  }
 0x113   :  { %v961_v46 = vadd.f32 %v960_v60, %v957_v45  ;;  %v1067_v59 = vadd.f32 %v1065_v37, %v1063_v63  ;;  %v1095_v10 = vadd.f32 %v1093_v7, %v1091_v16  ;;  %v1101_v8 = vmul.f32 %v8752_v51, %v8556_v2 }
 0x114   :  { %v8950_v11 = vadd.f32 %v1015_v19, %v1012_v23  ;;  %v1043_v44 = vadd.f32 %v1041_v20, %v1039_v32  ;;  %v1105_v34 = vmul.f32 %v8763_v12, %v8559_v5  ;;  %v1109_v55 = vmul.f32 %v8816_v4, %v8572_v52  ;;  %v6492_v5 = vld [vmem:[%s12104_s3 + $0x300] sm:$0xff]   ;;  %v9020_v32 = vld [vmem:[%s12101_s0 + $0x58] sm:$0xff] }
 0x115   :  { %v963_v15 = vmax.f32 %v961_v46, 0.0  ;;  %v1071_v60 = vadd.f32 %v1069_v9, %v1067_v59  ;;  %v1099_v2 = vadd.f32 %v1097_v22, %v1095_v10  ;;  %v1113_v19 = vmul.f32 %v8836_v14, %v8575_v41  ;;  %v6494_v41 = vld [vmem:[%s12104_s3 + $0x348] sm:$0xff]  }
 0x116   :  { %v1047_v20 = vadd.f32 %v1045_v50, %v1043_v44  ;;  %v1117_v52 = vmul.f32 %v8849_v42, %v8587_v28  ;;  %v1146_v62 = vmul.f32 %v8544_v30, %v8806_v18  ;;  %v8970_v6 = vstv %s8910_s16  ;;  %v8994_v9 = vld [vmem:[%s12101_s0 + $0x28] sm:$0xff]  ;;  %s10060_s16 = sld [smem:[#allocation3 + $0x5a]] }
 0x117   :  { %v2855_v35 = vpack.c.bf16 %v963_v15, %v963_v15  ;;  %v1075_v29 = vadd.f32 %v1073_v54, %v1071_v60  ;;  %v1103_v31 = vadd.f32 %v1101_v8, %v1099_v2  ;;  %v1149_v28 = vmul.f32 %v8978_v48, %v8970_v6  ;;  %12244 = vst [vmem:[#allocation22_spill] sm:$0xff] %v8994_v9  ;;  %v6500_v15 = vld [vmem:[%s12104_s3 + $0x310] sm:$0xff]   ;;  %v9048_v60 = vld [vmem:[%s12101_s0 + $0x88] sm:$0xff]  ;;  %v9055_v2 = vld [vmem:[%s12101_s0 + $0x98] sm:$0xff] }
 0x118   :  { %v1051_v50 = vadd.f32 %v1049_v0, %v1047_v20  ;;  %v8983_v30 = vstv %s8924_s6  ;;  %v8986_v43 = vstv %s8926_s7  ;;  %v8989_v53 = vstv %s8932_s17  ;;  %12248 = vst [vmem:[#allocation26_spill] sm:$0xff] %v9048_v60  ;;  %v9064_v20 = vld [vmem:[%s12101_s0 + $0x38] sm:$0xff]  ;;  %s9150_s6 = sld [smem:[#allocation3 + $0x43]]  ;;  %s9779_s7 = sld [smem:[#allocation3 + $0x56]] }
 0x119   :  { %5127 = vmatmul.mubr.bf16.vlgmr.msra.gmra.mrb[8].mxu0 %v2855_v35  ;;  %v1079_v37 = vadd.f32 %v1077_v26, %v1075_v29  ;;  %v1107_v57 = vadd.f32 %v1105_v34, %v1103_v31  ;;  %v1151_v21 = vadd.f32 %v1149_v28, %v1146_v62  ;;  %v1154_v0 = vmul.f32 %v8994_v9, %v8983_v30  ;;  %v9007_v26 = vld [vmem:[%s12101_s0 + $0x48] sm:$0xff]  ;;  %v6502_v31 = vld [vmem:[%s12104_s3 + $0x358] sm:$0xff]   ;;  %s9781_s17 = sld [smem:[#allocation3 + $0x57]] }
 0x11a   :  { %v1053_v54 = vmax.f32 %v8950_v11, %v1051_v50  ;;  %v1121_v61 = vmul.f32 %v8870_v38, %v8590_v56  ;;  %6171 = vmatpush3.bf16.msra.mxu0 %v6492_v5  ;;  %12245 = vst [vmem:[#allocation23_spill] sm:$0xff] %v9007_v26  ;;  %v1159_v45 = vmul.f32 %v9007_v26, %v8986_v43  ;;  %v9012_v63 = vstv %s8934_s24  ;;  %v6498_v56 = vld [vmem:[%s12104_s3 + $0x350] sm:$0xff]   ;;  %v9038_v34 = vld [vmem:[%s12101_s0 + $0x68] sm:$0xff]  ;;  %s9159_s24 = sld [smem:[#allocation6 + $0x6]] }
 0x11b   :  { %v1083_v16 = vadd.f32 %v1081_v25, %v1079_v37  ;;  %v1111_v7 = vadd.f32 %v1109_v55, %v1107_v57  ;;  %6172 = vmatprep.subr.bf16.mxu0 %v6494_v41  ;;  %v1156_v23 = vadd.f32 %v1154_v0, %v1151_v21  ;;  %v1164_v22 = vmul.f32 %v9020_v32, %v8989_v53  ;;  %v9074_v28 = vld [vmem:[%s12101_s0 + $0xa8] sm:$0xff]  ;;  %v9085_v21 = vld [vmem:[%s12101_s0 + $0x78] sm:$0xff] }
 0x11c   :  { %v9025_v46 = vstv %s8948_s19  ;;  %v9028_v59 = vstv %s8956_s20  ;;  %v9031_v25 = vstv %s8958_s12  ;;  %v1188_v10 = vmul.f32 %v8978_v48, %v8806_v18  ;;  %12249 = vst [vmem:[#allocation27_spill] sm:$0xff] %v9064_v20  ;;  %v6495_v38 = vld [vmem:[%s12104_s3 + $0x3c8] sm:$0xff]   ;;  %s9797_s12 = sld [smem:[#allocation3 + $0x58]]  ;;  %s10187_s20 = sld [smem:[#allocation3 + $0x5c]] }
 0x11d   :  { %12246 = vst [vmem:[#allocation24_spill] sm:$0xff] %v9028_v59  ;;  %12247 = vst [vmem:[#allocation25_spill] sm:$0xff] %v9031_v25  ;;  %v1087_v8 = vadd.f32 %v1085_v58, %v1083_v16  ;;  %v1115_v11 = vadd.f32 %v1113_v19, %v1111_v7  ;;  %v1161_v44 = vadd.f32 %v1159_v45, %v1156_v23  ;;  %v6504_v7 = vld [vmem:[%s12104_s3 + $0x318] sm:$0xff]   ;;  %v9264_v51 = vstv %s9179_s27  ;;  %s10372_s27 = sld [smem:[#allocation3 + $0x69]]  ;;  %s11064_s19 = sld [smem:[#allocation3 + $0x7b]] }
 0x11e   :  { %v1169_v55 = vmul.f32 %v9038_v34, %v9012_v63  ;;  %6173 = vmatpush3.bf16.msra.mxu0 %v6496_v33  ;;  %v1174_v58 = vmul.f32 %v9048_v60, %v9025_v46  ;;  %v1179_v19 = vmul.f32 %v9055_v2, %v9028_v59  ;;  %v1190_v5 = vmul.f32 %v8994_v9, %v8970_v6 }
 0x11f   :  { %v1194_v62 = vmul.f32 %v9064_v20, %v8983_v30  ;;  %v1089_v35 = vmax.f32 %v1053_v54, %v1087_v8  ;;  %v1119_v29 = vadd.f32 %v1117_v52, %v1115_v11  ;;  %6174 = vmatprep.subr.bf16.mxu0 %v6498_v56  ;;  %v1166_v41 = vadd.f32 %v1164_v22, %v1161_v44  ;;  %v6506_v8 = vld [vmem:[%s12104_s3 + $0x360] sm:$0xff]   ;;  %v9112_v44 = vld [vmem:[%s12101_s0 + $0xb8] sm:$0xff] }
 0x120   :  { %v1184_v50 = vmul.f32 %v9074_v28, %v9031_v25  ;;  %v1192_v37 = vadd.f32 %v1190_v5, %v1188_v10  ;;  %v1198_v57 = vmul.f32 %v9020_v32, %v8986_v43  ;;  %v1202_v52 = vmul.f32 %v9038_v34, %v8989_v53 }
 0x121   :  { %v1206_v0 = vmul.f32 %v9085_v21, %v9012_v63  ;;  %v1123_v54 = vadd.f32 %v1121_v61, %v1119_v29  ;;  %v1171_v33 = vadd.f32 %v1169_v55, %v1166_v41  ;;  %v1210_v45 = vmul.f32 %v9055_v2, %v9025_v46  ;;  %v9133_v41 = vld [vmem:[%s12101_s0 + $0xc8] sm:$0xff] }
 0x122   :  { %v9093_v16 = vmul.f32 %v9074_v28, %v9028_v59  ;;  %6175 = vmatpush3.bf16.msra.mxu0 %v6500_v15  ;;  %v1196_v56 = vadd.f32 %v1194_v62, %v1192_v37  ;;  %v1224_v23 = vmul.f32 %v9007_v26, %v8806_v18  ;;  %v1226_v61 = vmul.f32 %v9020_v32, %v8970_v6 }
 0x123   :  { %v1230_v22 = vmul.f32 %v9038_v34, %v8983_v30  ;;  %v1125_v10 = vmax.f32 %v1089_v35, %v1123_v54  ;;  %6176 = vmatprep.subr.bf16.mxu0 %v6502_v31  ;;  %v1176_v11 = vadd.f32 %v1174_v58, %v1171_v33  ;;  %v9116_v55 = vmul.f32 %v9112_v44, %v9031_v25 }
 0x124   :  { %v1234_v15 = vmul.f32 %v9048_v60, %v8986_v43  ;;  %v1200_v5 = vadd.f32 %v1198_v57, %v1196_v56  ;;  %v1228_v62 = vadd.f32 %v1226_v61, %v1224_v23  ;;  %v1238_v58 = vmul.f32 %v9055_v2, %v8989_v53  ;;  %v9142_v57 = vld [vmem:[%s12101_s0 + $0xd8] sm:$0xff] }
 0x125   :  { %v1242_v35 = vmul.f32 %v9074_v28, %v9012_v63  ;;  %v1129_v29 = vadd.f32 %v1128_v36, %v1125_v10  ;;  %v1181_v31 = vadd.f32 %v1179_v19, %v1176_v11  ;;  %v9137_v37 = vmul.f32 %v9133_v41, %v9025_v46  ;;  %12250 = vst [vmem:[#allocation28_spill] sm:$0xff] %v9142_v57  ;;  %v6508_v36 = vld [vmem:[%s12104_s3 + $0x320] sm:$0xff]  }
 0x126   :  { %v9146_v54 = vmul.f32 %v9142_v57, %v9028_v59  ;;  %6177 = vmatpush3.bf16.msra.mxu0 %v6504_v7  ;;  %v1204_v19 = vadd.f32 %v1202_v52, %v1200_v5  ;;  %v1232_v33 = vadd.f32 %v1230_v22, %v1228_v62  ;;  %v1260_v56 = vmul.f32 %v9020_v32, %v8806_v18  ;;  %v6510_v7 = vld [vmem:[%s12104_s3 + $0x368] sm:$0xff]  }
 0x127   :  { %v1262_v23 = vmul.f32 %v9038_v34, %v8970_v6  ;;  %v1131_v61 = vmax.f32 %v1129_v29, 0.0  ;;  %6178 = vmatprep.subr.bf16.mxu0 %v6506_v8  ;;  %v9164_v10 = vadd.f32 %v1184_v50, %v1181_v31  ;;  %v9169_v52 = vld [vmem:[%s12101_s0 + $0xe8] sm:$0xff]  ;;  %v1266_v11 = vmul.f32 %v9085_v21, %v8983_v30  ;;  %v6493_v50 = vld [vmem:[%s12104_s3 + $0x380] sm:$0xff]  }
 0x128   :  { %12251 = vst [vmem:[#allocation29_spill] sm:$0xff] %v9169_v52  ;;  %v9173_v22 = vmul.f32 %v9169_v52, %v9031_v25  ;;  %v1208_v8 = vadd.f32 %v1206_v0, %v1204_v19  ;;  %v1236_v5 = vadd.f32 %v1234_v15, %v1232_v33  ;;  %v1270_v29 = vmul.f32 %v9055_v2, %v8986_v43  ;;  %v6512_v15 = vld [vmem:[%s12104_s3 + $0x328] sm:$0xff]  }
 0x129   :  { %v1264_v62 = vadd.f32 %v1262_v23, %v1260_v56  ;;  %v2857_v31 = vpack.c.bf16 %v1131_v61, %v1131_v61  ;;  %v1274_v42 = vmul.f32 %v9074_v28, %v8989_v53  ;;  %v1278_v14 = vmul.f32 %v9112_v44, %v9012_v63  ;;  %v6514_v61 = vld [vmem:[%s12104_s3 + $0x370] sm:$0xff]  }
 0x12a   :  { %v1282_v0 = vmul.f32 %v9142_v57, %v9025_v46  ;;  %6179 = vmatpush3.bf16.msra.mxu0 %v6508_v36  ;;  %v1212_v19 = vadd.f32 %v1210_v45, %v1208_v8  ;;  %v1240_v33 = vadd.f32 %v1238_v58, %v1236_v5  ;;  %v1286_v23 = vmul.f32 %v9169_v52, %v9028_v59  ;;  %v9210_v36 = vld [vmem:[%s12101_s0 + $0xf8] sm:$0xff]  ;;  %v6497_v8 = vld [vmem:[%s12104_s3 + $0x388] sm:$0xff]  }
 0x12b   :  { %v1268_v56 = vadd.f32 %v1266_v11, %v1264_v62  ;;  %5167 = vmatmul.mubr.bf16.vlgmr.msra.gmra.mrb[8].mxu1 %v2857_v31  ;;  %6180 = vmatprep.subr.bf16.mxu0 %v6510_v7  ;;  %12252 = vst [vmem:[#allocation30_spill] sm:$0xff] %v9210_v36  ;;  %v9214_v45 = vmul.f32 %v9210_v36, %v9031_v25  ;;  %v9217_v58 = vstv %s9104_s23  ;;  %v9220_v11 = vstv %s9120_s18  ;;  %s10181_s18 = sld [smem:[#allocation3 + $0x5b]] }
 0x12c   :  { %v9223_v7 = vstv %s9122_s22  ;;  %6193 = vmatpush3.bf16.msra.mxu1 %v6493_v50  ;;  %v1216_v5 = vadd.f32 %v9093_v16, %v1212_v19  ;;  %v1244_v62 = vadd.f32 %v1242_v35, %v1240_v33  ;;  %v1314_v4 = vmul.f32 %v9232_v13, %v9217_v58  ;;  %v6499_v50 = vld [vmem:[%s12104_s3 + $0x3d0] sm:$0xff]   ;;  %s9376_s22 = sld [smem:[#allocation6 + $0x7]]  ;;  %s10570_s23 = sld [smem:[#allocation6 + $0xb]] }
 0x12d   :  { %v1272_v31 = vadd.f32 %v1270_v29, %v1268_v56  ;;  %6194 = vmatprep.subr.bf16.mxu1 %v6495_v38  ;;  %v1317_v16 = vmul.f32 %v8978_v48, %v9220_v11  ;;  %v1322_v35 = vmul.f32 %v8994_v9, %v9223_v7  ;;  %v9244_v29 = vstv %s9148_s26  ;;  %v6516_v38 = vld [vmem:[%s12104_s3 + $0x330] sm:$0xff]   ;;  %s10205_s26 = sld [smem:[#allocation3 + $0x5f]] }
 0x12e   :  { %v9247_v19 = vstv %s9150_s6  ;;  %6181 = vmatpush3.bf16.msra.mxu0 %v6512_v15  ;;  %v1220_v33 = vadd.f32 %v9116_v55, %v1216_v5  ;;  %v1248_v56 = vadd.f32 %v9137_v37, %v1244_v62  ;;  %v1327_v15 = vmul.f32 %v9007_v26, %v9244_v29  ;;  %v6503_v5 = vld [vmem:[%s12104_s3 + $0x3d8] sm:$0xff]   ;;  %s10211_s6 = sld [smem:[#allocation3 + $0x60]] }
 0x12f   :  { %v1276_v13 = vadd.f32 %v1274_v42, %v1272_v31  ;;  %6182 = vmatprep.subr.bf16.mxu0 %v6514_v61  ;;  %v1319_v12 = vadd.f32 %v1317_v16, %v1314_v4  ;;  %v9261_v25 = vstv %s9177_s13  ;;  %v6501_v42 = vld [vmem:[%s12104_s3 + $0x390] sm:$0xff]   ;;  %v1332_v4 = vmul.f32 %v9020_v32, %v9247_v19  ;;  %s9581_s13 = sld [smem:[#allocation3 + $0x4a]] }
 0x130   :  { %6195 = vmatpush3.bf16.msra.mxu1 %v6497_v8  ;;  %v1222_v55 = vmax.f32 %v9164_v10, %v1220_v33  ;;  %v1252_v37 = vadd.f32 %v9146_v54, %v1248_v56  ;;  %v1337_v8 = vmul.f32 %v9038_v34, %v9261_v25  ;;  %v9279_v31 = vstv %s9195_s1  ;;  %s10388_s1 = sld [smem:[#allocation3 + $0x6a]] }
 0x131   :  { %v1280_v61 = vadd.f32 %v1278_v14, %v1276_v13  ;;  %6196 = vmatprep.subr.bf16.mxu1 %v6499_v50  ;;  %v1324_v62 = vadd.f32 %v1322_v35, %v1319_v12  ;;  %v9282_v16 = vstv %s9197_s15  ;;  %v6520_v13 = vld [vmem:[%s12104_s3 + $0x338] sm:$0xff]   ;;  %v1342_v10 = vmul.f32 %v9048_v60, %v9264_v51  ;;  %s9597_s15 = sld [smem:[#allocation3 + $0x4b]] }
 0x132   :  { %6183 = vmatpush3.bf16.msra.mxu0 %v6516_v38  ;;  %v1256_v14 = vadd.f32 %v9173_v22, %v1252_v37  ;;  %v1347_v12 = vmul.f32 %v9055_v2, %v9279_v31  ;;  %v1356_v35 = vmul.f32 %v8978_v48, %v9217_v58  ;;  %v1358_v38 = vmul.f32 %v8994_v9, %v9220_v11  ;;  %v6522_v22 = vld [vmem:[%s12104_s3 + $0x440] sm:$0xff]  }
 0x133   :  { %v1284_v54 = vadd.f32 %v1282_v0, %v1280_v61  ;;  %6184 = vmatprep.subr.bf16.mxu0 %v6518_v24  ;;  %v1329_v50 = vadd.f32 %v1327_v15, %v1324_v62  ;;  %v1362_v33 = vmul.f32 %v9064_v20, %v9223_v7  ;;  %v6505_v0 = vld [vmem:[%s12104_s3 + $0x398] sm:$0xff]   ;;  %v1352_v15 = vmul.f32 %v9074_v28, %v9282_v16  ;;  %v6507_v61 = vld [vmem:[%s12104_s3 + $0x3e0] sm:$0xff]  }
 0x134   :  { %6197 = vmatpush3.bf16.msra.mxu1 %v6501_v42  ;;  %v1258_v24 = vmax.f32 %v1222_v55, %v1256_v14  ;;  %v1366_v37 = vmul.f32 %v9020_v32, %v9244_v29  ;;  %v1360_v49 = vadd.f32 %v1358_v38, %v1356_v35  ;;  %v1370_v42 = vmul.f32 %v9038_v34, %v9247_v19 }
 0x135   :  { %v1288_v56 = vadd.f32 %v1286_v23, %v1284_v54  ;;  %6198 = vmatprep.subr.bf16.mxu1 %v6503_v5  ;;  %v1334_v62 = vadd.f32 %v1332_v4, %v1329_v50  ;;  %v1374_v55 = vmul.f32 %v9085_v21, %v9261_v25  ;;  %v1378_v14 = vmul.f32 %v9055_v2, %v9264_v51 }
 0x136   :  { %6185 = vmatpush3.bf16.msra.mxu0 %v6520_v13  ;;  %v1382_v5 = vmul.f32 %v9074_v28, %v9279_v31  ;;  %v1392_v54 = vmul.f32 %v9007_v26, %v9217_v58  ;;  %v1364_v50 = vadd.f32 %v1362_v33, %v1360_v49  ;;  %v1394_v35 = vmul.f32 %v9020_v32, %v9220_v11  ;;  %v6511_v33 = vld [vmem:[%s12104_s3 + $0x3e8] sm:$0xff]  }
 0x137   :  { %v1292_v23 = vadd.f32 %v9214_v45, %v1288_v56  ;;  %v1339_v4 = vadd.f32 %v1337_v8, %v1334_v62  ;;  %v1398_v13 = vmul.f32 %v9038_v34, %v9223_v7  ;;  %6214 = vmatprep.subr.bf16.mxu0 %v6522_v22  ;;  %v6509_v45 = vld [vmem:[%s12104_s3 + $0x3a0] sm:$0xff]   ;;  %v1386_v56 = vmul.f32 %v9112_v44, %v9282_v16 }
 0x138   :  { %6199 = vmatpush3.bf16.msra.mxu1 %v6505_v0  ;;  %v1402_v49 = vmul.f32 %v9048_v60, %v9244_v29  ;;  %v1406_v8 = vmul.f32 %v9055_v2, %v9247_v19  ;;  %v1368_v0 = vadd.f32 %v1366_v37, %v1364_v50  ;;  %v1396_v62 = vadd.f32 %v1394_v35, %v1392_v54  ;;  %v6513_v37 = vld [vmem:[%s12104_s3 + $0x3a8] sm:$0xff]  }
 0x139   :  { %v1294_v38 = vmax.f32 %v1258_v24, %v1292_v23  ;;  %6200 = vmatprep.subr.bf16.mxu1 %v6507_v61  ;;  %v1344_v22 = vadd.f32 %v1342_v10, %v1339_v4  ;;  %v1410_v24 = vmul.f32 %v9074_v28, %v9261_v25  ;;  %v12254_v23 = vstv %s9159_s24 }
 0x13a   :  { %v1414_v26 = vmul.f32 %v9133_v41, %v9264_v51  ;;  %v1418_v60 = vmul.f32 %v9142_v57, %v9279_v31  ;;  %v1428_v61 = vmul.f32 %v9020_v32, %v9217_v58  ;;  %v1372_v48 = vadd.f32 %v1370_v42, %v1368_v0  ;;  %v6515_v42 = vld [vmem:[%s12104_s3 + $0x3f0] sm:$0xff]  }
 0x13b   :  { %v1298_v20 = vadd.f32 %v12254_v23, %v1294_v38  ;;  %v1349_v9 = vadd.f32 %v1347_v12, %v1344_v22  ;;  %v1400_v59 = vadd.f32 %v1398_v13, %v1396_v62  ;;  %v1430_v10 = vmul.f32 %v9038_v34, %v9220_v11 }
 0x13c   :  { %6201 = vmatpush3.bf16.msra.mxu1 %v6509_v45  ;;  %v1422_v4 = vmul.f32 %v9169_v52, %v9282_v16  ;;  %v1434_v50 = vmul.f32 %v9085_v21, %v9223_v7  ;;  %v1438_v12 = vmul.f32 %v9055_v2, %v9244_v29  ;;  %v1376_v35 = vadd.f32 %v1374_v55, %v1372_v48 }
 0x13d   :  { %v1300_v54 = vmax.f32 %v1298_v20, 0.0  ;;  %6202 = vmatprep.subr.bf16.mxu1 %v6511_v33  ;;  %v1404_v13 = vadd.f32 %v1402_v49, %v1400_v59  ;;  %v1432_v45 = vadd.f32 %v1430_v10, %v1428_v61  ;;  %v1442_v20 = vmul.f32 %v9074_v28, %v9247_v19 }
 0x13e   :  { %v1354_v38 = vadd.f32 %v1352_v15, %v1349_v9  ;;  %v1446_v22 = vmul.f32 %v9112_v44, %v9261_v25  ;;  %v1450_v0 = vmul.f32 %v9142_v57, %v9264_v51  ;;  %v1454_v33 = vmul.f32 %v9169_v52, %v9279_v31  ;;  %v6517_v9 = vld [vmem:[%s12104_s3 + $0x3b0] sm:$0xff]  }
 0x13f   :  { %1302 = vst.msk [vmem:[#allocation2 + $0x68] sm:$0xff] %vm293_vm0, %v1300_v54  ;;  %v1380_v62 = vadd.f32 %v1378_v14, %v1376_v35  ;;  %v1408_v23 = vadd.f32 %v1406_v8, %v1404_v13  ;;  %v1436_v48 = vadd.f32 %v1434_v50, %v1432_v45  ;;  %v1458_v59 = vmul.f32 %v9210_v36, %v9282_v16  ;;  %v6519_v8 = vld [vmem:[%s12104_s3 + $0x3f8] sm:$0xff]   ;;  %v12256_v35 = vld [vmem:[#allocation12_spill] sm:$0xff] }
 0x140   :  { %6203 = vmatpush3.bf16.msra.mxu1 %v6513_v37  ;;  %v1145_v15 = vmul.f32 %v8698_v47, %v8806_v18  ;;  %v1148_v55 = vmul.f32 %v8705_v39, %v8970_v6  ;;  %v1153_v14 = vmul.f32 %v8712_v3, %v8983_v30  ;;  %v1158_v49 = vmul.f32 %v8719_v27, %v8986_v43 }
 0x141   :  { %6204 = vmatprep.subr.bf16.mxu1 %v6515_v42  ;;  %v1384_v61 = vadd.f32 %v1382_v5, %v1380_v62  ;;  %v1412_v10 = vadd.f32 %v1410_v24, %v1408_v23  ;;  %v1440_v37 = vadd.f32 %v1438_v12, %v1436_v48  ;;  %v1163_v47 = vmul.f32 %v8729_v1, %v8989_v53  ;;  %v12255_v42 = vld [vmem:[#allocation24_spill] sm:$0xff]  ;;  %v12257_v24 = vld [vmem:[#allocation25_spill] sm:$0xff]  ;;  %v6521_v23 = vld [vmem:[%s12104_s3 + $0x3b8] sm:$0xff]  }
 0x142   :  { %v1150_v54 = vadd.f32 %v1148_v55, %v1145_v15  ;;  %v1168_v50 = vmul.f32 %v8738_v17, %v9012_v63  ;;  %v1173_v27 = vmul.f32 %v8745_v40, %v9025_v46  ;;  %v1178_v13 = vmul.f32 %v12256_v35, %v12255_v42  ;;  %v12258_v12 = vld [vmem:[#allocation13_spill] sm:$0xff] }
 0x143   :  { %v1388_v45 = vadd.f32 %v1386_v56, %v1384_v61  ;;  %v1416_v36 = vadd.f32 %v1414_v26, %v1412_v10  ;;  %v1444_v5 = vadd.f32 %v1442_v20, %v1440_v37  ;;  %v9401_v62 = vmul.f32 %v12258_v12, %v12257_v24  ;;  %v12259_v56 = vld [vmem:[#allocation14_spill] sm:$0xff] }
 0x144   :  { %6205 = vmatpush3.bf16.msra.mxu1 %v6517_v9  ;;  %v1155_v48 = vadd.f32 %v1153_v14, %v1150_v54  ;;  %v1187_v15 = vmul.f32 %v8705_v39, %v8806_v18  ;;  %v1189_v40 = vmul.f32 %v8712_v3, %v8970_v6  ;;  %v1193_v26 = vmul.f32 %v12259_v56, %v8983_v30  ;;  %v6523_v14 = vld [vmem:[%s12104_s3 + $0x4c0] sm:$0xff]  }
 0x145   :  { %6206 = vmatprep.subr.bf16.mxu1 %v6519_v8  ;;  %v1390_v55 = vmax.f32 %v1354_v38, %v1388_v45  ;;  %v1420_v61 = vadd.f32 %v1418_v60, %v1416_v36  ;;  %v1448_v9 = vadd.f32 %v1446_v22, %v1444_v5  ;;  %v1197_v10 = vmul.f32 %v8729_v1, %v8986_v43  ;;  %v12260_v38 = vld [vmem:[#allocation15_spill] sm:$0xff] }
 0x146   :  { %v2828_v20 = vld [vmem:[#allocation2 + $0x68] sm:$0xff]  ;;  %v1160_v37 = vadd.f32 %v1158_v49, %v1155_v48  ;;  %v1191_v54 = vadd.f32 %v1189_v40, %v1187_v15  ;;  %v1201_v3 = vmul.f32 %v8738_v17, %v8989_v53  ;;  %v1205_v60 = vmul.f32 %v12260_v38, %v9012_v63  ;;  %v9429_v17 = vld [vmem:[%s12101_s0 + $0x40] sm:$0xff] }
 0x147   :  { %v2860_v39 = vpack.c.bf16 %v2828_v20, %v2828_v20  ;;  %v1424_v8 = vadd.f32 %v1422_v4, %v1420_v61  ;;  %v1452_v56 = vadd.f32 %v1450_v0, %v1448_v9  ;;  %v1209_v36 = vmul.f32 %v12256_v35, %v9025_v46  ;;  %v9455_v20 = vld [vmem:[%s12101_s0 + $0x80] sm:$0xff]  ;;  %v9462_v61 = vld [vmem:[%s12101_s0 + $0x90] sm:$0xff] }
 0x148   :  { %6207 = vmatpush3.bf16.msra.mxu1 %v6521_v23  ;;  %v1464_v1 = vstv %s9376_s22  ;;  %v1165_v22 = vadd.f32 %v1163_v47, %v1160_v37  ;;  %v1195_v45 = vadd.f32 %v1193_v26, %v1191_v54  ;;  %v1213_v49 = vmul.f32 %v12258_v12, %v12255_v42  ;;  %v9439_v47 = vld [vmem:[%s12101_s0 + $0x50] sm:$0xff]  ;;  %v9446_v12 = vld [vmem:[%s12101_s0 + $0x60] sm:$0xff]  ;;  %s9766_s22 = sld [smem:[#allocation6 + $0x8]] }
 0x149   :  { %5206 = vmatprep.mubr.bf16.mxu0 %v2860_v39  ;;  %v1426_v5 = vmax.f32 %v1390_v55, %v1424_v8  ;;  %v1456_v48 = vadd.f32 %v1454_v33, %v1452_v56  ;;  %v1223_v4 = vmul.f32 %v9429_v17, %v8806_v18  ;;  %6236 = vmatprep.subr.bf16.mxu1 %v6523_v14  ;;  %v9434_v0 = vstv %s9391_s25  ;;  %v9469_v39 = vld [vmem:[%s12101_s0 + $0xa0] sm:$0xff]  ;;  %v12262_v8 = vld [vmem:[#allocation17_spill] sm:$0xff]  ;;  %s9799_s25 = sld [smem:[#allocation3 + $0x59]] }
 0x14a   :  { %v1170_v35 = vadd.f32 %v1168_v50, %v1165_v22  ;;  %v1199_v23 = vadd.f32 %v1197_v10, %v1195_v45  ;;  %v1225_v33 = vmul.f32 %v9439_v47, %v8970_v6  ;;  %v1229_v15 = vmul.f32 %v9446_v12, %v8983_v30  ;;  %v12261_v50 = vld [vmem:[#allocation16_spill] sm:$0xff]  ;;  %v12263_v22 = vld [vmem:[#allocation18_spill] sm:$0xff] }
 0x14b   :  { %v1460_v40 = vadd.f32 %v1458_v59, %v1456_v48  ;;  %v1217_v26 = vmul.f32 %v12261_v50, %v12257_v24  ;;  %v1233_v55 = vmul.f32 %v9455_v20, %v8986_v43  ;;  %v1237_v59 = vmul.f32 %v9462_v61, %v8989_v53 }
 0x14c   :  { %v1175_v9 = vadd.f32 %v1173_v27, %v1170_v35  ;;  %v1203_v10 = vadd.f32 %v1201_v3, %v1199_v23  ;;  %v1227_v14 = vadd.f32 %v1225_v33, %v1223_v4  ;;  %v1241_v37 = vmul.f32 %v9469_v39, %v9012_v63  ;;  %v12264_v33 = vld [vmem:[#allocation19_spill] sm:$0xff] }
 0x14d   :  { %v1462_v54 = vmax.f32 %v1426_v5, %v1460_v40  ;;  %v1245_v56 = vmul.f32 %v12262_v8, %v9025_v46  ;;  %v1249_v45 = vmul.f32 %v12263_v22, %v12255_v42  ;;  %v1259_v27 = vmul.f32 %v9439_v47, %v8806_v18 }
 0x14e   :  { %v1180_v3 = vadd.f32 %v1178_v13, %v1175_v9  ;;  %v1207_v48 = vadd.f32 %v1205_v60, %v1203_v10  ;;  %v1231_v4 = vadd.f32 %v1229_v15, %v1227_v14  ;;  %v1261_v35 = vmul.f32 %v9446_v12, %v8970_v6 }
 0x14f   :  { %v1466_v23 = vadd.f32 %v1464_v1, %v1462_v54  ;;  %v1253_v5 = vmul.f32 %v12264_v33, %v12257_v24  ;;  %v1265_v40 = vmul.f32 %v12260_v38, %v8983_v30  ;;  %v1269_v8 = vmul.f32 %v9462_v61, %v8986_v43 }
 0x150   :  { %v1211_v52 = vadd.f32 %v1209_v36, %v1207_v48  ;;  %v1235_v57 = vadd.f32 %v1233_v55, %v1231_v4  ;;  %v1263_v18 = vadd.f32 %v1261_v35, %v1259_v27  ;;  %v1273_v13 = vmul.f32 %v9469_v39, %v8989_v53  ;;  %v12265_v36 = vld [vmem:[#allocation20_spill] sm:$0xff] }
 0x151   :  { %v1468_v60 = vmax.f32 %v1466_v23, 0.0  ;;  %v1185_v6 = vadd.f32 %v9401_v62, %v1180_v3  ;;  %v1277_v15 = vmul.f32 %v12261_v50, %v9012_v63  ;;  %v1281_v9 = vmul.f32 %v12263_v22, %v9025_v46  ;;  %v9504_v62 = vld [vmem:[%s12101_s0] sm:$0xff]  ;;  %v9511_v46 = vld [vmem:[%s12101_s0 + $0x10] sm:$0xff] }
 0x152   :  { %v1215_v10 = vadd.f32 %v1213_v49, %v1211_v52  ;;  %v1239_v30 = vadd.f32 %v1237_v59, %v1235_v57  ;;  %v1267_v38 = vadd.f32 %v1265_v40, %v1263_v18  ;;  %v1285_v43 = vmul.f32 %v12264_v33, %v12255_v42  ;;  %v9518_v52 = vld [vmem:[%s12101_s0 + $0x20] sm:$0xff]  ;;  %v9539_v23 = vld [vmem:[%s12101_s0 + $0x30] sm:$0xff] }
 0x153   :  { %1470 = vst.msk [vmem:[#allocation2 + $0x78] sm:$0xff] %vm293_vm0, %v1468_v60  ;;  %v1289_v53 = vmul.f32 %v12265_v36, %v12257_v24  ;;  %v1313_v63 = vmul.f32 %v9504_v62, %v9217_v58  ;;  %v1316_v57 = vmul.f32 %v9511_v46, %v9220_v11  ;;  %v1321_v42 = vmul.f32 %v9518_v52, %v9223_v7 }
 0x154   :  { %v1219_v24 = vadd.f32 %v1217_v26, %v1215_v10  ;;  %v1243_v49 = vadd.f32 %v1241_v37, %v1239_v30  ;;  %v1271_v50 = vadd.f32 %v1269_v8, %v1267_v38  ;;  %v1326_v55 = vmul.f32 %v9429_v17, %v9244_v29  ;;  %v9552_v10 = vld [vmem:[%s12101_s0 + $0x70] sm:$0xff] }
 0x155   :  { %v1318_v59 = vadd.f32 %v1316_v57, %v1313_v63  ;;  %v1331_v14 = vmul.f32 %v9439_v47, %v9247_v19  ;;  %v1336_v54 = vmul.f32 %v9446_v12, %v9261_v25  ;;  %v1341_v22 = vmul.f32 %v9455_v20, %v9264_v51 }
 0x156   :  { %v1221_v27 = vmax.f32 %v1185_v6, %v1219_v24  ;;  %v1247_v3 = vadd.f32 %v1245_v56, %v1243_v49  ;;  %v1275_v48 = vadd.f32 %v1273_v13, %v1271_v50  ;;  %v1346_v26 = vmul.f32 %v9462_v61, %v9279_v31 }
 0x157   :  { %v1323_v37 = vadd.f32 %v1321_v42, %v1318_v59  ;;  %v1355_v4 = vmul.f32 %v9511_v46, %v9217_v58  ;;  %v1357_v35 = vmul.f32 %v9518_v52, %v9220_v11  ;;  %v1361_v33 = vmul.f32 %v9539_v23, %v9223_v7 }
 0x158   :  { %v1251_v56 = vadd.f32 %v1249_v45, %v1247_v3  ;;  %v1279_v40 = vadd.f32 %v1277_v15, %v1275_v48  ;;  %v1351_v8 = vmul.f32 %v9469_v39, %v9282_v16  ;;  %v1365_v18 = vmul.f32 %v9439_v47, %v9244_v29  ;;  %v9569_v48 = vld [vmem:[%s12101_s0 + $0xb0] sm:$0xff] }
 0x159   :  { %v1328_v13 = vadd.f32 %v1326_v55, %v1323_v37  ;;  %v1359_v60 = vadd.f32 %v1357_v35, %v1355_v4  ;;  %v1369_v6 = vmul.f32 %v9446_v12, %v9247_v19  ;;  %v1373_v45 = vmul.f32 %v9552_v10, %v9261_v25 }
 0x15a   :  { %v2830_v15 = vld [vmem:[#allocation2 + $0x78] sm:$0xff]  ;;  %v1255_v30 = vadd.f32 %v1253_v5, %v1251_v56  ;;  %v1283_v38 = vadd.f32 %v1281_v9, %v1279_v40  ;;  %v1377_v36 = vmul.f32 %v9462_v61, %v9264_v51  ;;  %v1381_v63 = vmul.f32 %v9469_v39, %v9279_v31  ;;  %v9586_v56 = vld [vmem:[%s12101_s0 + $0xc0] sm:$0xff]  ;;  %v9593_v40 = vld [vmem:[%s12101_s0 + $0xd0] sm:$0xff] }
 0x15b   :  { %v2862_v57 = vpack.c.bf16 %v2830_v15, %v2830_v15  ;;  %v1333_v42 = vadd.f32 %v1331_v14, %v1328_v13  ;;  %v1363_v24 = vadd.f32 %v1361_v33, %v1359_v60  ;;  %v1391_v49 = vmul.f32 %v9429_v17, %v9217_v58  ;;  %12266 = vst [vmem:[#allocation24_spill] sm:$0xff] %v9586_v56 }
 0x15c   :  { %v1257_v50 = vmax.f32 %v1221_v27, %v1255_v30  ;;  %v1287_v55 = vadd.f32 %v1285_v43, %v1283_v38  ;;  %v1393_v59 = vmul.f32 %v9439_v47, %v9220_v11  ;;  %v1397_v5 = vmul.f32 %v9446_v12, %v9223_v7  ;;  %12267 = vst [vmem:[#allocation12_spill] sm:$0xff] %v9593_v40  ;;  %v9608_v38 = vld [vmem:[%s12101_s0 + $0xe0] sm:$0xff] }
 0x15d   :  { %5246 = vmatprep.mubr.bf16.mxu1 %v2862_v57  ;;  %v1338_v9 = vadd.f32 %v1336_v54, %v1333_v42  ;;  %v1367_v3 = vadd.f32 %v1365_v18, %v1363_v24  ;;  %v1385_v14 = vmul.f32 %v9569_v48, %v9282_v16  ;;  %v1401_v43 = vmul.f32 %v9455_v20, %v9244_v29 }
 0x15e   :  { %v1291_v27 = vadd.f32 %v1289_v53, %v1287_v55  ;;  %v1395_v37 = vadd.f32 %v1393_v59, %v1391_v49  ;;  %v1405_v4 = vmul.f32 %v9462_v61, %v9247_v19  ;;  %v1409_v54 = vmul.f32 %v9469_v39, %v9261_v25  ;;  %12268 = vst [vmem:[#allocation25_spill] sm:$0xff] %v9608_v38 }
 0x15f   :  { %v1343_v35 = vadd.f32 %v1341_v22, %v1338_v9  ;;  %v1371_v33 = vadd.f32 %v1369_v6, %v1367_v3  ;;  %v1413_v53 = vmul.f32 %v9586_v56, %v9264_v51  ;;  %v1417_v18 = vmul.f32 %v9593_v40, %v9279_v31  ;;  %v12270_v9 = vld [vmem:[#allocation31_spill] sm:$0xff]  ;;  %v10001_v56 = vld [vmem:[%s12101_s0 + $0xd8] sm:$0xff] }
 0x160   :  { %v1293_v22 = vmax.f32 %v1257_v50, %v1291_v27  ;;  %v1399_v13 = vadd.f32 %v1397_v5, %v1395_v37  ;;  %v1427_v60 = vmul.f32 %v9439_v47, %v9217_v58  ;;  %v1429_v6 = vmul.f32 %v9446_v12, %v9220_v11 }
 0x161   :  { %v1348_v15 = vadd.f32 %v1346_v26, %v1343_v35  ;;  %v1375_v30 = vadd.f32 %v1373_v45, %v1371_v33  ;;  %v1421_v57 = vmul.f32 %v9608_v38, %v9282_v16  ;;  %v1433_v42 = vmul.f32 %v9552_v10, %v9223_v7 }
 0x162   :  { %v12269_v24 = vstv %s9159_s24  ;;  %v1403_v49 = vadd.f32 %v1401_v43, %v1399_v13  ;;  %v1431_v50 = vadd.f32 %v1429_v6, %v1427_v60  ;;  %v1437_v11 = vmul.f32 %v9462_v61, %v9244_v29  ;;  %s9628_s24 = sld [smem:[#allocation3 + $0x50]] }
 0x163   :  { %v1297_v58 = vadd.f32 %v12269_v24, %v1293_v22  ;;  %v1353_v26 = vadd.f32 %v1351_v8, %v1348_v15  ;;  %v1379_v45 = vadd.f32 %v1377_v36, %v1375_v30  ;;  %v1441_v55 = vmul.f32 %v9469_v39, %v9247_v19  ;;  %v12272_v15 = vld [vmem:[#allocation22_spill] sm:$0xff] }
 0x164   :  { %v1445_v7 = vmul.f32 %v9569_v48, %v9261_v25  ;;  %v1407_v5 = vadd.f32 %v1405_v4, %v1403_v49  ;;  %v1435_v29 = vadd.f32 %v1433_v42, %v1431_v50  ;;  %v1449_v8 = vmul.f32 %v9593_v40, %v9264_v51  ;;  %v6524_v25 = vld [vmem:[%s12104_s3 + $0x400] sm:$0xff]   ;;  %v6526_v51 = vld [vmem:[%s12104_s3 + $0x448] sm:$0xff]  }
 0x165   :  { %v1299_v59 = vmax.f32 %v1297_v58, 0.0  ;;  %v1383_v36 = vadd.f32 %v1381_v63, %v1379_v45  ;;  %v1453_v19 = vmul.f32 %v9608_v38, %v9279_v31  ;;  %v1482_v3 = vmul.f32 %v12270_v9, %v9434_v0  ;;  %v12271_v63 = vld [vmem:[#allocation21_spill] sm:$0xff]  ;;  %v12274_v58 = vld [vmem:[#allocation23_spill] sm:$0xff] }
 0x166   :  { %v9640_v43 = vstv %s9575_s14  ;;  %v1411_v37 = vadd.f32 %v1409_v54, %v1407_v5  ;;  %v1439_v4 = vadd.f32 %v1437_v11, %v1435_v29  ;;  %v9648_v33 = vstv %s9581_s13  ;;  %v6530_v45 = vld [vmem:[%s12104_s3 + $0x450] sm:$0xff]   ;;  %s10370_s13 = sld [smem:[#allocation3 + $0x68]]  ;;  %s11528_s14 = sld [smem:[#allocation3 + $0x82]] }
 0x167   :  { %v2859_v27 = vpack.c.bf16 %v1299_v59, %v1299_v59  ;;  %v1485_v35 = vmul.f32 %v12271_v63, %v9640_v43  ;;  %v1387_v31 = vadd.f32 %v1385_v14, %v1383_v36  ;;  %v9651_v22 = vstv %s9597_s15  ;;  %v9661_v14 = vld [vmem:[%s12101_s0 + $0xf0] sm:$0xff]  ;;  %s10390_s15 = sld [smem:[#allocation3 + $0x6b]] }
 0x168   :  { %v9654_v13 = vstv %s9599_s21  ;;  %v1415_v60 = vadd.f32 %v1413_v53, %v1411_v37  ;;  %v1443_v6 = vadd.f32 %v1441_v55, %v1439_v4  ;;  %v1490_v30 = vmul.f32 %v12272_v15, %v9648_v33  ;;  %12273 = vst [vmem:[#allocation13_spill] sm:$0xff] %v9661_v14  ;;  %v6528_v53 = vld [vmem:[%s12104_s3 + $0x408] sm:$0xff]   ;;  %v12275_v37 = vld [vmem:[#allocation26_spill] sm:$0xff]  ;;  %s9739_s21 = sld [smem:[#allocation3 + $0x52]] }
 0x169   :  { %5207 = vmatmul.mubr.bf16.vlgmr.msra.gmra.mrb[12].mxu0 %v2859_v27  ;;  %v1487_v54 = vadd.f32 %v1485_v35, %v1482_v3  ;;  %v1389_v42 = vmax.f32 %v1353_v26, %v1387_v31  ;;  %v1457_v24 = vmul.f32 %v9661_v14, %v9282_v16  ;;  %v1495_v49 = vmul.f32 %v12274_v58, %v9651_v22  ;;  %v6532_v27 = vld [vmem:[%s12104_s3 + $0x410] sm:$0xff]  }
 0x16a   :  { %6215 = vmatpush3.bf16.msra.mxu0 %v6524_v25  ;;  %v9671_v50 = vstv %s9614_s9  ;;  %v1419_v11 = vadd.f32 %v1417_v18, %v1415_v60  ;;  %v1447_v26 = vadd.f32 %v1445_v7, %v1443_v6  ;;  %v1500_v16 = vmul.f32 %v9020_v32, %v9654_v13  ;;  %v6534_v60 = vld [vmem:[%s12104_s3 + $0x458] sm:$0xff]   ;;  %s9757_s9 = sld [smem:[#allocation3 + $0x55]]  ;;  %12292 = vst [vmem:[#allocation26_spill] sm:$0xff] %v10001_v56 }
 0x16b   :  { %6216 = vmatprep.subr.bf16.mxu0 %v6526_v51  ;;  %v1492_v55 = vadd.f32 %v1490_v30, %v1487_v54  ;;  %v9679_v59 = vstv %s9620_s30  ;;  %v9682_v5 = vstv %s9626_s29  ;;  %v9685_v29 = vstv %s9628_s24  ;;  %s10045_s30 = sld [smem:[#allocation6 + $0x9]]  ;;  %s10833_s29 = sld [smem:[#allocation3 + $0x72]] }
 0x16c   :  { %v1524_v36 = vmul.f32 %v12271_v63, %v9434_v0  ;;  %v1423_v18 = vadd.f32 %v1421_v57, %v1419_v11  ;;  %v1451_v7 = vadd.f32 %v1449_v8, %v1447_v26  ;;  %v1505_v3 = vmul.f32 %v9038_v34, %v9671_v50  ;;  %v12276_v57 = vld [vmem:[#allocation27_spill] sm:$0xff]  ;;  %s10841_s24 = sld [smem:[#allocation3 + $0x73]] }
 0x16d   :  { %v1497_v25 = vadd.f32 %v1495_v49, %v1492_v55  ;;  %v1510_v4 = vmul.f32 %v12275_v37, %v9679_v59  ;;  %v1515_v51 = vmul.f32 %v9055_v2, %v9682_v5  ;;  %v1526_v63 = vmul.f32 %v12272_v15, %v9640_v43 }
 0x16e   :  { %6217 = vmatpush3.bf16.msra.mxu0 %v6528_v53  ;;  %v1530_v8 = vmul.f32 %v12276_v57, %v9648_v33  ;;  %v1425_v35 = vmax.f32 %v1389_v42, %v1423_v18  ;;  %v1455_v31 = vadd.f32 %v1453_v19, %v1451_v7  ;;  %v1520_v54 = vmul.f32 %v9074_v28, %v9685_v29  ;;  %v6538_v7 = vld [vmem:[%s12104_s3 + $0x460] sm:$0xff]  }
 0x16f   :  { %6218 = vmatprep.subr.bf16.mxu0 %v6530_v45  ;;  %v1502_v6 = vadd.f32 %v1500_v16, %v1497_v25  ;;  %v1528_v30 = vadd.f32 %v1526_v63, %v1524_v36  ;;  %v1534_v53 = vmul.f32 %v9020_v32, %v9651_v22  ;;  %v1538_v15 = vmul.f32 %v9038_v34, %v9654_v13  ;;  %v6536_v45 = vld [vmem:[%s12104_s3 + $0x418] sm:$0xff]  }
 0x170   :  { %v1542_v42 = vmul.f32 %v9085_v21, %v9671_v50  ;;  %v1459_v19 = vadd.f32 %v1457_v24, %v1455_v31  ;;  %v1546_v11 = vmul.f32 %v9055_v2, %v9679_v59  ;;  %v9717_v26 = vmul.f32 %v9074_v28, %v9682_v5 }
 0x171   :  { %v1507_v49 = vadd.f32 %v1505_v3, %v1502_v6  ;;  %v1532_v55 = vadd.f32 %v1530_v8, %v1528_v30  ;;  %v1560_v16 = vmul.f32 %v12274_v58, %v9434_v0  ;;  %v1562_v24 = vmul.f32 %v9020_v32, %v9640_v43  ;;  %v6540_v6 = vld [vmem:[%s12104_s3 + $0x420] sm:$0xff]  }
 0x172   :  { %6219 = vmatpush3.bf16.msra.mxu0 %v6532_v27  ;;  %v1566_v36 = vmul.f32 %v9038_v34, %v9648_v33  ;;  %v1461_v18 = vmax.f32 %v1425_v35, %v1459_v19  ;;  %v9735_v3 = vmul.f32 %v9112_v44, %v9685_v29  ;;  %v1570_v58 = vmul.f32 %v12275_v37, %v9651_v22  ;;  %v12277_v37 = vld [vmem:[#allocation28_spill] sm:$0xff] }
 0x173   :  { %6220 = vmatprep.subr.bf16.mxu0 %v6534_v60  ;;  %v1512_v25 = vadd.f32 %v1510_v4, %v1507_v49  ;;  %v1536_v27 = vadd.f32 %v1534_v53, %v1532_v55  ;;  %v1564_v63 = vadd.f32 %v1562_v24, %v1560_v16  ;;  %v1574_v57 = vmul.f32 %v9055_v2, %v9654_v13  ;;  %v6542_v19 = vld [vmem:[%s12104_s3 + $0x468] sm:$0xff]  }
 0x174   :  { %v1578_v8 = vmul.f32 %v9074_v28, %v9671_v50  ;;  %v1465_v4 = vadd.f32 %v1464_v1, %v1461_v18  ;;  %v1582_v31 = vmul.f32 %v9133_v41, %v9679_v59  ;;  %v9753_v60 = vmul.f32 %v12277_v37, %v9682_v5  ;;  %v6527_v18 = vld [vmem:[%s12104_s3 + $0x4c8] sm:$0xff]  }
 0x175   :  { %v1517_v35 = vadd.f32 %v1515_v51, %v1512_v25  ;;  %v1540_v30 = vadd.f32 %v1538_v15, %v1536_v27  ;;  %v1568_v53 = vadd.f32 %v1566_v36, %v1564_v63  ;;  %v1596_v1 = vmul.f32 %v9020_v32, %v9434_v0  ;;  %v12279_v63 = vld [vmem:[#allocation30_spill] sm:$0xff] }
 0x176   :  { %6221 = vmatpush3.bf16.msra.mxu0 %v6536_v45  ;;  %v1598_v41 = vmul.f32 %v9038_v34, %v9640_v43  ;;  %v1467_v51 = vmax.f32 %v1465_v4, 0.0  ;;  %v12278_v45 = vld [vmem:[#allocation29_spill] sm:$0xff]  ;;  %v1602_v32 = vmul.f32 %v9085_v21, %v9648_v33  ;;  %v6525_v34 = vld [vmem:[%s12104_s3 + $0x480] sm:$0xff]   ;;  %v1610_v21 = vmul.f32 %v9074_v28, %v9654_v13 }
 0x177   :  { %6222 = vmatprep.subr.bf16.mxu0 %v6538_v7  ;;  %v9771_v49 = vadd.f32 %v1520_v54, %v1517_v35  ;;  %v9775_v15 = vmul.f32 %v12278_v45, %v9685_v29  ;;  %v1544_v55 = vadd.f32 %v1542_v42, %v1540_v30  ;;  %v1572_v16 = vadd.f32 %v1570_v58, %v1568_v53 }
 0x178   :  { %v1600_v24 = vadd.f32 %v1598_v41, %v1596_v1  ;;  %v1606_v54 = vmul.f32 %v9055_v2, %v9651_v22  ;;  %v2861_v36 = vpack.c.bf16 %v1467_v51, %v1467_v51  ;;  %v1614_v7 = vmul.f32 %v9112_v44, %v9671_v50  ;;  %v6544_v2 = vld [vmem:[%s12104_s3 + $0x428] sm:$0xff]   ;;  %v6546_v44 = vld [vmem:[%s12104_s3 + $0x470] sm:$0xff]   ;;  %v9836_v51 = vld [vmem:[%s12101_s0 + $0x18] sm:$0xff] }
 0x179   :  { %v1618_v42 = vmul.f32 %v12277_v37, %v9679_v59  ;;  %v1548_v25 = vadd.f32 %v1546_v11, %v1544_v55  ;;  %v1576_v58 = vadd.f32 %v1574_v57, %v1572_v16  ;;  %v9806_v27 = vmul.f32 %v12278_v45, %v9682_v5  ;;  %v6529_v37 = vld [vmem:[%s12104_s3 + $0x488] sm:$0xff]   ;;  %v6531_v41 = vld [vmem:[%s12104_s3 + $0x4d0] sm:$0xff]   ;;  %12280 = vst [vmem:[#allocation14_spill] sm:$0xff] %v9836_v51 }
 0x17a   :  { %6223 = vmatpush3.bf16.msra.mxu0 %v6540_v6  ;;  %v1604_v28 = vadd.f32 %v1602_v32, %v1600_v24  ;;  %5247 = vmatmul.mubr.bf16.vlgmr.msra.gmra.mrb[12].mxu1 %v2861_v36  ;;  %v9813_v4 = vmul.f32 %v12279_v63, %v9685_v29  ;;  %v9816_v35 = vstv %s9728_s11  ;;  %v9819_v11 = vstv %s9739_s21  ;;  %v6548_v32 = vld [vmem:[%s12104_s3 + $0x430] sm:$0xff]   ;;  %s10803_s11 = sld [smem:[#allocation3 + $0x6d]]  ;;  %s10817_s21 = sld [smem:[#allocation3 + $0x70]] }
 0x17b   :  { %6224 = vmatprep.subr.bf16.mxu0 %v6542_v19  ;;  %v9822_v57 = vstv %s9741_s2  ;;  %6237 = vmatpush3.bf16.msra.mxu1 %v6525_v34  ;;  %v1552_v6 = vadd.f32 %v9717_v26, %v1548_v25  ;;  %v1580_v30 = vadd.f32 %v1578_v8, %v1576_v58  ;;  %v1650_v1 = vmul.f32 %v12270_v9, %v9816_v35  ;;  %v9843_v26 = vld [vmem:[%s12101_s0 + $0x28] sm:$0xff]  ;;  %s10827_s2 = sld [smem:[#allocation3 + $0x71]] }
 0x17c   :  { %v1608_v53 = vadd.f32 %v1606_v54, %v1604_v28  ;;  %6238 = vmatprep.subr.bf16.mxu1 %v6527_v18  ;;  %v1653_v19 = vmul.f32 %v9836_v51, %v9819_v11  ;;  %12281 = vst [vmem:[#allocation15_spill] sm:$0xff] %v9843_v26  ;;  %v1658_v9 = vmul.f32 %v9843_v26, %v9822_v57  ;;  %v9848_v8 = vstv %s9755_s8  ;;  %v6550_v54 = vld [vmem:[%s12104_s3 + $0x478] sm:$0xff]   ;;  %v9864_v18 = vld [vmem:[%s12101_s0 + $0x48] sm:$0xff]  ;;  %s11062_s8 = sld [smem:[#allocation3 + $0x7a]] }
 0x17d   :  { %12282 = vst [vmem:[#allocation16_spill] sm:$0xff] %v9848_v8  ;;  %v9851_v45 = vstv %s9757_s9  ;;  %v1556_v34 = vadd.f32 %v9735_v3, %v1552_v6  ;;  %v1584_v55 = vadd.f32 %v1582_v31, %v1580_v30  ;;  %12283 = vst [vmem:[#allocation17_spill] sm:$0xff] %v9864_v18  ;;  %v9869_v3 = vstv %s9779_s7  ;;  %s10193_s7 = sld [smem:[#allocation3 + $0x5d]]  ;;  %s10319_s9 = sld [smem:[#allocation3 + $0x63]] }
 0x17e   :  { %6225 = vmatpush3.bf16.msra.mxu0 %v6544_v2  ;;  %v1612_v16 = vadd.f32 %v1610_v21, %v1608_v53  ;;  %v1655_v36 = vadd.f32 %v1653_v19, %v1650_v1  ;;  %v1663_v2 = vmul.f32 %v9864_v18, %v9848_v8  ;;  %v9872_v31 = vstv %s9781_s17  ;;  %v6533_v21 = vld [vmem:[%s12104_s3 + $0x490] sm:$0xff]   ;;  %v6552_v53 = vld [vmem:[%s12104_s3 + $0x438] sm:$0xff]   ;;  %v9909_v19 = vld [vmem:[%s12101_s0 + $0x88] sm:$0xff]  ;;  %s10195_s17 = sld [smem:[#allocation3 + $0x5e]] }
 0x17f   :  { %6226 = vmatprep.subr.bf16.mxu0 %v6546_v44  ;;  %6239 = vmatpush3.bf16.msra.mxu1 %v6529_v37  ;;  %v1558_v25 = vmax.f32 %v9771_v49, %v1556_v34  ;;  %v1588_v58 = vadd.f32 %v9753_v60, %v1584_v55  ;;  %v9882_v44 = vld [vmem:[%s12101_s0 + $0x58] sm:$0xff]  ;;  %v9892_v49 = vld [vmem:[%s12101_s0 + $0x68] sm:$0xff]  ;;  %v9900_v30 = vstv %s9799_s25  ;;  %12286 = vst [vmem:[#allocation20_spill] sm:$0xff] %v9909_v19  ;;  %v12290_v38 = vstv %s9766_s22 }
 0x180   :  { %v1616_v28 = vadd.f32 %v1614_v7, %v1612_v16  ;;  %12284 = vst [vmem:[#allocation18_spill] sm:$0xff] %v9882_v44  ;;  %v1668_v63 = vmul.f32 %v9882_v44, %v9851_v45  ;;  %6240 = vmatprep.subr.bf16.mxu1 %v6531_v41  ;;  %v6535_v37 = vld [vmem:[%s12104_s3 + $0x4d8] sm:$0xff]   ;;  %v1660_v6 = vadd.f32 %v1658_v9, %v1655_v36  ;;  %12285 = vst [vmem:[#allocation19_spill] sm:$0xff] %v9892_v49 }
 0x181   :  { %v1673_v60 = vmul.f32 %v9892_v49, %v9869_v3  ;;  %v9897_v7 = vstv %s9797_s12  ;;  %v1592_v1 = vadd.f32 %v9775_v15, %v1588_v58  ;;  %v1678_v9 = vmul.f32 %v9909_v19, %v9872_v31  ;;  %v9916_v34 = vld [vmem:[%s12101_s0 + $0x98] sm:$0xff]  ;;  %v6554_v58 = vld [vmem:[%s12104_s3 + $0x540] sm:$0xff]   ;;  %s11536_s12 = sld [smem:[#allocation3 + $0x83]] }
 0x182   :  { %6227 = vmatpush3.bf16.msra.mxu0 %v6548_v32  ;;  %v1620_v41 = vadd.f32 %v1618_v42, %v1616_v28  ;;  %12287 = vst [vmem:[#allocation31_spill] sm:$0xff] %v9916_v34  ;;  %v1683_v32 = vmul.f32 %v9916_v34, %v9897_v7  ;;  %v1665_v55 = vadd.f32 %v1663_v2, %v1660_v6  ;;  %v9927_v16 = vld [vmem:[%s12101_s0 + $0x38] sm:$0xff]  ;;  %v9941_v6 = vld [vmem:[%s12101_s0 + $0xa8] sm:$0xff] }
 0x183   :  { %6228 = vmatprep.subr.bf16.mxu0 %v6550_v54  ;;  %v1692_v15 = vmul.f32 %v9836_v51, %v9816_v35  ;;  %v1694_v42 = vmul.f32 %v9843_v26, %v9819_v11  ;;  %12288 = vst [vmem:[#allocation21_spill] sm:$0xff] %v9927_v16  ;;  %v1698_v36 = vmul.f32 %v9927_v16, %v9822_v57  ;;  %v6537_v54 = vld [vmem:[%s12104_s3 + $0x498] sm:$0xff]  }
 0x184   :  { %6241 = vmatpush3.bf16.msra.mxu1 %v6533_v21  ;;  %v1594_v2 = vmax.f32 %v1558_v25, %v1592_v1  ;;  %v1624_v28 = vadd.f32 %v9806_v27, %v1620_v41  ;;  %v1688_v24 = vmul.f32 %v9941_v6, %v9900_v30  ;;  %v1702_v16 = vmul.f32 %v9882_v44, %v9848_v8  ;;  %v6539_v21 = vld [vmem:[%s12104_s3 + $0x4e0] sm:$0xff]   ;;  %v9955_v1 = vld [vmem:[%s12101_s0 + $0x78] sm:$0xff] }
 0x185   :  { %6242 = vmatprep.subr.bf16.mxu1 %v6535_v37  ;;  %v1670_v26 = vadd.f32 %v1668_v63, %v1665_v55  ;;  %v1696_v25 = vadd.f32 %v1694_v42, %v1692_v15  ;;  %v1706_v27 = vmul.f32 %v9892_v49, %v9851_v45  ;;  %12289 = vst [vmem:[#allocation22_spill] sm:$0xff] %v9955_v1 }
 0x186   :  { %v1710_v41 = vmul.f32 %v9955_v1, %v9869_v3  ;;  %6229 = vmatpush3.bf16.msra.mxu0 %v6552_v53  ;;  %v1628_v37 = vadd.f32 %v9813_v4, %v1624_v28  ;;  %v1714_v51 = vmul.f32 %v9916_v34, %v9872_v31  ;;  %v1718_v63 = vmul.f32 %v9941_v6, %v9897_v7  ;;  %v6541_v4 = vld [vmem:[%s12104_s3 + $0x4a0] sm:$0xff]  }
 0x187   :  { %v1728_v55 = vmul.f32 %v9864_v18, %v9816_v35  ;;  %v1675_v15 = vadd.f32 %v1673_v60, %v1670_v26  ;;  %v1700_v42 = vadd.f32 %v1698_v36, %v1696_v25  ;;  %v1730_v14 = vmul.f32 %v9882_v44, %v9819_v11  ;;  %6258 = vmatprep.subr.bf16.mxu0 %v6554_v58  ;;  %v9976_v18 = vld [vmem:[%s12101_s0 + $0xb8] sm:$0xff]  ;;  %v6543_v58 = vld [vmem:[%s12104_s3 + $0x4e8] sm:$0xff]  }
 0x188   :  { %v1734_v53 = vmul.f32 %v9892_v49, %v9822_v57  ;;  %6243 = vmatpush3.bf16.msra.mxu1 %v6537_v54  ;;  %v1630_v28 = vmax.f32 %v1594_v2, %v1628_v37  ;;  %v1722_v26 = vmul.f32 %v9976_v18, %v9900_v30  ;;  %v1738_v60 = vmul.f32 %v9909_v19, %v9848_v8  ;;  %v9994_v19 = vld [vmem:[%s12101_s0 + $0xc8] sm:$0xff] }
 0x189   :  { %v1742_v36 = vmul.f32 %v9916_v34, %v9851_v45  ;;  %6244 = vmatprep.subr.bf16.mxu1 %v6539_v21  ;;  %v1680_v54 = vadd.f32 %v1678_v9, %v1675_v15  ;;  %v1704_v2 = vadd.f32 %v1702_v16, %v1700_v42  ;;  %v1732_v25 = vadd.f32 %v1730_v14, %v1728_v55  ;;  %v6545_v42 = vld [vmem:[%s12104_s3 + $0x4a8] sm:$0xff]  }
 0x18a   :  { %v1746_v37 = vmul.f32 %v9941_v6, %v9869_v3  ;;  %v1634_v40 = vadd.f32 %v12290_v38, %v1630_v28  ;;  %12291 = vst [vmem:[#allocation23_spill] sm:$0xff] %v9994_v19  ;;  %v1750_v21 = vmul.f32 %v9994_v19, %v9872_v31  ;;  %v1754_v14 = vmul.f32 %v10001_v56, %v9897_v7  ;;  %v10015_v19 = vld [vmem:[%s12101_s0 + $0xe8] sm:$0xff] }
 0x18b   :  { %v1764_v9 = vmul.f32 %v9882_v44, %v9816_v35  ;;  %v1685_v38 = vadd.f32 %v1683_v32, %v1680_v54  ;;  %v1708_v16 = vadd.f32 %v1706_v27, %v1704_v2  ;;  %v1736_v55 = vadd.f32 %v1734_v53, %v1732_v25  ;;  %12293 = vst [vmem:[#allocation27_spill] sm:$0xff] %v10015_v19  ;;  %v6547_v53 = vld [vmem:[%s12104_s3 + $0x4f0] sm:$0xff]  }
 0x18c   :  { %v1766_v15 = vmul.f32 %v9892_v49, %v9819_v11  ;;  %6245 = vmatpush3.bf16.msra.mxu1 %v6541_v4  ;;  %v1636_v28 = vmax.f32 %v1634_v40, 0.0  ;;  %v1758_v44 = vmul.f32 %v10015_v19, %v9900_v30  ;;  %v1770_v32 = vmul.f32 %v9955_v1, %v9822_v57 }
 0x18d   :  { %v1774_v27 = vmul.f32 %v9916_v34, %v9848_v8  ;;  %6246 = vmatprep.subr.bf16.mxu1 %v6543_v58  ;;  %v1712_v40 = vadd.f32 %v1710_v41, %v1708_v16  ;;  %v1740_v4 = vadd.f32 %v1738_v60, %v1736_v55  ;;  %v1778_v2 = vmul.f32 %v9941_v6, %v9851_v45  ;;  %v10038_v60 = vld [vmem:[%s12101_s0 + $0xf8] sm:$0xff] }
 0x18e   :  { %v1768_v54 = vadd.f32 %v1766_v15, %v1764_v9  ;;  %1638 = vst.msk [vmem:[#allocation2 + $0x88] sm:$0xff] %vm293_vm0, %v1636_v28  ;;  %v1690_v25 = vadd.f32 %v1688_v24, %v1685_v38  ;;  %v1782_v1 = vmul.f32 %v9976_v18, %v9869_v3  ;;  %v1786_v34 = vmul.f32 %v10001_v56, %v9872_v31  ;;  %v6549_v9 = vld [vmem:[%s12104_s3 + $0x4b0] sm:$0xff]   ;;  %v6551_v55 = vld [vmem:[%s12104_s3 + $0x4f8] sm:$0xff]  }
 0x18f   :  { %v1790_v58 = vmul.f32 %v10015_v19, %v9897_v7  ;;  %v1716_v49 = vadd.f32 %v1714_v51, %v1712_v40  ;;  %v1744_v8 = vadd.f32 %v1742_v36, %v1740_v4  ;;  %12294 = vst [vmem:[#allocation28_spill] sm:$0xff] %v10038_v60  ;;  %v1794_v24 = vmul.f32 %v10038_v60, %v9900_v30 }
 0x190   :  { %v1772_v41 = vadd.f32 %v1770_v32, %v1768_v54  ;;  %6247 = vmatpush3.bf16.msra.mxu1 %v6545_v42  ;;  %v1481_v51 = vmul.f32 %v9504_v62, %v9434_v0  ;;  %v1484_v36 = vmul.f32 %v9511_v46, %v9640_v43  ;;  %v1489_v38 = vmul.f32 %v9518_v52, %v9648_v33 }
 0x191   :  { %v1494_v16 = vmul.f32 %v9429_v17, %v9651_v22  ;;  %6248 = vmatprep.subr.bf16.mxu1 %v6547_v53  ;;  %v1720_v15 = vadd.f32 %v1718_v63, %v1716_v49  ;;  %v1748_v42 = vadd.f32 %v1746_v37, %v1744_v8  ;;  %v1499_v32 = vmul.f32 %v9439_v47, %v9654_v13  ;;  %v6553_v63 = vld [vmem:[%s12104_s3 + $0x4b8] sm:$0xff]  }
 0x192   :  { %v1776_v28 = vadd.f32 %v1774_v27, %v1772_v41  ;;  %v1486_v40 = vadd.f32 %v1484_v36, %v1481_v51  ;;  %v1504_v4 = vmul.f32 %v9446_v12, %v9671_v50  ;;  %v1509_v54 = vmul.f32 %v9455_v20, %v9679_v59 }
 0x193   :  { %v1514_v53 = vmul.f32 %v9462_v61, %v9682_v5  ;;  %v1724_v60 = vadd.f32 %v1722_v26, %v1720_v15  ;;  %v1752_v19 = vadd.f32 %v1750_v21, %v1748_v42  ;;  %v1519_v8 = vmul.f32 %v9469_v39, %v9685_v29 }
 0x194   :  { %v1780_v49 = vadd.f32 %v1778_v2, %v1776_v28  ;;  %6249 = vmatpush3.bf16.msra.mxu1 %v6549_v9  ;;  %v1491_v37 = vadd.f32 %v1489_v38, %v1486_v40  ;;  %v1523_v27 = vmul.f32 %v9511_v46, %v9434_v0  ;;  %v1525_v41 = vmul.f32 %v9518_v52, %v9640_v43  ;;  %v6555_v38 = vld [vmem:[%s12104_s3 + $0x5c0] sm:$0xff]  }
 0x195   :  { %v1529_v26 = vmul.f32 %v9539_v23, %v9648_v33  ;;  %6250 = vmatprep.subr.bf16.mxu1 %v6551_v55  ;;  %v2832_v21 = vld [vmem:[#allocation2 + $0x88] sm:$0xff]  ;;  %v1726_v2 = vmax.f32 %v1690_v25, %v1724_v60  ;;  %v1756_v51 = vadd.f32 %v1754_v14, %v1752_v19  ;;  %v1533_v36 = vmul.f32 %v9439_v47, %v9651_v22 }
 0x196   :  { %v1784_v9 = vadd.f32 %v1782_v1, %v1780_v49  ;;  %v2864_v15 = vpack.c.bf16 %v2832_v21, %v2832_v21  ;;  %v1496_v42 = vadd.f32 %v1494_v16, %v1491_v37  ;;  %v1527_v28 = vadd.f32 %v1525_v41, %v1523_v27 }
 0x197   :  { %v1537_v40 = vmul.f32 %v9446_v12, %v9654_v13  ;;  %v1760_v55 = vadd.f32 %v1758_v44, %v1756_v51  ;;  %v1541_v19 = vmul.f32 %v9552_v10, %v9671_v50  ;;  %v1545_v1 = vmul.f32 %v9462_v61, %v9679_v59 }
 0x198   :  { %v1788_v56 = vadd.f32 %v1786_v34, %v1784_v9  ;;  %6251 = vmatpush3.bf16.msra.mxu1 %v6553_v63  ;;  %5286 = vmatprep.mubr.bf16.mxu0 %v2864_v15  ;;  %v1800_v14 = vstv %s10045_s30  ;;  %v1501_v25 = vadd.f32 %v1499_v32, %v1496_v42  ;;  %v1531_v60 = vadd.f32 %v1529_v26, %v1527_v28  ;;  %v12296_v15 = vld [vmem:[#allocation12_spill] sm:$0xff]  ;;  %s10357_s30 = sld [smem:[#allocation6 + $0xa]] }
 0x199   :  { %v1549_v16 = vmul.f32 %v9469_v39, %v9682_v5  ;;  %v1762_v49 = vmax.f32 %v1726_v2, %v1760_v55  ;;  %v1559_v44 = vmul.f32 %v9429_v17, %v9434_v0  ;;  %6280 = vmatprep.subr.bf16.mxu1 %v6555_v38  ;;  %v10096_v34 = vstv %s10060_s16  ;;  %v12295_v38 = vld [vmem:[#allocation24_spill] sm:$0xff]  ;;  %s11276_s16 = sld [smem:[#allocation3 + $0x7e]] }
 0x19a   :  { %v1792_v37 = vadd.f32 %v1790_v58, %v1788_v56  ;;  %v1506_v27 = vadd.f32 %v1504_v4, %v1501_v25  ;;  %v1535_v41 = vadd.f32 %v1533_v36, %v1531_v60  ;;  %v1561_v63 = vmul.f32 %v9439_v47, %v9640_v43 }
 0x19b   :  { %v1565_v32 = vmul.f32 %v9446_v12, %v9648_v33  ;;  %v1553_v21 = vmul.f32 %v9569_v48, %v9685_v29  ;;  %v1569_v56 = vmul.f32 %v9455_v20, %v9651_v22  ;;  %v1573_v58 = vmul.f32 %v9462_v61, %v9654_v13 }
 0x19c   :  { %v1796_v26 = vadd.f32 %v1794_v24, %v1792_v37  ;;  %v1511_v2 = vadd.f32 %v1509_v54, %v1506_v27  ;;  %v1539_v4 = vadd.f32 %v1537_v40, %v1535_v41  ;;  %v1563_v51 = vadd.f32 %v1561_v63, %v1559_v44  ;;  %v12297_v37 = vld [vmem:[#allocation25_spill] sm:$0xff] }
 0x19d   :  { %v1577_v9 = vmul.f32 %v9469_v39, %v9671_v50  ;;  %v1581_v24 = vmul.f32 %v12295_v38, %v9679_v59  ;;  %v1585_v42 = vmul.f32 %v12296_v15, %v9682_v5  ;;  %v1595_v28 = vmul.f32 %v9439_v47, %v9434_v0 }
 0x19e   :  { %v1798_v36 = vmax.f32 %v1762_v49, %v1796_v26  ;;  %v1516_v55 = vadd.f32 %v1514_v53, %v1511_v2  ;;  %v1543_v25 = vadd.f32 %v1541_v19, %v1539_v4  ;;  %v1567_v60 = vadd.f32 %v1565_v32, %v1563_v51  ;;  %v12299_v51 = vld [vmem:[#allocation16_spill] sm:$0xff] }
 0x19f   :  { %v1597_v54 = vmul.f32 %v9446_v12, %v9640_v43  ;;  %v1589_v49 = vmul.f32 %v12297_v37, %v9685_v29  ;;  %v1601_v44 = vmul.f32 %v9552_v10, %v9648_v33  ;;  %v1605_v27 = vmul.f32 %v9462_v61, %v9651_v22 }
 0x1a0   :  { %v1802_v40 = vadd.f32 %v1800_v14, %v1798_v36  ;;  %v1547_v41 = vadd.f32 %v1545_v1, %v1543_v25  ;;  %v1571_v63 = vadd.f32 %v1569_v56, %v1567_v60  ;;  %v1609_v53 = vmul.f32 %v9469_v39, %v9654_v13  ;;  %v12298_v1 = vld [vmem:[#allocation13_spill] sm:$0xff] }
 0x1a1   :  { %v1599_v0 = vadd.f32 %v1597_v54, %v1595_v28  ;;  %v1521_v32 = vadd.f32 %v1519_v8, %v1516_v55  ;;  %v1613_v43 = vmul.f32 %v9569_v48, %v9671_v50  ;;  %v1617_v26 = vmul.f32 %v12296_v15, %v9679_v59 }
 0x1a2   :  { %v1804_v19 = vmax.f32 %v1802_v40, 0.0  ;;  %v1551_v2 = vadd.f32 %v1549_v16, %v1547_v41  ;;  %v1575_v4 = vadd.f32 %v1573_v58, %v1571_v63  ;;  %v1621_v22 = vmul.f32 %v12297_v37, %v9682_v5 }
 0x1a3   :  { %v1603_v33 = vadd.f32 %v1601_v44, %v1599_v0  ;;  %v1625_v56 = vmul.f32 %v12298_v1, %v9685_v29  ;;  %v1649_v13 = vmul.f32 %v9504_v62, %v9816_v35  ;;  %v1652_v50 = vmul.f32 %v9511_v46, %v9819_v11 }
 0x1a4   :  { %1806 = vst.msk [vmem:[#allocation2 + $0x98] sm:$0xff] %vm293_vm0, %v1804_v19  ;;  %v1657_v59 = vmul.f32 %v9518_v52, %v9822_v57  ;;  %v1555_v8 = vadd.f32 %v1553_v21, %v1551_v2  ;;  %v1579_v16 = vadd.f32 %v1577_v9, %v1575_v4  ;;  %v1662_v5 = vmul.f32 %v9429_v17, %v12299_v51 }
 0x1a5   :  { %v1607_v58 = vadd.f32 %v1605_v27, %v1603_v33  ;;  %v1654_v36 = vadd.f32 %v1652_v50, %v1649_v13  ;;  %v1667_v28 = vmul.f32 %v9439_v47, %v9851_v45  ;;  %v1672_v29 = vmul.f32 %v9446_v12, %v9869_v3 }
 0x1a6   :  { %v1677_v62 = vmul.f32 %v9455_v20, %v9872_v31  ;;  %v1557_v55 = vmax.f32 %v1521_v32, %v1555_v8  ;;  %v1583_v25 = vadd.f32 %v1581_v24, %v1579_v16  ;;  %v1682_v21 = vmul.f32 %v9462_v61, %v9897_v7 }
 0x1a7   :  { %v1611_v60 = vadd.f32 %v1609_v53, %v1607_v58  ;;  %v1659_v9 = vadd.f32 %v1657_v59, %v1654_v36  ;;  %v1691_v54 = vmul.f32 %v9511_v46, %v9816_v35  ;;  %v1693_v40 = vmul.f32 %v9518_v52, %v9819_v11 }
 0x1a8   :  { %v1697_v44 = vmul.f32 %v9539_v23, %v9822_v57  ;;  %v1587_v27 = vadd.f32 %v1585_v42, %v1583_v25  ;;  %v1687_v63 = vmul.f32 %v9469_v39, %v9900_v30  ;;  %v1701_v24 = vmul.f32 %v9439_v47, %v12299_v51 }
 0x1a9   :  { %v1615_v41 = vadd.f32 %v1613_v43, %v1611_v60  ;;  %v1664_v0 = vadd.f32 %v1662_v5, %v1659_v9  ;;  %v1695_v53 = vadd.f32 %v1693_v40, %v1691_v54  ;;  %v1705_v19 = vmul.f32 %v9446_v12, %v9851_v45 }
 0x1aa   :  { %v1709_v46 = vmul.f32 %v9552_v10, %v9869_v3  ;;  %v1591_v32 = vadd.f32 %v1589_v49, %v1587_v27  ;;  %v1713_v23 = vmul.f32 %v9462_v61, %v9872_v31  ;;  %v1717_v42 = vmul.f32 %v9469_v39, %v9897_v7 }
 0x1ab   :  { %v2834_v52 = vld [vmem:[#allocation2 + $0x98] sm:$0xff]  ;;  %v1619_v2 = vadd.f32 %v1617_v26, %v1615_v41  ;;  %v1669_v4 = vadd.f32 %v1667_v28, %v1664_v0  ;;  %v1699_v33 = vadd.f32 %v1697_v44, %v1695_v53  ;;  %v1727_v13 = vmul.f32 %v9429_v17, %v9816_v35 }
 0x1ac   :  { %v2866_v43 = vpack.c.bf16 %v2834_v52, %v2834_v52  ;;  %v1593_v50 = vmax.f32 %v1557_v55, %v1591_v32  ;;  %v1729_v8 = vmul.f32 %v9439_v47, %v9819_v11  ;;  %v1733_v49 = vmul.f32 %v9446_v12, %v9822_v57 }
 0x1ad   :  { %v1623_v59 = vadd.f32 %v1621_v22, %v1619_v2  ;;  %v1674_v26 = vadd.f32 %v1672_v29, %v1669_v4  ;;  %v1703_v16 = vadd.f32 %v1701_v24, %v1699_v33  ;;  %v1721_v58 = vmul.f32 %v9569_v48, %v9900_v30  ;;  %v12302_v33 = vld [vmem:[#allocation15_spill] sm:$0xff] }
 0x1ae   :  { %5326 = vmatprep.mubr.bf16.mxu1 %v2866_v43  ;;  %v1737_v5 = vmul.f32 %v9455_v20, %v12299_v51  ;;  %v1731_v36 = vadd.f32 %v1729_v8, %v1727_v13  ;;  %v1741_v22 = vmul.f32 %v9462_v61, %v9851_v45  ;;  %v1745_v28 = vmul.f32 %v9469_v39, %v9869_v3  ;;  %v6560_v8 = vld [vmem:[%s12104_s3 + $0x508] sm:$0xff]  }
 0x1af   :  { %v1627_v17 = vadd.f32 %v1625_v56, %v1623_v59  ;;  %v1679_v29 = vadd.f32 %v1677_v62, %v1674_v26  ;;  %v1707_v55 = vadd.f32 %v1705_v19, %v1703_v16  ;;  %v1749_v25 = vmul.f32 %v12295_v38, %v9872_v31 }
 0x1b0   :  { %v1753_v20 = vmul.f32 %v12296_v15, %v9897_v7  ;;  %v1735_v60 = vadd.f32 %v1733_v49, %v1731_v36  ;;  %v1763_v9 = vmul.f32 %v9439_v47, %v9816_v35  ;;  %v1765_v54 = vmul.f32 %v9446_v12, %v9819_v11  ;;  %v12303_v49 = vld [vmem:[#allocation17_spill] sm:$0xff] }
 0x1b1   :  { %v1629_v56 = vmax.f32 %v1593_v50, %v1627_v17  ;;  %v1684_v62 = vadd.f32 %v1682_v21, %v1679_v29  ;;  %v1711_v40 = vadd.f32 %v1709_v46, %v1707_v55  ;;  %v1757_v38 = vmul.f32 %v12297_v37, %v9900_v30  ;;  %v6562_v17 = vld [vmem:[%s12104_s3 + $0x550] sm:$0xff]  }
 0x1b2   :  { %v1769_v44 = vmul.f32 %v9552_v10, %v9822_v57  ;;  %v12300_v27 = vstv %s9766_s22  ;;  %v1739_v24 = vadd.f32 %v1737_v5, %v1735_v60  ;;  %v1767_v0 = vadd.f32 %v1765_v54, %v1763_v9  ;;  %s10219_s22 = sld [smem:[#allocation3 + $0x62]]  ;;  %v12305_v60 = vld [vmem:[#allocation19_spill] sm:$0xff]  ;;  %v6564_v54 = vld [vmem:[%s12104_s3 + $0x510] sm:$0xff]  }
 0x1b3   :  { %v1633_v41 = vadd.f32 %v12300_v27, %v1629_v56  ;;  %v1773_v47 = vmul.f32 %v9462_v61, %v12299_v51  ;;  %v1689_v12 = vadd.f32 %v1687_v63, %v1684_v62  ;;  %v1715_v35 = vadd.f32 %v1713_v23, %v1711_v40  ;;  %v12306_v62 = vld [vmem:[#allocation20_spill] sm:$0xff] }
 0x1b4   :  { %v1777_v11 = vmul.f32 %v9469_v39, %v9851_v45  ;;  %v1781_v10 = vmul.f32 %v9569_v48, %v9869_v3  ;;  %v1743_v21 = vadd.f32 %v1741_v22, %v1739_v24  ;;  %v1771_v61 = vadd.f32 %v1769_v44, %v1767_v0  ;;  %v6556_v48 = vld [vmem:[%s12104_s3 + $0x500] sm:$0xff]   ;;  %v10231_v45 = vld [vmem:[%s12101_s0 + $0x8] sm:$0xff] }
 0x1b5   :  { %v1635_v57 = vmax.f32 %v1633_v41, 0.0  ;;  %v1785_v51 = vmul.f32 %v12296_v15, %v9872_v31  ;;  %v1719_v63 = vadd.f32 %v1717_v42, %v1715_v35  ;;  %v1789_v39 = vmul.f32 %v12297_v37, %v9897_v7  ;;  %v6558_v7 = vld [vmem:[%s12104_s3 + $0x548] sm:$0xff]   ;;  %v12301_v37 = vld [vmem:[#allocation14_spill] sm:$0xff]  ;;  %v12307_v44 = vld [vmem:[#allocation31_spill] sm:$0xff] }
 0x1b6   :  { %v1818_v3 = vmul.f32 %v10231_v45, %v10096_v34  ;;  %v10236_v53 = vstv %s10181_s18  ;;  %v1747_v31 = vadd.f32 %v1745_v28, %v1743_v21  ;;  %v1775_v15 = vadd.f32 %v1773_v47, %v1771_v61  ;;  %v12309_v61 = vld [vmem:[#allocation22_spill] sm:$0xff]  ;;  %s11738_s18 = sld [smem:[#allocation3 + $0x8f]] }
 0x1b7   :  { %v2863_v19 = vpack.c.bf16 %v1635_v57, %v1635_v57  ;;  %v1821_v46 = vmul.f32 %v12301_v37, %v10236_v53  ;;  %v1723_v52 = vadd.f32 %v1721_v58, %v1719_v63  ;;  %v10244_v32 = vstv %s10187_s20  ;;  %s10330_s20 = sld [smem:[#allocation3 + $0x64]] }
 0x1b8   :  { %v10247_v2 = vstv %s10193_s7  ;;  %v10250_v23 = vstv %s10195_s17  ;;  %v1751_v42 = vadd.f32 %v1749_v25, %v1747_v31  ;;  %v1779_v43 = vadd.f32 %v1777_v11, %v1775_v15  ;;  %s10332_s7 = sld [smem:[#allocation3 + $0x65]]  ;;  %s10346_s17 = sld [smem:[#allocation3 + $0x66]] }
 0x1b9   :  { %5287 = vmatmul.mubr.bf16.vlgmr.msra.gmra.mrb[16].mxu0 %v2863_v19  ;;  %v1823_v4 = vadd.f32 %v1821_v46, %v1818_v3  ;;  %v1826_v13 = vmul.f32 %v12302_v33, %v10244_v32  ;;  %v1725_v50 = vmax.f32 %v1689_v12, %v1723_v52  ;;  %v1793_v59 = vmul.f32 %v12298_v1, %v9900_v30  ;;  %v12304_v30 = vld [vmem:[#allocation18_spill] sm:$0xff] }
 0x1ba   :  { %6259 = vmatpush3.bf16.msra.mxu0 %v6556_v48  ;;  %v1831_v26 = vmul.f32 %v12303_v49, %v10247_v2  ;;  %v10262_v16 = vstv %s10205_s26  ;;  %v1755_v58 = vadd.f32 %v1753_v20, %v1751_v42  ;;  %v1783_v5 = vadd.f32 %v1781_v10, %v1779_v43  ;;  %v6566_v12 = vld [vmem:[%s12104_s3 + $0x558] sm:$0xff]   ;;  %v6570_v42 = vld [vmem:[%s12104_s3 + $0x560] sm:$0xff]   ;;  %s10348_s26 = sld [smem:[#allocation3 + $0x67]] }
 0x1bb   :  { %6260 = vmatprep.subr.bf16.mxu0 %v6558_v7  ;;  %v1828_v36 = vadd.f32 %v1826_v13, %v1823_v4  ;;  %v1836_v1 = vmul.f32 %v12304_v30, %v10250_v23  ;;  %v10270_v22 = vstv %s10211_s6  ;;  %v10273_v28 = vstv %s10217_s28  ;;  %v6568_v19 = vld [vmem:[%s12104_s3 + $0x518] sm:$0xff]   ;;  %s11082_s6 = sld [smem:[#allocation3 + $0x7d]]  ;;  %s11660_s28 = sld [smem:[#allocation3 + $0x87]] }
 0x1bc   :  { %v10276_v29 = vstv %s10219_s22  ;;  %v1860_v55 = vmul.f32 %v12301_v37, %v10096_v34  ;;  %v1759_v25 = vadd.f32 %v1757_v38, %v1755_v58  ;;  %v1787_v20 = vadd.f32 %v1785_v51, %v1783_v5  ;;  %v12308_v38 = vld [vmem:[#allocation21_spill] sm:$0xff]  ;;  %s11526_s22 = sld [smem:[#allocation3 + $0x81]] }
 0x1bd   :  { %v1833_v56 = vadd.f32 %v1831_v26, %v1828_v36  ;;  %v1841_v9 = vmul.f32 %v12305_v60, %v10262_v16  ;;  %v1846_v40 = vmul.f32 %v12306_v62, %v10270_v22  ;;  %v1851_v27 = vmul.f32 %v12307_v44, %v10273_v28 }
 0x1be   :  { %6261 = vmatpush3.bf16.msra.mxu0 %v6560_v8  ;;  %v1862_v41 = vmul.f32 %v12302_v33, %v10236_v53  ;;  %v1866_v24 = vmul.f32 %v12308_v38, %v10244_v32  ;;  %v1761_v0 = vmax.f32 %v1725_v50, %v1759_v25  ;;  %v1791_v47 = vadd.f32 %v1789_v39, %v1787_v20  ;;  %v6572_v25 = vld [vmem:[%s12104_s3 + $0x520] sm:$0xff]  }
 0x1bf   :  { %6262 = vmatprep.subr.bf16.mxu0 %v6562_v17  ;;  %v1838_v35 = vadd.f32 %v1836_v1, %v1833_v56  ;;  %v1856_v11 = vmul.f32 %v9941_v6, %v10276_v29  ;;  %v1870_v57 = vmul.f32 %v12304_v30, %v10247_v2  ;;  %v1874_v21 = vmul.f32 %v12305_v60, %v10250_v23  ;;  %v12310_v17 = vld [vmem:[#allocation23_spill] sm:$0xff]  ;;  %v12311_v1 = vld [vmem:[#allocation26_spill] sm:$0xff] }
 0x1c0   :  { %v1864_v10 = vadd.f32 %v1862_v41, %v1860_v55  ;;  %v1878_v51 = vmul.f32 %v12309_v61, %v10262_v16  ;;  %v1795_v63 = vadd.f32 %v1793_v59, %v1791_v47  ;;  %v1882_v48 = vmul.f32 %v12307_v44, %v10270_v22  ;;  %v12312_v41 = vld [vmem:[#allocation27_spill] sm:$0xff] }
 0x1c1   :  { %v1843_v39 = vadd.f32 %v1841_v9, %v1838_v35  ;;  %v10308_v3 = vmul.f32 %v9941_v6, %v10273_v28  ;;  %v1896_v15 = vmul.f32 %v12303_v49, %v10096_v34  ;;  %v1898_v7 = vmul.f32 %v12304_v30, %v10236_v53  ;;  %v6557_v47 = vld [vmem:[%s12104_s3 + $0x580] sm:$0xff]  }
 0x1c2   :  { %6263 = vmatpush3.bf16.msra.mxu0 %v6564_v54  ;;  %v1868_v31 = vadd.f32 %v1866_v24, %v1864_v10  ;;  %v1902_v46 = vmul.f32 %v12305_v60, %v10244_v32  ;;  %v1797_v52 = vmax.f32 %v1761_v0, %v1795_v63  ;;  %v10326_v4 = vmul.f32 %v9976_v18, %v10276_v29 }
 0x1c3   :  { %6264 = vmatprep.subr.bf16.mxu0 %v6566_v12  ;;  %v1848_v43 = vadd.f32 %v1846_v40, %v1843_v39  ;;  %v1906_v13 = vmul.f32 %v12306_v62, %v10247_v2  ;;  %v1900_v59 = vadd.f32 %v1898_v7, %v1896_v15  ;;  %v1910_v8 = vmul.f32 %v12307_v44, %v10250_v23  ;;  %v6574_v40 = vld [vmem:[%s12104_s3 + $0x568] sm:$0xff]  }
 0x1c4   :  { %v1872_v50 = vadd.f32 %v1870_v57, %v1868_v31  ;;  %v1914_v26 = vmul.f32 %v9941_v6, %v10262_v16  ;;  %v1801_v58 = vadd.f32 %v1800_v14, %v1797_v52  ;;  %v1918_v36 = vmul.f32 %v12310_v17, %v10270_v22  ;;  %v6578_v52 = vld [vmem:[%s12104_s3 + $0x570] sm:$0xff]  }
 0x1c5   :  { %v1853_v5 = vadd.f32 %v1851_v27, %v1848_v43  ;;  %v10344_v55 = vmul.f32 %v12311_v1, %v10273_v28  ;;  %v1904_v56 = vadd.f32 %v1902_v46, %v1900_v59  ;;  %v1932_v14 = vmul.f32 %v12304_v30, %v10096_v34  ;;  %v6561_v59 = vld [vmem:[%s12104_s3 + $0x588] sm:$0xff]  }
 0x1c6   :  { %6265 = vmatpush3.bf16.msra.mxu0 %v6568_v19  ;;  %v1876_v20 = vadd.f32 %v1874_v21, %v1872_v50  ;;  %v1934_v9 = vmul.f32 %v12305_v60, %v10236_v53  ;;  %v1803_v54 = vmax.f32 %v1801_v58, 0.0  ;;  %v10366_v24 = vmul.f32 %v12312_v41, %v10276_v29  ;;  %v6559_v21 = vld [vmem:[%s12104_s3 + $0x5c8] sm:$0xff]  }
 0x1c7   :  { %6266 = vmatprep.subr.bf16.mxu0 %v6570_v42  ;;  %v10362_v27 = vadd.f32 %v1856_v11, %v1853_v5  ;;  %v1938_v0 = vmul.f32 %v12309_v61, %v10244_v32  ;;  %v1908_v35 = vadd.f32 %v1906_v13, %v1904_v56  ;;  %v1942_v11 = vmul.f32 %v12307_v44, %v10247_v2  ;;  %v6576_v19 = vld [vmem:[%s12104_s3 + $0x528] sm:$0xff]  }
 0x1c8   :  { %v1880_v12 = vadd.f32 %v1878_v51, %v1876_v20  ;;  %v1936_v10 = vadd.f32 %v1934_v9, %v1932_v14  ;;  %v2865_v57 = vpack.c.bf16 %v1803_v54, %v1803_v54  ;;  %v1946_v63 = vmul.f32 %v9941_v6, %v10250_v23  ;;  %v12313_v42 = vld [vmem:[#allocation28_spill] sm:$0xff]  ;;  %v6563_v20 = vld [vmem:[%s12104_s3 + $0x5d0] sm:$0xff]  }
 0x1c9   :  { %v1950_v39 = vmul.f32 %v9976_v18, %v10262_v16  ;;  %v1954_v51 = vmul.f32 %v12311_v1, %v10270_v22  ;;  %v1912_v15 = vadd.f32 %v1910_v8, %v1908_v35  ;;  %v1958_v46 = vmul.f32 %v12312_v41, %v10273_v28 }
 0x1ca   :  { %6267 = vmatpush3.bf16.msra.mxu0 %v6572_v25  ;;  %v1884_v31 = vadd.f32 %v1882_v48, %v1880_v12  ;;  %v1940_v7 = vadd.f32 %v1938_v0, %v1936_v10  ;;  %5327 = vmatmul.mubr.bf16.vlgmr.msra.gmra.mrb[16].mxu1 %v2865_v57  ;;  %v10402_v43 = vmul.f32 %v12313_v42, %v10276_v29  ;;  %v10405_v13 = vstv %s10319_s9  ;;  %v6582_v12 = vld [vmem:[%s12104_s3 + $0x578] sm:$0xff]  }
 0x1cb   :  { %6268 = vmatprep.subr.bf16.mxu0 %v6574_v40  ;;  %v10408_v48 = vstv %s10330_s20  ;;  %v10411_v50 = vstv %s10332_s7  ;;  %6281 = vmatpush3.bf16.msra.mxu1 %v6557_v47  ;;  %v1916_v58 = vadd.f32 %v1914_v26, %v1912_v15  ;;  %v1986_v25 = vmul.f32 %v10231_v45, %v10405_v13  ;;  %v6580_v26 = vld [vmem:[%s12104_s3 + $0x530] sm:$0xff]   ;;  %s11507_s7 = sld [smem:[#allocation3 + $0x7f]] }
 0x1cc   :  { %v1888_v8 = vadd.f32 %v10308_v3, %v1884_v31  ;;  %v1944_v5 = vadd.f32 %v1942_v11, %v1940_v7  ;;  %6282 = vmatprep.subr.bf16.mxu1 %v6559_v21  ;;  %v1989_v56 = vmul.f32 %v12301_v37, %v10408_v48  ;;  %v1994_v14 = vmul.f32 %v12302_v33, %v10411_v50  ;;  %v6567_v31 = vld [vmem:[%s12104_s3 + $0x5d8] sm:$0xff]  }
 0x1cd   :  { %v10427_v9 = vstv %s10346_s17  ;;  %v10430_v3 = vstv %s10348_s26  ;;  %v1920_v40 = vadd.f32 %v1918_v36, %v1916_v58  ;;  %v1968_v47 = vstv %s10357_s30  ;;  %s10843_s30 = sld [smem:[#allocation3 + $0x74]]  ;;  %s10989_s26 = sld [smem:[#allocation3 + $0x75]] }
 0x1ce   :  { %6269 = vmatpush3.bf16.msra.mxu0 %v6576_v19  ;;  %v1892_v54 = vadd.f32 %v10326_v4, %v1888_v8  ;;  %v1948_v0 = vadd.f32 %v1946_v63, %v1944_v5  ;;  %v1991_v35 = vadd.f32 %v1989_v56, %v1986_v25  ;;  %v1999_v10 = vmul.f32 %v12303_v49, %v10427_v9  ;;  %v6565_v4 = vld [vmem:[%s12104_s3 + $0x590] sm:$0xff]   ;;  %s11080_s17 = sld [smem:[#allocation3 + $0x7c]] }
 0x1cf   :  { %6270 = vmatprep.subr.bf16.mxu0 %v6578_v52  ;;  %v10443_v11 = vstv %s10370_s13  ;;  %v10446_v57 = vstv %s10372_s27  ;;  %6283 = vmatpush3.bf16.msra.mxu1 %v6561_v59  ;;  %v1924_v21 = vadd.f32 %v10344_v55, %v1920_v40  ;;  %v2004_v19 = vmul.f32 %v12304_v30, %v10430_v3  ;;  %v6584_v55 = vld [vmem:[%s12104_s3 + $0x538] sm:$0xff]   ;;  %s11005_s13 = sld [smem:[#allocation3 + $0x76]]  ;;  %s11007_s27 = sld [smem:[#allocation3 + $0x77]] }
 0x1d0   :  { %v1894_v36 = vmax.f32 %v10362_v27, %v1892_v54  ;;  %v1952_v63 = vadd.f32 %v1950_v39, %v1948_v0  ;;  %6284 = vmatprep.subr.bf16.mxu1 %v6563_v20  ;;  %v1996_v15 = vadd.f32 %v1994_v14, %v1991_v35  ;;  %v2009_v7 = vmul.f32 %v12305_v60, %v10443_v11 }
 0x1d1   :  { %v10461_v52 = vstv %s10388_s1  ;;  %v10464_v59 = vstv %s10390_s15  ;;  %v1928_v27 = vadd.f32 %v10366_v24, %v1924_v21  ;;  %v2014_v8 = vmul.f32 %v12306_v62, %v10446_v57  ;;  %v6586_v24 = vld [vmem:[%s12104_s3 + $0x640] sm:$0xff]   ;;  %s10809_s1 = sld [smem:[#allocation3 + $0x6e]]  ;;  %s10815_s15 = sld [smem:[#allocation3 + $0x6f]] }
 0x1d2   :  { %6271 = vmatpush3.bf16.msra.mxu0 %v6580_v26  ;;  %v1956_v39 = vadd.f32 %v1954_v51, %v1952_v63  ;;  %v2019_v58 = vmul.f32 %v12307_v44, %v10461_v52  ;;  %v2001_v5 = vadd.f32 %v1999_v10, %v1996_v15  ;;  %v2028_v25 = vmul.f32 %v12301_v37, %v10405_v13  ;;  %v6569_v51 = vld [vmem:[%s12104_s3 + $0x598] sm:$0xff]  }
 0x1d3   :  { %6272 = vmatprep.subr.bf16.mxu0 %v6582_v12  ;;  %v2030_v20 = vmul.f32 %v12302_v33, %v10408_v48  ;;  %v2034_v56 = vmul.f32 %v12308_v38, %v10411_v50  ;;  %6285 = vmatpush3.bf16.msra.mxu1 %v6565_v4  ;;  %v1930_v14 = vmax.f32 %v1894_v36, %v1928_v27  ;;  %v6571_v38 = vld [vmem:[%s12104_s3 + $0x5e0] sm:$0xff]  }
 0x1d4   :  { %v1960_v26 = vadd.f32 %v1958_v46, %v1956_v39  ;;  %v2024_v37 = vmul.f32 %v9941_v6, %v10464_v59  ;;  %v2038_v33 = vmul.f32 %v12304_v30, %v10427_v9  ;;  %6286 = vmatprep.subr.bf16.mxu1 %v6567_v31  ;;  %v2006_v54 = vadd.f32 %v2004_v19, %v2001_v5 }
 0x1d5   :  { %v2032_v40 = vadd.f32 %v2030_v20, %v2028_v25  ;;  %v2042_v0 = vmul.f32 %v12305_v60, %v10430_v3  ;;  %v2046_v12 = vmul.f32 %v12309_v61, %v10443_v11  ;;  %v2050_v35 = vmul.f32 %v12307_v44, %v10446_v57 }
 0x1d6   :  { %6273 = vmatpush3.bf16.msra.mxu0 %v6584_v55  ;;  %v1964_v46 = vadd.f32 %v10402_v43, %v1960_v26  ;;  %v2054_v10 = vmul.f32 %v9941_v6, %v10461_v52  ;;  %v2064_v4 = vmul.f32 %v12303_v49, %v10405_v13  ;;  %v2011_v36 = vadd.f32 %v2009_v7, %v2006_v54  ;;  %v6573_v43 = vld [vmem:[%s12104_s3 + $0x5a0] sm:$0xff]   ;;  %v6575_v55 = vld [vmem:[%s12104_s3 + $0x5e8] sm:$0xff]  }
 0x1d7   :  { %v2036_v21 = vadd.f32 %v2034_v56, %v2032_v40  ;;  %v2066_v63 = vmul.f32 %v12304_v30, %v10408_v48  ;;  %v2070_v19 = vmul.f32 %v12305_v60, %v10411_v50  ;;  %6302 = vmatprep.subr.bf16.mxu0 %v6586_v24  ;;  %6287 = vmatpush3.bf16.msra.mxu1 %v6569_v51 }
 0x1d8   :  { %v1966_v31 = vmax.f32 %v1930_v14, %v1964_v46  ;;  %v10513_v15 = vmul.f32 %v9976_v18, %v10464_v59  ;;  %v2074_v49 = vmul.f32 %v12306_v62, %v10427_v9  ;;  %v2078_v7 = vmul.f32 %v12307_v44, %v10430_v3  ;;  %6288 = vmatprep.subr.bf16.mxu1 %v6571_v38 }
 0x1d9   :  { %v2016_v27 = vadd.f32 %v2014_v8, %v2011_v36  ;;  %v2040_v39 = vadd.f32 %v2038_v33, %v2036_v21  ;;  %v2068_v5 = vadd.f32 %v2066_v63, %v2064_v4  ;;  %v2082_v25 = vmul.f32 %v9941_v6, %v10443_v11  ;;  %v6577_v33 = vld [vmem:[%s12104_s3 + $0x5a8] sm:$0xff]  }
 0x1da   :  { %v1970_v20 = vadd.f32 %v1968_v47, %v1966_v31  ;;  %v2086_v56 = vmul.f32 %v12310_v17, %v10446_v57  ;;  %v10530_v62 = vmul.f32 %v12311_v1, %v10461_v52  ;;  %v2100_v24 = vmul.f32 %v12304_v30, %v10405_v13 }
 0x1db   :  { %v2021_v51 = vadd.f32 %v2019_v58, %v2016_v27  ;;  %v2044_v14 = vadd.f32 %v2042_v0, %v2040_v39  ;;  %v2072_v8 = vadd.f32 %v2070_v19, %v2068_v5  ;;  %v2102_v26 = vmul.f32 %v12305_v60, %v10408_v48  ;;  %6289 = vmatpush3.bf16.msra.mxu1 %v6573_v43  ;;  %v6579_v60 = vld [vmem:[%s12104_s3 + $0x5f0] sm:$0xff]   ;;  %v10596_v43 = vld [vmem:[%s12101_s0 + $0x40] sm:$0xff] }
 0x1dc   :  { %v1972_v38 = vmax.f32 %v1970_v20, 0.0  ;;  %v10541_v17 = vmul.f32 %v12312_v41, %v10464_v59  ;;  %v2106_v54 = vmul.f32 %v12309_v61, %v10411_v50  ;;  %v2110_v30 = vmul.f32 %v12307_v44, %v10427_v9  ;;  %6290 = vmatprep.subr.bf16.mxu1 %v6575_v55  ;;  %v10606_v39 = vld [vmem:[%s12101_s0 + $0x50] sm:$0xff] }
 0x1dd   :  { %v2048_v58 = vadd.f32 %v2046_v12, %v2044_v14  ;;  %v2076_v40 = vadd.f32 %v2074_v49, %v2072_v8  ;;  %v2104_v0 = vadd.f32 %v2102_v26, %v2100_v24  ;;  %v2114_v46 = vmul.f32 %v9941_v6, %v10430_v3  ;;  %v6583_v49 = vld [vmem:[%s12104_s3 + $0x5f8] sm:$0xff]   ;;  %v10615_v24 = vld [vmem:[%s12101_s0 + $0x60] sm:$0xff]  ;;  %v10629_v14 = vld [vmem:[%s12101_s0 + $0x90] sm:$0xff] }
 0x1de   :  { %1974 = vst.msk [vmem:[#allocation2 + $0xa8] sm:$0xff] %vm293_vm0, %v1972_v38  ;;  %v10553_v4 = vadd.f32 %v2024_v37, %v2021_v51  ;;  %v2118_v61 = vmul.f32 %v9976_v18, %v10443_v11  ;;  %v2122_v44 = vmul.f32 %v12311_v1, %v10446_v57  ;;  %v10561_v36 = vmul.f32 %v12312_v41, %v10461_v52  ;;  %v6581_v37 = vld [vmem:[%s12104_s3 + $0x5b0] sm:$0xff]   ;;  %v10575_v18 = vld [vmem:[%s12101_s0] sm:$0xff] }
 0x1df   :  { %v2052_v12 = vadd.f32 %v2050_v35, %v2048_v58  ;;  %v2080_v21 = vadd.f32 %v2078_v7, %v2076_v40  ;;  %v2108_v63 = vadd.f32 %v2106_v54, %v2104_v0  ;;  %v10565_v6 = vmul.f32 %v12313_v42, %v10464_v59  ;;  %6291 = vmatpush3.bf16.msra.mxu1 %v6577_v33  ;;  %v10582_v41 = vld [vmem:[%s12101_s0 + $0x10] sm:$0xff]  ;;  %v10589_v35 = vld [vmem:[%s12101_s0 + $0x20] sm:$0xff] }
 0x1e0   :  { %v1817_v1 = vmul.f32 %v10575_v18, %v10096_v34  ;;  %v1820_v42 = vmul.f32 %v10582_v41, %v10236_v53  ;;  %v1825_v19 = vmul.f32 %v10589_v35, %v10244_v32  ;;  %v1830_v31 = vmul.f32 %v10596_v43, %v10247_v2  ;;  %6292 = vmatprep.subr.bf16.mxu1 %v6579_v60  ;;  %v10637_v54 = vld [vmem:[%s12101_s0 + $0xa0] sm:$0xff]  ;;  %v6585_v60 = vld [vmem:[%s12104_s3 + $0x5b8] sm:$0xff]   ;;  %v10653_v40 = vld [vmem:[%s12101_s0 + $0x30] sm:$0xff] }
 0x1e1   :  { %v2056_v7 = vadd.f32 %v2054_v10, %v2052_v12  ;;  %v2084_v55 = vadd.f32 %v2082_v25, %v2080_v21  ;;  %v2112_v27 = vadd.f32 %v2110_v30, %v2108_v63  ;;  %v1835_v5 = vmul.f32 %v10606_v39, %v10250_v23  ;;  %v10622_v25 = vld [vmem:[%s12101_s0 + $0x80] sm:$0xff]  ;;  %12314 = vst [vmem:[#allocation29_spill] sm:$0xff] %v10629_v14 }
 0x1e2   :  { %v1822_v20 = vadd.f32 %v1820_v42, %v1817_v1  ;;  %v1840_v10 = vmul.f32 %v10615_v24, %v10262_v16  ;;  %v1845_v51 = vmul.f32 %v10622_v25, %v10270_v22  ;;  %v1850_v8 = vmul.f32 %v10629_v14, %v10273_v28  ;;  %12315 = vst [vmem:[#allocation30_spill] sm:$0xff] %v10637_v54  ;;  %v6587_v1 = vld [vmem:[%s12104_s3 + $0x6c0] sm:$0xff]  }
 0x1e3   :  { %v2060_v26 = vadd.f32 %v10513_v15, %v2056_v7  ;;  %v2088_v33 = vadd.f32 %v2086_v56, %v2084_v55  ;;  %v2116_v38 = vadd.f32 %v2114_v46, %v2112_v27  ;;  %v10641_v30 = vmul.f32 %v10637_v54, %v10276_v29  ;;  %6293 = vmatpush3.bf16.msra.mxu1 %v6581_v37 }
 0x1e4   :  { %v1827_v58 = vadd.f32 %v1825_v19, %v1822_v20  ;;  %v1859_v15 = vmul.f32 %v10582_v41, %v10096_v34  ;;  %v1861_v56 = vmul.f32 %v10589_v35, %v10236_v53  ;;  %12316 = vst [vmem:[#allocation24_spill] sm:$0xff] %v10653_v40  ;;  %v1865_v0 = vmul.f32 %v10653_v40, %v10244_v32 }
 0x1e5   :  { %6294 = vmatprep.subr.bf16.mxu1 %v6583_v49  ;;  %v2836_v46 = vld [vmem:[#allocation2 + $0xa8] sm:$0xff]  ;;  %v2062_v12 = vmax.f32 %v10553_v4, %v2060_v26  ;;  %v2092_v21 = vadd.f32 %v10530_v62, %v2088_v33  ;;  %v2120_v63 = vadd.f32 %v2118_v61, %v2116_v38  ;;  %v1869_v37 = vmul.f32 %v10606_v39, %v10247_v2  ;;  %v10670_v62 = vld [vmem:[%s12101_s0 + $0x70] sm:$0xff] }
 0x1e6   :  { %v2868_v42 = vpack.c.bf16 %v2836_v46, %v2836_v46  ;;  %v1832_v19 = vadd.f32 %v1830_v31, %v1827_v58  ;;  %v1863_v7 = vadd.f32 %v1861_v56, %v1859_v15  ;;  %v1873_v49 = vmul.f32 %v10615_v24, %v10250_v23  ;;  %12317 = vst [vmem:[#allocation12_spill] sm:$0xff] %v10670_v62 }
 0x1e7   :  { %v2096_v4 = vadd.f32 %v10541_v17, %v2092_v21  ;;  %v2124_v55 = vadd.f32 %v2122_v44, %v2120_v63  ;;  %v1877_v61 = vmul.f32 %v10670_v62, %v10262_v16  ;;  %v1881_v27 = vmul.f32 %v10629_v14, %v10270_v22  ;;  %6295 = vmatpush3.bf16.msra.mxu1 %v6585_v60 }
 0x1e8   :  { %5366 = vmatprep.mubr.bf16.mxu0 %v2868_v42  ;;  %v2136_v31 = vstv %s10570_s23  ;;  %v1837_v20 = vadd.f32 %v1835_v5, %v1832_v19  ;;  %v1867_v26 = vadd.f32 %v1865_v0, %v1863_v7  ;;  %v1885_v17 = vmul.f32 %v10637_v54, %v10273_v28  ;;  %6324 = vmatprep.subr.bf16.mxu1 %v6587_v1  ;;  %v10706_v42 = vld [vmem:[%s12101_s0 + $0xc0] sm:$0xff]  ;;  %v10713_v7 = vld [vmem:[%s12101_s0 + $0xd0] sm:$0xff]  ;;  %s11033_s23 = sld [smem:[#allocation3 + $0x78]] }
 0x1e9   :  { %v2098_v44 = vmax.f32 %v2062_v12, %v2096_v4  ;;  %v2128_v33 = vadd.f32 %v10561_v36, %v2124_v55  ;;  %v1895_v38 = vmul.f32 %v10596_v43, %v10096_v34  ;;  %v10683_v58 = vstv %s10610_s10  ;;  %v10693_v36 = vld [vmem:[%s12101_s0 + $0xb0] sm:$0xff]  ;;  %12319 = vst [vmem:[#allocation13_spill] sm:$0xff] %v10706_v42  ;;  %12320 = vst [vmem:[#allocation16_spill] sm:$0xff] %v10713_v7  ;;  %s11542_s10 = sld [smem:[#allocation3 + $0x84]] }
 0x1ea   :  { %v1842_v15 = vadd.f32 %v1840_v10, %v1837_v20  ;;  %v1871_v56 = vadd.f32 %v1869_v37, %v1867_v26  ;;  %v1897_v60 = vmul.f32 %v10606_v39, %v10236_v53  ;;  %v1901_v5 = vmul.f32 %v10615_v24, %v10244_v32  ;;  %12318 = vst [vmem:[#allocation25_spill] sm:$0xff] %v10693_v36 }
 0x1eb   :  { %v2132_v0 = vadd.f32 %v10565_v6, %v2128_v33  ;;  %v1889_v46 = vmul.f32 %v10693_v36, %v10276_v29  ;;  %v1905_v10 = vmul.f32 %v10622_v25, %v10247_v2  ;;  %v1909_v12 = vmul.f32 %v10629_v14, %v10250_v23  ;;  %v10726_v33 = vld [vmem:[%s12101_s0 + $0xe0] sm:$0xff] }
 0x1ec   :  { %v1847_v21 = vadd.f32 %v1845_v51, %v1842_v15  ;;  %v1875_v63 = vadd.f32 %v1873_v49, %v1871_v56  ;;  %v1899_v37 = vadd.f32 %v1897_v60, %v1895_v38  ;;  %v1913_v6 = vmul.f32 %v10637_v54, %v10262_v16  ;;  %12321 = vst [vmem:[#allocation14_spill] sm:$0xff] %v10726_v33 }
 0x1ed   :  { %v2134_v1 = vmax.f32 %v2098_v44, %v2132_v0  ;;  %v1917_v19 = vmul.f32 %v10706_v42, %v10270_v22  ;;  %v1921_v51 = vmul.f32 %v10713_v7, %v10273_v28  ;;  %v1931_v49 = vmul.f32 %v10606_v39, %v10096_v34 }
 0x1ee   :  { %v1852_v4 = vadd.f32 %v1850_v8, %v1847_v21  ;;  %v1879_v55 = vadd.f32 %v1877_v61, %v1875_v63  ;;  %v1903_v20 = vadd.f32 %v1901_v5, %v1899_v37  ;;  %v1933_v26 = vmul.f32 %v10615_v24, %v10236_v53 }
 0x1ef   :  { %v2138_v44 = vadd.f32 %v2136_v31, %v2134_v1  ;;  %v1925_v38 = vmul.f32 %v10726_v33, %v10276_v29  ;;  %v1937_v15 = vmul.f32 %v10670_v62, %v10244_v32  ;;  %v1941_v34 = vmul.f32 %v10629_v14, %v10247_v2 }
 0x1f0   :  { %v1883_v8 = vadd.f32 %v1881_v27, %v1879_v55  ;;  %v1907_v61 = vadd.f32 %v1905_v10, %v1903_v20  ;;  %v1935_v56 = vadd.f32 %v1933_v26, %v1931_v49  ;;  %v1945_v53 = vmul.f32 %v10637_v54, %v10250_v23  ;;  %v10747_v23 = vld [vmem:[%s12101_s0 + $0xf0] sm:$0xff] }
 0x1f1   :  { %v2140_v60 = vmax.f32 %v2138_v44, 0.0  ;;  %v1857_v5 = vadd.f32 %v10641_v30, %v1852_v4  ;;  %v1949_v0 = vmul.f32 %v10693_v36, %v10262_v16  ;;  %v1953_v21 = vmul.f32 %v10713_v7, %v10270_v22  ;;  %12322 = vst [vmem:[#allocation15_spill] sm:$0xff] %v10747_v23 }
 0x1f2   :  { %v1887_v63 = vadd.f32 %v1885_v17, %v1883_v8  ;;  %v1911_v32 = vadd.f32 %v1909_v12, %v1907_v61  ;;  %v1939_v37 = vadd.f32 %v1937_v15, %v1935_v56  ;;  %v1957_v2 = vmul.f32 %v10726_v33, %v10273_v28 }
 0x1f3   :  { %2142 = vst.msk [vmem:[#allocation2 + $0xb8] sm:$0xff] %vm293_vm0, %v2140_v60  ;;  %v1961_v30 = vmul.f32 %v10747_v23, %v10276_v29  ;;  %v1985_v16 = vmul.f32 %v10575_v18, %v10405_v13  ;;  %v1988_v22 = vmul.f32 %v10582_v41, %v10408_v48  ;;  %v1993_v27 = vmul.f32 %v10589_v35, %v10411_v50 }
 0x1f4   :  { %v1891_v28 = vadd.f32 %v1889_v46, %v1887_v63  ;;  %v1915_v17 = vadd.f32 %v1913_v6, %v1911_v32  ;;  %v1943_v10 = vadd.f32 %v1941_v34, %v1939_v37  ;;  %v1998_v12 = vmul.f32 %v10596_v43, %v10427_v9 }
 0x1f5   :  { %v1990_v1 = vadd.f32 %v1988_v22, %v1985_v16  ;;  %v2003_v49 = vmul.f32 %v10606_v39, %v10430_v3  ;;  %v2008_v29 = vmul.f32 %v10615_v24, %v10443_v11  ;;  %v2013_v4 = vmul.f32 %v10622_v25, %v10446_v57  ;;  %v10785_v22 = vpop.f32.mrb[0].mxu0 }
 0x1f6   :  { %v1893_v55 = vmax.f32 %v1857_v5, %v1891_v28  ;;  %v1919_v20 = vadd.f32 %v1917_v19, %v1915_v17  ;;  %v1947_v26 = vadd.f32 %v1945_v53, %v1943_v10  ;;  %v2018_v46 = vmul.f32 %v10629_v14, %v10461_v52  ;;  %12323 = vst [vmem:[#allocation17_spill] sm:$0xff] %v10785_v22 }
 0x1f7   :  { %v1995_v6 = vadd.f32 %v1993_v27, %v1990_v1  ;;  %v2027_v44 = vmul.f32 %v10582_v41, %v10405_v13  ;;  %v2029_v15 = vmul.f32 %v10589_v35, %v10408_v48  ;;  %v2033_v34 = vmul.f32 %v10653_v40, %v10411_v50  ;;  %v10787_v27 = vpop.f32.mrb[0].mxu1  ;;  %v10791_v1 = vpop.f32.mrb[1].mxu0  ;;  %v6614_v40 = vld [vmem:[%s12104_s3 + $0x678] sm:$0xff]  }
 0x1f8   :  { %v1923_v8 = vadd.f32 %v1921_v51, %v1919_v20  ;;  %v1951_v61 = vadd.f32 %v1949_v0, %v1947_v26  ;;  %v2023_v56 = vmul.f32 %v10637_v54, %v10464_v59  ;;  %v2037_v19 = vmul.f32 %v10606_v39, %v10427_v9  ;;  %12324 = vst [vmem:[#allocation18_spill] sm:$0xff] %v10787_v27 }
 0x1f9   :  { %v2000_v53 = vadd.f32 %v1998_v12, %v1995_v6  ;;  %v2031_v60 = vadd.f32 %v2029_v15, %v2027_v44  ;;  %v2041_v5 = vmul.f32 %v10615_v24, %v10430_v3  ;;  %v2045_v63 = vmul.f32 %v10670_v62, %v10443_v11  ;;  %12325 = vst [vmem:[#allocation19_spill] sm:$0xff] %v10791_v1  ;;  %v6057_v44 = vpop.f32.mrb[2].mxu0 }
 0x1fa   :  { %v2838_v32 = vld [vmem:[#allocation2 + $0xb8] sm:$0xff]  ;;  %v1927_v37 = vadd.f32 %v1925_v38, %v1923_v8  ;;  %v1955_v16 = vadd.f32 %v1953_v21, %v1951_v61  ;;  %v2049_v51 = vmul.f32 %v10629_v14, %v10446_v57  ;;  %v2053_v0 = vmul.f32 %v10637_v54, %v10461_v52  ;;  %v10793_v38 = vpop.f32.mrb[1].mxu1 }
 0x1fb   :  { %v2870_v28 = vpack.c.bf16 %v2838_v32, %v2838_v32  ;;  %v2005_v17 = vadd.f32 %v2003_v49, %v2000_v53  ;;  %v2035_v10 = vadd.f32 %v2033_v34, %v2031_v60  ;;  %v2063_v12 = vmul.f32 %v10596_v43, %v10405_v13  ;;  %12326 = vst [vmem:[#allocation20_spill] sm:$0xff] %v10793_v38  ;;  %v6079_v15 = vpop.f32.mrb[2].mxu1  ;;  %v11018_v38 = vld [vmem:[%s12101_s0 + $0xc8] sm:$0xff] }
 0x1fc   :  { %v1929_v21 = vmax.f32 %v1893_v55, %v1927_v37  ;;  %v1959_v20 = vadd.f32 %v1957_v2, %v1955_v16  ;;  %v2065_v26 = vmul.f32 %v10606_v39, %v10408_v48  ;;  %v2069_v6 = vmul.f32 %v10615_v24, %v10411_v50  ;;  %v6058_v2 = vpop.f32.mrb[3].mxu0  ;;  %v6080_v55 = vpop.f32.mrb[3].mxu1 }
 0x1fd   :  { %5406 = vmatprep.mubr.bf16.mxu1 %v2870_v28  ;;  %v2010_v49 = vadd.f32 %v2008_v29, %v2005_v17  ;;  %v2039_v34 = vadd.f32 %v2037_v19, %v2035_v10  ;;  %v2057_v8 = vmul.f32 %v10693_v36, %v10464_v59  ;;  %v2073_v61 = vmul.f32 %v10622_v25, %v10427_v9 }
 0x1fe   :  { %v1963_v53 = vadd.f32 %v1961_v30, %v1959_v20  ;;  %v2067_v60 = vadd.f32 %v2065_v26, %v2063_v12  ;;  %v2077_v32 = vmul.f32 %v10629_v14, %v10430_v3  ;;  %v2081_v37 = vmul.f32 %v10637_v54, %v10443_v11 }
 0x1ff   :  { %v2015_v29 = vadd.f32 %v2013_v4, %v2010_v49  ;;  %v2043_v19 = vadd.f32 %v2041_v5, %v2039_v34  ;;  %v2085_v16 = vmul.f32 %v10706_v42, %v10446_v57  ;;  %v2089_v28 = vmul.f32 %v10713_v7, %v10461_v52  ;;  %v11117_v42 = vld [vmem:[%s12101_s0 + $0x8] sm:$0xff] }
 0x200   :  { %v1965_v30 = vmax.f32 %v1929_v21, %v1963_v53  ;;  %v2071_v17 = vadd.f32 %v2069_v6, %v2067_v60  ;;  %v2099_v10 = vmul.f32 %v10606_v39, %v10405_v13  ;;  %v2101_v12 = vmul.f32 %v10615_v24, %v10408_v48  ;;  %12337 = vst [vmem:[#allocation35_spill] sm:$0xff] %v11117_v42 }
 0x201   :  { %v2020_v4 = vadd.f32 %v2018_v46, %v2015_v29  ;;  %v2047_v5 = vadd.f32 %v2045_v63, %v2043_v19  ;;  %v2093_v20 = vmul.f32 %v10726_v33, %v10464_v59  ;;  %v2105_v26 = vmul.f32 %v10670_v62, %v10411_v50 }
 0x202   :  { %v1969_v44 = vadd.f32 %v1968_v47, %v1965_v30  ;;  %v2075_v21 = vadd.f32 %v2073_v61, %v2071_v17  ;;  %v2103_v6 = vadd.f32 %v2101_v12, %v2099_v10  ;;  %v2109_v13 = vmul.f32 %v10629_v14, %v10427_v9  ;;  %v10879_v30 = vld [vmem:[%s12101_s0 + $0x28] sm:$0xff] }
 0x203   :  { %v10835_v48 = vadd.f32 %v2023_v56, %v2020_v4  ;;  %v2051_v46 = vadd.f32 %v2049_v51, %v2047_v5  ;;  %v2113_v63 = vmul.f32 %v10637_v54, %v10430_v3  ;;  %v2117_v50 = vmul.f32 %v10693_v36, %v10443_v11  ;;  %v6588_v11 = vld [vmem:[%s12104_s3 + $0x600] sm:$0xff]   ;;  %12328 = vst [vmem:[#allocation21_spill] sm:$0xff] %v10879_v30  ;;  %v10892_v12 = vld [vmem:[%s12101_s0 + $0x48] sm:$0xff] }
 0x204   :  { %v1971_v47 = vmax.f32 %v1969_v44, 0.0  ;;  %v2079_v15 = vadd.f32 %v2077_v32, %v2075_v21  ;;  %v2107_v9 = vadd.f32 %v2105_v26, %v2103_v6  ;;  %v2121_v56 = vmul.f32 %v10713_v7, %v10446_v57  ;;  %v6590_v57 = vld [vmem:[%s12104_s3 + $0x648] sm:$0xff]   ;;  %12329 = vst [vmem:[#allocation22_spill] sm:$0xff] %v10892_v12  ;;  %v10905_v6 = vld [vmem:[%s12101_s0 + $0x58] sm:$0xff] }
 0x205   :  { %v2055_v51 = vadd.f32 %v2053_v0, %v2051_v46  ;;  %v2125_v3 = vmul.f32 %v10726_v33, %v10461_v52  ;;  %v2154_v49 = vmul.f32 %v10231_v45, %v10683_v58  ;;  %v10855_v34 = vstv %s10803_s11  ;;  %v10863_v52 = vld [vmem:[%s12101_s0 + $0x18] sm:$0xff] }
 0x206   :  { %v2867_v61 = vpack.c.bf16 %v1971_v47, %v1971_v47  ;;  %v2083_v2 = vadd.f32 %v2081_v37, %v2079_v15  ;;  %v2111_v55 = vadd.f32 %v2109_v13, %v2107_v9  ;;  %12327 = vst [vmem:[#allocation31_spill] sm:$0xff] %v10863_v52  ;;  %v2157_v0 = vmul.f32 %v10863_v52, %v10855_v34  ;;  %v10923_v9 = vld [vmem:[%s12101_s0 + $0x68] sm:$0xff] }
 0x207   :  { %v2059_v53 = vadd.f32 %v2057_v8, %v2055_v51  ;;  %v10868_v45 = vstv %s10809_s1  ;;  %v10871_v60 = vstv %s10815_s15  ;;  %v10874_v32 = vstv %s10817_s21  ;;  %s11035_s1 = sld [smem:[#allocation3 + $0x79]] }
 0x208   :  { %5367 = vmatmul.mubr.bf16.vlgmr.msra.gmra.mrb[20].mxu0 %v2867_v61  ;;  %v2087_v37 = vadd.f32 %v2085_v16, %v2083_v2  ;;  %v2115_v29 = vadd.f32 %v2113_v63, %v2111_v55  ;;  %v2159_v19 = vadd.f32 %v2157_v0, %v2154_v49  ;;  %v2162_v8 = vmul.f32 %v10879_v30, %v10868_v45  ;;  %v6592_v16 = vld [vmem:[%s12104_s3 + $0x608] sm:$0xff]   ;;  %v10949_v55 = vld [vmem:[%s12101_s0 + $0x38] sm:$0xff] }
 0x209   :  { %v2061_v17 = vmax.f32 %v10835_v48, %v2059_v53  ;;  %v2129_v10 = vmul.f32 %v10747_v23, %v10464_v59  ;;  %6303 = vmatpush3.bf16.msra.mxu0 %v6588_v11  ;;  %v2167_v4 = vmul.f32 %v10892_v12, %v10871_v60  ;;  %v10897_v5 = vstv %s10827_s2  ;;  %v6594_v59 = vld [vmem:[%s12104_s3 + $0x650] sm:$0xff]   ;;  %v10933_v49 = vld [vmem:[%s12101_s0 + $0x88] sm:$0xff]  ;;  %12333 = vst [vmem:[#allocation28_spill] sm:$0xff] %v10949_v55  ;;  %s11044_s2 = sld [smem:[#allocation6 + $0xc]] }
 0x20a   :  { %v2091_v26 = vadd.f32 %v2089_v28, %v2087_v37  ;;  %v2119_v44 = vadd.f32 %v2117_v50, %v2115_v29  ;;  %6304 = vmatprep.subr.bf16.mxu0 %v6590_v57  ;;  %v2164_v21 = vadd.f32 %v2162_v8, %v2159_v19  ;;  %v2172_v13 = vmul.f32 %v10905_v6, %v10874_v32  ;;  %v6596_v11 = vld [vmem:[%s12104_s3 + $0x610] sm:$0xff]   ;;  %v6598_v37 = vld [vmem:[%s12104_s3 + $0x658] sm:$0xff]   ;;  %v10959_v19 = vld [vmem:[%s12101_s0 + $0xa8] sm:$0xff] }
 0x20b   :  { %v10910_v48 = vstv %s10833_s29  ;;  %v10913_v46 = vstv %s10841_s24  ;;  %v10916_v28 = vstv %s10843_s30  ;;  %v2196_v63 = vmul.f32 %v10863_v52, %v10683_v58  ;;  %12332 = vst [vmem:[#allocation27_spill] sm:$0xff] %v10933_v49  ;;  %v6591_v23 = vld [vmem:[%s12104_s3 + $0x6c8] sm:$0xff]   ;;  %s11560_s29 = sld [smem:[#allocation3 + $0x86]] }
 0x20c   :  { %12330 = vst [vmem:[#allocation23_spill] sm:$0xff] %v10913_v46  ;;  %12331 = vst [vmem:[#allocation26_spill] sm:$0xff] %v10916_v28  ;;  %v2095_v50 = vadd.f32 %v2093_v20, %v2091_v26  ;;  %v2123_v47 = vadd.f32 %v2121_v56, %v2119_v44  ;;  %v2169_v15 = vadd.f32 %v2167_v4, %v2164_v21  ;;  %v10940_v56 = vld [vmem:[%s12101_s0 + $0x98] sm:$0xff]  ;;  %v11149_v14 = vstv %s11064_s19 }
 0x20d   :  { %v2177_v51 = vmul.f32 %v10923_v9, %v10897_v5  ;;  %6305 = vmatpush3.bf16.msra.mxu0 %v6592_v16  ;;  %v2182_v20 = vmul.f32 %v10933_v49, %v10910_v48  ;;  %v2187_v61 = vmul.f32 %v10940_v56, %v10913_v46  ;;  %v2198_v2 = vmul.f32 %v10879_v30, %v10855_v34 }
 0x20e   :  { %v2202_v57 = vmul.f32 %v10949_v55, %v10868_v45  ;;  %v2097_v0 = vmax.f32 %v2061_v17, %v2095_v50  ;;  %v2127_v53 = vadd.f32 %v2125_v3, %v2123_v47  ;;  %6306 = vmatprep.subr.bf16.mxu0 %v6594_v59  ;;  %v2174_v29 = vadd.f32 %v2172_v13, %v2169_v15  ;;  %v10970_v17 = vld [vmem:[%s12101_s0 + $0x78] sm:$0xff] }
 0x20f   :  { %v2192_v8 = vmul.f32 %v10959_v19, %v10916_v28  ;;  %v2200_v16 = vadd.f32 %v2198_v2, %v2196_v63  ;;  %v2206_v4 = vmul.f32 %v10905_v6, %v10871_v60  ;;  %v2210_v3 = vmul.f32 %v10923_v9, %v10874_v32  ;;  %v6600_v63 = vld [vmem:[%s12104_s3 + $0x618] sm:$0xff]  }
 0x210   :  { %v2214_v26 = vmul.f32 %v10970_v17, %v10897_v5  ;;  %v2131_v44 = vadd.f32 %v2129_v10, %v2127_v53  ;;  %v2179_v59 = vadd.f32 %v2177_v51, %v2174_v29  ;;  %v2218_v21 = vmul.f32 %v10940_v56, %v10910_v48 }
 0x211   :  { %v10978_v13 = vmul.f32 %v10959_v19, %v10913_v46  ;;  %6307 = vmatpush3.bf16.msra.mxu0 %v6596_v11  ;;  %v2204_v50 = vadd.f32 %v2202_v57, %v2200_v16  ;;  %v2232_v47 = vmul.f32 %v10892_v12, %v10683_v58  ;;  %v2234_v10 = vmul.f32 %v10905_v6, %v10855_v34  ;;  %v6602_v11 = vld [vmem:[%s12104_s3 + $0x660] sm:$0xff]   ;;  %v10997_v57 = vld [vmem:[%s12101_s0 + $0xb8] sm:$0xff] }
 0x212   :  { %v2238_v15 = vmul.f32 %v10923_v9, %v10868_v45  ;;  %v2133_v51 = vmax.f32 %v2097_v0, %v2131_v44  ;;  %6308 = vmatprep.subr.bf16.mxu0 %v6598_v37  ;;  %v2184_v2 = vadd.f32 %v2182_v20, %v2179_v59  ;;  %v11001_v53 = vmul.f32 %v10997_v57, %v10916_v28 }
 0x213   :  { %v2242_v29 = vmul.f32 %v10933_v49, %v10871_v60  ;;  %v2208_v0 = vadd.f32 %v2206_v4, %v2204_v50  ;;  %v2236_v37 = vadd.f32 %v2234_v10, %v2232_v47  ;;  %v2246_v20 = vmul.f32 %v10940_v56, %v10874_v32  ;;  %v11027_v4 = vld [vmem:[%s12101_s0 + $0xd8] sm:$0xff] }
 0x214   :  { %v2250_v16 = vmul.f32 %v10959_v19, %v10897_v5  ;;  %v2137_v44 = vadd.f32 %v2136_v31, %v2133_v51  ;;  %v2189_v59 = vadd.f32 %v2187_v61, %v2184_v2  ;;  %v11022_v27 = vmul.f32 %v11018_v38, %v10910_v48  ;;  %12334 = vst [vmem:[#allocation32_spill] sm:$0xff] %v11027_v4  ;;  %v6604_v31 = vld [vmem:[%s12104_s3 + $0x620] sm:$0xff]  }
 0x215   :  { %v11031_v50 = vmul.f32 %v11027_v4, %v10913_v46  ;;  %6309 = vmatpush3.bf16.msra.mxu0 %v6600_v63  ;;  %v2212_v61 = vadd.f32 %v2210_v3, %v2208_v0  ;;  %v2240_v47 = vadd.f32 %v2238_v15, %v2236_v37  ;;  %v2268_v10 = vmul.f32 %v10905_v6, %v10683_v58  ;;  %v6606_v63 = vld [vmem:[%s12104_s3 + $0x668] sm:$0xff]  }
 0x216   :  { %v2270_v51 = vmul.f32 %v10923_v9, %v10855_v34  ;;  %v2139_v2 = vmax.f32 %v2137_v44, 0.0  ;;  %6310 = vmatprep.subr.bf16.mxu0 %v6602_v11  ;;  %v11049_v1 = vadd.f32 %v2192_v8, %v2189_v59  ;;  %v11054_v3 = vld [vmem:[%s12101_s0 + $0xe8] sm:$0xff]  ;;  %v2274_v0 = vmul.f32 %v10970_v17, %v10868_v45  ;;  %v6589_v8 = vld [vmem:[%s12104_s3 + $0x680] sm:$0xff]  }
 0x217   :  { %12335 = vst [vmem:[#allocation33_spill] sm:$0xff] %v11054_v3  ;;  %v11058_v15 = vmul.f32 %v11054_v3, %v10916_v28  ;;  %v2216_v11 = vadd.f32 %v2214_v26, %v2212_v61  ;;  %v2244_v37 = vadd.f32 %v2242_v29, %v2240_v47  ;;  %v2278_v59 = vmul.f32 %v10940_v56, %v10871_v60  ;;  %v6608_v29 = vld [vmem:[%s12104_s3 + $0x628] sm:$0xff]  }
 0x218   :  { %v2272_v44 = vadd.f32 %v2270_v51, %v2268_v10  ;;  %v2869_v22 = vpack.c.bf16 %v2139_v2, %v2139_v2  ;;  %v2282_v33 = vmul.f32 %v10959_v19, %v10874_v32  ;;  %v2286_v7 = vmul.f32 %v10997_v57, %v10897_v5  ;;  %v6610_v2 = vld [vmem:[%s12104_s3 + $0x670] sm:$0xff]  }
 0x219   :  { %v2290_v26 = vmul.f32 %v11027_v4, %v10910_v48  ;;  %6311 = vmatpush3.bf16.msra.mxu0 %v6604_v31  ;;  %v2220_v61 = vadd.f32 %v2218_v21, %v2216_v11  ;;  %v2248_v47 = vadd.f32 %v2246_v20, %v2244_v37  ;;  %v2294_v51 = vmul.f32 %v11054_v3, %v10913_v46  ;;  %v11095_v31 = vld [vmem:[%s12101_s0 + $0xf8] sm:$0xff] }
 0x21a   :  { %v2276_v10 = vadd.f32 %v2274_v0, %v2272_v44  ;;  %5407 = vmatmul.mubr.bf16.vlgmr.msra.gmra.mrb[20].mxu1 %v2869_v22  ;;  %6312 = vmatprep.subr.bf16.mxu0 %v6606_v63  ;;  %12336 = vst [vmem:[#allocation34_spill] sm:$0xff] %v11095_v31  ;;  %v11099_v21 = vmul.f32 %v11095_v31, %v10916_v28  ;;  %v11102_v20 = vstv %s10989_s26  ;;  %v11105_v0 = vstv %s11005_s13  ;;  %v6593_v63 = vld [vmem:[%s12104_s3 + $0x688] sm:$0xff]   ;;  %s11716_s13 = sld [smem:[#allocation3 + $0x8d]] }
 0x21b   :  { %v11108_v22 = vstv %s11007_s27  ;;  %6325 = vmatpush3.bf16.msra.mxu1 %v6589_v8  ;;  %v2224_v11 = vadd.f32 %v10978_v13, %v2220_v61  ;;  %v2252_v37 = vadd.f32 %v2250_v16, %v2248_v47  ;;  %v2322_v36 = vmul.f32 %v11117_v42, %v11102_v20  ;;  %v6595_v8 = vld [vmem:[%s12104_s3 + $0x6d0] sm:$0xff]   ;;  %s11261_s27 = sld [smem:[#allocation6 + $0xd]] }
 0x21c   :  { %v2280_v44 = vadd.f32 %v2278_v59, %v2276_v10  ;;  %6326 = vmatprep.subr.bf16.mxu1 %v6591_v23  ;;  %v2325_v13 = vmul.f32 %v10863_v52, %v11105_v0  ;;  %v2330_v16 = vmul.f32 %v10879_v30, %v11108_v22  ;;  %v11129_v59 = vstv %s11033_s23  ;;  %v6612_v23 = vld [vmem:[%s12104_s3 + $0x630] sm:$0xff]   ;;  %s11729_s23 = sld [smem:[#allocation3 + $0x8e]] }
 0x21d   :  { %v11132_v61 = vstv %s11035_s1  ;;  %6313 = vmatpush3.bf16.msra.mxu0 %v6608_v29  ;;  %v2228_v47 = vadd.f32 %v11001_v53, %v2224_v11  ;;  %v2256_v10 = vadd.f32 %v11022_v27, %v2252_v37  ;;  %v2335_v29 = vmul.f32 %v10892_v12, %v11129_v59  ;;  %v6599_v11 = vld [vmem:[%s12104_s3 + $0x6d8] sm:$0xff]  }
 0x21e   :  { %v2284_v42 = vadd.f32 %v2282_v33, %v2280_v44  ;;  %6314 = vmatprep.subr.bf16.mxu0 %v6610_v2  ;;  %v2327_v54 = vadd.f32 %v2325_v13, %v2322_v36  ;;  %v11146_v28 = vstv %s11062_s8  ;;  %v6597_v33 = vld [vmem:[%s12104_s3 + $0x690] sm:$0xff]   ;;  %v2340_v36 = vmul.f32 %v10905_v6, %v11132_v61 }
 0x21f   :  { %6327 = vmatpush3.bf16.msra.mxu1 %v6593_v63  ;;  %v2230_v27 = vmax.f32 %v11049_v1, %v2228_v47  ;;  %v2260_v53 = vadd.f32 %v11031_v50, %v2256_v10  ;;  %v2345_v63 = vmul.f32 %v10923_v9, %v11146_v28  ;;  %v11164_v44 = vstv %s11080_s17  ;;  %s11509_s17 = sld [smem:[#allocation3 + $0x80]] }
 0x220   :  { %v2288_v2 = vadd.f32 %v2286_v7, %v2284_v42  ;;  %6328 = vmatprep.subr.bf16.mxu1 %v6595_v8  ;;  %v2332_v37 = vadd.f32 %v2330_v16, %v2327_v54  ;;  %v11167_v13 = vstv %s11082_s6  ;;  %v6616_v42 = vld [vmem:[%s12104_s3 + $0x638] sm:$0xff]   ;;  %v2350_v50 = vmul.f32 %v10933_v49, %v11149_v14 }
 0x221   :  { %6315 = vmatpush3.bf16.msra.mxu0 %v6612_v23  ;;  %v2264_v7 = vadd.f32 %v11058_v15, %v2260_v53  ;;  %v2355_v54 = vmul.f32 %v10940_v56, %v11164_v44  ;;  %v2364_v16 = vmul.f32 %v10863_v52, %v11102_v20  ;;  %v2366_v23 = vmul.f32 %v10879_v30, %v11105_v0  ;;  %v6618_v15 = vld [vmem:[%s12104_s3 + $0x740] sm:$0xff]  }
 0x222   :  { %v2292_v1 = vadd.f32 %v2290_v26, %v2288_v2  ;;  %6316 = vmatprep.subr.bf16.mxu0 %v6614_v40  ;;  %v2337_v8 = vadd.f32 %v2335_v29, %v2332_v37  ;;  %v2370_v47 = vmul.f32 %v10949_v55, %v11108_v22  ;;  %v6601_v26 = vld [vmem:[%s12104_s3 + $0x698] sm:$0xff]   ;;  %v2360_v29 = vmul.f32 %v10959_v19, %v11167_v13  ;;  %v6603_v2 = vld [vmem:[%s12104_s3 + $0x6e0] sm:$0xff]  }
 0x223   :  { %6329 = vmatpush3.bf16.msra.mxu1 %v6597_v33  ;;  %v2266_v40 = vmax.f32 %v2230_v27, %v2264_v7  ;;  %v2374_v53 = vmul.f32 %v10905_v6, %v11129_v59  ;;  %v2368_v62 = vadd.f32 %v2366_v23, %v2364_v16  ;;  %v2378_v33 = vmul.f32 %v10923_v9, %v11132_v61 }
 0x224   :  { %v2296_v10 = vadd.f32 %v2294_v51, %v2292_v1  ;;  %6330 = vmatprep.subr.bf16.mxu1 %v6599_v11  ;;  %v2342_v37 = vadd.f32 %v2340_v36, %v2337_v8  ;;  %v2382_v27 = vmul.f32 %v10970_v17, %v11146_v28  ;;  %v2386_v7 = vmul.f32 %v10940_v56, %v11149_v14 }
 0x225   :  { %6317 = vmatpush3.bf16.msra.mxu0 %v6616_v42  ;;  %v2390_v11 = vmul.f32 %v10959_v19, %v11164_v44  ;;  %v2400_v1 = vmul.f32 %v10892_v12, %v11102_v20  ;;  %v2372_v8 = vadd.f32 %v2370_v47, %v2368_v62  ;;  %v2402_v16 = vmul.f32 %v10905_v6, %v11105_v0  ;;  %v6607_v47 = vld [vmem:[%s12104_s3 + $0x6e8] sm:$0xff]  }
 0x226   :  { %v2300_v51 = vadd.f32 %v11099_v21, %v2296_v10  ;;  %v2347_v36 = vadd.f32 %v2345_v63, %v2342_v37  ;;  %v2406_v42 = vmul.f32 %v10923_v9, %v11108_v22  ;;  %6346 = vmatprep.subr.bf16.mxu0 %v6618_v15  ;;  %v6605_v21 = vld [vmem:[%s12104_s3 + $0x6a0] sm:$0xff]   ;;  %v2394_v10 = vmul.f32 %v10997_v57, %v11167_v13 }
 0x227   :  { %6331 = vmatpush3.bf16.msra.mxu1 %v6601_v26  ;;  %v2410_v62 = vmul.f32 %v10933_v49, %v11129_v59  ;;  %v2414_v63 = vmul.f32 %v10940_v56, %v11132_v61  ;;  %v2376_v26 = vadd.f32 %v2374_v53, %v2372_v8  ;;  %v2404_v37 = vadd.f32 %v2402_v16, %v2400_v1  ;;  %v6609_v53 = vld [vmem:[%s12104_s3 + $0x6a8] sm:$0xff]  }
 0x228   :  { %v2302_v23 = vmax.f32 %v2266_v40, %v2300_v51  ;;  %6332 = vmatprep.subr.bf16.mxu1 %v6603_v2  ;;  %v2352_v15 = vadd.f32 %v2350_v50, %v2347_v36  ;;  %v2418_v40 = vmul.f32 %v10959_v19, %v11146_v28  ;;  %v12338_v51 = vstv %s11044_s2 }
 0x229   :  { %v2422_v12 = vmul.f32 %v11018_v38, %v11149_v14  ;;  %v2426_v49 = vmul.f32 %v11027_v4, %v11164_v44  ;;  %v2436_v2 = vmul.f32 %v10905_v6, %v11102_v20  ;;  %v2380_v52 = vadd.f32 %v2378_v33, %v2376_v26  ;;  %v6611_v33 = vld [vmem:[%s12104_s3 + $0x6f0] sm:$0xff]  }
 0x22a   :  { %v2306_v55 = vadd.f32 %v12338_v51, %v2302_v23  ;;  %v2357_v30 = vadd.f32 %v2355_v54, %v2352_v15  ;;  %v2408_v46 = vadd.f32 %v2406_v42, %v2404_v37  ;;  %v2438_v50 = vmul.f32 %v10923_v9, %v11105_v0 }
 0x22b   :  { %6333 = vmatpush3.bf16.msra.mxu1 %v6605_v21  ;;  %v2430_v36 = vmul.f32 %v11054_v3, %v11167_v13  ;;  %v2442_v8 = vmul.f32 %v10970_v17, %v11108_v22  ;;  %v2446_v54 = vmul.f32 %v10940_v56, %v11129_v59  ;;  %v2384_v16 = vadd.f32 %v2382_v27, %v2380_v52 }
 0x22c   :  { %v2308_v1 = vmax.f32 %v2306_v55, 0.0  ;;  %6334 = vmatprep.subr.bf16.mxu1 %v6607_v47  ;;  %v2412_v42 = vadd.f32 %v2410_v62, %v2408_v46  ;;  %v2440_v21 = vadd.f32 %v2438_v50, %v2436_v2  ;;  %v2450_v55 = vmul.f32 %v10959_v19, %v11132_v61 }
 0x22d   :  { %v2362_v23 = vadd.f32 %v2360_v29, %v2357_v30  ;;  %v2454_v15 = vmul.f32 %v10997_v57, %v11146_v28  ;;  %v2458_v26 = vmul.f32 %v11027_v4, %v11149_v14  ;;  %v2462_v47 = vmul.f32 %v11054_v3, %v11164_v44  ;;  %v6613_v30 = vld [vmem:[%s12104_s3 + $0x6b0] sm:$0xff]  }
 0x22e   :  { %2310 = vst.msk [vmem:[#allocation2 + $0xc8] sm:$0xff] %vm293_vm0, %v2308_v1  ;;  %v2388_v37 = vadd.f32 %v2386_v7, %v2384_v16  ;;  %v2416_v51 = vadd.f32 %v2414_v63, %v2412_v42  ;;  %v2444_v52 = vadd.f32 %v2442_v8, %v2440_v21  ;;  %v2466_v46 = vmul.f32 %v11095_v31, %v11167_v13  ;;  %v6615_v63 = vld [vmem:[%s12104_s3 + $0x6f8] sm:$0xff]   ;;  %v12340_v42 = vld [vmem:[#allocation29_spill] sm:$0xff] }
 0x22f   :  { %6335 = vmatpush3.bf16.msra.mxu1 %v6609_v53  ;;  %v2153_v29 = vmul.f32 %v10575_v18, %v10683_v58  ;;  %v2156_v27 = vmul.f32 %v10582_v41, %v10855_v34  ;;  %v2161_v7 = vmul.f32 %v10589_v35, %v10868_v45  ;;  %v2166_v62 = vmul.f32 %v10596_v43, %v10871_v60 }
 0x230   :  { %6336 = vmatprep.subr.bf16.mxu1 %v6611_v33  ;;  %v2392_v2 = vadd.f32 %v2390_v11, %v2388_v37  ;;  %v2420_v50 = vadd.f32 %v2418_v40, %v2416_v51  ;;  %v2448_v53 = vadd.f32 %v2446_v54, %v2444_v52  ;;  %v2171_v18 = vmul.f32 %v10606_v39, %v10874_v32  ;;  %v12339_v33 = vld [vmem:[#allocation23_spill] sm:$0xff]  ;;  %v12341_v40 = vld [vmem:[#allocation26_spill] sm:$0xff] }
 0x231   :  { %v2158_v1 = vadd.f32 %v2156_v27, %v2153_v29  ;;  %v2176_v8 = vmul.f32 %v10615_v24, %v10897_v5  ;;  %v2181_v16 = vmul.f32 %v10622_v25, %v10910_v48  ;;  %v2186_v21 = vmul.f32 %v12340_v42, %v12339_v33  ;;  %v12342_v54 = vld [vmem:[#allocation30_spill] sm:$0xff] }
 0x232   :  { %v2396_v31 = vadd.f32 %v2394_v10, %v2392_v2  ;;  %v2424_v3 = vadd.f32 %v2422_v12, %v2420_v50  ;;  %v2452_v11 = vadd.f32 %v2450_v55, %v2448_v53  ;;  %v11286_v37 = vmul.f32 %v12342_v54, %v12341_v40  ;;  %v6617_v51 = vld [vmem:[%s12104_s3 + $0x6b8] sm:$0xff]   ;;  %v12343_v10 = vld [vmem:[#allocation24_spill] sm:$0xff] }
 0x233   :  { %6337 = vmatpush3.bf16.msra.mxu1 %v6613_v30  ;;  %v2163_v52 = vadd.f32 %v2161_v7, %v2158_v1  ;;  %v2195_v29 = vmul.f32 %v10582_v41, %v10683_v58  ;;  %v2197_v27 = vmul.f32 %v10589_v35, %v10855_v34  ;;  %v2201_v12 = vmul.f32 %v12343_v10, %v10868_v45  ;;  %v6619_v7 = vld [vmem:[%s12104_s3 + $0x7c0] sm:$0xff]  }
 0x234   :  { %6338 = vmatprep.subr.bf16.mxu1 %v6615_v63  ;;  %v2398_v2 = vmax.f32 %v2362_v23, %v2396_v31  ;;  %v2428_v50 = vadd.f32 %v2426_v49, %v2424_v3  ;;  %v2456_v30 = vadd.f32 %v2454_v15, %v2452_v11  ;;  %v2205_v53 = vmul.f32 %v10606_v39, %v10871_v60  ;;  %v12344_v31 = vld [vmem:[#allocation12_spill] sm:$0xff] }
 0x235   :  { %v2840_v55 = vld [vmem:[#allocation2 + $0xc8] sm:$0xff]  ;;  %v2168_v1 = vadd.f32 %v2166_v62, %v2163_v52  ;;  %v2199_v4 = vadd.f32 %v2197_v27, %v2195_v29  ;;  %v2209_v35 = vmul.f32 %v10615_v24, %v10874_v32  ;;  %v2213_v49 = vmul.f32 %v12344_v31, %v10897_v5 }
 0x236   :  { %v2872_v41 = vpack.c.bf16 %v2840_v55, %v2840_v55  ;;  %v2432_v63 = vadd.f32 %v2430_v36, %v2428_v50  ;;  %v2460_v10 = vadd.f32 %v2458_v26, %v2456_v30  ;;  %v2217_v3 = vmul.f32 %v12340_v42, %v10910_v48 }
 0x237   :  { %6339 = vmatpush3.bf16.msra.mxu1 %v6617_v51  ;;  %v2173_v15 = vadd.f32 %v2171_v18, %v2168_v1  ;;  %v2203_v11 = vadd.f32 %v2201_v12, %v2199_v4  ;;  %v2221_v62 = vmul.f32 %v12342_v54, %v12339_v33  ;;  %v2231_v36 = vmul.f32 %v10596_v43, %v10683_v58  ;;  %v11320_v4 = vpop.f32.mrb[4].mxu0  ;;  %v11322_v12 = vpop.f32.mrb[4].mxu1 }
 0x238   :  { %5446 = vmatprep.mubr.bf16.mxu0 %v2872_v41  ;;  %v2434_v52 = vmax.f32 %v2398_v2, %v2432_v63  ;;  %v2464_v29 = vadd.f32 %v2462_v47, %v2460_v10  ;;  %6368 = vmatprep.subr.bf16.mxu1 %v6619_v7  ;;  %v11314_v26 = vstv %s11276_s16  ;;  %v2233_v51 = vmul.f32 %v10606_v39, %v10855_v34  ;;  %v12347_v47 = vld [vmem:[#allocation25_spill] sm:$0xff]  ;;  %v11330_v30 = vpop.f32.mrb[5].mxu0  ;;  %s11727_s16 = sld [smem:[#allocation6 + $0xe]] }
 0x239   :  { %v2178_v27 = vadd.f32 %v2176_v8, %v2173_v15  ;;  %v2207_v55 = vadd.f32 %v2205_v53, %v2203_v11  ;;  %v2237_v18 = vmul.f32 %v10615_v24, %v10868_v45  ;;  %12345 = vst [vmem:[#allocation23_spill] sm:$0xff] %v11320_v4  ;;  %12346 = vst [vmem:[#allocation29_spill] sm:$0xff] %v11322_v12  ;;  %v11332_v53 = vpop.f32.mrb[5].mxu1  ;;  %v6101_v63 = vpop.f32.mrb[6].mxu0  ;;  %v12350_v11 = vld [vmem:[#allocation13_spill] sm:$0xff] }
 0x23a   :  { %v2468_v2 = vadd.f32 %v2466_v46, %v2464_v29  ;;  %v2225_v50 = vmul.f32 %v12347_v47, %v12341_v40  ;;  %v2241_v43 = vmul.f32 %v10622_v25, %v10871_v60  ;;  %v2245_v8 = vmul.f32 %v12340_v42, %v10874_v32  ;;  %12348 = vst [vmem:[#allocation26_spill] sm:$0xff] %v11330_v30  ;;  %v6123_v10 = vpop.f32.mrb[6].mxu1  ;;  %v12351_v29 = vld [vmem:[#allocation16_spill] sm:$0xff] }
 0x23b   :  { %12349 = vst [vmem:[#allocation30_spill] sm:$0xff] %v11332_v53  ;;  %v2183_v7 = vadd.f32 %v2181_v16, %v2178_v27  ;;  %v2211_v41 = vadd.f32 %v2209_v35, %v2207_v55  ;;  %v2235_v1 = vadd.f32 %v2233_v51, %v2231_v36  ;;  %v2249_v46 = vmul.f32 %v12342_v54, %v10897_v5  ;;  %v6102_v16 = vpop.f32.mrb[7].mxu0  ;;  %v6124_v35 = vpop.f32.mrb[7].mxu1 }
 0x23c   :  { %v2470_v15 = vmax.f32 %v2434_v52, %v2468_v2  ;;  %v2253_v25 = vmul.f32 %v12350_v11, %v10910_v48  ;;  %v11340_v23 = vmul.f32 %v12351_v29, %v12339_v33  ;;  %v2267_v53 = vmul.f32 %v10606_v39, %v10683_v58  ;;  %v11346_v63 = vpop.f32.mrb[8].mxu0  ;;  %v11348_v52 = vpop.f32.mrb[8].mxu1  ;;  %v12355_v11 = vld [vmem:[#allocation14_spill] sm:$0xff] }
 0x23d   :  { %v2188_v36 = vadd.f32 %v2186_v21, %v2183_v7  ;;  %v2215_v27 = vadd.f32 %v2213_v49, %v2211_v41  ;;  %v2239_v55 = vadd.f32 %v2237_v18, %v2235_v1  ;;  %v2269_v51 = vmul.f32 %v10615_v24, %v10855_v34  ;;  %12352 = vst [vmem:[#allocation24_spill] sm:$0xff] %v11346_v63  ;;  %v11360_v21 = vpop.f32.mrb[9].mxu0  ;;  %v11362_v49 = vpop.f32.mrb[9].mxu1 }
 0x23e   :  { %12353 = vst [vmem:[#allocation12_spill] sm:$0xff] %v11348_v52  ;;  %v12354_v2 = vstv %s11261_s27  ;;  %v11354_v12 = vmul.f32 %v12355_v11, %v12341_v40  ;;  %v2273_v39 = vmul.f32 %v12344_v31, %v10868_v45  ;;  %v2277_v58 = vmul.f32 %v12340_v42, %v10871_v60  ;;  %12356 = vst [vmem:[#allocation25_spill] sm:$0xff] %v11360_v21  ;;  %v6145_v41 = vpop.f32.mrb[10].mxu0  ;;  %v6167_v1 = vpop.f32.mrb[10].mxu1  ;;  %v12379_v21 = vld [vmem:[#allocation32_spill] sm:$0xff] }
 0x23f   :  { %v2474_v10 = vadd.f32 %v12354_v2, %v2470_v15  ;;  %12357 = vst [vmem:[#allocation13_spill] sm:$0xff] %v11362_v49  ;;  %v2219_v24 = vadd.f32 %v2217_v3, %v2215_v27  ;;  %v2243_v34 = vadd.f32 %v2241_v43, %v2239_v55  ;;  %v2271_v18 = vadd.f32 %v2269_v51, %v2267_v53  ;;  %v6146_v42 = vpop.f32.mrb[11].mxu0  ;;  %v6168_v31 = vpop.f32.mrb[11].mxu1  ;;  %v11406_v55 = vld [vmem:[%s12101_s0 + $0x40] sm:$0xff] }
 0x240   :  { %v2281_v7 = vmul.f32 %v12342_v54, %v10874_v32  ;;  %v11367_v16 = vadd.f32 %v11286_v37, %v2188_v36  ;;  %v2285_v45 = vmul.f32 %v12347_v47, %v10897_v5  ;;  %v2289_v60 = vmul.f32 %v12351_v29, %v10910_v48  ;;  %v11375_v54 = vpop.f32.mrb[12].mxu0  ;;  %v12359_v37 = vld [vmem:[#allocation15_spill] sm:$0xff] }
 0x241   :  { %v2476_v15 = vmax.f32 %v2474_v10, 0.0  ;;  %v2223_v3 = vadd.f32 %v2221_v62, %v2219_v24  ;;  %v2247_v43 = vadd.f32 %v2245_v8, %v2243_v34  ;;  %v2275_v53 = vadd.f32 %v2273_v39, %v2271_v18  ;;  %12358 = vst [vmem:[#allocation16_spill] sm:$0xff] %v11375_v54  ;;  %v11383_v5 = vld [vmem:[%s12101_s0] sm:$0xff]  ;;  %v11390_v62 = vld [vmem:[%s12101_s0 + $0x10] sm:$0xff]  ;;  %v11401_v8 = vpop.f32.mrb[13].mxu0 }
 0x242   :  { %v2293_v32 = vmul.f32 %v12355_v11, %v12339_v33  ;;  %v2297_v35 = vmul.f32 %v12359_v37, %v12341_v40  ;;  %v2321_v48 = vmul.f32 %v11383_v5, %v11102_v20  ;;  %v2324_v33 = vmul.f32 %v11390_v62, %v11105_v0  ;;  %v11397_v40 = vld [vmem:[%s12101_s0 + $0x20] sm:$0xff]  ;;  %12360 = vst [vmem:[#allocation14_spill] sm:$0xff] %v11401_v8  ;;  %v6189_v2 = vpop.f32.mrb[14].mxu0  ;;  %v11413_v11 = vld [vmem:[%s12101_s0 + $0x50] sm:$0xff] }
 0x243   :  { %2478 = vst.msk [vmem:[#allocation2 + $0xd8] sm:$0xff] %vm293_vm0, %v2476_v15  ;;  %v2329_v47 = vmul.f32 %v11397_v40, %v11108_v22  ;;  %v2227_v29 = vadd.f32 %v2225_v50, %v2223_v3  ;;  %v2251_v36 = vadd.f32 %v2249_v46, %v2247_v43  ;;  %v2279_v27 = vadd.f32 %v2277_v58, %v2275_v53  ;;  %v11420_v46 = vld [vmem:[%s12101_s0 + $0x60] sm:$0xff]  ;;  %v6190_v34 = vpop.f32.mrb[15].mxu0  ;;  %v11435_v15 = vld [vmem:[%s12101_s0 + $0x90] sm:$0xff] }
 0x244   :  { %v2334_v51 = vmul.f32 %v11406_v55, %v11129_v59  ;;  %v2326_v10 = vadd.f32 %v2324_v33, %v2321_v48  ;;  %v2339_v50 = vmul.f32 %v11413_v11, %v11132_v61  ;;  %v2344_v39 = vmul.f32 %v11420_v46, %v11146_v28  ;;  %v11427_v58 = vld [vmem:[%s12101_s0 + $0x80] sm:$0xff] }
 0x245   :  { %v2349_v24 = vmul.f32 %v11427_v58, %v11149_v14  ;;  %v2229_v18 = vmax.f32 %v11367_v16, %v2227_v29  ;;  %v2255_v41 = vadd.f32 %v2253_v25, %v2251_v36  ;;  %v2283_v1 = vadd.f32 %v2281_v7, %v2279_v27  ;;  %v11446_v25 = vld [vmem:[%s12101_s0 + $0x30] sm:$0xff]  ;;  %v11454_v37 = vld [vmem:[%s12101_s0 + $0xa0] sm:$0xff] }
 0x246   :  { %v2354_v42 = vmul.f32 %v11435_v15, %v11164_v44  ;;  %v2331_v31 = vadd.f32 %v2329_v47, %v2326_v10  ;;  %v2363_v3 = vmul.f32 %v11390_v62, %v11102_v20  ;;  %v2365_v43 = vmul.f32 %v11397_v40, %v11105_v0 }
 0x247   :  { %v2369_v7 = vmul.f32 %v11446_v25, %v11108_v22  ;;  %v2259_v16 = vadd.f32 %v11340_v23, %v2255_v41  ;;  %v2287_v53 = vadd.f32 %v2285_v45, %v2283_v1  ;;  %v2359_v48 = vmul.f32 %v11454_v37, %v11167_v13  ;;  %v11465_v23 = vld [vmem:[%s12101_s0 + $0x70] sm:$0xff] }
 0x248   :  { %v2373_v33 = vmul.f32 %v11413_v11, %v11129_v59  ;;  %v2336_v47 = vadd.f32 %v2334_v51, %v2331_v31  ;;  %v2367_v29 = vadd.f32 %v2365_v43, %v2363_v3  ;;  %v2377_v36 = vmul.f32 %v11420_v46, %v11132_v61 }
 0x249   :  { %v2381_v45 = vmul.f32 %v11465_v23, %v11146_v28  ;;  %v2263_v2 = vadd.f32 %v11354_v12, %v2259_v16  ;;  %v2291_v10 = vadd.f32 %v2289_v60, %v2287_v53  ;;  %v2385_v34 = vmul.f32 %v11435_v15, %v11149_v14  ;;  %v11483_v53 = vld [vmem:[%s12101_s0 + $0xb0] sm:$0xff] }
 0x24a   :  { %v2842_v27 = vld [vmem:[#allocation2 + $0xd8] sm:$0xff]  ;;  %v2389_v51 = vmul.f32 %v11454_v37, %v11164_v44  ;;  %v2341_v1 = vadd.f32 %v2339_v50, %v2336_v47  ;;  %v2371_v31 = vadd.f32 %v2369_v7, %v2367_v29  ;;  %v2399_v3 = vmul.f32 %v11406_v55, %v11102_v20 }
 0x24b   :  { %v2874_v41 = vpack.c.bf16 %v2842_v27, %v2842_v27  ;;  %v2265_v43 = vmax.f32 %v2229_v18, %v2263_v2  ;;  %v2295_v8 = vadd.f32 %v2293_v32, %v2291_v10  ;;  %v2401_v54 = vmul.f32 %v11413_v11, %v11105_v0  ;;  %v11496_v27 = vld [vmem:[%s12101_s0 + $0xc0] sm:$0xff] }
 0x24c   :  { %v2405_v12 = vmul.f32 %v11420_v46, %v11108_v22  ;;  %v2346_v60 = vadd.f32 %v2344_v39, %v2341_v1  ;;  %v2375_v16 = vadd.f32 %v2373_v33, %v2371_v31  ;;  %v2393_v50 = vmul.f32 %v11483_v53, %v11167_v13 }
 0x24d   :  { %5486 = vmatprep.mubr.bf16.mxu1 %v2874_v41  ;;  %v2409_v32 = vmul.f32 %v11427_v58, %v11129_v59  ;;  %v2299_v18 = vadd.f32 %v2297_v35, %v2295_v8  ;;  %v2403_v7 = vadd.f32 %v2401_v54, %v2399_v3  ;;  %v2413_v47 = vmul.f32 %v11435_v15, %v11132_v61  ;;  %v11503_v54 = vld [vmem:[%s12101_s0 + $0xd0] sm:$0xff]  ;;  %v11515_v41 = vpop.f32.mrb[12].mxu1  ;;  %v11520_v3 = vld [vmem:[%s12101_s0 + $0xe0] sm:$0xff] }
 0x24e   :  { %v2417_v39 = vmul.f32 %v11454_v37, %v11146_v28  ;;  %v2351_v33 = vadd.f32 %v2349_v24, %v2346_v60  ;;  %v2379_v29 = vadd.f32 %v2377_v36, %v2375_v16  ;;  %v2421_v2 = vmul.f32 %v11496_v27, %v11149_v14  ;;  %12361 = vst [vmem:[#allocation15_spill] sm:$0xff] %v11503_v54 }
 0x24f   :  { %v2425_v35 = vmul.f32 %v11503_v54, %v11164_v44  ;;  %v2301_v8 = vmax.f32 %v2265_v43, %v2299_v18  ;;  %v2407_v24 = vadd.f32 %v2405_v12, %v2403_v7  ;;  %v2435_v36 = vmul.f32 %v11413_v11, %v11102_v20  ;;  %12362 = vst [vmem:[#allocation36_spill] sm:$0xff] %v11515_v41  ;;  %v11530_v20 = vpop.f32.mrb[13].mxu1 }
 0x250   :  { %v2437_v10 = vmul.f32 %v11420_v46, %v11105_v0  ;;  %v2356_v1 = vadd.f32 %v2354_v42, %v2351_v33  ;;  %v2383_v31 = vadd.f32 %v2381_v45, %v2379_v29  ;;  %12363 = vst [vmem:[#allocation37_spill] sm:$0xff] %v11520_v3  ;;  %v2429_v60 = vmul.f32 %v11520_v3, %v11167_v13  ;;  %v6211_v18 = vpop.f32.mrb[14].mxu1 }
 0x251   :  { %v2441_v43 = vmul.f32 %v11465_v23, %v11108_v22  ;;  %12364 = vst [vmem:[#allocation38_spill] sm:$0xff] %v11530_v20  ;;  %v12365_v0 = vstv %s11044_s2  ;;  %v2411_v45 = vadd.f32 %v2409_v32, %v2407_v24  ;;  %v2445_v16 = vmul.f32 %v11435_v15, %v11129_v59  ;;  %s11544_s2 = sld [smem:[#allocation3 + $0x85]]  ;;  %v6212_v32 = vpop.f32.mrb[15].mxu1 }
 0x252   :  { %v2305_v42 = vadd.f32 %v12365_v0, %v2301_v8  ;;  %v2439_v12 = vadd.f32 %v2437_v10, %v2435_v36  ;;  %v2361_v7 = vadd.f32 %v2359_v48, %v2356_v1  ;;  %v2387_v33 = vadd.f32 %v2385_v34, %v2383_v31  ;;  %v6620_v34 = vld [vmem:[%s12104_s3 + $0x700] sm:$0xff]   ;;  %v12366_v10 = vld [vmem:[#allocation17_spill] sm:$0xff]  ;;  %v12368_v31 = vld [vmem:[#allocation18_spill] sm:$0xff] }
 0x253   :  { %v2449_v22 = vmul.f32 %v11454_v37, %v11132_v61  ;;  %v2453_v29 = vmul.f32 %v11483_v53, %v11146_v28  ;;  %v2415_v24 = vadd.f32 %v2413_v47, %v2411_v45  ;;  %v2457_v59 = vmul.f32 %v11503_v54, %v11149_v14  ;;  %v5781_v61 = vld [vmem:[%s12105_s4] ss:$0 sm:$0xff]  ;;  %s11872_s4 = sld [smem:[#allocation6 + $0xf]] }
 0x254   :  { %v2307_v8 = vmax.f32 %v2305_v42, 0.0  ;;  %v2443_v36 = vadd.f32 %v2441_v43, %v2439_v12  ;;  %v2391_v48 = vadd.f32 %v2389_v51, %v2387_v33  ;;  %v2461_v28 = vmul.f32 %v11520_v3, %v11164_v44  ;;  %v12367_v47 = vld [vmem:[#allocation19_spill] sm:$0xff]  ;;  %v12369_v43 = vld [vmem:[#allocation20_spill] sm:$0xff] }
 0x255   :  { %v6056_v1 = vadd.f32 %v12367_v47, %v12366_v10  ;;  %v6078_v0 = vadd.f32 %v12369_v43, %v12368_v31  ;;  %v2419_v42 = vadd.f32 %v2417_v39, %v2415_v24  ;;  %v6622_v44 = vld [vmem:[%s12104_s3 + $0x748] sm:$0xff]   ;;  %v12370_v51 = vld [vmem:[#allocation35_spill] sm:$0xff]  ;;  %v11568_v32 = vstv %s11507_s7  ;;  %v12372_v24 = vld [vmem:[#allocation21_spill] sm:$0xff] }
 0x256   :  { %v2871_v14 = vpack.c.bf16 %v2307_v8, %v2307_v8  ;;  %v2447_v45 = vadd.f32 %v2445_v16, %v2443_v36  ;;  %v2490_v12 = vmul.f32 %v12370_v51, %v11314_v26  ;;  %v2395_v18 = vadd.f32 %v2393_v50, %v2391_v48  ;;  %v12371_v39 = vld [vmem:[#allocation31_spill] sm:$0xff]  ;;  %v6624_v50 = vld [vmem:[%s12104_s3 + $0x708] sm:$0xff]   ;;  %v6626_v43 = vld [vmem:[%s12104_s3 + $0x750] sm:$0xff]  }
 0x257   :  { %v4969_v33 = vadd.f32 %v6056_v1, %v5781_v61  ;;  %v11571_v10 = vstv %s11509_s17  ;;  %v2423_v47 = vadd.f32 %v2421_v2, %v2419_v42  ;;  %v2493_v16 = vmul.f32 %v12371_v39, %v11568_v32 }
 0x258   :  { %5447 = vmatmul.mubr.bf16.vlgmr.msra.gmra.mrb[24].mxu0 %v2871_v14  ;;  %v2451_v8 = vadd.f32 %v2449_v22, %v2447_v45  ;;  %v2498_v36 = vmul.f32 %v12372_v24, %v11571_v10  ;;  %v2397_v31 = vmax.f32 %v2361_v7, %v2395_v18  ;;  %v11583_v48 = vstv %s11526_s22  ;;  %s11670_s22 = sld [smem:[#allocation3 + $0x88]] }
 0x259   :  { %6347 = vmatpush3.bf16.msra.mxu0 %v6620_v34  ;;  %v11580_v61 = vadd.f32 %v6078_v0, %v4969_v33  ;;  %v11586_v2 = vstv %s11528_s14  ;;  %v2427_v22 = vadd.f32 %v2425_v35, %v2423_v47  ;;  %v2495_v7 = vadd.f32 %v2493_v16, %v2490_v12  ;;  %v12374_v34 = vld [vmem:[#allocation22_spill] sm:$0xff]  ;;  %v11596_v0 = vld [vmem:[%s12101_s0 + $0xf0] sm:$0xff]  ;;  %s11672_s14 = sld [smem:[#allocation3 + $0x89]] }
 0x25a   :  { %v2455_v1 = vadd.f32 %v2453_v29, %v2451_v8  ;;  %6348 = vmatprep.subr.bf16.mxu0 %v6622_v44  ;;  %v2503_v14 = vmul.f32 %v12374_v34, %v11583_v48  ;;  %12375 = vst [vmem:[#allocation19_spill] sm:$0xff] %v11596_v0  ;;  %v2465_v42 = vmul.f32 %v11596_v0, %v11167_v13  ;;  %v11601_v35 = vstv %s11536_s12  ;;  %v6628_v47 = vld [vmem:[%s12104_s3 + $0x710] sm:$0xff]   ;;  %v12376_v8 = vld [vmem:[#allocation27_spill] sm:$0xff] }
 0x25b   :  { %12373 = vst [vmem:[#allocation17_spill] sm:$0xff] %v11580_v61  ;;  %v11604_v29 = vstv %s11542_s10  ;;  %v11607_v45 = vstv %s11544_s2  ;;  %v2431_v44 = vadd.f32 %v2429_v60, %v2427_v22  ;;  %v2500_v12 = vadd.f32 %v2498_v36, %v2495_v7  ;;  %v12377_v61 = vld [vmem:[#allocation28_spill] sm:$0xff]  ;;  %s11691_s2 = sld [smem:[#allocation3 + $0x8b]] }
 0x25c   :  { %v2459_v18 = vadd.f32 %v2457_v59, %v2455_v1  ;;  %v2508_v33 = vmul.f32 %v10905_v6, %v11586_v2  ;;  %v2513_v13 = vmul.f32 %v10923_v9, %v11601_v35  ;;  %v2518_v16 = vmul.f32 %v12376_v8, %v11604_v29 }
 0x25d   :  { %6349 = vmatpush3.bf16.msra.mxu0 %v6624_v50  ;;  %v11619_v20 = vstv %s11560_s29  ;;  %v2532_v60 = vmul.f32 %v12371_v39, %v11314_v26  ;;  %v2433_v59 = vmax.f32 %v2397_v31, %v2431_v44  ;;  %v6630_v50 = vld [vmem:[%s12104_s3 + $0x758] sm:$0xff]   ;;  %v2505_v22 = vadd.f32 %v2503_v14, %v2500_v12  ;;  %s11709_s29 = sld [smem:[#allocation3 + $0x8c]] }
 0x25e   :  { %v2463_v36 = vadd.f32 %v2461_v28, %v2459_v18  ;;  %6350 = vmatprep.subr.bf16.mxu0 %v6626_v43  ;;  %v2523_v1 = vmul.f32 %v10940_v56, %v11607_v45  ;;  %v2528_v7 = vmul.f32 %v10959_v19, %v11619_v20  ;;  %v2534_v41 = vmul.f32 %v12372_v24, %v11568_v32  ;;  %v6632_v18 = vld [vmem:[%s12104_s3 + $0x718] sm:$0xff]  }
 0x25f   :  { %v2538_v39 = vmul.f32 %v12377_v61, %v11571_v10  ;;  %v2542_v28 = vmul.f32 %v10905_v6, %v11583_v48  ;;  %v2510_v43 = vadd.f32 %v2508_v33, %v2505_v22  ;;  %v2546_v14 = vmul.f32 %v10923_v9, %v11586_v2 }
 0x260   :  { %v2467_v31 = vadd.f32 %v2465_v42, %v2463_v36  ;;  %v2550_v44 = vmul.f32 %v10970_v17, %v11601_v35  ;;  %v2536_v24 = vadd.f32 %v2534_v41, %v2532_v60  ;;  %v11645_v61 = vmul.f32 %v10940_v56, %v11604_v29 }
 0x261   :  { %6351 = vmatpush3.bf16.msra.mxu0 %v6628_v47  ;;  %v11649_v42 = vmul.f32 %v10959_v19, %v11607_v45  ;;  %v2568_v12 = vmul.f32 %v12374_v34, %v11314_v26  ;;  %v6634_v47 = vld [vmem:[%s12104_s3 + $0x760] sm:$0xff]   ;;  %v2515_v36 = vadd.f32 %v2513_v13, %v2510_v43  ;;  %v2570_v41 = vmul.f32 %v10905_v6, %v11568_v32 }
 0x262   :  { %v2469_v33 = vmax.f32 %v2433_v59, %v2467_v31  ;;  %6352 = vmatprep.subr.bf16.mxu0 %v6630_v50  ;;  %v2574_v60 = vmul.f32 %v10923_v9, %v11571_v10  ;;  %v2540_v22 = vadd.f32 %v2538_v39, %v2536_v24  ;;  %v11664_v49 = vmul.f32 %v10997_v57, %v11619_v20  ;;  %v6636_v24 = vld [vmem:[%s12104_s3 + $0x720] sm:$0xff]  }
 0x263   :  { %v2578_v34 = vmul.f32 %v12376_v8, %v11583_v48  ;;  %v2582_v59 = vmul.f32 %v10940_v56, %v11586_v2  ;;  %v12378_v13 = vstv %s11261_s27  ;;  %v2520_v31 = vadd.f32 %v2518_v16, %v2515_v36  ;;  %s11689_s27 = sld [smem:[#allocation3 + $0x8a]]  ;;  %v6621_v36 = vld [vmem:[%s12104_s3 + $0x780] sm:$0xff]  }
 0x264   :  { %v2473_v50 = vadd.f32 %v12378_v13, %v2469_v33  ;;  %v2572_v43 = vadd.f32 %v2570_v41, %v2568_v12  ;;  %v2586_v39 = vmul.f32 %v10959_v19, %v11601_v35  ;;  %v2544_v8 = vadd.f32 %v2542_v28, %v2540_v22  ;;  %v6638_v28 = vld [vmem:[%s12104_s3 + $0x768] sm:$0xff]   ;;  %v12380_v41 = vld [vmem:[#allocation33_spill] sm:$0xff] }
 0x265   :  { %6353 = vmatpush3.bf16.msra.mxu0 %v6632_v18  ;;  %v2590_v52 = vmul.f32 %v11018_v38, %v11604_v29  ;;  %v11685_v63 = vmul.f32 %v12379_v21, %v11607_v45  ;;  %v2604_v16 = vmul.f32 %v10905_v6, %v11314_v26  ;;  %v2525_v12 = vadd.f32 %v2523_v1, %v2520_v31 }
 0x266   :  { %v2475_v18 = vmax.f32 %v2473_v50, 0.0  ;;  %6354 = vmatprep.subr.bf16.mxu0 %v6634_v47  ;;  %v2576_v33 = vadd.f32 %v2574_v60, %v2572_v43  ;;  %v2606_v38 = vmul.f32 %v10923_v9, %v11568_v32  ;;  %v2548_v6 = vadd.f32 %v2546_v14, %v2544_v8  ;;  %v6623_v9 = vld [vmem:[%s12104_s3 + $0x7c8] sm:$0xff]  }
 0x267   :  { %v11703_v22 = vmul.f32 %v12380_v41, %v11619_v20  ;;  %v2610_v47 = vmul.f32 %v10970_v17, %v11571_v10  ;;  %v2614_v13 = vmul.f32 %v10940_v56, %v11583_v48  ;;  %v2618_v14 = vmul.f32 %v10959_v19, %v11586_v2  ;;  %v6640_v17 = vld [vmem:[%s12104_s3 + $0x728] sm:$0xff]   ;;  %v6642_v19 = vld [vmem:[%s12104_s3 + $0x770] sm:$0xff]  }
 0x268   :  { %v2873_v1 = vpack.c.bf16 %v2475_v18, %v2475_v18  ;;  %v2580_v60 = vadd.f32 %v2578_v34, %v2576_v33  ;;  %v2608_v50 = vadd.f32 %v2606_v38, %v2604_v16  ;;  %v11721_v56 = vadd.f32 %v2528_v7, %v2525_v12  ;;  %v6627_v18 = vld [vmem:[%s12104_s3 + $0x7d0] sm:$0xff]  }
 0x269   :  { %6355 = vmatpush3.bf16.msra.mxu0 %v6636_v24  ;;  %v2552_v31 = vadd.f32 %v2550_v44, %v2548_v6  ;;  %v2622_v43 = vmul.f32 %v10997_v57, %v11601_v35  ;;  %v2626_v34 = vmul.f32 %v12379_v21, %v11604_v29  ;;  %v11736_v24 = vmul.f32 %v12380_v41, %v11607_v45  ;;  %v6625_v57 = vld [vmem:[%s12104_s3 + $0x788] sm:$0xff]  }
 0x26a   :  { %5487 = vmatmul.mubr.bf16.vlgmr.msra.gmra.mrb[24].mxu1 %v2873_v1  ;;  %6356 = vmatprep.subr.bf16.mxu0 %v6638_v28  ;;  %v2584_v7 = vadd.f32 %v2582_v59, %v2580_v60  ;;  %v2612_v44 = vadd.f32 %v2610_v47, %v2608_v50  ;;  %v11745_v8 = vstv %s11660_s28  ;;  %v11748_v16 = vstv %s11670_s22  ;;  %v6812_v60 = vld [vmem:[%s12101_s0 + $0x48] sm:$0xff] }
 0x26b   :  { %6369 = vmatpush3.bf16.msra.mxu1 %v6621_v36  ;;  %v2556_v21 = vadd.f32 %v11645_v61, %v2552_v31  ;;  %12381 = vst [vmem:[#allocation18_spill] sm:$0xff] %v11748_v16  ;;  %v11751_v59 = vstv %s11672_s14  ;;  %v2658_v33 = vmul.f32 %v12370_v51, %v11745_v8  ;;  %v6810_v61 = vld [vmem:[%s12101_s0 + $0x18] sm:$0xff]  ;;  %v6644_v36 = vld [vmem:[%s12104_s3 + $0x730] sm:$0xff]   ;;  %v11771_v51 = vstv %s11689_s27 }
 0x26c   :  { %6370 = vmatprep.subr.bf16.mxu1 %v6623_v9  ;;  %v2588_v28 = vadd.f32 %v2586_v39, %v2584_v7  ;;  %v2616_v12 = vadd.f32 %v2614_v13, %v2612_v44  ;;  %v2661_v38 = vmul.f32 %v6810_v61, %v11748_v16  ;;  %v6811_v39 = vld [vmem:[%s12101_s0 + $0x28] sm:$0xff]  ;;  %v11774_v47 = vstv %s11691_s2  ;;  %v6646_v13 = vld [vmem:[%s12104_s3 + $0x778] sm:$0xff]  }
 0x26d   :  { %6357 = vmatpush3.bf16.msra.mxu0 %v6640_v17  ;;  %v2560_v6 = vadd.f32 %v11649_v42, %v2556_v21  ;;  %v2666_v41 = vmul.f32 %v6811_v39, %v11751_v59  ;;  %v2671_v50 = vmul.f32 %v6812_v60, %v11771_v51  ;;  %v6629_v17 = vld [vmem:[%s12104_s3 + $0x790] sm:$0xff]   ;;  %v11797_v44 = vstv %s11709_s29 }
 0x26e   :  { %6358 = vmatprep.subr.bf16.mxu0 %v6642_v19  ;;  %v2592_v1 = vadd.f32 %v2590_v52, %v2588_v28  ;;  %v2620_v9 = vadd.f32 %v2618_v14, %v2616_v12  ;;  %v2663_v42 = vadd.f32 %v2661_v38, %v2658_v33  ;;  %v12382_v19 = vld [vmem:[#allocation34_spill] sm:$0xff]  ;;  %v11804_v12 = vstv %s11716_s13 }
 0x26f   :  { %6371 = vmatpush3.bf16.msra.mxu1 %v6625_v57  ;;  %v2564_v31 = vadd.f32 %v11664_v49, %v2560_v6  ;;  %v2634_v52 = vmul.f32 %v12382_v19, %v11619_v20  ;;  %v11792_v14 = vld [vmem:[%s12101_s0 + $0x58] sm:$0xff]  ;;  %v11816_v30 = vstv %s11729_s23  ;;  %v12383_v3 = vstv %s11727_s16 }
 0x270   :  { %v2676_v7 = vmul.f32 %v11792_v14, %v11774_v47  ;;  %6372 = vmatprep.subr.bf16.mxu1 %v6627_v18  ;;  %v6631_v57 = vld [vmem:[%s12104_s3 + $0x7d8] sm:$0xff]   ;;  %v2596_v49 = vadd.f32 %v11685_v63, %v2592_v1  ;;  %v2624_v21 = vadd.f32 %v2622_v43, %v2620_v9  ;;  %v2668_v28 = vadd.f32 %v2666_v41, %v2663_v42  ;;  %v6814_v18 = vld [vmem:[%s12101_s0 + $0x68] sm:$0xff] }
 0x271   :  { %6359 = vmatpush3.bf16.msra.mxu0 %v6644_v36  ;;  %v6648_v33 = vld [vmem:[%s12104_s3 + $0x738] sm:$0xff]   ;;  %v2566_v38 = vmax.f32 %v11721_v56, %v2564_v31  ;;  %v2681_v19 = vmul.f32 %v6814_v18, %v11797_v44  ;;  %v11820_v41 = vstv %s11738_s18  ;;  %v6815_v1 = vld [vmem:[%s12101_s0 + $0x88] sm:$0xff]  ;;  %v2700_v42 = vmul.f32 %v6810_v61, %v11745_v8 }
 0x272   :  { %6360 = vmatprep.subr.bf16.mxu0 %v6646_v13  ;;  %v2600_v63 = vadd.f32 %v11703_v22, %v2596_v49  ;;  %v2628_v43 = vadd.f32 %v2626_v34, %v2624_v21  ;;  %v2673_v36 = vadd.f32 %v2671_v50, %v2668_v28  ;;  %v6633_v56 = vld [vmem:[%s12104_s3 + $0x798] sm:$0xff]   ;;  %v2686_v9 = vmul.f32 %v6815_v1, %v11804_v12  ;;  %v6635_v50 = vld [vmem:[%s12104_s3 + $0x7e0] sm:$0xff]   ;;  %v6818_v21 = vld [vmem:[%s12101_s0 + $0xa8] sm:$0xff] }
 0x273   :  { %6373 = vmatpush3.bf16.msra.mxu1 %v6629_v17  ;;  %v2702_v13 = vmul.f32 %v6811_v39, %v11748_v16  ;;  %v6816_v22 = vld [vmem:[%s12101_s0 + $0x38] sm:$0xff]  ;;  %v2726_v6 = vmul.f32 %v6818_v21, %v11816_v30  ;;  %v2746_v0 = vmul.f32 %v6815_v1, %v11771_v51  ;;  %v6641_v1 = vld [vmem:[%s12104_s3 + $0x7a8] sm:$0xff]  }
 0x274   :  { %v2706_v34 = vmul.f32 %v6816_v22, %v11751_v59  ;;  %6374 = vmatprep.subr.bf16.mxu1 %v6631_v57  ;;  %v2602_v17 = vmax.f32 %v2566_v38, %v2600_v63  ;;  %v2632_v31 = vadd.f32 %v11736_v24, %v2628_v43  ;;  %v2678_v49 = vadd.f32 %v2676_v7, %v2673_v36  ;;  %v6817_v61 = vld [vmem:[%s12101_s0 + $0x98] sm:$0xff] }
 0x275   :  { %v2691_v39 = vmul.f32 %v6817_v61, %v11816_v30  ;;  %6361 = vmatpush3.bf16.msra.mxu0 %v6648_v33  ;;  %v2696_v57 = vmul.f32 %v6818_v21, %v11820_v41  ;;  %v2704_v28 = vadd.f32 %v2702_v13, %v2700_v42  ;;  %v2710_v38 = vmul.f32 %v11792_v14, %v11771_v51  ;;  %v6819_v43 = vld [vmem:[%s12101_s0 + $0x78] sm:$0xff]  ;;  %v6637_v42 = vld [vmem:[%s12104_s3 + $0x7a0] sm:$0xff]  }
 0x276   :  { %v2714_v24 = vmul.f32 %v6814_v18, %v11774_v47  ;;  %v2636_v7 = vadd.f32 %v2634_v52, %v2632_v31  ;;  %v2683_v63 = vadd.f32 %v2681_v19, %v2678_v49  ;;  %v2718_v33 = vmul.f32 %v6819_v43, %v11797_v44  ;;  %v6639_v31 = vld [vmem:[%s12104_s3 + $0x7e8] sm:$0xff]  }
 0x277   :  { %v2722_v36 = vmul.f32 %v6817_v61, %v11804_v12  ;;  %6375 = vmatpush3.bf16.msra.mxu1 %v6633_v56  ;;  %v2708_v13 = vadd.f32 %v2706_v34, %v2704_v28  ;;  %v2736_v22 = vmul.f32 %v6812_v60, %v11745_v8  ;;  %v2738_v52 = vmul.f32 %v11792_v14, %v11748_v16  ;;  %v6820_v34 = vld [vmem:[%s12101_s0 + $0xb8] sm:$0xff] }
 0x278   :  { %v2742_v19 = vmul.f32 %v6814_v18, %v11751_v59  ;;  %6376 = vmatprep.subr.bf16.mxu1 %v6635_v50  ;;  %v2638_v49 = vmax.f32 %v2602_v17, %v2636_v7  ;;  %v2688_v56 = vadd.f32 %v2686_v9, %v2683_v63  ;;  %v2730_v60 = vmul.f32 %v6820_v34, %v11820_v41  ;;  %v6821_v7 = vld [vmem:[%s12101_s0 + $0xc8] sm:$0xff] }
 0x279   :  { %v2712_v28 = vadd.f32 %v2710_v38, %v2708_v13  ;;  %v2740_v4 = vadd.f32 %v2738_v52, %v2736_v22  ;;  %v2750_v50 = vmul.f32 %v6817_v61, %v11774_v47  ;;  %v2754_v9 = vmul.f32 %v6818_v21, %v11797_v44 }
 0x27a   :  { %v2642_v54 = vadd.f32 %v12383_v3, %v2638_v49  ;;  %v2693_v17 = vadd.f32 %v2691_v39, %v2688_v56  ;;  %v2758_v63 = vmul.f32 %v6821_v7, %v11804_v12  ;;  %v2772_v22 = vmul.f32 %v11792_v14, %v11745_v8  ;;  %v6643_v39 = vld [vmem:[%s12104_s3 + $0x7f0] sm:$0xff]  }
 0x27b   :  { %6377 = vmatpush3.bf16.msra.mxu1 %v6637_v42  ;;  %v2716_v38 = vadd.f32 %v2714_v24, %v2712_v28  ;;  %v2744_v13 = vadd.f32 %v2742_v19, %v2740_v4  ;;  %v2774_v3 = vmul.f32 %v6814_v18, %v11748_v16  ;;  %v6822_v42 = vld [vmem:[%s12101_s0 + $0xd8] sm:$0xff]  ;;  %v6823_v4 = vld [vmem:[%s12101_s0 + $0xe8] sm:$0xff]  ;;  %v2778_v18 = vmul.f32 %v6819_v43, %v11751_v59  ;;  %v6645_v43 = vld [vmem:[%s12104_s3 + $0x7b0] sm:$0xff]  }
 0x27c   :  { %6378 = vmatprep.subr.bf16.mxu1 %v6639_v31  ;;  %v2644_v52 = vmax.f32 %v2642_v54, 0.0  ;;  %v2762_v49 = vmul.f32 %v6822_v42, %v11816_v30  ;;  %v2766_v14 = vmul.f32 %v6823_v4, %v11820_v41  ;;  %v2782_v56 = vmul.f32 %v6817_v61, %v11771_v51 }
 0x27d   :  { %v2720_v24 = vadd.f32 %v2718_v33, %v2716_v38  ;;  %v2748_v19 = vadd.f32 %v2746_v0, %v2744_v13  ;;  %v2776_v31 = vadd.f32 %v2774_v3, %v2772_v22  ;;  %v2698_v54 = vadd.f32 %v2696_v57, %v2693_v17  ;;  %v6824_v57 = vld [vmem:[%s12101_s0 + $0xf8] sm:$0xff] }
 0x27e   :  { %2646 = vst.msk [vmem:[#allocation2 + $0xe8] sm:$0xff] %vm293_vm0, %v2644_v52  ;;  %v2786_v28 = vmul.f32 %v6818_v21, %v11774_v47  ;;  %v2790_v7 = vmul.f32 %v6820_v34, %v11797_v44  ;;  %v2794_v16 = vmul.f32 %v6822_v42, %v11804_v12  ;;  %v2798_v61 = vmul.f32 %v6823_v4, %v11816_v30  ;;  %v6647_v21 = vld [vmem:[%s12104_s3 + $0x7f8] sm:$0xff]  }
 0x27f   :  { %6379 = vmatpush3.bf16.msra.mxu1 %v6641_v1  ;;  %v2724_v33 = vadd.f32 %v2722_v36, %v2720_v24  ;;  %v2752_v0 = vadd.f32 %v2750_v50, %v2748_v19  ;;  %v2780_v38 = vadd.f32 %v2778_v18, %v2776_v31  ;;  %v2802_v34 = vmul.f32 %v6824_v57, %v11820_v41  ;;  %v6649_v18 = vld [vmem:[%s12104_s3 + $0x7b8] sm:$0xff]   ;;  %s6880_s3 = smov [#allocation8]  }
 0x280   :  { %6380 = vmatprep.subr.bf16.mxu1 %v6643_v39  ;;  %v2489_v17 = vmul.f32 %v11383_v5, %v11314_v26  ;;  %v2492_v36 = vmul.f32 %v11390_v62, %v11568_v32  ;;  %v2497_v50 = vmul.f32 %v11397_v40, %v11571_v10  ;;  %v2808_v3 = vstv %s11872_s4 }
 0x281   :  { %v2728_v1 = vadd.f32 %v2726_v6, %v2724_v33  ;;  %v2756_v13 = vadd.f32 %v2754_v9, %v2752_v0  ;;  %v2784_v22 = vadd.f32 %v2782_v56, %v2780_v38  ;;  %v2502_v52 = vmul.f32 %v11406_v55, %v11583_v48 }
 0x282   :  { %v2494_v39 = vadd.f32 %v2492_v36, %v2489_v17  ;;  %v2507_v42 = vmul.f32 %v11413_v11, %v11586_v2  ;;  %v2512_v4 = vmul.f32 %v11420_v46, %v11601_v35  ;;  %v2517_v19 = vmul.f32 %v11427_v58, %v11604_v29 }
 0x283   :  { %6381 = vmatpush3.bf16.msra.mxu1 %v6645_v43  ;;  %v2732_v24 = vadd.f32 %v2730_v60, %v2728_v1  ;;  %v2760_v6 = vadd.f32 %v2758_v63, %v2756_v13  ;;  %v2788_v9 = vadd.f32 %v2786_v28, %v2784_v22  ;;  %v2531_v56 = vmul.f32 %v11390_v62, %v11314_v26 }
 0x284   :  { %6382 = vmatprep.subr.bf16.mxu1 %v6647_v21  ;;  %v2499_v31 = vadd.f32 %v2497_v50, %v2494_v39  ;;  %v2533_v33 = vmul.f32 %v11397_v40, %v11568_v32  ;;  %v2537_v43 = vmul.f32 %v11446_v25, %v11571_v10  ;;  %v2522_v63 = vmul.f32 %v11435_v15, %v11607_v45 }
 0x285   :  { %v2844_v0 = vld [vmem:[#allocation2 + $0xe8] sm:$0xff]  ;;  %v2734_v38 = vmax.f32 %v2698_v54, %v2732_v24  ;;  %v2764_v57 = vadd.f32 %v2762_v49, %v2760_v6  ;;  %v2792_v60 = vadd.f32 %v2790_v7, %v2788_v9  ;;  %v2541_v36 = vmul.f32 %v11413_v11, %v11583_v48 }
 0x286   :  { %v2876_v28 = vpack.c.bf16 %v2844_v0, %v2844_v0  ;;  %v2504_v17 = vadd.f32 %v2502_v52, %v2499_v31  ;;  %v2535_v21 = vadd.f32 %v2533_v33, %v2531_v56  ;;  %v2527_v13 = vmul.f32 %v11454_v37, %v11619_v20 }
 0x287   :  { %6383 = vmatpush3.bf16.msra.mxu1 %v6649_v18  ;;  %v2768_v50 = vadd.f32 %v2766_v14, %v2764_v57  ;;  %v2796_v1 = vadd.f32 %v2794_v16, %v2792_v60  ;;  %v2545_v54 = vmul.f32 %v11420_v46, %v11586_v2  ;;  %v2549_v22 = vmul.f32 %v11465_v23, %v11601_v35 }
 0x288   :  { %5526 = vmatprep.mubr.bf16.mxu0 %v2876_v28  ;;  %v2509_v49 = vadd.f32 %v2507_v42, %v2504_v17  ;;  %v2539_v7 = vadd.f32 %v2537_v43, %v2535_v21  ;;  %v2553_v39 = vmul.f32 %v11435_v15, %v11604_v29  ;;  %v2567_v16 = vmul.f32 %v11406_v55, %v11314_v26 }
 0x289   :  { %v2770_v52 = vmax.f32 %v2734_v38, %v2768_v50  ;;  %v2800_v24 = vadd.f32 %v2798_v61, %v2796_v1  ;;  %v2569_v14 = vmul.f32 %v11413_v11, %v11568_v32  ;;  %v2557_v42 = vmul.f32 %v11454_v37, %v11607_v45 }
 0x28a   :  { %v2514_v18 = vadd.f32 %v2512_v4, %v2509_v49  ;;  %v2543_v6 = vadd.f32 %v2541_v36, %v2539_v7  ;;  %v2573_v9 = vmul.f32 %v11420_v46, %v11571_v10  ;;  %v2561_v56 = vmul.f32 %v11483_v53, %v11619_v20  ;;  %v12384_v7 = vld [vmem:[#allocation15_spill] sm:$0xff] }
 0x28b   :  { %v2804_v31 = vadd.f32 %v2802_v34, %v2800_v24  ;;  %v2571_v33 = vadd.f32 %v2569_v14, %v2567_v16  ;;  %v2577_v61 = vmul.f32 %v11427_v58, %v11583_v48  ;;  %v2581_v4 = vmul.f32 %v11435_v15, %v11586_v2 }
 0x28c   :  { %v2519_v43 = vadd.f32 %v2517_v19, %v2514_v18  ;;  %v2547_v0 = vadd.f32 %v2545_v54, %v2543_v6  ;;  %v2585_v38 = vmul.f32 %v11454_v37, %v11601_v35  ;;  %v2589_v34 = vmul.f32 %v11496_v27, %v11604_v29  ;;  %v11971_v17 = vpop.f32.mrb[16].mxu0 }
 0x28d   :  { %v2806_v57 = vmax.f32 %v2770_v52, %v2804_v31  ;;  %v2575_v60 = vadd.f32 %v2573_v9, %v2571_v33  ;;  %v2603_v28 = vmul.f32 %v11413_v11, %v11314_v26  ;;  %v2605_v19 = vmul.f32 %v11420_v46, %v11568_v32  ;;  %v11977_v1 = vpop.f32.mrb[17].mxu0  ;;  %v12385_v26 = vld [vmem:[#allocation37_spill] sm:$0xff] }
 0x28e   :  { %v2524_v21 = vadd.f32 %v2522_v63, %v2519_v43  ;;  %v2551_v36 = vadd.f32 %v2549_v22, %v2547_v0  ;;  %v2609_v50 = vmul.f32 %v11465_v23, %v11571_v10  ;;  %v2593_v52 = vmul.f32 %v12384_v7, %v11607_v45  ;;  %v6233_v16 = vpop.f32.mrb[18].mxu0  ;;  %v12386_v0 = vld [vmem:[#allocation18_spill] sm:$0xff] }
 0x28f   :  { %v2810_v54 = vadd.f32 %v2808_v3, %v2806_v57  ;;  %v2579_v49 = vadd.f32 %v2577_v61, %v2575_v60  ;;  %v2597_v24 = vmul.f32 %v12385_v26, %v11619_v20  ;;  %v2607_v22 = vadd.f32 %v2605_v19, %v2603_v28  ;;  %v6234_v14 = vpop.f32.mrb[19].mxu0  ;;  %v12387_v57 = vld [vmem:[#allocation19_spill] sm:$0xff] }
 0x290   :  { %v2555_v63 = vadd.f32 %v2553_v39, %v2551_v36  ;;  %v2613_v32 = vmul.f32 %v11435_v15, %v11583_v48  ;;  %v2617_v10 = vmul.f32 %v11454_v37, %v11586_v2  ;;  %v2529_v6 = vadd.f32 %v2527_v13, %v2524_v21 }
 0x291   :  { %v2812_v18 = vmax.f32 %v2810_v54, 0.0  ;;  %v2583_v9 = vadd.f32 %v2581_v4, %v2579_v49  ;;  %v2621_v31 = vmul.f32 %v11483_v53, %v11601_v35  ;;  %v2611_v61 = vadd.f32 %v2609_v50, %v2607_v22 }
 0x292   :  { %v2559_v33 = vadd.f32 %v2557_v42, %v2555_v63  ;;  %v2625_v43 = vmul.f32 %v12384_v7, %v11604_v29  ;;  %v2657_v39 = vmul.f32 %v11383_v5, %v11745_v8  ;;  %v2629_v2 = vmul.f32 %v12385_v26, %v11607_v45 }
 0x293   :  { %2814 = vst.msk [vmem:[#allocation2 + $0xf8] sm:$0xff] %vm293_vm0, %v2812_v18  ;;  %v2587_v48 = vadd.f32 %v2585_v38, %v2583_v9  ;;  %v2660_v13 = vmul.f32 %v11390_v62, %v12386_v0  ;;  %v2665_v35 = vmul.f32 %v11397_v40, %v11751_v59  ;;  %v2615_v4 = vadd.f32 %v2613_v32, %v2611_v61 }
 0x294   :  { %v2563_v42 = vadd.f32 %v2561_v56, %v2559_v33  ;;  %v2633_v29 = vmul.f32 %v12387_v57, %v11619_v20  ;;  %v2670_v5 = vmul.f32 %v11406_v55, %v11771_v51  ;;  %v2675_v38 = vmul.f32 %v11413_v11, %v11774_v47 }
 0x295   :  { %v2591_v60 = vadd.f32 %v2589_v34, %v2587_v48  ;;  %v2662_v28 = vadd.f32 %v2660_v13, %v2657_v39  ;;  %v2680_v45 = vmul.f32 %v11420_v46, %v11797_v44  ;;  %v2619_v21 = vadd.f32 %v2617_v10, %v2615_v4 }
 0x296   :  { %v2685_v36 = vmul.f32 %v11427_v58, %v11804_v12  ;;  %v2690_v56 = vmul.f32 %v11435_v15, %v11816_v30  ;;  %v2699_v20 = vmul.f32 %v11390_v62, %v11745_v8  ;;  %v2701_v34 = vmul.f32 %v11397_v40, %v12386_v0 }
 0x297   :  { %v2595_v19 = vadd.f32 %v2593_v52, %v2591_v60  ;;  %v2667_v50 = vadd.f32 %v2665_v35, %v2662_v28  ;;  %v2705_v54 = vmul.f32 %v11446_v25, %v11751_v59  ;;  %v2565_v49 = vmax.f32 %v2529_v6, %v2563_v42 }
 0x298   :  { %v2623_v16 = vadd.f32 %v2621_v31, %v2619_v21  ;;  %v2695_v63 = vmul.f32 %v11454_v37, %v11820_v41  ;;  %v2709_v22 = vmul.f32 %v11413_v11, %v11771_v51  ;;  %v2703_v14 = vadd.f32 %v2701_v34, %v2699_v20 }
 0x299   :  { %v2599_v32 = vadd.f32 %v2597_v24, %v2595_v19  ;;  %v2672_v10 = vadd.f32 %v2670_v5, %v2667_v50  ;;  %v2713_v62 = vmul.f32 %v11420_v46, %v11774_v47  ;;  %v2717_v40 = vmul.f32 %v11465_v23, %v11797_v44 }
 0x29a   :  { %v2846_v52 = vld [vmem:[#allocation2 + $0xf8] sm:$0xff]  ;;  %v2627_v18 = vadd.f32 %v2625_v43, %v2623_v16  ;;  %v2721_v25 = vmul.f32 %v11435_v15, %v11804_v12  ;;  %v2735_v6 = vmul.f32 %v11406_v55, %v11745_v8  ;;  %v2707_v33 = vadd.f32 %v2705_v54, %v2703_v14 }
 0x29b   :  { %v2878_v9 = vpack.c.bf16 %v2846_v52, %v2846_v52  ;;  %v2677_v31 = vadd.f32 %v2675_v38, %v2672_v10  ;;  %v2725_v24 = vmul.f32 %v11454_v37, %v11816_v30  ;;  %v2601_v61 = vmax.f32 %v2565_v49, %v2599_v32 }
 0x29c   :  { %v2631_v39 = vadd.f32 %v2629_v2, %v2627_v18  ;;  %v2737_v43 = vmul.f32 %v11413_v11, %v12386_v0  ;;  %v2741_v48 = vmul.f32 %v11420_v46, %v11751_v59  ;;  %v2711_v35 = vadd.f32 %v2709_v22, %v2707_v33  ;;  %v12394_v33 = vld [vmem:[#allocation25_spill] sm:$0xff] }
 0x29d   :  { %5566 = vmatprep.mubr.bf16.mxu1 %v2878_v9  ;;  %v2682_v13 = vadd.f32 %v2680_v45, %v2677_v31  ;;  %v2729_v55 = vmul.f32 %v11483_v53, %v11820_v41  ;;  %v2745_v42 = vmul.f32 %v11427_v58, %v11771_v51  ;;  %v2749_v2 = vmul.f32 %v11435_v15, %v11774_v47  ;;  %v6252_v20 = vpop.f32.mrb[16].mxu1  ;;  %v12390_v9 = vld [vmem:[#allocation26_spill] sm:$0xff] }
 0x29e   :  { %v2635_v4 = vadd.f32 %v2633_v29, %v2631_v39  ;;  %v2739_v5 = vadd.f32 %v2737_v43, %v2735_v6  ;;  %v2753_v60 = vmul.f32 %v11454_v37, %v11797_v44  ;;  %v2715_v38 = vadd.f32 %v2713_v62, %v2711_v35  ;;  %v6253_v34 = vpop.f32.mrb[17].mxu1  ;;  %v12389_v6 = vld [vmem:[#allocation23_spill] sm:$0xff] }
 0x29f   :  { %v2687_v28 = vadd.f32 %v2685_v36, %v2682_v13  ;;  %v2757_v45 = vmul.f32 %v11496_v27, %v11804_v12  ;;  %v2771_v21 = vmul.f32 %v11413_v11, %v11745_v8  ;;  %v2773_v29 = vmul.f32 %v11420_v46, %v12386_v0  ;;  %v6255_v16 = vpop.f32.mrb[18].mxu1  ;;  %v12397_v13 = vld [vmem:[#allocation17_spill] sm:$0xff] }
 0x2a0   :  { %v2637_v19 = vmax.f32 %v2601_v61, %v2635_v4  ;;  %v2743_v58 = vadd.f32 %v2741_v48, %v2739_v5  ;;  %v2777_v50 = vmul.f32 %v11465_v23, %v11751_v59  ;;  %v2719_v49 = vadd.f32 %v2717_v40, %v2715_v38  ;;  %v6256_v0 = vpop.f32.mrb[19].mxu1  ;;  %v12401_v4 = vld [vmem:[#allocation38_spill] sm:$0xff] }
 0x2a1   :  { %v2692_v54 = vadd.f32 %v2690_v56, %v2687_v28  ;;  %v2761_v36 = vmul.f32 %v12384_v7, %v11816_v30  ;;  %v2765_v27 = vmul.f32 %v12385_v26, %v11820_v41  ;;  %v12388_v11 = vstv %s11727_s16  ;;  %s5583_s16 = sshll.u32 %s6880_s3, 4  ;;  %s5584_s16 = int_to_ptr.vmem [resolvable:$true] %s5583_s16 }
 0x2a2   :  { %v2641_v8 = vadd.f32 %v12388_v11, %v2637_v19  ;;  %v2747_v22 = vadd.f32 %v2745_v42, %v2743_v58  ;;  %v2775_v32 = vadd.f32 %v2773_v29, %v2771_v21  ;;  %v2781_v46 = vmul.f32 %v11435_v15, %v11771_v51  ;;  %v12391_v15 = vld [vmem:[#allocation29_spill] sm:$0xff]  ;;  %v12392_v51 = vld [vmem:[#allocation30_spill] sm:$0xff]  ;;  %v12400_v42 = vld [vmem:[#allocation36_spill] sm:$0xff]  ;;  %s6849_s14 = scalar_lea.vmem %s5584_s16, 128  ;;  %p6854_p11 = scmp.lt.s32.totalorder %s5584_s16, %s5584_s16 }
 0x2a3   :  { %v2697_v10 = vadd.f32 %v2695_v63, %v2692_v54  ;;  %v2723_v23 = vadd.f32 %v2721_v25, %v2719_v49  ;;  %v2785_v59 = vmul.f32 %v11454_v37, %v11774_v47  ;;  %v2789_v56 = vmul.f32 %v11483_v53, %v11797_v44  ;;  %v12393_v25 = vld [vmem:[#allocation24_spill] sm:$0xff]  ;;  %v12396_v44 = vld [vmem:[#allocation13_spill] sm:$0xff]  ;;  %p6850_p10 = scmp.ne.s32.totalorder %s5584_s16, %s6849_s14  ;;  %p6855_p12 = scmp.lt.s32.totalorder %s6849_s14, %s6849_s14 }
 0x2a4   :  { %v2643_v14 = vmax.f32 %v2641_v8, 0.0  ;;  %v2751_v62 = vadd.f32 %v2749_v2, %v2747_v22  ;;  %v2779_v52 = vadd.f32 %v2777_v50, %v2775_v32  ;;  %v2793_v18 = vmul.f32 %v12384_v7, %v11804_v12  ;;  %v12395_v53 = vld [vmem:[#allocation12_spill] sm:$0xff]  ;;  %v12399_v7 = vld [vmem:[#allocation14_spill] sm:$0xff] }
 0x2a5   :  { %v2727_v40 = vadd.f32 %v2725_v24, %v2723_v23  ;;  %v6100_v31 = vadd.f32 %v12390_v9, %v12389_v6  ;;  %v6122_v63 = vadd.f32 %v12392_v51, %v12391_v15  ;;  %v6144_v61 = vadd.f32 %v12394_v33, %v12393_v25  ;;  %v12398_v12 = vld [vmem:[#allocation16_spill] sm:$0xff]  ;;  %p6856_p13 = por %p6855_p12, %p6854_p11 }
 0x2a6   :  { %v2875_v37 = vpack.c.bf16 %v2643_v14, %v2643_v14  ;;  %v2755_v47 = vadd.f32 %v2753_v60, %v2751_v62  ;;  %v2783_v39 = vadd.f32 %v2781_v46, %v2779_v52  ;;  %v6166_v43 = vadd.f32 %v12396_v44, %v12395_v53 }
 0x2a7   :  { %v2731_v48 = vadd.f32 %v2729_v55, %v2727_v40  ;;  %v5049_v35 = vadd.f32 %v6100_v31, %v12397_v13  ;;  %v6188_v24 = vadd.f32 %v12399_v7, %v12398_v12  ;;  %v6210_v5 = vadd.f32 %v12401_v4, %v12400_v42  ;;  %p6857_p0 = pnand %p6856_p13, %p6850_p10 }
 0x2a8   :  { %5527 = vmatmul.mubr.bf16.vlgmr.msra.gmra.mrb[28].mxu0 %v2875_v37  ;;  %v2759_v2 = vadd.f32 %v2757_v45, %v2755_v47  ;;  %v2787_v28 = vadd.f32 %v2785_v59, %v2783_v39  ;;  %v6232_v38 = vadd.f32 %v11977_v1, %v11971_v17  ;;  %v6254_v60 = vadd.f32 %v6253_v34, %v6252_v20 }
 0x2a9   :  { %v5089_v21 = vadd.f32 %v6122_v63, %v5049_v35  ;;  %v2733_v19 = vmax.f32 %v2697_v10, %v2731_v48  ;;  %v2797_v29 = vmul.f32 %v12385_v26, %v11816_v30  ;;  %v2801_v16 = vmul.f32 %v12387_v57, %v11820_v41 }
 0x2aa   :  { %v2763_v58 = vadd.f32 %v2761_v36, %v2759_v2  ;;  %v2791_v55 = vadd.f32 %v2789_v56, %v2787_v28 }
 0x2ab   :  { %v5129_v50 = vadd.f32 %v6144_v61, %v5089_v21 }
 0x2ac   :  { %v2767_v54 = vadd.f32 %v2765_v27, %v2763_v58  ;;  %v2795_v49 = vadd.f32 %v2793_v18, %v2791_v55 }
 0x2ad   :  { %v5169_v45 = vadd.f32 %v6166_v43, %v5129_v50 }
 0x2ae   :  { %v2769_v11 = vmax.f32 %v2733_v19, %v2767_v54  ;;  %v2799_v8 = vadd.f32 %v2797_v29, %v2795_v49 }
 0x2af   :  { %v5209_v22 = vadd.f32 %v6188_v24, %v5169_v45 }
 0x2b0   :  { %v2803_v17 = vadd.f32 %v2801_v16, %v2799_v8 }
 0x2b1   :  { %v5249_v1 = vadd.f32 %v6210_v5, %v5209_v22 }
 0x2b2   :  { %v2805_v20 = vmax.f32 %v2769_v11, %v2803_v17 }
 0x2b3   :  { %v5289_v34 = vadd.f32 %v6232_v38, %v5249_v1 }
 0x2b4   :  { %v2809_v36 = vadd.f32 %v2808_v3, %v2805_v20 }
 0x2b5   :  { %v5329_v32 = vadd.f32 %v6254_v60, %v5289_v34 }
 0x2b6   :  { %v2811_v46 = vmax.f32 %v2809_v36, 0.0 }
 0x2b8   :  { %v2877_v0 = vpack.c.bf16 %v2811_v46, %v2811_v46 }
 0x2ba   :  { %5567 = vmatmul.mubr.bf16.vlgmr.msra.gmra.mrb[28].mxu1 %v2877_v0 }
 0x2db   :  { %v6274_v30 = vpop.f32.mrb[20].mxu0 }
 0x2dc   :  { %v6275_v26 = vpop.f32.mrb[21].mxu0 }
 0x2dd   :  { %v6276_v27 = vadd.f32 %v6275_v26, %v6274_v30  ;;  %v6277_v10 = vpop.f32.mrb[22].mxu0 }
 0x2de   :  { %v6278_v23 = vpop.f32.mrb[23].mxu0 }
 0x2df   :  { %v5369_v41 = vadd.f32 %v6276_v27, %v5329_v32 }
 0x2ed   :  { %v6296_v57 = vpop.f32.mrb[20].mxu1 }
 0x2ee   :  { %v6297_v59 = vpop.f32.mrb[21].mxu1 }
 0x2ef   :  { %v6298_v56 = vadd.f32 %v6297_v59, %v6296_v57  ;;  %v6299_v14 = vpop.f32.mrb[22].mxu1 }
 0x2f0   :  { %v6300_v62 = vpop.f32.mrb[23].mxu1 }
 0x2f1   :  { %v5409_v52 = vadd.f32 %v6298_v56, %v5369_v41 }
 0x32b   :  { %v6318_v18 = vpop.f32.mrb[24].mxu0 }
 0x32c   :  { %v6319_v40 = vpop.f32.mrb[25].mxu0 }
 0x32d   :  { %v6320_v6 = vadd.f32 %v6319_v40, %v6318_v18  ;;  %v6321_v3 = vpop.f32.mrb[26].mxu0 }
 0x32e   :  { %v6322_v9 = vpop.f32.mrb[27].mxu0 }
 0x32f   :  { %v5449_v31 = vadd.f32 %v6320_v6, %v5409_v52 }
 0x33d   :  { %v6340_v15 = vpop.f32.mrb[24].mxu1 }
 0x33e   :  { %v6341_v51 = vpop.f32.mrb[25].mxu1 }
 0x33f   :  { %v6342_v63 = vadd.f32 %v6341_v51, %v6340_v15  ;;  %v6343_v25 = vpop.f32.mrb[26].mxu1 }
 0x340   :  { %v6344_v33 = vpop.f32.mrb[27].mxu1 }
 0x341   :  { %v5489_v61 = vadd.f32 %v6342_v63, %v5449_v31 }
 0x37b   :  { %v6362_v37 = vpop.f32.mrb[28].mxu0 }
 0x37c   :  { %v6363_v47 = vpop.f32.mrb[29].mxu0 }
 0x37d   :  { %v6364_v39 = vadd.f32 %v6363_v47, %v6362_v37  ;;  %v6365_v53 = vpop.f32.mrb[30].mxu0 }
 0x37e   :  { %v6366_v44 = vpop.f32.mrb[31].mxu0 }
 0x37f   :  { %v5529_v43 = vadd.f32 %v6364_v39, %v5489_v61 }
 0x38d   :  { %v6384_v48 = vpop.f32.mrb[28].mxu1 }
 0x38e   :  { %v6385_v13 = vpop.f32.mrb[29].mxu1 }
 0x38f   :  { %v6386_v35 = vadd.f32 %v6385_v13, %v6384_v48  ;;  %v6387_v12 = vpop.f32.mrb[30].mxu1 }
 0x390   :  { %v6388_v7 = vpop.f32.mrb[31].mxu1 }
 0x391   :  { %v5569_v24 = vadd.f32 %v6386_v35, %v5529_v43 }
 0x393   :  { %v5574_v42 = vmax.f32 %v5569_v24, 0.0 }
 0x395   :  { %5576 = vst.msk [vmem:[#allocation8] sm:$0xff] %vm5575_vm1, %v5574_v42 }
 0x396   :  { %6860 = shalt.err (!%p6857_p0)
}
 0x397   :  { %s6861_s25 = scalar_lea.hbm %s12106_s5, 128 }
 0x398   :  { %p6862_p1 = scmp.ne.s32.totalorder %s12106_s5, %s6861_s25  ;;  %p6865_p2 = scmp.lt.u32.totalorder %s6861_s25, %s12106_s5 }
 0x39a   :  { %p6867_p3 = pnand %p6865_p2, %p6862_p1 }
 0x39c   :  { %6870 = shalt.err (!%p6867_p3)
}
 0x39d   :  { %5586 = dma.vmem_to_hbm [thread:$0]  %s5584_s16, 128, %s12106_s5, [#allocation4]  }
 0x39e   :  { %6875 = dma.done.wait [#allocation4], 128  }
 0x39f   :  { %6876 = vsyncadd [#allocation4], 4294967168 }
 0x3a0   :  { %5590 = vsyncpa [#allocation4], 1 }
 0x3a1   :  { %5591 = vsyncpa [#allocation5], 1 }
 0x3a2   :  { %5592 = vsyncpa [#allocation7], 1 }

</bundles_post_ra>
